<compile_context>
chip_gen: v6e
topology: v6e:2x2x1
jax: 0.10.0
libtpu: 0.0.40
codegen_flags: <defaults>
</compile_context>

<pallas_src>
import jax
import jax.numpy as jnp
from jax import lax
from jax.experimental import pallas as pl
from jax.experimental.pallas import tpu as pltpu

# ---------------------------------------------------------------------------
# geometry (CIFAR-10 LeNet): 32x32x3 -> conv5 -> 28x28x6 -> pool -> 14x14x6
#                            -> conv5 -> 10x10x16 -> pool -> 5x5x16 -> 400
# ---------------------------------------------------------------------------
H0 = W0 = 32
C0, C1, C2 = 3, 6, 16
K = 5
P_OUT = 5                            # final pooled spatial size (5x5)
F1, F2, F3 = 120, 60, 10

ROWS0 = H0 * W0                      # 1024 flattened input lanes (p = 32*h + w)
B_TILE = 8                           # images per feature-kernel grid step

# Lane widths of the in-kernel (channels-first) activation slabs.  Chosen so
# the last lane each stage reads is exactly the last lane the previous stage
# holds (no zero-padding buffers needed anywhere):
#   conv1 valid outputs end at lane 27*32+27 = 891          -> W_C1 = 892
#   conv1 tap shift <= 4*32+4 = 132, 891+132 = 1023         -> 1024-wide input OK
#   pool1 (embedded at 64*hp+2*wp) ends at 858, +33 = 891   -> W_P1 = 859
#   conv2 (embedded at 64*i+2*j)  ends at 594, +264 = 858   -> W_C2 = 595
#   pool2 (embedded at 128*a+4*b) ends at 528, +66 = 594    -> W_P2 = 529
W_C1 = 892
W_P1 = 859
W_C2 = 595
W_P2 = 529
F_TILE = 32                          # per-channel feature lanes (25 used, 7 zero)
F_PAD = C2 * F_TILE                  # 512: fc1 input width (zero-padded from 400)


# ---------------------------------------------------------------------------
# Kernel A: fused conv1 + ReLU + pool1 + conv2 + ReLU + pool2 (+ feature pack)
#           for B_TILE images per grid step, all channels-first in VMEM.
# ---------------------------------------------------------------------------
def _feature_kernel(x_ref, w1_ref, b1_ref, w2_ref, b2_ref, sel_ref, out_ref):
    def one_image(b, carry):
        # ---- conv1: 25 shifted taps, each a (6,3)@(3,892) matmul, N in lanes
        acc1 = jnp.zeros((C1, W_C1), jnp.float32)
        for t in range(K * K):
            kh, kw = divmod(t, K)
            s = kh * W0 + kw                               # 0 .. 132
            acc1 = acc1 + jnp.dot(w1_ref[t], x_ref[b, :, pl.ds(s, W_C1)],
                                  preferred_element_type=jnp.float32)
        a1 = jnp.maximum(acc1 + b1_ref[...], 0.0)          # bias + ReLU, (6, 892)

        # ---- pool1 (2x2/2), embedded: value for (hp,wp) stays at 64*hp+2*wp
        p1 = jnp.maximum(
            jnp.maximum(a1[:, 0:W_P1], a1[:, 1:W_P1 + 1]),
            jnp.maximum(a1[:, W0:W_P1 + W0], a1[:, W0 + 1:W_P1 + W0 + 1]))

        # ---- conv2 on the embedded grid: tap shift 2*(32*kh + kw)
        acc2 = jnp.zeros((C2, W_C2), jnp.float32)
        for t in range(K * K):
            kh, kw = divmod(t, K)
            s = 2 * (kh * W0 + kw)                         # 0 .. 264
            acc2 = acc2 + jnp.dot(w2_ref[t], p1[:, s:s + W_C2],
                                  preferred_element_type=jnp.float32)
        a2 = jnp.maximum(acc2 + b2_ref[...], 0.0)          # (16, 595)

        # ---- pool2 (2x2/2), embedded: value for (a,b) stays at 128*a+4*b
        p2 = jnp.maximum(
            jnp.maximum(a2[:, 0:W_P2], a2[:, 2:W_P2 + 2]),
            jnp.maximum(a2[:, 64:W_P2 + 64], a2[:, 66:W_P2 + 66]))

        # ---- compact the 25 valid lanes per channel into lanes 0..24 with a
        #      one-hot selection matmul; lanes 25..31 become exact zeros.
        out_ref[b] = jnp.dot(p2, sel_ref[...],
                             preferred_element_type=jnp.float32)   # (16, 32)
        return carry

    lax.fori_loop(0, B_TILE, one_image, 0)


def _feature_extractor(x_cf, p):
    n = x_cf.shape[0]                                     # multiple of B_TILE
    cost = pl.CostEstimate(
        flops=n * 2 * (K * K * C0 * C1 * W_C1 + K * K * C1 * C2 * W_C2
                       + C2 * W_P2 * F_TILE),
        transcendentals=0,
        bytes_accessed=4 * (n * C0 * ROWS0 + n * C2 * F_TILE
                            + K * K * (C0 * C1 + C1 * C2) + W_P2 * F_TILE),
    )
    return pl.pallas_call(
        _feature_kernel,
        out_shape=jax.ShapeDtypeStruct((n, C2, F_TILE), jnp.float32),
        grid=(n // B_TILE,),
        in_specs=[
            pl.BlockSpec((B_TILE, C0, ROWS0), lambda i: (i, 0, 0)),
            pl.BlockSpec((K * K, C1, C0), lambda i: (0, 0, 0)),
            pl.BlockSpec((C1, 1), lambda i: (0, 0)),
            pl.BlockSpec((K * K, C2, C1), lambda i: (0, 0, 0)),
            pl.BlockSpec((C2, 1), lambda i: (0, 0)),
            pl.BlockSpec((W_P2, F_TILE), lambda i: (0, 0)),
        ],
        out_specs=pl.BlockSpec((B_TILE, C2, F_TILE), lambda i: (i, 0, 0)),
        compiler_params=pltpu.CompilerParams(dimension_semantics=("parallel",)),
        cost_estimate=cost,
    )(x_cf, p["w1"], p["b1"], p["w2"], p["b2"], p["sel"])


# ---------------------------------------------------------------------------
# Kernel B: fused fc1 + fc2 + fc3, gridded over the batch.
# ---------------------------------------------------------------------------
def _fc_kernel(x_ref, w1_ref, b1_ref, w2_ref, b2_ref, w3_ref, b3_ref, o_ref):
    h = jnp.dot(x_ref[...], w1_ref[...], preferred_element_type=jnp.float32)
    h = jnp.maximum(h + b1_ref[...], 0.0)
    h = jnp.dot(h, w2_ref[...], preferred_element_type=jnp.float32)
    h = jnp.maximum(h + b2_ref[...], 0.0)
    o_ref[...] = (jnp.dot(h, w3_ref[...], preferred_element_type=jnp.float32)
                  + b3_ref[...])


def _pick_fc_block(n):
    for nb in (256, 128, 64, 32, 16, 8):
        if n % nb == 0:
            return nb
    return n


def _fc_stack(feat, p):
    n = feat.shape[0]
    nb = _pick_fc_block(n)
    cost = pl.CostEstimate(
        flops=n * 2 * (F_PAD * F1 + F1 * F2 + F2 * F3),
        transcendentals=0,
        bytes_accessed=4 * (n * F_PAD + F_PAD * F1 + F1 * F2 + F2 * F3
                            + F1 + F2 + F3 + n * F3),
    )
    return pl.pallas_call(
        _fc_kernel,
        out_shape=jax.ShapeDtypeStruct((n, F3), jnp.float32),
        grid=(n // nb,),
        in_specs=[
            pl.BlockSpec((nb, F_PAD), lambda i: (i, 0)),
            pl.BlockSpec((F_PAD, F1), lambda i: (0, 0)),
            pl.BlockSpec((1, F1), lambda i: (0, 0)),
            pl.BlockSpec((F1, F2), lambda i: (0, 0)),
            pl.BlockSpec((1, F2), lambda i: (0, 0)),
            pl.BlockSpec((F2, F3), lambda i: (0, 0)),
            pl.BlockSpec((1, F3), lambda i: (0, 0)),
        ],
        out_specs=pl.BlockSpec((nb, F3), lambda i: (i, 0)),
        compiler_params=pltpu.CompilerParams(dimension_semantics=("parallel",)),
        cost_estimate=cost,
    )(feat, p["fc1w"], p["fc1b"], p["fc2w"], p["fc2b"], p["fc3w"], p["fc3b"])


# ---------------------------------------------------------------------------
# forward pass + one-time parameter preparation
# ---------------------------------------------------------------------------
@jax.jit
def convnet_forward(x, p):
    n = x.shape[0]
    n_pad = ((n + B_TILE - 1) // B_TILE) * B_TILE
    # NCHW is already channels-first / spatial-in-lanes: only free reshapes.
    x_cf = x.reshape(n, C0, ROWS0).astype(jnp.float32)
    if n_pad != n:
        x_cf = jnp.pad(x_cf, ((0, n_pad - n), (0, 0), (0, 0)))
    feat = _feature_extractor(x_cf, p)               # (n_pad, 16, 32)
    feat = feat.reshape(n_pad, F_PAD)                # free contiguous reshape
    return _fc_stack(feat, p)[:n]                    # (n, 10)


def prepare_params(raw):
    """One-time prep: relayout all weights for the channels-first kernels."""
    (w1, b1, w2, b2, fw1, fb1, fw2, fb2, fw3, fb3) = raw
    # conv weights: [tap = kh*K+kw, C_out, C_in]
    w1_cf = jnp.transpose(w1, (2, 3, 0, 1)).reshape(K * K, C1, C0)
    w2_cf = jnp.transpose(w2, (2, 3, 0, 1)).reshape(K * K, C2, C1)
    # one-hot selector: embedded pool2 lane 128*a+4*b -> feature lane 5*a+b
    m = jnp.arange(P_OUT * P_OUT)
    rows = 128 * (m // P_OUT) + 4 * (m % P_OUT)
    sel = jnp.zeros((W_P2, F_TILE), jnp.float32).at[rows, m].set(1.0)
    # fc1: fold torch's (c, h, w) flatten order and the 25->32 per-channel
    # padding into the weight matrix (padded rows are exactly zero).
    fc1w = fw1.reshape(F1, C2, P_OUT * P_OUT)
    fc1w = jnp.pad(fc1w, ((0, 0), (0, 0), (0, F_TILE - P_OUT * P_OUT)))
    fc1w = jnp.transpose(fc1w, (1, 2, 0)).reshape(F_PAD, F1)
    return {
        "w1": w1_cf, "b1": b1.reshape(C1, 1),
        "w2": w2_cf, "b2": b2.reshape(C2, 1),
        "sel": sel,
        "fc1w": fc1w, "fc1b": fb1.reshape(1, F1),
        "fc2w": fw2.T, "fc2b": fb2.reshape(1, F2),
        "fc3w": fw3.T, "fc3b": fb3.reshape(1, F3),
    }


# ---------------------------------------------------------------------------
# deterministic init (PyTorch-style uniform) + pure-JAX reference
# ---------------------------------------------------------------------------
def init_params(key):
    def uni(k, shape, fan_in):
        bound = 1.0 / jnp.sqrt(fan_in)
        return jax.random.uniform(k, shape, jnp.float32, -bound, bound)

    ks = jax.random.split(key, 10)
    return (uni(ks[0], (C1, C0, K, K), C0 * K * K), uni(ks[1], (C1,), C0 * K * K),
            uni(ks[2], (C2, C1, K, K), C1 * K * K), uni(ks[3], (C2,), C1 * K * K),
            uni(ks[4], (F1, C2 * 25), C2 * 25), uni(ks[5], (F1,), C2 * 25),
            uni(ks[6], (F2, F1), F1), uni(ks[7], (F2,), F1),
            uni(ks[8], (F3, F2), F2), uni(ks[9], (F3,), F2))


def reference_forward(x, raw):
    (w1, b1, w2, b2, fw1, fb1, fw2, fb2, fw3, fb3) = raw
    dn = ("NCHW", "OIHW", "NCHW")
    hp = lax.Precision.HIGHEST
    y = lax.conv_general_dilated(x, w1, (1, 1), "VALID",
                                 dimension_numbers=dn, precision=hp)
    y = jnp.maximum(y + b1[None, :, None, None], 0.0)
    y = lax.reduce_window(y, -jnp.inf, lax.max, (1, 1, 2, 2), (1, 1, 2, 2), "VALID")
    y = lax.conv_general_dilated(y, w2, (1, 1), "VALID",
                                 dimension_numbers=dn, precision=hp)
    y = jnp.maximum(y + b2[None, :, None, None], 0.0)
    y = lax.reduce_window(y, -jnp.inf, lax.max, (1, 1, 2, 2), (1, 1, 2, 2), "VALID")
    f = y.reshape(y.shape[0], -1)
    h = jnp.maximum(jnp.dot(f, fw1.T, precision=hp) + fb1, 0.0)
    h = jnp.maximum(jnp.dot(h, fw2.T, precision=hp) + fb2, 0.0)
    return jnp.dot(h, fw3.T, precision=hp) + fb3


# ---------------------------------------------------------------------------
if __name__ == "__main__":
    key = jax.random.PRNGKey(0)
    pkey, xkey = jax.random.split(key)
    raw = init_params(pkey)
    params = prepare_params(raw)

    # CIFAR-10 sized input (32x32x3 is required for the 16*5*5 flatten to hold)
    x = jax.random.normal(xkey, (2, 3, 32, 32), jnp.float32)

    out = jax.block_until_ready(convnet_forward(x, params))
    assert out.shape == (2, 10), out.shape
    assert bool(jnp.all(jnp.isfinite(out)))

    ref = reference_forward(x, raw)
    max_err = float(jnp.max(jnp.abs(out - ref)))
    assert bool(jnp.allclose(out, ref, atol=1e-2, rtol=1e-2)), max_err

    print("KERNEL_OK")
</pallas_src>

<mosaic_0001>
module attributes {stable_mosaic.version = 11 : i64} {
  func.func @_fc_kernel(%arg0: i32, %arg1: memref<8x512xf32, #tpu.memory_space<vmem>>, %arg2: memref<512x120xf32, #tpu.memory_space<vmem>>, %arg3: memref<1x120xf32, #tpu.memory_space<vmem>>, %arg4: memref<120x60xf32, #tpu.memory_space<vmem>>, %arg5: memref<1x60xf32, #tpu.memory_space<vmem>>, %arg6: memref<60x10xf32, #tpu.memory_space<vmem>>, %arg7: memref<1x10xf32, #tpu.memory_space<vmem>>, %arg8: memref<8x10xf32, #tpu.memory_space<vmem>>) attributes {dimension_semantics = [#tpu.dimension_semantics<parallel>], iteration_bounds = array<i64: 1>, scalar_prefetch = 0 : i64, scratch_operands = 0 : i64, tpu.core_type = #tpu.core_type<tc>, window_params = [{transform_indices = @transform_0, window_bounds = array<i64: 8, 512>}, {pipeline_mode = #tpu.pipeline_mode<synchronous>, transform_indices = @transform_1, window_bounds = array<i64: 512, 120>}, {pipeline_mode = #tpu.pipeline_mode<synchronous>, transform_indices = @transform_2, window_bounds = array<i64: 1, 120>}, {pipeline_mode = #tpu.pipeline_mode<synchronous>, transform_indices = @transform_3, window_bounds = array<i64: 120, 60>}, {pipeline_mode = #tpu.pipeline_mode<synchronous>, transform_indices = @transform_4, window_bounds = array<i64: 1, 60>}, {pipeline_mode = #tpu.pipeline_mode<synchronous>, transform_indices = @transform_5, window_bounds = array<i64: 60, 10>}, {pipeline_mode = #tpu.pipeline_mode<synchronous>, transform_indices = @transform_6, window_bounds = array<i64: 1, 10>}, {transform_indices = @transform_7, window_bounds = array<i64: 8, 10>}]} {
    %c0 = arith.constant 0 : index
    %c0_0 = arith.constant 0 : index
    %0 = vector.load %arg1[%c0, %c0_0] : memref<8x512xf32, #tpu.memory_space<vmem>>, vector<8x512xf32>
    %c0_1 = arith.constant 0 : index
    %c0_2 = arith.constant 0 : index
    %1 = vector.load %arg2[%c0_1, %c0_2] : memref<512x120xf32, #tpu.memory_space<vmem>>, vector<512x120xf32>
    %cst = arith.constant dense<0.000000e+00> : vector<8x120xf32>
    %2 = tpu.matmul %0, %1, %cst {dimension_numbers = #tpu.dot_dimension_numbers<[1], [0], [0], [1], [0, 0, 1, 1], [], []>} : vector<8x512xf32>, vector<512x120xf32>, vector<8x120xf32> -> vector<8x120xf32>
    %c0_3 = arith.constant 0 : index
    %c0_4 = arith.constant 0 : index
    %3 = vector.load %arg3[%c0_3, %c0_4] : memref<1x120xf32, #tpu.memory_space<vmem>>, vector<1x120xf32>
    %4 = vector.broadcast %3 : vector<1x120xf32> to vector<8x120xf32>
    %5 = arith.addf %2, %4 : vector<8x120xf32>
    %cst_5 = arith.constant 0.000000e+00 : f32
    %6 = vector.broadcast %cst_5 : f32 to vector<8x120xf32>
    %7 = arith.maximumf %5, %6 : vector<8x120xf32>
    %c0_6 = arith.constant 0 : index
    %c0_7 = arith.constant 0 : index
    %8 = vector.load %arg4[%c0_6, %c0_7] : memref<120x60xf32, #tpu.memory_space<vmem>>, vector<120x60xf32>
    %cst_8 = arith.constant dense<0.000000e+00> : vector<8x60xf32>
    %9 = tpu.matmul %7, %8, %cst_8 {dimension_numbers = #tpu.dot_dimension_numbers<[1], [0], [0], [1], [0, 0, 1, 1], [], []>} : vector<8x120xf32>, vector<120x60xf32>, vector<8x60xf32> -> vector<8x60xf32>
    %c0_9 = arith.constant 0 : index
    %c0_10 = arith.constant 0 : index
    %10 = vector.load %arg5[%c0_9, %c0_10] : memref<1x60xf32, #tpu.memory_space<vmem>>, vector<1x60xf32>
    %11 = vector.broadcast %10 : vector<1x60xf32> to vector<8x60xf32>
    %12 = arith.addf %9, %11 : vector<8x60xf32>
    %cst_11 = arith.constant 0.000000e+00 : f32
    %13 = vector.broadcast %cst_11 : f32 to vector<8x60xf32>
    %14 = arith.maximumf %12, %13 : vector<8x60xf32>
    %c0_12 = arith.constant 0 : index
    %c0_13 = arith.constant 0 : index
    %15 = vector.load %arg6[%c0_12, %c0_13] : memref<60x10xf32, #tpu.memory_space<vmem>>, vector<60x10xf32>
    %cst_14 = arith.constant dense<0.000000e+00> : vector<8x10xf32>
    %16 = tpu.matmul %14, %15, %cst_14 {dimension_numbers = #tpu.dot_dimension_numbers<[1], [0], [0], [1], [0, 0, 1, 1], [], []>} : vector<8x60xf32>, vector<60x10xf32>, vector<8x10xf32> -> vector<8x10xf32>
    %c0_15 = arith.constant 0 : index
    %c0_16 = arith.constant 0 : index
    %17 = vector.load %arg7[%c0_15, %c0_16] : memref<1x10xf32, #tpu.memory_space<vmem>>, vector<1x10xf32>
    %18 = vector.broadcast %17 : vector<1x10xf32> to vector<8x10xf32>
    %19 = arith.addf %16, %18 : vector<8x10xf32>
    %c0_17 = arith.constant 0 : index
    %c0_18 = arith.constant 0 : index
    %20 = vector.load %arg8[%c0_17, %c0_18] : memref<8x10xf32, #tpu.memory_space<vmem>>, vector<8x10xf32>
    tpu.vector_store %arg8[%c0_17, %c0_18], %19 {strides = array<i32>} : memref<8x10xf32, #tpu.memory_space<vmem>>, vector<8x10xf32>,
    return
  }
  func.func @transform_0(%arg0: i32) -> (i32, i32) {
    %c0_i32 = arith.constant 0 : i32
    %c0_i32_0 = arith.constant 0 : i32
    return %arg0, %c0_i32 : i32, i32
  }
  func.func @transform_1(%arg0: i32) -> (i32, i32) {
    %c0_i32 = arith.constant 0 : i32
    %c0_i32_0 = arith.constant 0 : i32
    %c0_i32_1 = arith.constant 0 : i32
    return %c0_i32, %c0_i32_0 : i32, i32
  }
  func.func @transform_2(%arg0: i32) -> (i32, i32) {
    %c0_i32 = arith.constant 0 : i32
    %c0_i32_0 = arith.constant 0 : i32
    %c0_i32_1 = arith.constant 0 : i32
    return %c0_i32, %c0_i32_0 : i32, i32
  }
  func.func @transform_3(%arg0: i32) -> (i32, i32) {
    %c0_i32 = arith.constant 0 : i32
    %c0_i32_0 = arith.constant 0 : i32
    %c0_i32_1 = arith.constant 0 : i32
    return %c0_i32, %c0_i32_0 : i32, i32
  }
  func.func @transform_4(%arg0: i32) -> (i32, i32) {
    %c0_i32 = arith.constant 0 : i32
    %c0_i32_0 = arith.constant 0 : i32
    %c0_i32_1 = arith.constant 0 : i32
    return %c0_i32, %c0_i32_0 : i32, i32
  }
  func.func @transform_5(%arg0: i32) -> (i32, i32) {
    %c0_i32 = arith.constant 0 : i32
    %c0_i32_0 = arith.constant 0 : i32
    %c0_i32_1 = arith.constant 0 : i32
    return %c0_i32, %c0_i32_0 : i32, i32
  }
  func.func @transform_6(%arg0: i32) -> (i32, i32) {
    %c0_i32 = arith.constant 0 : i32
    %c0_i32_0 = arith.constant 0 : i32
    %c0_i32_1 = arith.constant 0 : i32
    return %c0_i32, %c0_i32_0 : i32, i32
  }
  func.func @transform_7(%arg0: i32) -> (i32, i32) {
    %c0_i32 = arith.constant 0 : i32
    %c0_i32_0 = arith.constant 0 : i32
    return %arg0, %c0_i32 : i32, i32
  }
}

module attributes {stable_mosaic.version = 11 : i64} {
  func.func @_feature_kernel(%arg0: i32, %arg1: memref<8x3x1024xf32, #tpu.memory_space<vmem>>, %arg2: memref<25x6x3xf32, #tpu.memory_space<vmem>>, %arg3: memref<6x1xf32, #tpu.memory_space<vmem>>, %arg4: memref<25x16x6xf32, #tpu.memory_space<vmem>>, %arg5: memref<16x1xf32, #tpu.memory_space<vmem>>, %arg6: memref<529x32xf32, #tpu.memory_space<vmem>>, %arg7: memref<8x16x32xf32, #tpu.memory_space<vmem>>) attributes {dimension_semantics = [#tpu.dimension_semantics<parallel>], iteration_bounds = array<i64: 1>, scalar_prefetch = 0 : i64, scratch_operands = 0 : i64, tpu.core_type = #tpu.core_type<tc>, window_params = [{transform_indices = @transform_0, window_bounds = array<i64: 8, 3, 1024>}, {pipeline_mode = #tpu.pipeline_mode<synchronous>, transform_indices = @transform_1, window_bounds = array<i64: 25, 6, 3>}, {pipeline_mode = #tpu.pipeline_mode<synchronous>, transform_indices = @transform_2, window_bounds = array<i64: 6, 1>}, {pipeline_mode = #tpu.pipeline_mode<synchronous>, transform_indices = @transform_3, window_bounds = array<i64: 25, 16, 6>}, {pipeline_mode = #tpu.pipeline_mode<synchronous>, transform_indices = @transform_4, window_bounds = array<i64: 16, 1>}, {pipeline_mode = #tpu.pipeline_mode<synchronous>, transform_indices = @transform_5, window_bounds = array<i64: 529, 32>}, {transform_indices = @transform_6, window_bounds = array<i64: 8, 16, 32>}]} {
    %c0_i32 = arith.constant 0 : i32
    %c8_i32 = arith.constant 8 : i32
    %0 = arith.addi %c0_i32, %c8_i32 : i32
    %c1_i32 = arith.constant 1 : i32
    scf.for %arg8 = %c0_i32 to %0 step %c1_i32  : i32 {
      %cst = arith.constant 0.000000e+00 : f32
      %1 = vector.broadcast %cst : f32 to vector<6x892xf32>
      %c0 = arith.constant 0 : index
      %c0_1 = arith.constant 0 : index
      %c0_2 = arith.constant 0 : index
      %2 = vector.load %arg2[%c0, %c0_1, %c0_2] : memref<25x6x3xf32, #tpu.memory_space<vmem>>, vector<1x6x3xf32>
      %3 = vector.shape_cast %2 : vector<1x6x3xf32> to vector<6x3xf32>
      %4 = arith.index_cast %arg8 : i32 to index
      %c0_3 = arith.constant 0 : index
      %c0_4 = arith.constant 0 : index
      %5 = vector.load %arg1[%4, %c0_3, %c0_4] : memref<8x3x1024xf32, #tpu.memory_space<vmem>>, vector<1x3x892xf32>
      %6 = vector.shape_cast %5 : vector<1x3x892xf32> to vector<3x892xf32>
      %cst_5 = arith.constant dense<0.000000e+00> : vector<6x892xf32>
      %7 = tpu.matmul %3, %6, %cst_5 {dimension_numbers = #tpu.dot_dimension_numbers<[1], [0], [0], [1], [0, 0, 1, 1], [], []>} : vector<6x3xf32>, vector<3x892xf32>, vector<6x892xf32> -> vector<6x892xf32>
      %8 = arith.addf %1, %7 : vector<6x892xf32>
      %c1 = arith.constant 1 : index
      %c0_6 = arith.constant 0 : index
      %c0_7 = arith.constant 0 : index
      %9 = vector.load %arg2[%c1, %c0_6, %c0_7] : memref<25x6x3xf32, #tpu.memory_space<vmem>>, vector<1x6x3xf32>
      %10 = vector.shape_cast %9 : vector<1x6x3xf32> to vector<6x3xf32>
      %11 = arith.index_cast %arg8 : i32 to index
      %c0_8 = arith.constant 0 : index
      %c1_9 = arith.constant 1 : index
      %12 = vector.load %arg1[%11, %c0_8, %c1_9] : memref<8x3x1024xf32, #tpu.memory_space<vmem>>, vector<1x3x892xf32>
      %13 = vector.shape_cast %12 : vector<1x3x892xf32> to vector<3x892xf32>
      %cst_10 = arith.constant dense<0.000000e+00> : vector<6x892xf32>
      %14 = tpu.matmul %10, %13, %cst_10 {dimension_numbers = #tpu.dot_dimension_numbers<[1], [0], [0], [1], [0, 0, 1, 1], [], []>} : vector<6x3xf32>, vector<3x892xf32>, vector<6x892xf32> -> vector<6x892xf32>
      %15 = arith.addf %8, %14 : vector<6x892xf32>
      %c2 = arith.constant 2 : index
      %c0_11 = arith.constant 0 : index
      %c0_12 = arith.constant 0 : index
      %16 = vector.load %arg2[%c2, %c0_11, %c0_12] : memref<25x6x3xf32, #tpu.memory_space<vmem>>, vector<1x6x3xf32>
      %17 = vector.shape_cast %16 : vector<1x6x3xf32> to vector<6x3xf32>
      %18 = arith.index_cast %arg8 : i32 to index
      %c0_13 = arith.constant 0 : index
      %c2_14 = arith.constant 2 : index
      %19 = vector.load %arg1[%18, %c0_13, %c2_14] : memref<8x3x1024xf32, #tpu.memory_space<vmem>>, vector<1x3x892xf32>
      %20 = vector.shape_cast %19 : vector<1x3x892xf32> to vector<3x892xf32>
      %cst_15 = arith.constant dense<0.000000e+00> : vector<6x892xf32>
      %21 = tpu.matmul %17, %20, %cst_15 {dimension_numbers = #tpu.dot_dimension_numbers<[1], [0], [0], [1], [0, 0, 1, 1], [], []>} : vector<6x3xf32>, vector<3x892xf32>, vector<6x892xf32> -> vector<6x892xf32>
      %22 = arith.addf %15, %21 : vector<6x892xf32>
      %c3 = arith.constant 3 : index
      %c0_16 = arith.constant 0 : index
      %c0_17 = arith.constant 0 : index
      %23 = vector.load %arg2[%c3, %c0_16, %c0_17] : memref<25x6x3xf32, #tpu.memory_space<vmem>>, vector<1x6x3xf32>
      %24 = vector.shape_cast %23 : vector<1x6x3xf32> to vector<6x3xf32>
      %25 = arith.index_cast %arg8 : i32 to index
      %c0_18 = arith.constant 0 : index
      %c3_19 = arith.constant 3 : index
      %26 = vector.load %arg1[%25, %c0_18, %c3_19] : memref<8x3x1024xf32, #tpu.memory_space<vmem>>, vector<1x3x892xf32>
      %27 = vector.shape_cast %26 : vector<1x3x892xf32> to vector<3x892xf32>
      %cst_20 = arith.constant dense<0.000000e+00> : vector<6x892xf32>
      %28 = tpu.matmul %24, %27, %cst_20 {dimension_numbers = #tpu.dot_dimension_numbers<[1], [0], [0], [1], [0, 0, 1, 1], [], []>} : vector<6x3xf32>, vector<3x892xf32>, vector<6x892xf32> -> vector<6x892xf32>
      %29 = arith.addf %22, %28 : vector<6x892xf32>
      %c4 = arith.constant 4 : index
      %c0_21 = arith.constant 0 : index
      %c0_22 = arith.constant 0 : index
      %30 = vector.load %arg2[%c4, %c0_21, %c0_22] : memref<25x6x3xf32, #tpu.memory_space<vmem>>, vector<1x6x3xf32>
      %31 = vector.shape_cast %30 : vector<1x6x3xf32> to vector<6x3xf32>
      %32 = arith.index_cast %arg8 : i32 to index
      %c0_23 = arith.constant 0 : index
      %c4_24 = arith.constant 4 : index
      %33 = vector.load %arg1[%32, %c0_23, %c4_24] : memref<8x3x1024xf32, #tpu.memory_space<vmem>>, vector<1x3x892xf32>
      %34 = vector.shape_cast %33 : vector<1x3x892xf32> to vector<3x892xf32>
      %cst_25 = arith.constant dense<0.000000e+00> : vector<6x892xf32>
      %35 = tpu.matmul %31, %34, %cst_25 {dimension_numbers = #tpu.dot_dimension_numbers<[1], [0], [0], [1], [0, 0, 1, 1], [], []>} : vector<6x3xf32>, vector<3x892xf32>, vector<6x892xf32> -> vector<6x892xf32>
      %36 = arith.addf %29, %35 : vector<6x892xf32>
      %c5 = arith.constant 5 : index
      %c0_26 = arith.constant 0 : index
      %c0_27 = arith.constant 0 : index
      %37 = vector.load %arg2[%c5, %c0_26, %c0_27] : memref<25x6x3xf32, #tpu.memory_space<vmem>>, vector<1x6x3xf32>
      %38 = vector.shape_cast %37 : vector<1x6x3xf32> to vector<6x3xf32>
      %39 = arith.index_cast %arg8 : i32 to index
      %c0_28 = arith.constant 0 : index
      %c32 = arith.constant 32 : index
      %40 = vector.load %arg1[%39, %c0_28, %c32] : memref<8x3x1024xf32, #tpu.memory_space<vmem>>, vector<1x3x892xf32>
      %41 = vector.shape_cast %40 : vector<1x3x892xf32> to vector<3x892xf32>
      %cst_29 = arith.constant dense<0.000000e+00> : vector<6x892xf32>
      %42 = tpu.matmul %38, %41, %cst_29 {dimension_numbers = #tpu.dot_dimension_numbers<[1], [0], [0], [1], [0, 0, 1, 1], [], []>} : vector<6x3xf32>, vector<3x892xf32>, vector<6x892xf32> -> vector<6x892xf32>
      %43 = arith.addf %36, %42 : vector<6x892xf32>
      %c6 = arith.constant 6 : index
      %c0_30 = arith.constant 0 : index
      %c0_31 = arith.constant 0 : index
      %44 = vector.load %arg2[%c6, %c0_30, %c0_31] : memref<25x6x3xf32, #tpu.memory_space<vmem>>, vector<1x6x3xf32>
      %45 = vector.shape_cast %44 : vector<1x6x3xf32> to vector<6x3xf32>
      %46 = arith.index_cast %arg8 : i32 to index
      %c0_32 = arith.constant 0 : index
      %c33 = arith.constant 33 : index
      %47 = vector.load %arg1[%46, %c0_32, %c33] : memref<8x3x1024xf32, #tpu.memory_space<vmem>>, vector<1x3x892xf32>
      %48 = vector.shape_cast %47 : vector<1x3x892xf32> to vector<3x892xf32>
      %cst_33 = arith.constant dense<0.000000e+00> : vector<6x892xf32>
      %49 = tpu.matmul %45, %48, %cst_33 {dimension_numbers = #tpu.dot_dimension_numbers<[1], [0], [0], [1], [0, 0, 1, 1], [], []>} : vector<6x3xf32>, vector<3x892xf32>, vector<6x892xf32> -> vector<6x892xf32>
      %50 = arith.addf %43, %49 : vector<6x892xf32>
      %c7 = arith.constant 7 : index
      %c0_34 = arith.constant 0 : index
      %c0_35 = arith.constant 0 : index
      %51 = vector.load %arg2[%c7, %c0_34, %c0_35] : memref<25x6x3xf32, #tpu.memory_space<vmem>>, vector<1x6x3xf32>
      %52 = vector.shape_cast %51 : vector<1x6x3xf32> to vector<6x3xf32>
      %53 = arith.index_cast %arg8 : i32 to index
      %c0_36 = arith.constant 0 : index
      %c34 = arith.constant 34 : index
      %54 = vector.load %arg1[%53, %c0_36, %c34] : memref<8x3x1024xf32, #tpu.memory_space<vmem>>, vector<1x3x892xf32>
      %55 = vector.shape_cast %54 : vector<1x3x892xf32> to vector<3x892xf32>
      %cst_37 = arith.constant dense<0.000000e+00> : vector<6x892xf32>
      %56 = tpu.matmul %52, %55, %cst_37 {dimension_numbers = #tpu.dot_dimension_numbers<[1], [0], [0], [1], [0, 0, 1, 1], [], []>} : vector<6x3xf32>, vector<3x892xf32>, vector<6x892xf32> -> vector<6x892xf32>
      %57 = arith.addf %50, %56 : vector<6x892xf32>
      %c8 = arith.constant 8 : index
      %c0_38 = arith.constant 0 : index
      %c0_39 = arith.constant 0 : index
      %58 = vector.load %arg2[%c8, %c0_38, %c0_39] : memref<25x6x3xf32, #tpu.memory_space<vmem>>, vector<1x6x3xf32>
      %59 = vector.shape_cast %58 : vector<1x6x3xf32> to vector<6x3xf32>
      %60 = arith.index_cast %arg8 : i32 to index
      %c0_40 = arith.constant 0 : index
      %c35 = arith.constant 35 : index
      %61 = vector.load %arg1[%60, %c0_40, %c35] : memref<8x3x1024xf32, #tpu.memory_space<vmem>>, vector<1x3x892xf32>
      %62 = vector.shape_cast %61 : vector<1x3x892xf32> to vector<3x892xf32>
      %cst_41 = arith.constant dense<0.000000e+00> : vector<6x892xf32>
      %63 = tpu.matmul %59, %62, %cst_41 {dimension_numbers = #tpu.dot_dimension_numbers<[1], [0], [0], [1], [0, 0, 1, 1], [], []>} : vector<6x3xf32>, vector<3x892xf32>, vector<6x892xf32> -> vector<6x892xf32>
      %64 = arith.addf %57, %63 : vector<6x892xf32>
      %c9 = arith.constant 9 : index
      %c0_42 = arith.constant 0 : index
      %c0_43 = arith.constant 0 : index
      %65 = vector.load %arg2[%c9, %c0_42, %c0_43] : memref<25x6x3xf32, #tpu.memory_space<vmem>>, vector<1x6x3xf32>
      %66 = vector.shape_cast %65 : vector<1x6x3xf32> to vector<6x3xf32>
      %67 = arith.index_cast %arg8 : i32 to index
      %c0_44 = arith.constant 0 : index
      %c36 = arith.constant 36 : index
      %68 = vector.load %arg1[%67, %c0_44, %c36] : memref<8x3x1024xf32, #tpu.memory_space<vmem>>, vector<1x3x892xf32>
      %69 = vector.shape_cast %68 : vector<1x3x892xf32> to vector<3x892xf32>
      %cst_45 = arith.constant dense<0.000000e+00> : vector<6x892xf32>
      %70 = tpu.matmul %66, %69, %cst_45 {dimension_numbers = #tpu.dot_dimension_numbers<[1], [0], [0], [1], [0, 0, 1, 1], [], []>} : vector<6x3xf32>, vector<3x892xf32>, vector<6x892xf32> -> vector<6x892xf32>
      %71 = arith.addf %64, %70 : vector<6x892xf32>
      %c10 = arith.constant 10 : index
      %c0_46 = arith.constant 0 : index
      %c0_47 = arith.constant 0 : index
      %72 = vector.load %arg2[%c10, %c0_46, %c0_47] : memref<25x6x3xf32, #tpu.memory_space<vmem>>, vector<1x6x3xf32>
      %73 = vector.shape_cast %72 : vector<1x6x3xf32> to vector<6x3xf32>
      %74 = arith.index_cast %arg8 : i32 to index
      %c0_48 = arith.constant 0 : index
      %c64 = arith.constant 64 : index
      %75 = vector.load %arg1[%74, %c0_48, %c64] : memref<8x3x1024xf32, #tpu.memory_space<vmem>>, vector<1x3x892xf32>
      %76 = vector.shape_cast %75 : vector<1x3x892xf32> to vector<3x892xf32>
      %cst_49 = arith.constant dense<0.000000e+00> : vector<6x892xf32>
      %77 = tpu.matmul %73, %76, %cst_49 {dimension_numbers = #tpu.dot_dimension_numbers<[1], [0], [0], [1], [0, 0, 1, 1], [], []>} : vector<6x3xf32>, vector<3x892xf32>, vector<6x892xf32> -> vector<6x892xf32>
      %78 = arith.addf %71, %77 : vector<6x892xf32>
      %c11 = arith.constant 11 : index
      %c0_50 = arith.constant 0 : index
      %c0_51 = arith.constant 0 : index
      %79 = vector.load %arg2[%c11, %c0_50, %c0_51] : memref<25x6x3xf32, #tpu.memory_space<vmem>>, vector<1x6x3xf32>
      %80 = vector.shape_cast %79 : vector<1x6x3xf32> to vector<6x3xf32>
      %81 = arith.index_cast %arg8 : i32 to index
      %c0_52 = arith.constant 0 : index
      %c65 = arith.constant 65 : index
      %82 = vector.load %arg1[%81, %c0_52, %c65] : memref<8x3x1024xf32, #tpu.memory_space<vmem>>, vector<1x3x892xf32>
      %83 = vector.shape_cast %82 : vector<1x3x892xf32> to vector<3x892xf32>
      %cst_53 = arith.constant dense<0.000000e+00> : vector<6x892xf32>
      %84 = tpu.matmul %80, %83, %cst_53 {dimension_numbers = #tpu.dot_dimension_numbers<[1], [0], [0], [1], [0, 0, 1, 1], [], []>} : vector<6x3xf32>, vector<3x892xf32>, vector<6x892xf32> -> vector<6x892xf32>
      %85 = arith.addf %78, %84 : vector<6x892xf32>
      %c12 = arith.constant 12 : index
      %c0_54 = arith.constant 0 : index
      %c0_55 = arith.constant 0 : index
      %86 = vector.load %arg2[%c12, %c0_54, %c0_55] : memref<25x6x3xf32, #tpu.memory_space<vmem>>, vector<1x6x3xf32>
      %87 = vector.shape_cast %86 : vector<1x6x3xf32> to vector<6x3xf32>
      %88 = arith.index_cast %arg8 : i32 to index
      %c0_56 = arith.constant 0 : index
      %c66 = arith.constant 66 : index
      %89 = vector.load %arg1[%88, %c0_56, %c66] : memref<8x3x1024xf32, #tpu.memory_space<vmem>>, vector<1x3x892xf32>
      %90 = vector.shape_cast %89 : vector<1x3x892xf32> to vector<3x892xf32>
      %cst_57 = arith.constant dense<0.000000e+00> : vector<6x892xf32>
      %91 = tpu.matmul %87, %90, %cst_57 {dimension_numbers = #tpu.dot_dimension_numbers<[1], [0], [0], [1], [0, 0, 1, 1], [], []>} : vector<6x3xf32>, vector<3x892xf32>, vector<6x892xf32> -> vector<6x892xf32>
      %92 = arith.addf %85, %91 : vector<6x892xf32>
      %c13 = arith.constant 13 : index
      %c0_58 = arith.constant 0 : index
      %c0_59 = arith.constant 0 : index
      %93 = vector.load %arg2[%c13, %c0_58, %c0_59] : memref<25x6x3xf32, #tpu.memory_space<vmem>>, vector<1x6x3xf32>
      %94 = vector.shape_cast %93 : vector<1x6x3xf32> to vector<6x3xf32>
      %95 = arith.index_cast %arg8 : i32 to index
      %c0_60 = arith.constant 0 : index
      %c67 = arith.constant 67 : index
      %96 = vector.load %arg1[%95, %c0_60, %c67] : memref<8x3x1024xf32, #tpu.memory_space<vmem>>, vector<1x3x892xf32>
      %97 = vector.shape_cast %96 : vector<1x3x892xf32> to vector<3x892xf32>
      %cst_61 = arith.constant dense<0.000000e+00> : vector<6x892xf32>
      %98 = tpu.matmul %94, %97, %cst_61 {dimension_numbers = #tpu.dot_dimension_numbers<[1], [0], [0], [1], [0, 0, 1, 1], [], []>} : vector<6x3xf32>, vector<3x892xf32>, vector<6x892xf32> -> vector<6x892xf32>
      %99 = arith.addf %92, %98 : vector<6x892xf32>
      %c14 = arith.constant 14 : index
      %c0_62 = arith.constant 0 : index
      %c0_63 = arith.constant 0 : index
      %100 = vector.load %arg2[%c14, %c0_62, %c0_63] : memref<25x6x3xf32, #tpu.memory_space<vmem>>, vector<1x6x3xf32>
      %101 = vector.shape_cast %100 : vector<1x6x3xf32> to vector<6x3xf32>
      %102 = arith.index_cast %arg8 : i32 to index
      %c0_64 = arith.constant 0 : index
      %c68 = arith.constant 68 : index
      %103 = vector.load %arg1[%102, %c0_64, %c68] : memref<8x3x1024xf32, #tpu.memory_space<vmem>>, vector<1x3x892xf32>
      %104 = vector.shape_cast %103 : vector<1x3x892xf32> to vector<3x892xf32>
      %cst_65 = arith.constant dense<0.000000e+00> : vector<6x892xf32>
      %105 = tpu.matmul %101, %104, %cst_65 {dimension_numbers = #tpu.dot_dimension_numbers<[1], [0], [0], [1], [0, 0, 1, 1], [], []>} : vector<6x3xf32>, vector<3x892xf32>, vector<6x892xf32> -> vector<6x892xf32>
      %106 = arith.addf %99, %105 : vector<6x892xf32>
      %c15 = arith.constant 15 : index
      %c0_66 = arith.constant 0 : index
      %c0_67 = arith.constant 0 : index
      %107 = vector.load %arg2[%c15, %c0_66, %c0_67] : memref<25x6x3xf32, #tpu.memory_space<vmem>>, vector<1x6x3xf32>
      %108 = vector.shape_cast %107 : vector<1x6x3xf32> to vector<6x3xf32>
      %109 = arith.index_cast %arg8 : i32 to index
      %c0_68 = arith.constant 0 : index
      %c96 = arith.constant 96 : index
      %110 = vector.load %arg1[%109, %c0_68, %c96] : memref<8x3x1024xf32, #tpu.memory_space<vmem>>, vector<1x3x892xf32>
      %111 = vector.shape_cast %110 : vector<1x3x892xf32> to vector<3x892xf32>
      %cst_69 = arith.constant dense<0.000000e+00> : vector<6x892xf32>
      %112 = tpu.matmul %108, %111, %cst_69 {dimension_numbers = #tpu.dot_dimension_numbers<[1], [0], [0], [1], [0, 0, 1, 1], [], []>} : vector<6x3xf32>, vector<3x892xf32>, vector<6x892xf32> -> vector<6x892xf32>
      %113 = arith.addf %106, %112 : vector<6x892xf32>
      %c16 = arith.constant 16 : index
      %c0_70 = arith.constant 0 : index
      %c0_71 = arith.constant 0 : index
      %114 = vector.load %arg2[%c16, %c0_70, %c0_71] : memref<25x6x3xf32, #tpu.memory_space<vmem>>, vector<1x6x3xf32>
      %115 = vector.shape_cast %114 : vector<1x6x3xf32> to vector<6x3xf32>
      %116 = arith.index_cast %arg8 : i32 to index
      %c0_72 = arith.constant 0 : index
      %c97 = arith.constant 97 : index
      %117 = vector.load %arg1[%116, %c0_72, %c97] : memref<8x3x1024xf32, #tpu.memory_space<vmem>>, vector<1x3x892xf32>
      %118 = vector.shape_cast %117 : vector<1x3x892xf32> to vector<3x892xf32>
      %cst_73 = arith.constant dense<0.000000e+00> : vector<6x892xf32>
      %119 = tpu.matmul %115, %118, %cst_73 {dimension_numbers = #tpu.dot_dimension_numbers<[1], [0], [0], [1], [0, 0, 1, 1], [], []>} : vector<6x3xf32>, vector<3x892xf32>, vector<6x892xf32> -> vector<6x892xf32>
      %120 = arith.addf %113, %119 : vector<6x892xf32>
      %c17 = arith.constant 17 : index
      %c0_74 = arith.constant 0 : index
      %c0_75 = arith.constant 0 : index
      %121 = vector.load %arg2[%c17, %c0_74, %c0_75] : memref<25x6x3xf32, #tpu.memory_space<vmem>>, vector<1x6x3xf32>
      %122 = vector.shape_cast %121 : vector<1x6x3xf32> to vector<6x3xf32>
      %123 = arith.index_cast %arg8 : i32 to index
      %c0_76 = arith.constant 0 : index
      %c98 = arith.constant 98 : index
      %124 = vector.load %arg1[%123, %c0_76, %c98] : memref<8x3x1024xf32, #tpu.memory_space<vmem>>, vector<1x3x892xf32>
      %125 = vector.shape_cast %124 : vector<1x3x892xf32> to vector<3x892xf32>
      %cst_77 = arith.constant dense<0.000000e+00> : vector<6x892xf32>
      %126 = tpu.matmul %122, %125, %cst_77 {dimension_numbers = #tpu.dot_dimension_numbers<[1], [0], [0], [1], [0, 0, 1, 1], [], []>} : vector<6x3xf32>, vector<3x892xf32>, vector<6x892xf32> -> vector<6x892xf32>
      %127 = arith.addf %120, %126 : vector<6x892xf32>
      %c18 = arith.constant 18 : index
      %c0_78 = arith.constant 0 : index
      %c0_79 = arith.constant 0 : index
      %128 = vector.load %arg2[%c18, %c0_78, %c0_79] : memref<25x6x3xf32, #tpu.memory_space<vmem>>, vector<1x6x3xf32>
      %129 = vector.shape_cast %128 : vector<1x6x3xf32> to vector<6x3xf32>
      %130 = arith.index_cast %arg8 : i32 to index
      %c0_80 = arith.constant 0 : index
      %c99 = arith.constant 99 : index
      %131 = vector.load %arg1[%130, %c0_80, %c99] : memref<8x3x1024xf32, #tpu.memory_space<vmem>>, vector<1x3x892xf32>
      %132 = vector.shape_cast %131 : vector<1x3x892xf32> to vector<3x892xf32>
      %cst_81 = arith.constant dense<0.000000e+00> : vector<6x892xf32>
      %133 = tpu.matmul %129, %132, %cst_81 {dimension_numbers = #tpu.dot_dimension_numbers<[1], [0], [0], [1], [0, 0, 1, 1], [], []>} : vector<6x3xf32>, vector<3x892xf32>, vector<6x892xf32> -> vector<6x892xf32>
      %134 = arith.addf %127, %133 : vector<6x892xf32>
      %c19 = arith.constant 19 : index
      %c0_82 = arith.constant 0 : index
      %c0_83 = arith.constant 0 : index
      %135 = vector.load %arg2[%c19, %c0_82, %c0_83] : memref<25x6x3xf32, #tpu.memory_space<vmem>>, vector<1x6x3xf32>
      %136 = vector.shape_cast %135 : vector<1x6x3xf32> to vector<6x3xf32>
      %137 = arith.index_cast %arg8 : i32 to index
      %c0_84 = arith.constant 0 : index
      %c100 = arith.constant 100 : index
      %138 = vector.load %arg1[%137, %c0_84, %c100] : memref<8x3x1024xf32, #tpu.memory_space<vmem>>, vector<1x3x892xf32>
      %139 = vector.shape_cast %138 : vector<1x3x892xf32> to vector<3x892xf32>
      %cst_85 = arith.constant dense<0.000000e+00> : vector<6x892xf32>
      %140 = tpu.matmul %136, %139, %cst_85 {dimension_numbers = #tpu.dot_dimension_numbers<[1], [0], [0], [1], [0, 0, 1, 1], [], []>} : vector<6x3xf32>, vector<3x892xf32>, vector<6x892xf32> -> vector<6x892xf32>
      %141 = arith.addf %134, %140 : vector<6x892xf32>
      %c20 = arith.constant 20 : index
      %c0_86 = arith.constant 0 : index
      %c0_87 = arith.constant 0 : index
      %142 = vector.load %arg2[%c20, %c0_86, %c0_87] : memref<25x6x3xf32, #tpu.memory_space<vmem>>, vector<1x6x3xf32>
      %143 = vector.shape_cast %142 : vector<1x6x3xf32> to vector<6x3xf32>
      %144 = arith.index_cast %arg8 : i32 to index
      %c0_88 = arith.constant 0 : index
      %c128 = arith.constant 128 : index
      %145 = vector.load %arg1[%144, %c0_88, %c128] : memref<8x3x1024xf32, #tpu.memory_space<vmem>>, vector<1x3x892xf32>
      %146 = vector.shape_cast %145 : vector<1x3x892xf32> to vector<3x892xf32>
      %cst_89 = arith.constant dense<0.000000e+00> : vector<6x892xf32>
      %147 = tpu.matmul %143, %146, %cst_89 {dimension_numbers = #tpu.dot_dimension_numbers<[1], [0], [0], [1], [0, 0, 1, 1], [], []>} : vector<6x3xf32>, vector<3x892xf32>, vector<6x892xf32> -> vector<6x892xf32>
      %148 = arith.addf %141, %147 : vector<6x892xf32>
      %c21 = arith.constant 21 : index
      %c0_90 = arith.constant 0 : index
      %c0_91 = arith.constant 0 : index
      %149 = vector.load %arg2[%c21, %c0_90, %c0_91] : memref<25x6x3xf32, #tpu.memory_space<vmem>>, vector<1x6x3xf32>
      %150 = vector.shape_cast %149 : vector<1x6x3xf32> to vector<6x3xf32>
      %151 = arith.index_cast %arg8 : i32 to index
      %c0_92 = arith.constant 0 : index
      %c129 = arith.constant 129 : index
      %152 = vector.load %arg1[%151, %c0_92, %c129] : memref<8x3x1024xf32, #tpu.memory_space<vmem>>, vector<1x3x892xf32>
      %153 = vector.shape_cast %152 : vector<1x3x892xf32> to vector<3x892xf32>
      %cst_93 = arith.constant dense<0.000000e+00> : vector<6x892xf32>
      %154 = tpu.matmul %150, %153, %cst_93 {dimension_numbers = #tpu.dot_dimension_numbers<[1], [0], [0], [1], [0, 0, 1, 1], [], []>} : vector<6x3xf32>, vector<3x892xf32>, vector<6x892xf32> -> vector<6x892xf32>
      %155 = arith.addf %148, %154 : vector<6x892xf32>
      %c22 = arith.constant 22 : index
      %c0_94 = arith.constant 0 : index
      %c0_95 = arith.constant 0 : index
      %156 = vector.load %arg2[%c22, %c0_94, %c0_95] : memref<25x6x3xf32, #tpu.memory_space<vmem>>, vector<1x6x3xf32>
      %157 = vector.shape_cast %156 : vector<1x6x3xf32> to vector<6x3xf32>
      %158 = arith.index_cast %arg8 : i32 to index
      %c0_96 = arith.constant 0 : index
      %c130 = arith.constant 130 : index
      %159 = vector.load %arg1[%158, %c0_96, %c130] : memref<8x3x1024xf32, #tpu.memory_space<vmem>>, vector<1x3x892xf32>
      %160 = vector.shape_cast %159 : vector<1x3x892xf32> to vector<3x892xf32>
      %cst_97 = arith.constant dense<0.000000e+00> : vector<6x892xf32>
      %161 = tpu.matmul %157, %160, %cst_97 {dimension_numbers = #tpu.dot_dimension_numbers<[1], [0], [0], [1], [0, 0, 1, 1], [], []>} : vector<6x3xf32>, vector<3x892xf32>, vector<6x892xf32> -> vector<6x892xf32>
      %162 = arith.addf %155, %161 : vector<6x892xf32>
      %c23 = arith.constant 23 : index
      %c0_98 = arith.constant 0 : index
      %c0_99 = arith.constant 0 : index
      %163 = vector.load %arg2[%c23, %c0_98, %c0_99] : memref<25x6x3xf32, #tpu.memory_space<vmem>>, vector<1x6x3xf32>
      %164 = vector.shape_cast %163 : vector<1x6x3xf32> to vector<6x3xf32>
      %165 = arith.index_cast %arg8 : i32 to index
      %c0_100 = arith.constant 0 : index
      %c131 = arith.constant 131 : index
      %166 = vector.load %arg1[%165, %c0_100, %c131] : memref<8x3x1024xf32, #tpu.memory_space<vmem>>, vector<1x3x892xf32>
      %167 = vector.shape_cast %166 : vector<1x3x892xf32> to vector<3x892xf32>
      %cst_101 = arith.constant dense<0.000000e+00> : vector<6x892xf32>
      %168 = tpu.matmul %164, %167, %cst_101 {dimension_numbers = #tpu.dot_dimension_numbers<[1], [0], [0], [1], [0, 0, 1, 1], [], []>} : vector<6x3xf32>, vector<3x892xf32>, vector<6x892xf32> -> vector<6x892xf32>
      %169 = arith.addf %162, %168 : vector<6x892xf32>
      %c24 = arith.constant 24 : index
      %c0_102 = arith.constant 0 : index
      %c0_103 = arith.constant 0 : index
      %170 = vector.load %arg2[%c24, %c0_102, %c0_103] : memref<25x6x3xf32, #tpu.memory_space<vmem>>, vector<1x6x3xf32>
      %171 = vector.shape_cast %170 : vector<1x6x3xf32> to vector<6x3xf32>
      %172 = arith.index_cast %arg8 : i32 to index
      %c0_104 = arith.constant 0 : index
      %c132 = arith.constant 132 : index
      %173 = vector.load %arg1[%172, %c0_104, %c132] : memref<8x3x1024xf32, #tpu.memory_space<vmem>>, vector<1x3x892xf32>
      %174 = vector.shape_cast %173 : vector<1x3x892xf32> to vector<3x892xf32>
      %cst_105 = arith.constant dense<0.000000e+00> : vector<6x892xf32>
      %175 = tpu.matmul %171, %174, %cst_105 {dimension_numbers = #tpu.dot_dimension_numbers<[1], [0], [0], [1], [0, 0, 1, 1], [], []>} : vector<6x3xf32>, vector<3x892xf32>, vector<6x892xf32> -> vector<6x892xf32>
      %176 = arith.addf %169, %175 : vector<6x892xf32>
      %c0_106 = arith.constant 0 : index
      %c0_107 = arith.constant 0 : index
      %177 = vector.load %arg3[%c0_106, %c0_107] : memref<6x1xf32, #tpu.memory_space<vmem>>, vector<6x1xf32>
      %178 = vector.broadcast %177 : vector<6x1xf32> to vector<6x892xf32>
      %179 = arith.addf %176, %178 : vector<6x892xf32>
      %cst_108 = arith.constant 0.000000e+00 : f32
      %180 = vector.broadcast %cst_108 : f32 to vector<6x892xf32>
      %181 = arith.maximumf %179, %180 : vector<6x892xf32>
      %182 = vector.extract_strided_slice %181 {offsets = [0, 0], sizes = [6, 859], strides = [1, 1]} : vector<6x892xf32> to vector<6x859xf32>
      %183 = vector.extract_strided_slice %181 {offsets = [0, 1], sizes = [6, 859], strides = [1, 1]} : vector<6x892xf32> to vector<6x859xf32>
      %184 = arith.maximumf %182, %183 : vector<6x859xf32>
      %185 = vector.extract_strided_slice %181 {offsets = [0, 32], sizes = [6, 859], strides = [1, 1]} : vector<6x892xf32> to vector<6x859xf32>
      %186 = vector.extract_strided_slice %181 {offsets = [0, 33], sizes = [6, 859], strides = [1, 1]} : vector<6x892xf32> to vector<6x859xf32>
      %187 = arith.maximumf %185, %186 : vector<6x859xf32>
      %188 = arith.maximumf %184, %187 : vector<6x859xf32>
      %cst_109 = arith.constant 0.000000e+00 : f32
      %189 = vector.broadcast %cst_109 : f32 to vector<16x595xf32>
      %c0_110 = arith.constant 0 : index
      %c0_111 = arith.constant 0 : index
      %c0_112 = arith.constant 0 : index
      %190 = vector.load %arg4[%c0_110, %c0_111, %c0_112] : memref<25x16x6xf32, #tpu.memory_space<vmem>>, vector<1x16x6xf32>
      %191 = vector.shape_cast %190 : vector<1x16x6xf32> to vector<16x6xf32>
      %192 = vector.extract_strided_slice %188 {offsets = [0, 0], sizes = [6, 595], strides = [1, 1]} : vector<6x859xf32> to vector<6x595xf32>
      %cst_113 = arith.constant dense<0.000000e+00> : vector<16x595xf32>
      %193 = tpu.matmul %191, %192, %cst_113 {dimension_numbers = #tpu.dot_dimension_numbers<[1], [0], [0], [1], [0, 0, 1, 1], [], []>} : vector<16x6xf32>, vector<6x595xf32>, vector<16x595xf32> -> vector<16x595xf32>
      %194 = arith.addf %189, %193 : vector<16x595xf32>
      %c1_114 = arith.constant 1 : index
      %c0_115 = arith.constant 0 : index
      %c0_116 = arith.constant 0 : index
      %195 = vector.load %arg4[%c1_114, %c0_115, %c0_116] : memref<25x16x6xf32, #tpu.memory_space<vmem>>, vector<1x16x6xf32>
      %196 = vector.shape_cast %195 : vector<1x16x6xf32> to vector<16x6xf32>
      %197 = vector.extract_strided_slice %188 {offsets = [0, 2], sizes = [6, 595], strides = [1, 1]} : vector<6x859xf32> to vector<6x595xf32>
      %cst_117 = arith.constant dense<0.000000e+00> : vector<16x595xf32>
      %198 = tpu.matmul %196, %197, %cst_117 {dimension_numbers = #tpu.dot_dimension_numbers<[1], [0], [0], [1], [0, 0, 1, 1], [], []>} : vector<16x6xf32>, vector<6x595xf32>, vector<16x595xf32> -> vector<16x595xf32>
      %199 = arith.addf %194, %198 : vector<16x595xf32>
      %c2_118 = arith.constant 2 : index
      %c0_119 = arith.constant 0 : index
      %c0_120 = arith.constant 0 : index
      %200 = vector.load %arg4[%c2_118, %c0_119, %c0_120] : memref<25x16x6xf32, #tpu.memory_space<vmem>>, vector<1x16x6xf32>
      %201 = vector.shape_cast %200 : vector<1x16x6xf32> to vector<16x6xf32>
      %202 = vector.extract_strided_slice %188 {offsets = [0, 4], sizes = [6, 595], strides = [1, 1]} : vector<6x859xf32> to vector<6x595xf32>
      %cst_121 = arith.constant dense<0.000000e+00> : vector<16x595xf32>
      %203 = tpu.matmul %201, %202, %cst_121 {dimension_numbers = #tpu.dot_dimension_numbers<[1], [0], [0], [1], [0, 0, 1, 1], [], []>} : vector<16x6xf32>, vector<6x595xf32>, vector<16x595xf32> -> vector<16x595xf32>
      %204 = arith.addf %199, %203 : vector<16x595xf32>
      %c3_122 = arith.constant 3 : index
      %c0_123 = arith.constant 0 : index
      %c0_124 = arith.constant 0 : index
      %205 = vector.load %arg4[%c3_122, %c0_123, %c0_124] : memref<25x16x6xf32, #tpu.memory_space<vmem>>, vector<1x16x6xf32>
      %206 = vector.shape_cast %205 : vector<1x16x6xf32> to vector<16x6xf32>
      %207 = vector.extract_strided_slice %188 {offsets = [0, 6], sizes = [6, 595], strides = [1, 1]} : vector<6x859xf32> to vector<6x595xf32>
      %cst_125 = arith.constant dense<0.000000e+00> : vector<16x595xf32>
      %208 = tpu.matmul %206, %207, %cst_125 {dimension_numbers = #tpu.dot_dimension_numbers<[1], [0], [0], [1], [0, 0, 1, 1], [], []>} : vector<16x6xf32>, vector<6x595xf32>, vector<16x595xf32> -> vector<16x595xf32>
      %209 = arith.addf %204, %208 : vector<16x595xf32>
      %c4_126 = arith.constant 4 : index
      %c0_127 = arith.constant 0 : index
      %c0_128 = arith.constant 0 : index
      %210 = vector.load %arg4[%c4_126, %c0_127, %c0_128] : memref<25x16x6xf32, #tpu.memory_space<vmem>>, vector<1x16x6xf32>
      %211 = vector.shape_cast %210 : vector<1x16x6xf32> to vector<16x6xf32>
      %212 = vector.extract_strided_slice %188 {offsets = [0, 8], sizes = [6, 595], strides = [1, 1]} : vector<6x859xf32> to vector<6x595xf32>
      %cst_129 = arith.constant dense<0.000000e+00> : vector<16x595xf32>
      %213 = tpu.matmul %211, %212, %cst_129 {dimension_numbers = #tpu.dot_dimension_numbers<[1], [0], [0], [1], [0, 0, 1, 1], [], []>} : vector<16x6xf32>, vector<6x595xf32>, vector<16x595xf32> -> vector<16x595xf32>
      %214 = arith.addf %209, %213 : vector<16x595xf32>
      %c5_130 = arith.constant 5 : index
      %c0_131 = arith.constant 0 : index
      %c0_132 = arith.constant 0 : index
      %215 = vector.load %arg4[%c5_130, %c0_131, %c0_132] : memref<25x16x6xf32, #tpu.memory_space<vmem>>, vector<1x16x6xf32>
      %216 = vector.shape_cast %215 : vector<1x16x6xf32> to vector<16x6xf32>
      %217 = vector.extract_strided_slice %188 {offsets = [0, 64], sizes = [6, 595], strides = [1, 1]} : vector<6x859xf32> to vector<6x595xf32>
      %cst_133 = arith.constant dense<0.000000e+00> : vector<16x595xf32>
      %218 = tpu.matmul %216, %217, %cst_133 {dimension_numbers = #tpu.dot_dimension_numbers<[1], [0], [0], [1], [0, 0, 1, 1], [], []>} : vector<16x6xf32>, vector<6x595xf32>, vector<16x595xf32> -> vector<16x595xf32>
      %219 = arith.addf %214, %218 : vector<16x595xf32>
      %c6_134 = arith.constant 6 : index
      %c0_135 = arith.constant 0 : index
      %c0_136 = arith.constant 0 : index
      %220 = vector.load %arg4[%c6_134, %c0_135, %c0_136] : memref<25x16x6xf32, #tpu.memory_space<vmem>>, vector<1x16x6xf32>
      %221 = vector.shape_cast %220 : vector<1x16x6xf32> to vector<16x6xf32>
      %222 = vector.extract_strided_slice %188 {offsets = [0, 66], sizes = [6, 595], strides = [1, 1]} : vector<6x859xf32> to vector<6x595xf32>
      %cst_137 = arith.constant dense<0.000000e+00> : vector<16x595xf32>
      %223 = tpu.matmul %221, %222, %cst_137 {dimension_numbers = #tpu.dot_dimension_numbers<[1], [0], [0], [1], [0, 0, 1, 1], [], []>} : vector<16x6xf32>, vector<6x595xf32>, vector<16x595xf32> -> vector<16x595xf32>
      %224 = arith.addf %219, %223 : vector<16x595xf32>
      %c7_138 = arith.constant 7 : index
      %c0_139 = arith.constant 0 : index
      %c0_140 = arith.constant 0 : index
      %225 = vector.load %arg4[%c7_138, %c0_139, %c0_140] : memref<25x16x6xf32, #tpu.memory_space<vmem>>, vector<1x16x6xf32>
      %226 = vector.shape_cast %225 : vector<1x16x6xf32> to vector<16x6xf32>
      %227 = vector.extract_strided_slice %188 {offsets = [0, 68], sizes = [6, 595], strides = [1, 1]} : vector<6x859xf32> to vector<6x595xf32>
      %cst_141 = arith.constant dense<0.000000e+00> : vector<16x595xf32>
      %228 = tpu.matmul %226, %227, %cst_141 {dimension_numbers = #tpu.dot_dimension_numbers<[1], [0], [0], [1], [0, 0, 1, 1], [], []>} : vector<16x6xf32>, vector<6x595xf32>, vector<16x595xf32> -> vector<16x595xf32>
      %229 = arith.addf %224, %228 : vector<16x595xf32>
      %c8_142 = arith.constant 8 : index
      %c0_143 = arith.constant 0 : index
      %c0_144 = arith.constant 0 : index
      %230 = vector.load %arg4[%c8_142, %c0_143, %c0_144] : memref<25x16x6xf32, #tpu.memory_space<vmem>>, vector<1x16x6xf32>
      %231 = vector.shape_cast %230 : vector<1x16x6xf32> to vector<16x6xf32>
      %232 = vector.extract_strided_slice %188 {offsets = [0, 70], sizes = [6, 595], strides = [1, 1]} : vector<6x859xf32> to vector<6x595xf32>
      %cst_145 = arith.constant dense<0.000000e+00> : vector<16x595xf32>
      %233 = tpu.matmul %231, %232, %cst_145 {dimension_numbers = #tpu.dot_dimension_numbers<[1], [0], [0], [1], [0, 0, 1, 1], [], []>} : vector<16x6xf32>, vector<6x595xf32>, vector<16x595xf32> -> vector<16x595xf32>
      %234 = arith.addf %229, %233 : vector<16x595xf32>
      %c9_146 = arith.constant 9 : index
      %c0_147 = arith.constant 0 : index
      %c0_148 = arith.constant 0 : index
      %235 = vector.load %arg4[%c9_146, %c0_147, %c0_148] : memref<25x16x6xf32, #tpu.memory_space<vmem>>, vector<1x16x6xf32>
      %236 = vector.shape_cast %235 : vector<1x16x6xf32> to vector<16x6xf32>
      %237 = vector.extract_strided_slice %188 {offsets = [0, 72], sizes = [6, 595], strides = [1, 1]} : vector<6x859xf32> to vector<6x595xf32>
      %cst_149 = arith.constant dense<0.000000e+00> : vector<16x595xf32>
      %238 = tpu.matmul %236, %237, %cst_149 {dimension_numbers = #tpu.dot_dimension_numbers<[1], [0], [0], [1], [0, 0, 1, 1], [], []>} : vector<16x6xf32>, vector<6x595xf32>, vector<16x595xf32> -> vector<16x595xf32>
      %239 = arith.addf %234, %238 : vector<16x595xf32>
      %c10_150 = arith.constant 10 : index
      %c0_151 = arith.constant 0 : index
      %c0_152 = arith.constant 0 : index
      %240 = vector.load %arg4[%c10_150, %c0_151, %c0_152] : memref<25x16x6xf32, #tpu.memory_space<vmem>>, vector<1x16x6xf32>
      %241 = vector.shape_cast %240 : vector<1x16x6xf32> to vector<16x6xf32>
      %242 = vector.extract_strided_slice %188 {offsets = [0, 128], sizes = [6, 595], strides = [1, 1]} : vector<6x859xf32> to vector<6x595xf32>
      %cst_153 = arith.constant dense<0.000000e+00> : vector<16x595xf32>
      %243 = tpu.matmul %241, %242, %cst_153 {dimension_numbers = #tpu.dot_dimension_numbers<[1], [0], [0], [1], [0, 0, 1, 1], [], []>} : vector<16x6xf32>, vector<6x595xf32>, vector<16x595xf32> -> vector<16x595xf32>
      %244 = arith.addf %239, %243 : vector<16x595xf32>
      %c11_154 = arith.constant 11 : index
      %c0_155 = arith.constant 0 : index
      %c0_156 = arith.constant 0 : index
      %245 = vector.load %arg4[%c11_154, %c0_155, %c0_156] : memref<25x16x6xf32, #tpu.memory_space<vmem>>, vector<1x16x6xf32>
      %246 = vector.shape_cast %245 : vector<1x16x6xf32> to vector<16x6xf32>
      %247 = vector.extract_strided_slice %188 {offsets = [0, 130], sizes = [6, 595], strides = [1, 1]} : vector<6x859xf32> to vector<6x595xf32>
      %cst_157 = arith.constant dense<0.000000e+00> : vector<16x595xf32>
      %248 = tpu.matmul %246, %247, %cst_157 {dimension_numbers = #tpu.dot_dimension_numbers<[1], [0], [0], [1], [0, 0, 1, 1], [], []>} : vector<16x6xf32>, vector<6x595xf32>, vector<16x595xf32> -> vector<16x595xf32>
      %249 = arith.addf %244, %248 : vector<16x595xf32>
      %c12_158 = arith.constant 12 : index
      %c0_159 = arith.constant 0 : index
      %c0_160 = arith.constant 0 : index
      %250 = vector.load %arg4[%c12_158, %c0_159, %c0_160] : memref<25x16x6xf32, #tpu.memory_space<vmem>>, vector<1x16x6xf32>
      %251 = vector.shape_cast %250 : vector<1x16x6xf32> to vector<16x6xf32>
      %252 = vector.extract_strided_slice %188 {offsets = [0, 132], sizes = [6, 595], strides = [1, 1]} : vector<6x859xf32> to vector<6x595xf32>
      %cst_161 = arith.constant dense<0.000000e+00> : vector<16x595xf32>
      %253 = tpu.matmul %251, %252, %cst_161 {dimension_numbers = #tpu.dot_dimension_numbers<[1], [0], [0], [1], [0, 0, 1, 1], [], []>} : vector<16x6xf32>, vector<6x595xf32>, vector<16x595xf32> -> vector<16x595xf32>
      %254 = arith.addf %249, %253 : vector<16x595xf32>
      %c13_162 = arith.constant 13 : index
      %c0_163 = arith.constant 0 : index
      %c0_164 = arith.constant 0 : index
      %255 = vector.load %arg4[%c13_162, %c0_163, %c0_164] : memref<25x16x6xf32, #tpu.memory_space<vmem>>, vector<1x16x6xf32>
      %256 = vector.shape_cast %255 : vector<1x16x6xf32> to vector<16x6xf32>
      %257 = vector.extract_strided_slice %188 {offsets = [0, 134], sizes = [6, 595], strides = [1, 1]} : vector<6x859xf32> to vector<6x595xf32>
      %cst_165 = arith.constant dense<0.000000e+00> : vector<16x595xf32>
      %258 = tpu.matmul %256, %257, %cst_165 {dimension_numbers = #tpu.dot_dimension_numbers<[1], [0], [0], [1], [0, 0, 1, 1], [], []>} : vector<16x6xf32>, vector<6x595xf32>, vector<16x595xf32> -> vector<16x595xf32>
      %259 = arith.addf %254, %258 : vector<16x595xf32>
      %c14_166 = arith.constant 14 : index
      %c0_167 = arith.constant 0 : index
      %c0_168 = arith.constant 0 : index
      %260 = vector.load %arg4[%c14_166, %c0_167, %c0_168] : memref<25x16x6xf32, #tpu.memory_space<vmem>>, vector<1x16x6xf32>
      %261 = vector.shape_cast %260 : vector<1x16x6xf32> to vector<16x6xf32>
      %262 = vector.extract_strided_slice %188 {offsets = [0, 136], sizes = [6, 595], strides = [1, 1]} : vector<6x859xf32> to vector<6x595xf32>
      %cst_169 = arith.constant dense<0.000000e+00> : vector<16x595xf32>
      %263 = tpu.matmul %261, %262, %cst_169 {dimension_numbers = #tpu.dot_dimension_numbers<[1], [0], [0], [1], [0, 0, 1, 1], [], []>} : vector<16x6xf32>, vector<6x595xf32>, vector<16x595xf32> -> vector<16x595xf32>
      %264 = arith.addf %259, %263 : vector<16x595xf32>
      %c15_170 = arith.constant 15 : index
      %c0_171 = arith.constant 0 : index
      %c0_172 = arith.constant 0 : index
      %265 = vector.load %arg4[%c15_170, %c0_171, %c0_172] : memref<25x16x6xf32, #tpu.memory_space<vmem>>, vector<1x16x6xf32>
      %266 = vector.shape_cast %265 : vector<1x16x6xf32> to vector<16x6xf32>
      %267 = vector.extract_strided_slice %188 {offsets = [0, 192], sizes = [6, 595], strides = [1, 1]} : vector<6x859xf32> to vector<6x595xf32>
      %cst_173 = arith.constant dense<0.000000e+00> : vector<16x595xf32>
      %268 = tpu.matmul %266, %267, %cst_173 {dimension_numbers = #tpu.dot_dimension_numbers<[1], [0], [0], [1], [0, 0, 1, 1], [], []>} : vector<16x6xf32>, vector<6x595xf32>, vector<16x595xf32> -> vector<16x595xf32>
      %269 = arith.addf %264, %268 : vector<16x595xf32>
      %c16_174 = arith.constant 16 : index
      %c0_175 = arith.constant 0 : index
      %c0_176 = arith.constant 0 : index
      %270 = vector.load %arg4[%c16_174, %c0_175, %c0_176] : memref<25x16x6xf32, #tpu.memory_space<vmem>>, vector<1x16x6xf32>
      %271 = vector.shape_cast %270 : vector<1x16x6xf32> to vector<16x6xf32>
      %272 = vector.extract_strided_slice %188 {offsets = [0, 194], sizes = [6, 595], strides = [1, 1]} : vector<6x859xf32> to vector<6x595xf32>
      %cst_177 = arith.constant dense<0.000000e+00> : vector<16x595xf32>
      %273 = tpu.matmul %271, %272, %cst_177 {dimension_numbers = #tpu.dot_dimension_numbers<[1], [0], [0], [1], [0, 0, 1, 1], [], []>} : vector<16x6xf32>, vector<6x595xf32>, vector<16x595xf32> -> vector<16x595xf32>
      %274 = arith.addf %269, %273 : vector<16x595xf32>
      %c17_178 = arith.constant 17 : index
      %c0_179 = arith.constant 0 : index
      %c0_180 = arith.constant 0 : index
      %275 = vector.load %arg4[%c17_178, %c0_179, %c0_180] : memref<25x16x6xf32, #tpu.memory_space<vmem>>, vector<1x16x6xf32>
      %276 = vector.shape_cast %275 : vector<1x16x6xf32> to vector<16x6xf32>
      %277 = vector.extract_strided_slice %188 {offsets = [0, 196], sizes = [6, 595], strides = [1, 1]} : vector<6x859xf32> to vector<6x595xf32>
      %cst_181 = arith.constant dense<0.000000e+00> : vector<16x595xf32>
      %278 = tpu.matmul %276, %277, %cst_181 {dimension_numbers = #tpu.dot_dimension_numbers<[1], [0], [0], [1], [0, 0, 1, 1], [], []>} : vector<16x6xf32>, vector<6x595xf32>, vector<16x595xf32> -> vector<16x595xf32>
      %279 = arith.addf %274, %278 : vector<16x595xf32>
      %c18_182 = arith.constant 18 : index
      %c0_183 = arith.constant 0 : index
      %c0_184 = arith.constant 0 : index
      %280 = vector.load %arg4[%c18_182, %c0_183, %c0_184] : memref<25x16x6xf32, #tpu.memory_space<vmem>>, vector<1x16x6xf32>
      %281 = vector.shape_cast %280 : vector<1x16x6xf32> to vector<16x6xf32>
      %282 = vector.extract_strided_slice %188 {offsets = [0, 198], sizes = [6, 595], strides = [1, 1]} : vector<6x859xf32> to vector<6x595xf32>
      %cst_185 = arith.constant dense<0.000000e+00> : vector<16x595xf32>
      %283 = tpu.matmul %281, %282, %cst_185 {dimension_numbers = #tpu.dot_dimension_numbers<[1], [0], [0], [1], [0, 0, 1, 1], [], []>} : vector<16x6xf32>, vector<6x595xf32>, vector<16x595xf32> -> vector<16x595xf32>
      %284 = arith.addf %279, %283 : vector<16x595xf32>
      %c19_186 = arith.constant 19 : index
      %c0_187 = arith.constant 0 : index
      %c0_188 = arith.constant 0 : index
      %285 = vector.load %arg4[%c19_186, %c0_187, %c0_188] : memref<25x16x6xf32, #tpu.memory_space<vmem>>, vector<1x16x6xf32>
      %286 = vector.shape_cast %285 : vector<1x16x6xf32> to vector<16x6xf32>
      %287 = vector.extract_strided_slice %188 {offsets = [0, 200], sizes = [6, 595], strides = [1, 1]} : vector<6x859xf32> to vector<6x595xf32>
      %cst_189 = arith.constant dense<0.000000e+00> : vector<16x595xf32>
      %288 = tpu.matmul %286, %287, %cst_189 {dimension_numbers = #tpu.dot_dimension_numbers<[1], [0], [0], [1], [0, 0, 1, 1], [], []>} : vector<16x6xf32>, vector<6x595xf32>, vector<16x595xf32> -> vector<16x595xf32>
      %289 = arith.addf %284, %288 : vector<16x595xf32>
      %c20_190 = arith.constant 20 : index
      %c0_191 = arith.constant 0 : index
      %c0_192 = arith.constant 0 : index
      %290 = vector.load %arg4[%c20_190, %c0_191, %c0_192] : memref<25x16x6xf32, #tpu.memory_space<vmem>>, vector<1x16x6xf32>
      %291 = vector.shape_cast %290 : vector<1x16x6xf32> to vector<16x6xf32>
      %292 = vector.extract_strided_slice %188 {offsets = [0, 256], sizes = [6, 595], strides = [1, 1]} : vector<6x859xf32> to vector<6x595xf32>
      %cst_193 = arith.constant dense<0.000000e+00> : vector<16x595xf32>
      %293 = tpu.matmul %291, %292, %cst_193 {dimension_numbers = #tpu.dot_dimension_numbers<[1], [0], [0], [1], [0, 0, 1, 1], [], []>} : vector<16x6xf32>, vector<6x595xf32>, vector<16x595xf32> -> vector<16x595xf32>
      %294 = arith.addf %289, %293 : vector<16x595xf32>
      %c21_194 = arith.constant 21 : index
      %c0_195 = arith.constant 0 : index
      %c0_196 = arith.constant 0 : index
      %295 = vector.load %arg4[%c21_194, %c0_195, %c0_196] : memref<25x16x6xf32, #tpu.memory_space<vmem>>, vector<1x16x6xf32>
      %296 = vector.shape_cast %295 : vector<1x16x6xf32> to vector<16x6xf32>
      %297 = vector.extract_strided_slice %188 {offsets = [0, 258], sizes = [6, 595], strides = [1, 1]} : vector<6x859xf32> to vector<6x595xf32>
      %cst_197 = arith.constant dense<0.000000e+00> : vector<16x595xf32>
      %298 = tpu.matmul %296, %297, %cst_197 {dimension_numbers = #tpu.dot_dimension_numbers<[1], [0], [0], [1], [0, 0, 1, 1], [], []>} : vector<16x6xf32>, vector<6x595xf32>, vector<16x595xf32> -> vector<16x595xf32>
      %299 = arith.addf %294, %298 : vector<16x595xf32>
      %c22_198 = arith.constant 22 : index
      %c0_199 = arith.constant 0 : index
      %c0_200 = arith.constant 0 : index
      %300 = vector.load %arg4[%c22_198, %c0_199, %c0_200] : memref<25x16x6xf32, #tpu.memory_space<vmem>>, vector<1x16x6xf32>
      %301 = vector.shape_cast %300 : vector<1x16x6xf32> to vector<16x6xf32>
      %302 = vector.extract_strided_slice %188 {offsets = [0, 260], sizes = [6, 595], strides = [1, 1]} : vector<6x859xf32> to vector<6x595xf32>
      %cst_201 = arith.constant dense<0.000000e+00> : vector<16x595xf32>
      %303 = tpu.matmul %301, %302, %cst_201 {dimension_numbers = #tpu.dot_dimension_numbers<[1], [0], [0], [1], [0, 0, 1, 1], [], []>} : vector<16x6xf32>, vector<6x595xf32>, vector<16x595xf32> -> vector<16x595xf32>
      %304 = arith.addf %299, %303 : vector<16x595xf32>
      %c23_202 = arith.constant 23 : index
      %c0_203 = arith.constant 0 : index
      %c0_204 = arith.constant 0 : index
      %305 = vector.load %arg4[%c23_202, %c0_203, %c0_204] : memref<25x16x6xf32, #tpu.memory_space<vmem>>, vector<1x16x6xf32>
      %306 = vector.shape_cast %305 : vector<1x16x6xf32> to vector<16x6xf32>
      %307 = vector.extract_strided_slice %188 {offsets = [0, 262], sizes = [6, 595], strides = [1, 1]} : vector<6x859xf32> to vector<6x595xf32>
      %cst_205 = arith.constant dense<0.000000e+00> : vector<16x595xf32>
      %308 = tpu.matmul %306, %307, %cst_205 {dimension_numbers = #tpu.dot_dimension_numbers<[1], [0], [0], [1], [0, 0, 1, 1], [], []>} : vector<16x6xf32>, vector<6x595xf32>, vector<16x595xf32> -> vector<16x595xf32>
      %309 = arith.addf %304, %308 : vector<16x595xf32>
      %c24_206 = arith.constant 24 : index
      %c0_207 = arith.constant 0 : index
      %c0_208 = arith.constant 0 : index
      %310 = vector.load %arg4[%c24_206, %c0_207, %c0_208] : memref<25x16x6xf32, #tpu.memory_space<vmem>>, vector<1x16x6xf32>
      %311 = vector.shape_cast %310 : vector<1x16x6xf32> to vector<16x6xf32>
      %312 = vector.extract_strided_slice %188 {offsets = [0, 264], sizes = [6, 595], strides = [1, 1]} : vector<6x859xf32> to vector<6x595xf32>
      %cst_209 = arith.constant dense<0.000000e+00> : vector<16x595xf32>
      %313 = tpu.matmul %311, %312, %cst_209 {dimension_numbers = #tpu.dot_dimension_numbers<[1], [0], [0], [1], [0, 0, 1, 1], [], []>} : vector<16x6xf32>, vector<6x595xf32>, vector<16x595xf32> -> vector<16x595xf32>
      %314 = arith.addf %309, %313 : vector<16x595xf32>
      %c0_210 = arith.constant 0 : index
      %c0_211 = arith.constant 0 : index
      %315 = vector.load %arg5[%c0_210, %c0_211] : memref<16x1xf32, #tpu.memory_space<vmem>>, vector<16x1xf32>
      %316 = vector.broadcast %315 : vector<16x1xf32> to vector<16x595xf32>
      %317 = arith.addf %314, %316 : vector<16x595xf32>
      %cst_212 = arith.constant 0.000000e+00 : f32
      %318 = vector.broadcast %cst_212 : f32 to vector<16x595xf32>
      %319 = arith.maximumf %317, %318 : vector<16x595xf32>
      %320 = vector.extract_strided_slice %319 {offsets = [0, 0], sizes = [16, 529], strides = [1, 1]} : vector<16x595xf32> to vector<16x529xf32>
      %321 = vector.extract_strided_slice %319 {offsets = [0, 2], sizes = [16, 529], strides = [1, 1]} : vector<16x595xf32> to vector<16x529xf32>
      %322 = arith.maximumf %320, %321 : vector<16x529xf32>
      %323 = vector.extract_strided_slice %319 {offsets = [0, 64], sizes = [16, 529], strides = [1, 1]} : vector<16x595xf32> to vector<16x529xf32>
      %324 = vector.extract_strided_slice %319 {offsets = [0, 66], sizes = [16, 529], strides = [1, 1]} : vector<16x595xf32> to vector<16x529xf32>
      %325 = arith.maximumf %323, %324 : vector<16x529xf32>
      %326 = arith.maximumf %322, %325 : vector<16x529xf32>
      %c0_213 = arith.constant 0 : index
      %c0_214 = arith.constant 0 : index
      %327 = vector.load %arg6[%c0_213, %c0_214] : memref<529x32xf32, #tpu.memory_space<vmem>>, vector<529x32xf32>
      %cst_215 = arith.constant dense<0.000000e+00> : vector<16x32xf32>
      %328 = tpu.matmul %326, %327, %cst_215 {dimension_numbers = #tpu.dot_dimension_numbers<[1], [0], [0], [1], [0, 0, 1, 1], [], []>} : vector<16x529xf32>, vector<529x32xf32>, vector<16x32xf32> -> vector<16x32xf32>
      %329 = arith.index_cast %arg8 : i32 to index
      %c0_216 = arith.constant 0 : index
      %c0_217 = arith.constant 0 : index
      %330 = vector.load %arg7[%329, %c0_216, %c0_217] : memref<8x16x32xf32, #tpu.memory_space<vmem>>, vector<1x16x32xf32>
      %331 = vector.shape_cast %330 : vector<1x16x32xf32> to vector<16x32xf32>
      %332 = vector.shape_cast %328 : vector<16x32xf32> to vector<1x16x32xf32>
      tpu.vector_store %arg7[%329, %c0_216, %c0_217], %332 {strides = array<i32>} : memref<8x16x32xf32, #tpu.memory_space<vmem>>, vector<1x16x32xf32>,
    }
    %c8_i32_0 = arith.constant 8 : i32
    return
  }
  func.func @transform_0(%arg0: i32) -> (i32, i32, i32) {
    %c0_i32 = arith.constant 0 : i32
    %c0_i32_0 = arith.constant 0 : i32
    %c0_i32_1 = arith.constant 0 : i32
    return %arg0, %c0_i32, %c0_i32_0 : i32, i32, i32
  }
  func.func @transform_1(%arg0: i32) -> (i32, i32, i32) {
    %c0_i32 = arith.constant 0 : i32
    %c0_i32_0 = arith.constant 0 : i32
    %c0_i32_1 = arith.constant 0 : i32
    %c0_i32_2 = arith.constant 0 : i32
    return %c0_i32, %c0_i32_0, %c0_i32_1 : i32, i32, i32
  }
  func.func @transform_2(%arg0: i32) -> (i32, i32) {
    %c0_i32 = arith.constant 0 : i32
    %c0_i32_0 = arith.constant 0 : i32
    %c0_i32_1 = arith.constant 0 : i32
    return %c0_i32, %c0_i32_0 : i32, i32
  }
  func.func @transform_3(%arg0: i32) -> (i32, i32, i32) {
    %c0_i32 = arith.constant 0 : i32
    %c0_i32_0 = arith.constant 0 : i32
    %c0_i32_1 = arith.constant 0 : i32
    %c0_i32_2 = arith.constant 0 : i32
    return %c0_i32, %c0_i32_0, %c0_i32_1 : i32, i32, i32
  }
  func.func @transform_4(%arg0: i32) -> (i32, i32) {
    %c0_i32 = arith.constant 0 : i32
    %c0_i32_0 = arith.constant 0 : i32
    %c0_i32_1 = arith.constant 0 : i32
    return %c0_i32, %c0_i32_0 : i32, i32
  }
  func.func @transform_5(%arg0: i32) -> (i32, i32) {
    %c0_i32 = arith.constant 0 : i32
    %c0_i32_0 = arith.constant 0 : i32
    %c0_i32_1 = arith.constant 0 : i32
    return %c0_i32, %c0_i32_0 : i32, i32
  }
  func.func @transform_6(%arg0: i32) -> (i32, i32, i32) {
    %c0_i32 = arith.constant 0 : i32
    %c0_i32_0 = arith.constant 0 : i32
    %c0_i32_1 = arith.constant 0 : i32
    return %arg0, %c0_i32, %c0_i32_0 : i32, i32, i32
  }
}

</mosaic_0001>

<bundles_post_ra>
// kernel: convnet_forward.3
= control target key start
LH: loop header
LB: loop body
LE: loop exit
PB: predicated region body
PF: predicated region fallthrough
CT: control target
= control target key end

     0   :  { %vm594_vm0 = vmmov 0   ;;  %vm358_vm1 = vcmask 1043456   ;;  %vm264_vm2 = vcmask 982016   ;;  %vm354_vm3 = vcmask 490496   ;;  %s945_s1 = inlined_call_operand.vmem [shape: f32[512,120], index: 1, kind: input, shape index: {}]   ;;  %s946_s0 = inlined_call_operand.vmem [shape: f32[8,512], index: 0, kind: input, shape index: {}]   ;;  %s947_s3 = inlined_call_operand.vmem [shape: f32[120,60], index: 3, kind: input, shape index: {}]   ;;  %s948_s5 = inlined_call_operand.vmem [shape: f32[60,10], index: 5, kind: input, shape index: {}]   ;;  %s949_s2 = inlined_call_operand.vmem [shape: f32[1,120], index: 2, kind: input, shape index: {}]   ;;  %s950_s4 = inlined_call_operand.vmem [shape: f32[1,60], index: 4, kind: input, shape index: {}]   ;;  %s951_s6 = inlined_call_operand.vmem [shape: f32[1,10], index: 6, kind: input, shape index: {}]   ;;  %s952_s7 = inlined_call_operand.vmem [shape: f32[8,10], index: 7, kind: output, shape index: {}]  }
   0x1   :  { %v61_v0 = vld [vmem:[%s945_s1 + $0xf8] sm:$0xff]  ;;  %v60_v4 = vld [vmem:[%s945_s1 + $0xf0] sm:$0xff]  ;;  %v59_v8 = vld [vmem:[%s945_s1 + $0xe8] sm:$0xff]  ;;  %vm432_vm4 = vcmask 80896  }
   0x2   :  { %v93_v1 = vld [vmem:[%s945_s1 + $0x1f8] sm:$0xff]  ;;  %444 = vmatprep.subr.mxu0 %v61_v0  ;;  %v92_v5 = vld [vmem:[%s945_s1 + $0x1f0] sm:$0xff]  ;;  %v91_v9 = vld [vmem:[%s945_s1 + $0x1e8] sm:$0xff] }
   0x3   :  { %v45_v2 = vld [vmem:[%s945_s1 + $0x78] sm:$0xff]  ;;  %479 = vmatprep.subr.mxu1 %v93_v1  ;;  %v44_v6 = vld [vmem:[%s945_s1 + $0x70] sm:$0xff]  ;;  %v43_v10 = vld [vmem:[%s945_s1 + $0x68] sm:$0xff] }
   0x4   :  { %v77_v3 = vld [vmem:[%s945_s1 + $0x178] sm:$0xff]  ;;  %445 = vmatpush3.msra.mxu0 %v45_v2  ;;  %v76_v7 = vld [vmem:[%s945_s1 + $0x170] sm:$0xff]  ;;  %v75_v11 = vld [vmem:[%s945_s1 + $0x168] sm:$0xff] }
   0x5   :  { %480 = vmatpush3.msra.mxu1 %v77_v3  ;;  %446 = vmatprep.subr.mxu0 %v60_v4  ;;  %v58_v12 = vld [vmem:[%s945_s1 + $0xe0] sm:$0xff]  ;;  %v57_v16 = vld [vmem:[%s945_s1 + $0xd8] sm:$0xff]  ;;  %v56_v20 = vld [vmem:[%s945_s1 + $0xd0] sm:$0xff] }
   0x6   :  { %481 = vmatprep.subr.mxu1 %v92_v5  ;;  %447 = vmatpush3.msra.mxu0 %v44_v6  ;;  %v90_v13 = vld [vmem:[%s945_s1 + $0x1e0] sm:$0xff]  ;;  %v89_v17 = vld [vmem:[%s945_s1 + $0x1d8] sm:$0xff]  ;;  %v88_v21 = vld [vmem:[%s945_s1 + $0x1d0] sm:$0xff]  ;;  %v593_v5 = vmov 0.0  }
   0x7   :  { %482 = vmatpush3.msra.mxu1 %v76_v7  ;;  %448 = vmatprep.subr.mxu0 %v59_v8  ;;  %v42_v14 = vld [vmem:[%s945_s1 + $0x60] sm:$0xff]  ;;  %v41_v18 = vld [vmem:[%s945_s1 + $0x58] sm:$0xff]  ;;  %v40_v22 = vld [vmem:[%s945_s1 + $0x50] sm:$0xff] }
   0x8   :  { %483 = vmatprep.subr.mxu1 %v91_v9  ;;  %v74_v15 = vld [vmem:[%s945_s1 + $0x160] sm:$0xff]  ;;  %449 = vmatpush3.msra.mxu0 %v43_v10  ;;  %v73_v19 = vld [vmem:[%s945_s1 + $0x158] sm:$0xff]  ;;  %v72_v23 = vld [vmem:[%s945_s1 + $0x150] sm:$0xff] }
   0x9   :  { %484 = vmatpush3.msra.mxu1 %v75_v11  ;;  %450 = vmatprep.subr.mxu0 %v58_v12  ;;  %v55_v24 = vld [vmem:[%s945_s1 + $0xc8] sm:$0xff]  ;;  %v54_v28 = vld [vmem:[%s945_s1 + $0xc0] sm:$0xff]  ;;  %v53_v32 = vld [vmem:[%s945_s1 + $0xb8] sm:$0xff] }
   0xa   :  { %485 = vmatprep.subr.mxu1 %v90_v13  ;;  %451 = vmatpush3.msra.mxu0 %v42_v14  ;;  %v87_v25 = vld [vmem:[%s945_s1 + $0x1c8] sm:$0xff]  ;;  %v86_v29 = vld [vmem:[%s945_s1 + $0x1c0] sm:$0xff]  ;;  %v85_v33 = vld [vmem:[%s945_s1 + $0x1b8] sm:$0xff] }
   0xb   :  { %486 = vmatpush3.msra.mxu1 %v74_v15  ;;  %452 = vmatprep.subr.mxu0 %v57_v16  ;;  %v39_v26 = vld [vmem:[%s945_s1 + $0x48] sm:$0xff]  ;;  %v38_v30 = vld [vmem:[%s945_s1 + $0x40] sm:$0xff]  ;;  %v37_v34 = vld [vmem:[%s945_s1 + $0x38] sm:$0xff] }
   0xc   :  { %487 = vmatprep.subr.mxu1 %v89_v17  ;;  %453 = vmatpush3.msra.mxu0 %v41_v18  ;;  %v71_v27 = vld [vmem:[%s945_s1 + $0x148] sm:$0xff]  ;;  %v70_v31 = vld [vmem:[%s945_s1 + $0x140] sm:$0xff]  ;;  %v69_v35 = vld [vmem:[%s945_s1 + $0x138] sm:$0xff] }
   0xd   :  { %488 = vmatpush3.msra.mxu1 %v73_v19  ;;  %454 = vmatprep.subr.mxu0 %v56_v20  ;;  %v52_v36 = vld [vmem:[%s945_s1 + $0xb0] sm:$0xff]  ;;  %v51_v40 = vld [vmem:[%s945_s1 + $0xa8] sm:$0xff]  ;;  %v50_v44 = vld [vmem:[%s945_s1 + $0xa0] sm:$0xff] }
   0xe   :  { %489 = vmatprep.subr.mxu1 %v88_v21  ;;  %455 = vmatpush3.msra.mxu0 %v40_v22  ;;  %v84_v37 = vld [vmem:[%s945_s1 + $0x1b0] sm:$0xff]  ;;  %v83_v41 = vld [vmem:[%s945_s1 + $0x1a8] sm:$0xff]  ;;  %v82_v45 = vld [vmem:[%s945_s1 + $0x1a0] sm:$0xff] }
   0xf   :  { %490 = vmatpush3.msra.mxu1 %v72_v23  ;;  %456 = vmatprep.subr.mxu0 %v55_v24  ;;  %v36_v38 = vld [vmem:[%s945_s1 + $0x30] sm:$0xff]  ;;  %v35_v42 = vld [vmem:[%s945_s1 + $0x28] sm:$0xff]  ;;  %v34_v46 = vld [vmem:[%s945_s1 + $0x20] sm:$0xff] }
  0x10   :  { %491 = vmatprep.subr.mxu1 %v87_v25  ;;  %457 = vmatpush3.msra.mxu0 %v39_v26  ;;  %v68_v39 = vld [vmem:[%s945_s1 + $0x130] sm:$0xff]  ;;  %v67_v43 = vld [vmem:[%s945_s1 + $0x128] sm:$0xff]  ;;  %v66_v47 = vld [vmem:[%s945_s1 + $0x120] sm:$0xff] }
  0x11   :  { %492 = vmatpush3.msra.mxu1 %v71_v27  ;;  %458 = vmatprep.subr.mxu0 %v54_v28  ;;  %v49_v48 = vld [vmem:[%s945_s1 + $0x98] sm:$0xff]  ;;  %v48_v52 = vld [vmem:[%s945_s1 + $0x90] sm:$0xff]  ;;  %v47_v56 = vld [vmem:[%s945_s1 + $0x88] sm:$0xff] }
  0x12   :  { %493 = vmatprep.subr.mxu1 %v86_v29  ;;  %459 = vmatpush3.msra.mxu0 %v38_v30  ;;  %v81_v49 = vld [vmem:[%s945_s1 + $0x198] sm:$0xff]  ;;  %v80_v53 = vld [vmem:[%s945_s1 + $0x190] sm:$0xff]  ;;  %v79_v57 = vld [vmem:[%s945_s1 + $0x188] sm:$0xff] }
  0x13   :  { %494 = vmatpush3.msra.mxu1 %v70_v31  ;;  %460 = vmatprep.subr.mxu0 %v53_v32  ;;  %v33_v50 = vld [vmem:[%s945_s1 + $0x18] sm:$0xff]  ;;  %v32_v54 = vld [vmem:[%s945_s1 + $0x10] sm:$0xff]  ;;  %v31_v58 = vld [vmem:[%s945_s1 + $0x8] sm:$0xff] }
  0x14   :  { %495 = vmatprep.subr.mxu1 %v85_v33  ;;  %461 = vmatpush3.msra.mxu0 %v37_v34  ;;  %v65_v51 = vld [vmem:[%s945_s1 + $0x118] sm:$0xff]  ;;  %v64_v55 = vld [vmem:[%s945_s1 + $0x110] sm:$0xff]  ;;  %v63_v59 = vld [vmem:[%s945_s1 + $0x108] sm:$0xff] }
  0x15   :  { %496 = vmatpush3.msra.mxu1 %v69_v35  ;;  %462 = vmatprep.subr.mxu0 %v52_v36  ;;  %v46_v60 = vld [vmem:[%s945_s1 + $0x80] sm:$0xff]  ;;  %v27_v63 = vld [vmem:[%s946_s0 + $0x8] sm:$0xff]  ;;  %v29_v1 = vld [vmem:[%s946_s0 + $0x18] sm:$0xff] }
  0x16   :  { %497 = vmatprep.subr.mxu1 %v84_v37  ;;  %463 = vmatpush3.msra.mxu0 %v36_v38  ;;  %v78_v61 = vld [vmem:[%s945_s1 + $0x180] sm:$0xff]  ;;  %v28_v3 = vld [vmem:[%s946_s0 + $0x10] sm:$0xff]  ;;  %v255_v6 = vld [vmem:[%s947_s3 + $0x68] sm:$0xff] }
  0x17   :  { %498 = vmatpush3.msra.mxu1 %v68_v39  ;;  %464 = vmatprep.subr.mxu0 %v51_v40  ;;  %v30_v62 = vld [vmem:[%s945_s1] sm:$0xff]  ;;  %v256_v4 = vld [vmem:[%s947_s3 + $0x70] sm:$0xff]  ;;  %v253_v8 = vld [vmem:[%s947_s3 + $0x58] sm:$0xff] }
  0x18   :  { %499 = vmatprep.subr.mxu1 %v83_v41  ;;  %465 = vmatpush3.msra.mxu0 %v35_v42  ;;  %v62_v0 = vld [vmem:[%s945_s1 + $0x100] sm:$0xff]  ;;  %v252_v9 = vld [vmem:[%s947_s3 + $0x50] sm:$0xff]  ;;  %v251_v10 = vld [vmem:[%s947_s3 + $0x48] sm:$0xff] }
  0x19   :  { %500 = vmatpush3.msra.mxu1 %v67_v43  ;;  %466 = vmatprep.subr.mxu0 %v50_v44  ;;  %v26_v2 = vld [vmem:[%s946_s0] sm:$0xff]  ;;  %v249_v12 = vld [vmem:[%s947_s3 + $0x38] sm:$0xff]  ;;  %v248_v13 = vld [vmem:[%s947_s3 + $0x30] sm:$0xff] }
  0x1a   :  { %501 = vmatprep.subr.mxu1 %v82_v45  ;;  %467 = vmatpush3.msra.mxu0 %v34_v46  ;;  %v254_v7 = vld [vmem:[%s947_s3 + $0x60] sm:$0xff]  ;;  %v247_v14 = vld [vmem:[%s947_s3 + $0x28] sm:$0xff]  ;;  %v245_v16 = vld [vmem:[%s947_s3 + $0x18] sm:$0xff] }
  0x1b   :  { %502 = vmatpush3.msra.mxu1 %v66_v47  ;;  %468 = vmatprep.subr.mxu0 %v49_v48  ;;  %v250_v11 = vld [vmem:[%s947_s3 + $0x40] sm:$0xff]  ;;  %v244_v17 = vld [vmem:[%s947_s3 + $0x10] sm:$0xff]  ;;  %v243_v18 = vld [vmem:[%s947_s3 + $0x8] sm:$0xff] }
  0x1c   :  { %503 = vmatprep.subr.mxu1 %v81_v49  ;;  %469 = vmatpush3.msra.mxu0 %v33_v50  ;;  %v246_v15 = vld [vmem:[%s947_s3 + $0x20] sm:$0xff]  ;;  %v346_v20 = vld [vmem:[%s948_s5 + $0x38] sm:$0xf]  ;;  %v345_v21 = vld [vmem:[%s948_s5 + $0x30] sm:$0xff] }
  0x1d   :  { %504 = vmatpush3.msra.mxu1 %v65_v51  ;;  %470 = vmatprep.subr.mxu0 %v48_v52  ;;  %v242_v19 = vld [vmem:[%s947_s3] sm:$0xff]  ;;  %v344_v22 = vld [vmem:[%s948_s5 + $0x28] sm:$0xff]  ;;  %v342_v24 = vld [vmem:[%s948_s5 + $0x18] sm:$0xff] }
  0x1e   :  { %505 = vmatprep.subr.mxu1 %v80_v53  ;;  %471 = vmatpush3.msra.mxu0 %v32_v54  ;;  %v343_v23 = vld [vmem:[%s948_s5 + $0x20] sm:$0xff]  ;;  %v341_v35 = vld [vmem:[%s948_s5 + $0x10] sm:$0xff]  ;;  %v340_v36 = vld [vmem:[%s948_s5 + $0x8] sm:$0xff] }
  0x1f   :  { %506 = vmatpush3.msra.mxu1 %v64_v55  ;;  %472 = vmatprep.subr.mxu0 %v47_v56  ;;  %v438_v27 = vld [vmem:[%s949_s2] ss:$0 sm:$0xff] }
  0x20   :  { %507 = vmatprep.subr.mxu1 %v79_v57  ;;  %473 = vmatpush3.msra.mxu0 %v31_v58  ;;  %v339_v37 = vld [vmem:[%s948_s5] sm:$0xff] }
  0x21   :  { %508 = vmatpush3.msra.mxu1 %v63_v59  ;;  %474 = vmatprep.subr.mxu0 %v46_v60  ;;  %v439_v38 = vld [vmem:[%s950_s4] ss:$0 sm:$0xff] }
  0x22   :  { %509 = vmatprep.subr.mxu1 %v78_v61  ;;  %475 = vmatpush3.msra.mxu0 %v30_v62  ;;  %v441_v43 = vld [vmem:[%s951_s6] ss:$0 sm:$0xff] }
  0x23   :  { %165 = vmatprep.mubr.f32.mxu0 %v27_v63  ;;  %510 = vmatpush3.msra.mxu1 %v62_v0 }
  0x24   :  { %235 = vmatprep.mubr.f32.mxu1 %v29_v1  ;;  %166 = vmatmul.mubr.f32.vlgmr.msra.gmra.mxu0 %v26_v2 }
  0x25   :  { %236 = vmatmul.mubr.f32.vlgmr.msra.gmra.mxu1 %v28_v3  ;;  %539 = vmatprep.subr.mxu0 %v593_v5 }
  0x26   :  { %572 = vmatprep.subr.mxu1 %v593_v5  ;;  %540 = vmatpush3.msra.mxu0 %v256_v4 }
  0x27   :  { %541 = vmatprep.subr.mxu0 %v593_v5  ;;  %569 = vmatprep.mubr.msk.f32.mxu0 %vm594_vm0, %v593_v5 }
  0x28   :  { %542 = vmatpush3.msra.mxu0 %v255_v6  ;;  %588 = vmatprep.mubr.msk.f32.mxu1 %vm594_vm0, %v593_v5 }
  0x29   :  { %543 = vmatprep.subr.mxu0 %v593_v5  ;;  %573 = vmatpush3.msk.msra.mxu1 %vm358_vm1, %v346_v20 }
  0x2a   :  { %544 = vmatpush3.msra.mxu0 %v254_v7  ;;  %574 = vmatprep.subr.mxu1 %v593_v5 }
  0x2b   :  { %545 = vmatprep.subr.mxu0 %v593_v5  ;;  %575 = vmatpush3.msra.mxu1 %v345_v21 }
  0x2c   :  { %546 = vmatpush3.msra.mxu0 %v253_v8  ;;  %576 = vmatprep.subr.mxu1 %v593_v5 }
  0x2d   :  { %547 = vmatprep.subr.mxu0 %v593_v5  ;;  %577 = vmatpush3.msra.mxu1 %v344_v22 }
  0x2e   :  { %548 = vmatpush3.msra.mxu0 %v252_v9  ;;  %578 = vmatprep.subr.mxu1 %v593_v5 }
  0x2f   :  { %549 = vmatprep.subr.mxu0 %v593_v5  ;;  %579 = vmatpush3.msra.mxu1 %v343_v23 }
  0x30   :  { %550 = vmatpush3.msra.mxu0 %v251_v10  ;;  %580 = vmatprep.subr.mxu1 %v593_v5 }
  0x31   :  { %551 = vmatprep.subr.mxu0 %v593_v5  ;;  %581 = vmatpush3.msra.mxu1 %v342_v24 }
  0x32   :  { %552 = vmatpush3.msra.mxu0 %v250_v11  ;;  %582 = vmatprep.subr.mxu1 %v593_v5 }
  0x33   :  { %553 = vmatprep.subr.mxu0 %v593_v5  ;;  %583 = vmatpush3.msra.mxu1 %v341_v35 }
  0x34   :  { %554 = vmatpush3.msra.mxu0 %v249_v12  ;;  %584 = vmatprep.subr.mxu1 %v593_v5 }
  0x35   :  { %555 = vmatprep.subr.mxu0 %v593_v5  ;;  %585 = vmatpush3.msra.mxu1 %v340_v36 }
  0x36   :  { %556 = vmatpush3.msra.mxu0 %v248_v13  ;;  %586 = vmatprep.subr.mxu1 %v593_v5 }
  0x37   :  { %557 = vmatprep.subr.mxu0 %v593_v5  ;;  %587 = vmatpush3.msra.mxu1 %v339_v37 }
  0x38   :  { %558 = vmatpush3.msra.mxu0 %v247_v14 }
  0x39   :  { %559 = vmatprep.subr.mxu0 %v593_v5 }
  0x3a   :  { %560 = vmatpush3.msra.mxu0 %v246_v15 }
  0x3b   :  { %561 = vmatprep.subr.mxu0 %v593_v5 }
  0x3c   :  { %562 = vmatpush3.msra.mxu0 %v245_v16 }
  0x3d   :  { %563 = vmatprep.subr.mxu0 %v593_v5 }
  0x3e   :  { %564 = vmatpush3.msra.mxu0 %v244_v17 }
  0x3f   :  { %565 = vmatprep.subr.mxu0 %v593_v5 }
  0x40   :  { %566 = vmatpush3.msra.mxu0 %v243_v18 }
  0x41   :  { %567 = vmatprep.subr.mxu0 %v593_v5 }
  0x42   :  { %568 = vmatpush3.msra.mxu0 %v242_v19 }
  0xe4   :  { %v476_v25 = vpop.f32.mrf.mxu0 }
  0xe5   :  { %v511_v26 = vpop.f32.mrf.mxu1 }
  0xe6   :  { %v477_v28 = vpop.f32.mrf.mxu0 }
  0xe7   :  { %v512_v29 = vpop.f32.mrf.mxu1  ;;  %v478_v30 = vadd.f32 %v477_v28, %v476_v25 }
  0xe8   :  { %v513_v32 = vadd.f32 %v512_v29, %v511_v26 }
  0xe9   :  { %v168_v31 = vadd.f32 %v478_v30, %v438_v27 }
  0xeb   :  { %v238_v33 = vadd.f32 %v513_v32, %v168_v31 }
  0xed   :  { %v241_v34 = vmax.f32 %v238_v33, 0.0 }
  0xef   :  { %570 = vmatmul.mubr.msk.f32.vlgmr.msra.gmra.mxu0 %vm264_vm2, %v241_v34 }
 0x1af   :  { %v334_v39 = vpop.f32.mrf.mxu0 }
 0x1b0   :  { %v335_v40 = vadd.f32 %v439_v38, %v334_v39 }
 0x1b1   :  { %v571_v41 = vpop.f32.mrf.mxu0 }
 0x1b2   :  { %v338_v42 = vmax.f32 %v335_v40, 0.0 }
 0x1b4   :  { %589 = vmatmul.mubr.msk.f32.vlgmr.msra.gmra.mxu1 %vm354_vm3, %v338_v42 }
 0x274   :  { %v428_v44 = vpop.f32.mrf.mxu1 }
 0x275   :  { %v429_v45 = vadd.f32 %v441_v43, %v428_v44 }
 0x276   :  { %v590_v46 = vpop.f32.mrf.mxu1 }
 0x277   :  { %433 = vst.msk [vmem:[%s952_s7] sm:$0xff] %vm432_vm4, %v429_v45 }

// kernel: convnet_forward.2
= control target key start
LH: loop header
LB: loop body
LE: loop exit
PB: predicated region body
PF: predicated region fallthrough
CT: control target
= control target key end

     0   :  { %s16961_s21 = smov 0   ;;  %s19842_s0 = inlined_call_operand.vmem [shape: f32[8,3,1024], index: 0, kind: input, shape index: {}]   ;;  %s19843_s1 = inlined_call_operand.vmem [shape: f32[25,6,3], index: 1, kind: input, shape index: {}]   ;;  %s19844_s2 = inlined_call_operand.vmem [shape: f32[6,1], index: 2, kind: input, shape index: {}]   ;;  %s19845_s3 = inlined_call_operand.vmem [shape: f32[25,16,6], index: 3, kind: input, shape index: {}]   ;;  %s19846_s4 = inlined_call_operand.vmem [shape: f32[16,1], index: 4, kind: input, shape index: {}]   ;;  %s19847_s5 = inlined_call_operand.vmem [shape: f32[529,32], index: 5, kind: input, shape index: {}]   ;;  %s19848_s6 = inlined_call_operand.vmem [shape: f32[8,16,32], index: 6, kind: output, shape index: {}]  }
   0x1 LB: > { %s16263_s22 = sshll.u32 %s16898_s21, 5  ;;  %v19849_v0 = vmov 0.0   ;;  %s16901_s26 = smov 127   ;;  %vm60_vm0 = vcmask 1039360   ;;  %vm71_vm1 = vcmask 1042432   ;;  %vm67_vm2 = vcmask 23552   ;;  %s16898_s21 = sphi %s16961_s21, %s28_s21  }
   0x2   : > { %s16970_s25 = scalar_lea.vmem %s19842_s0, %s16263_s22  ;;  %150 = vmatprep.mubr.f32.mxu0 %v19849_v0  ;;  %221 = vmatprep.mubr.f32.mxu1 %v19849_v0  ;;  %s16902_s27 = smov 126   ;;  %vm16910_vm3 = vmmov 0   ;;  %vm696_vm4 = vcmask 1031168   ;;  %vm1037_vm5 = vcmask 1022976   ;;  %vm1378_vm6 = vcmask 1014784  }
   0x3   : > { %v16975_v1 = vld [vmem:[%s16970_s25 + $0x8] sm:$0x77]  ;;  %v16978_v2 = vld [vmem:[%s16970_s25] sm:$0x77]  ;;  %v16993_v5 = vld [vmem:[%s16970_s25 + $0x10] sm:$0x77] }
   0x4   : > { %50 = vrot.lane.b32.xlu0 %v16975_v1, %s16901_s26  ;;  %46 = vrot.lane.b32.xlu1 %v16978_v2, %s16901_s26  ;;  %v16986_v3 = vcombine.high %v16975_v1, %v16975_v1  ;;  %v16990_v4 = vcombine.high %v16978_v2, %v16978_v2  ;;  %v17001_v6 = vcombine.high %v16993_v5, %v16993_v5  ;;  %v671_v7 = vld [vmem:[%s16970_s25] sm:$0x77]  ;;  %v17009_v9 = vld [vmem:[%s16970_s25 + $0x18] sm:$0x7]  ;;  %s16903_s28 = smov 125   ;;  %s16904_s29 = smov 124  }
   0x5   : > { %v679_v8 = vcombine.high %v671_v7, %v671_v7  ;;  %v672_v10 = vld [vmem:[%s16970_s25 + $0x8] sm:$0x77]  ;;  %v673_v12 = vld [vmem:[%s16970_s25 + $0x10] sm:$0x77]  ;;  %v674_v14 = vld [vmem:[%s16970_s25 + $0x18] sm:$0x7] }
   0x6   : > { %v680_v11 = vcombine.high %v672_v10, %v672_v10  ;;  %v681_v13 = vcombine.high %v673_v12, %v673_v12  ;;  %v1012_v15 = vld [vmem:[%s16970_s25] sm:$0x77]  ;;  %v1013_v17 = vld [vmem:[%s16970_s25 + $0x8] sm:$0x77]  ;;  %v1014_v19 = vld [vmem:[%s16970_s25 + $0x10] sm:$0x77] }
   0x7   : > { %v1020_v16 = vcombine.high %v1012_v15, %v1012_v15  ;;  %v1021_v18 = vcombine.high %v1013_v17, %v1013_v17  ;;  %v1022_v20 = vcombine.high %v1014_v19, %v1014_v19  ;;  %v1353_v21 = vld [vmem:[%s16970_s25] sm:$0x77]  ;;  %v1015_v23 = vld [vmem:[%s16970_s25 + $0x18] sm:$0x7]  ;;  %v1354_v24 = vld [vmem:[%s16970_s25 + $0x8] sm:$0x77] }
   0x8   : > { %52 = vrot.lane.b32.xlu1 %v16986_v3, %s16901_s26  ;;  %48 = vrot.lane.b32.xlu0 %v16990_v4, %s16901_s26  ;;  %v1361_v22 = vcombine.high %v1353_v21, %v1353_v21  ;;  %v1362_v25 = vcombine.high %v1354_v24, %v1354_v24  ;;  %v1355_v26 = vld [vmem:[%s16970_s25 + $0x10] sm:$0x77]  ;;  %v1356_v28 = vld [vmem:[%s16970_s25 + $0x18] sm:$0x7]  ;;  %s16905_s30 = smov 96   ;;  %s16906_s7 = smov 95  }
   0x9   : > { %v1363_v27 = vcombine.high %v1355_v26, %v1355_v26  ;;  %v1694_v29 = vld [vmem:[%s16970_s25] sm:$0x77]  ;;  %v1695_v31 = vld [vmem:[%s16970_s25 + $0x8] sm:$0x77]  ;;  %v1696_v33 = vld [vmem:[%s16970_s25 + $0x10] sm:$0x77] }
   0xa   : > { %v1702_v30 = vcombine.high %v1694_v29, %v1694_v29  ;;  %v1703_v32 = vcombine.high %v1695_v31, %v1695_v31  ;;  %v1704_v34 = vcombine.high %v1696_v33, %v1696_v33  ;;  %v1697_v35 = vld [vmem:[%s16970_s25 + $0x18] sm:$0x77]  ;;  %v2039_v37 = vld [vmem:[%s16970_s25] sm:$0x77]  ;;  %v2040_v39 = vld [vmem:[%s16970_s25 + $0x8] sm:$0x77] }
   0xb   : > { %v1705_v36 = vcombine.high %v1697_v35, %v1697_v35  ;;  %v2047_v38 = vcombine.high %v2039_v37, %v2039_v37  ;;  %v2048_v40 = vcombine.high %v2040_v39, %v2040_v39  ;;  %v2041_v41 = vld [vmem:[%s16970_s25 + $0x10] sm:$0x77]  ;;  %v2042_v43 = vld [vmem:[%s16970_s25 + $0x18] sm:$0x77]  ;;  %v2384_v45 = vld [vmem:[%s16970_s25] sm:$0x77] }
   0xc   : > { %56 = vrot.lane.b32.xlu1 %v17001_v6, %s16901_s26  ;;  %54 = vrot.lane.b32.xlu0 %v16993_v5, %s16901_s26  ;;  %v2049_v42 = vcombine.high %v2041_v41, %v2041_v41  ;;  %v2050_v44 = vcombine.high %v2042_v43, %v2042_v43  ;;  %v2392_v46 = vcombine.high %v2384_v45, %v2384_v45  ;;  %v2385_v47 = vld [vmem:[%s16970_s25 + $0x8] sm:$0x77]  ;;  %s16907_s8 = smov 94   ;;  %v2386_v49 = vld [vmem:[%s16970_s25 + $0x10] sm:$0x77]  ;;  %s16908_s9 = smov 93  }
   0xd   : > { %v2393_v48 = vcombine.high %v2385_v47, %v2385_v47  ;;  %v2394_v50 = vcombine.high %v2386_v49, %v2386_v49  ;;  %v2387_v51 = vld [vmem:[%s16970_s25 + $0x18] sm:$0x77]  ;;  %v2729_v53 = vld [vmem:[%s16970_s25] sm:$0x77]  ;;  %v2730_v55 = vld [vmem:[%s16970_s25 + $0x8] sm:$0x77] }
   0xe   : > { %v2395_v52 = vcombine.high %v2387_v51, %v2387_v51  ;;  %v2737_v54 = vcombine.high %v2729_v53, %v2729_v53  ;;  %v2738_v56 = vcombine.high %v2730_v55, %v2730_v55  ;;  %v2731_v57 = vld [vmem:[%s16970_s25 + $0x10] sm:$0x77]  ;;  %v2732_v59 = vld [vmem:[%s16970_s25 + $0x18] sm:$0x77]  ;;  %v3074_v61 = vld [vmem:[%s16970_s25] sm:$0x77] }
   0xf   : > { %v2739_v58 = vcombine.high %v2731_v57, %v2731_v57  ;;  %v2740_v60 = vcombine.high %v2732_v59, %v2732_v59  ;;  %s16909_s10 = smov 92   ;;  %s16911_s15 = smov 64   ;;  %vm1722_vm7 = vcmask 785408   ;;  %vm2067_vm8 = vcmask 777216  }
  0x10   : > { %684 = vrot.lane.b32.xlu1 %v679_v8, %s16902_s27  ;;  %58 = vrot.lane.b32.xlu0 %v17009_v9, %s16901_s26  ;;  %v3075_v8 = vld [vmem:[%s16970_s25 + $0x8] sm:$0x77]  ;;  %s16912_s20 = smov 63   ;;  %s16913_s24 = smov 62   ;;  %vm2412_vm9 = vcmask 769024   ;;  %vm2757_vm10 = vcmask 760832  }
  0x11   : > { %s16915_s12 = smov 60   ;;  %s16916_s16 = smov 32   ;;  %vm3102_vm11 = vcmask 752640   ;;  %vm3447_vm12 = vcmask 523264   ;;  %vm3792_vm13 = vcmask 515072   ;;  %vm4137_vm14 = vcmask 506880  }
  0x12   : > { %s16917_s19 = smov 31   ;;  %s16918_s23 = smov 30   ;;  %vm4482_vm15 = vcmask 498688  }
  0x13   : > { %s16920_s13 = smov 28   ;;  %s16924_s18 = smov 58  }
  0x14   : > { %682 = vrot.lane.b32.xlu1 %v671_v7, %s16902_s27  ;;  %686 = vrot.lane.b32.xlu0 %v672_v10, %s16902_s27  ;;  %v3082_v7 = vcombine.high %v3074_v61, %v3074_v61 }
  0x18   : > { %690 = vrot.lane.b32.xlu1 %v673_v12, %s16902_s27  ;;  %688 = vrot.lane.b32.xlu0 %v680_v11, %s16902_s27 }
  0x1c   : > { %694 = vrot.lane.b32.xlu1 %v674_v14, %s16902_s27  ;;  %692 = vrot.lane.b32.xlu0 %v681_v13, %s16902_s27  ;;  %v3083_v14 = vcombine.high %v3075_v8, %v3075_v8 }
  0x20   : > { %1027 = vrot.lane.b32.xlu1 %v1013_v17, %s16903_s28  ;;  %1025 = vrot.lane.b32.xlu0 %v1020_v16, %s16903_s28  ;;  %v3076_v16 = vld [vmem:[%s16970_s25 + $0x10] sm:$0x77] }
  0x24   : > { %1029 = vrot.lane.b32.xlu1 %v1021_v18, %s16903_s28  ;;  %1023 = vrot.lane.b32.xlu0 %v1012_v15, %s16903_s28  ;;  %v15637_v15 = vld [vmem:[%s19843_s1 + $0x8] sm:$0x3f] }
  0x28   : > { %1033 = vrot.lane.b32.xlu1 %v1022_v20, %s16903_s28  ;;  %1031 = vrot.lane.b32.xlu0 %v1014_v19, %s16903_s28  ;;  %v3084_v20 = vcombine.high %v3076_v16, %v3076_v16 }
  0x2c   : > { %1366 = vrot.lane.b32.xlu1 %v1361_v22, %s16904_s29  ;;  %1035 = vrot.lane.b32.xlu0 %v1015_v23, %s16903_s28  ;;  %v3077_v22 = vld [vmem:[%s16970_s25 + $0x18] sm:$0x77] }
  0x30   : > { %1364 = vrot.lane.b32.xlu1 %v1353_v21, %s16904_s29  ;;  %1368 = vrot.lane.b32.xlu0 %v1354_v24, %s16904_s29 }
  0x34   : > { %1372 = vrot.lane.b32.xlu1 %v1355_v26, %s16904_s29  ;;  %1370 = vrot.lane.b32.xlu0 %v1362_v25, %s16904_s29  ;;  %v3085_v26 = vcombine.high %v3077_v22, %v3077_v22 }
  0x38   : > { %1376 = vrot.lane.b32.xlu1 %v1356_v28, %s16904_s29  ;;  %1374 = vrot.lane.b32.xlu0 %v1363_v27, %s16904_s29 }
  0x3c   : > { %1710 = vrot.lane.b32.xlu1 %v1695_v31, %s16905_s30  ;;  %1708 = vrot.lane.b32.xlu0 %v1702_v30, %s16905_s30  ;;  %v29_v30 = vld [vmem:[%s19843_s1] sm:$0x3f] }
  0x3d   : > { %v3419_v31 = vld [vmem:[%s16970_s25] sm:$0x77] }
  0x40   : > { %1712 = vrot.lane.b32.xlu1 %v1703_v32, %s16905_s30  ;;  %1706 = vrot.lane.b32.xlu0 %v1694_v29, %s16905_s30 }
  0x44   : > { %1716 = vrot.lane.b32.xlu1 %v1704_v34, %s16905_s30  ;;  %1714 = vrot.lane.b32.xlu0 %v1696_v33, %s16905_s30  ;;  %v3427_v33 = vcombine.high %v3419_v31, %v3419_v31 }
  0x48   : > { %1720 = vrot.lane.b32.xlu1 %v1705_v36, %s16905_s30  ;;  %1718 = vrot.lane.b32.xlu0 %v1697_v35, %s16905_s30 }
  0x4c   : > { %2055 = vrot.lane.b32.xlu1 %v2040_v39, %s16906_s7  ;;  %2053 = vrot.lane.b32.xlu0 %v2047_v38, %s16906_s7  ;;  %v3421_v39 = vld [vmem:[%s16970_s25 + $0x10] sm:$0x77] }
  0x50   : > { %2057 = vrot.lane.b32.xlu1 %v2048_v40, %s16906_s7  ;;  %2051 = vrot.lane.b32.xlu0 %v2039_v37, %s16906_s7  ;;  %v15660_v40 = vld [vmem:[%s19843_s1 + $0x10] sm:$0x3f] }
  0x54   : > { %2061 = vrot.lane.b32.xlu1 %v2049_v42, %s16906_s7  ;;  %2059 = vrot.lane.b32.xlu0 %v2041_v41, %s16906_s7  ;;  %v3429_v41 = vcombine.high %v3421_v39, %v3421_v39 }
  0x58   : > { %2065 = vrot.lane.b32.xlu1 %v2050_v44, %s16906_s7  ;;  %2063 = vrot.lane.b32.xlu0 %v2042_v43, %s16906_s7  ;;  %v3422_v44 = vld [vmem:[%s16970_s25 + $0x18] sm:$0x77]  ;;  %s16925_s7 = smov 56  }
  0x5c   : > { %2400 = vrot.lane.b32.xlu1 %v2385_v47, %s16907_s8  ;;  %2398 = vrot.lane.b32.xlu0 %v2392_v46, %s16907_s8 }
  0x60   : > { %2402 = vrot.lane.b32.xlu1 %v2393_v48, %s16907_s8  ;;  %2396 = vrot.lane.b32.xlu0 %v2384_v45, %s16907_s8  ;;  %v3430_v48 = vcombine.high %v3422_v44, %v3422_v44 }
  0x64   : > { %2406 = vrot.lane.b32.xlu1 %v2394_v50, %s16907_s8  ;;  %2404 = vrot.lane.b32.xlu0 %v2386_v49, %s16907_s8 }
  0x68   : > { %2410 = vrot.lane.b32.xlu1 %v2395_v52, %s16907_s8  ;;  %2408 = vrot.lane.b32.xlu0 %v2387_v51, %s16907_s8  ;;  %v3764_v51 = vld [vmem:[%s16970_s25] sm:$0x77] }
  0x6c   : > { %2745 = vrot.lane.b32.xlu1 %v2730_v55, %s16908_s9  ;;  %2743 = vrot.lane.b32.xlu0 %v2737_v54, %s16908_s9  ;;  %v15672_v54 = vld [vmem:[%s19843_s1 + $0x18] sm:$0x3f] }
  0x70   : > { %2747 = vrot.lane.b32.xlu1 %v2738_v56, %s16908_s9  ;;  %2741 = vrot.lane.b32.xlu0 %v2729_v53, %s16908_s9  ;;  %v3772_v53 = vcombine.high %v3764_v51, %v3764_v51  ;;  %v3765_v56 = vld [vmem:[%s16970_s25 + $0x8] sm:$0x77] }
  0x74   : > { %2751 = vrot.lane.b32.xlu1 %v2739_v58, %s16908_s9  ;;  %2749 = vrot.lane.b32.xlu0 %v2731_v57, %s16908_s9 }
  0x76   : > { %v51_v62 = vpop.permute.xlu0 %50  ;;  %v47_v63 = vpop.permute.xlu1 %46 }
  0x78   : > { %2755 = vrot.lane.b32.xlu1 %v2740_v60, %s16908_s9  ;;  %2753 = vrot.lane.b32.xlu0 %v2732_v59, %s16908_s9  ;;  %v3773_v60 = vcombine.high %v3765_v56, %v3765_v56  ;;  %s16914_s9 = smov 61  }
  0x7a   : > { %v53_v10 = vpop.permute.xlu1 %52  ;;  %v49_v11 = vpop.permute.xlu0 %48 }
  0x7b   : > { %v62_v12 = vsel %vm60_vm0, %v49_v11, %v51_v62  ;;  %v61_v13 = vsel %vm60_vm0, %v47_v63, %v49_v11  ;;  %v63_v21 = vsel %vm60_vm0, %v51_v62, %v53_v10  ;;  %v3766_v63 = vld [vmem:[%s16970_s25 + $0x10] sm:$0x77] }
  0x7c   : > { %3090 = vrot.lane.b32.xlu1 %v3075_v8, %s16909_s10  ;;  %3088 = vrot.lane.b32.xlu0 %v3082_v7, %s16909_s10  ;;  %v3774_v11 = vcombine.high %v3766_v63, %v3766_v63 }
  0x7d   : > { %15638 = vmatprep.subr.msk.mxu0 %vm71_vm1, %v62_v12 }
  0x7e   : > { %15639 = vmatpush1.msk.msra.mxu0 %vm71_vm1, %v61_v13  ;;  %v57_v17 = vpop.permute.xlu1 %56  ;;  %v55_v18 = vpop.permute.xlu0 %54 }
  0x7f   : > { %v64_v19 = vsel %vm60_vm0, %v53_v10, %v55_v18  ;;  %15640 = vmatmul.mubr.msk.f32.vlgmr.msra.gmra.mxu0 %vm67_vm2, %v15637_v15  ;;  %v65_v27 = vsel %vm60_vm0, %v55_v18, %v57_v17 }
  0x80   : > { %3092 = vrot.lane.b32.xlu1 %v3083_v14, %s16909_s10  ;;  %3086 = vrot.lane.b32.xlu0 %v3074_v61, %s16909_s10  ;;  %v3767_v14 = vld [vmem:[%s16970_s25 + $0x18] sm:$0x77] }
  0x81   : > { %15641 = vmatprep.subr.msk.mxu1 %vm71_vm1, %v64_v19  ;;  %292 = vmatprep.mubr.f32.mxu0 %v19849_v0  ;;  %v3775_v18 = vcombine.high %v3767_v14, %v3767_v14 }
  0x82   : > { %15642 = vmatpush1.msk.msra.mxu1 %vm71_vm1, %v63_v21  ;;  %v685_v23 = vpop.permute.xlu1 %684  ;;  %v59_v24 = vpop.permute.xlu0 %58  ;;  %v4109_v21 = vld [vmem:[%s16970_s25] sm:$0x77] }
  0x83   : > { %15643 = vmatmul.mubr.msk.f32.vlgmr.msra.gmra.mxu1 %vm67_vm2, %v15637_v15  ;;  %16470 = vmatprep.subr.mxu1 %v19849_v0  ;;  %v66_v25 = vsel %vm60_vm0, %v57_v17, %v59_v24  ;;  %v15684_v17 = vld [vmem:[%s19843_s1 + $0x20] sm:$0x3f] }
  0x84   : > { %16471 = vmatpush3.msk.msra.mxu1 %vm71_vm1, %v59_v24  ;;  %3096 = vrot.lane.b32.xlu1 %v3084_v20, %s16909_s10  ;;  %v4117_v24 = vcombine.high %v4109_v21, %v4109_v21 }
  0x85   : > { %3094 = vrot.lane.b32.xlu0 %v3076_v16, %s16909_s10  ;;  %15644 = vmatprep.subr.msk.mxu0 %vm71_vm1, %v66_v25  ;;  %v4110_v25 = vld [vmem:[%s16970_s25 + $0x8] sm:$0x77] }
  0x86   : > { %15645 = vmatpush1.msk.msra.mxu0 %vm71_vm1, %v65_v27  ;;  %16472 = vmatprep.mubr.msk.f32.mxu1 %vm16910_vm3, %v19849_v0  ;;  %v683_v28 = vpop.permute.xlu1 %682  ;;  %v687_v29 = vpop.permute.xlu0 %686 }
  0x87   : > { %15646 = vmatmul.mubr.msk.f32.vlgmr.msra.gmra.mxu0 %vm67_vm2, %v15637_v15  ;;  %16473 = vmatmul.mubr.msk.f32.vlgmr.msra.gmra.mxu1 %vm67_vm2, %v15637_v15 }
  0x88   : > { %15649 = vmatprep.subr.msk.mxu0 %vm71_vm1, %v16990_v4  ;;  %3100 = vrot.lane.b32.xlu1 %v3085_v26, %s16909_s10 }
  0x89   : > { %3098 = vrot.lane.b32.xlu0 %v3077_v22, %s16909_s10  ;;  %15650 = vmatpush1.msk.msra.mxu0 %vm71_vm1, %v16978_v2  ;;  %v3420_v2 = vld [vmem:[%s16970_s25 + $0x8] sm:$0x77] }
  0x8a   : > { %15652 = vmatprep.subr.msk.mxu1 %vm71_vm1, %v16986_v3  ;;  %450 = vmatprep.mubr.f32.mxu0 %v19849_v0  ;;  %v691_v32 = vpop.permute.xlu1 %690  ;;  %v689_v4 = vpop.permute.xlu0 %688  ;;  %v698_v3 = vsel %vm696_vm4, %v685_v23, %v687_v29 }
  0x8b   : > { %15653 = vmatpush1.msk.msra.mxu1 %vm71_vm1, %v16975_v1  ;;  %521 = vmatprep.mubr.f32.mxu1 %v19849_v0  ;;  %v700_v34 = vsel %vm696_vm4, %v689_v4, %v691_v32  ;;  %v699_v36 = vsel %vm696_vm4, %v687_v29, %v689_v4  ;;  %v4118_v29 = vcombine.high %v4110_v25, %v4110_v25 }
  0x8c   : > { %15655 = vmatprep.subr.msk.mxu0 %vm71_vm1, %v17001_v6  ;;  %15651 = vmatmul.mubr.msk.f32.vlgmr.msra.gmra.mxu0 %vm67_vm2, %v29_v30  ;;  %v3428_v6 = vcombine.high %v3420_v2, %v3420_v2 }
  0x8d   : > { %15654 = vmatmul.mubr.msk.f32.vlgmr.msra.gmra.mxu1 %vm67_vm2, %v29_v30  ;;  %15656 = vmatpush1.msk.msra.mxu0 %vm71_vm1, %v16993_v5  ;;  %v697_v5 = vsel %vm696_vm4, %v683_v28, %v685_v23 }
  0x8e   : > { %16475 = vmatprep.subr.mxu1 %v19849_v0  ;;  %15661 = vmatprep.subr.msk.mxu0 %vm71_vm1, %v698_v3  ;;  %v695_v1 = vpop.permute.xlu1 %694  ;;  %v693_v35 = vpop.permute.xlu0 %692 }
  0x8f   : > { %16476 = vmatpush3.msk.msra.mxu1 %vm71_vm1, %v17009_v9  ;;  %3435 = vrot.lane.b32.xlu1 %v3420_v2, %s16911_s15  ;;  %v702_v9 = vsel %vm696_vm4, %v693_v35, %v695_v1  ;;  %v701_v45 = vsel %vm696_vm4, %v691_v32, %v693_v35  ;;  %v4111_v32 = vld [vmem:[%s16970_s25 + $0x10] sm:$0x77]  ;;  %v15696_v2 = vld [vmem:[%s19843_s1 + $0x28] sm:$0x3f] }
  0x90   : > { %3433 = vrot.lane.b32.xlu0 %v3427_v33, %s16911_s15  ;;  %15664 = vmatprep.subr.msk.mxu1 %vm71_vm1, %v700_v34  ;;  %v4119_v33 = vcombine.high %v4111_v32, %v4111_v32 }
  0x91   : > { %592 = vmatprep.mubr.f32.mxu0 %v19849_v0  ;;  %16477 = vmatprep.mubr.msk.f32.mxu1 %vm16910_vm3, %v19849_v0 }
  0x92   : > { %15657 = vmatmul.mubr.msk.f32.vlgmr.msra.gmra.mxu0 %vm67_vm2, %v29_v30  ;;  %16478 = vmatmul.mubr.msk.f32.vlgmr.msra.gmra.mxu1 %vm67_vm2, %v29_v30  ;;  %v1028_v37 = vpop.permute.xlu1 %1027  ;;  %v1026_v38 = vpop.permute.xlu0 %1025 }
  0x93   : > { %15662 = vmatpush1.msk.msra.mxu0 %vm71_vm1, %v697_v5  ;;  %15665 = vmatpush1.msk.msra.mxu1 %vm71_vm1, %v699_v36  ;;  %v1039_v46 = vsel %vm1037_vm5, %v1026_v38, %v1028_v37 }
  0x94   : > { %3437 = vrot.lane.b32.xlu1 %v3428_v6, %s16911_s15  ;;  %3431 = vrot.lane.b32.xlu0 %v3419_v31, %s16911_s15 }
  0x95   : > { %15667 = vmatprep.subr.msk.mxu0 %vm71_vm1, %v702_v9  ;;  %784 = vmatprep.mubr.f32.mxu0 %v19849_v0 }
  0x96   : > { %855 = vmatprep.mubr.f32.mxu1 %v19849_v0  ;;  %16480 = vmatprep.subr.mxu1 %v19849_v0  ;;  %v1030_v42 = vpop.permute.xlu1 %1029  ;;  %v1024_v43 = vpop.permute.xlu0 %1023 }
  0x97   : > { %15663 = vmatmul.mubr.msk.f32.vlgmr.msra.gmra.mxu0 %vm67_vm2, %v15660_v40  ;;  %15666 = vmatmul.mubr.msk.f32.vlgmr.msra.gmra.mxu1 %vm67_vm2, %v15660_v40  ;;  %v1038_v47 = vsel %vm1037_vm5, %v1024_v43, %v1026_v38  ;;  %v1040_v55 = vsel %vm1037_vm5, %v1028_v37, %v1030_v42  ;;  %v4454_v37 = vld [vmem:[%s16970_s25] sm:$0x77] }
  0x98   : > { %15668 = vmatpush1.msk.msra.mxu0 %vm71_vm1, %v701_v45  ;;  %16481 = vmatpush3.msk.msra.mxu1 %vm71_vm1, %v695_v1  ;;  %v4112_v1 = vld [vmem:[%s16970_s25 + $0x18] sm:$0x77] }
  0x99   : > { %3441 = vrot.lane.b32.xlu1 %v3429_v41, %s16911_s15  ;;  %3439 = vrot.lane.b32.xlu0 %v3421_v39, %s16911_s15  ;;  %v4120_v5 = vcombine.high %v4112_v1, %v4112_v1  ;;  %v4462_v41 = vcombine.high %v4454_v37, %v4454_v37 }
  0x9a   : > { %15673 = vmatprep.subr.msk.mxu0 %vm71_vm1, %v1039_v46  ;;  %926 = vmatprep.mubr.f32.mxu0 %v19849_v0  ;;  %v1034_v49 = vpop.permute.xlu1 %1033  ;;  %v1032_v50 = vpop.permute.xlu0 %1031 }
  0x9b   : > { %15669 = vmatmul.mubr.msk.f32.vlgmr.msra.gmra.mxu0 %vm67_vm2, %v15660_v40  ;;  %16482 = vmatprep.mubr.msk.f32.mxu1 %vm16910_vm3, %v19849_v0  ;;  %v1041_v52 = vsel %vm1037_vm5, %v1030_v42, %v1032_v50  ;;  %v1042_v7 = vsel %vm1037_vm5, %v1032_v50, %v1034_v49  ;;  %v4455_v42 = vld [vmem:[%s16970_s25 + $0x8] sm:$0x77] }
  0x9c   : > { %15674 = vmatpush1.msk.msra.mxu0 %vm71_vm1, %v1038_v47  ;;  %16483 = vmatmul.mubr.msk.f32.vlgmr.msra.gmra.mxu1 %vm67_vm2, %v15660_v40  ;;  %v4463_v46 = vcombine.high %v4455_v42, %v4455_v42 }
  0x9d   : > { %3445 = vrot.lane.b32.xlu1 %v3430_v48, %s16911_s15  ;;  %3443 = vrot.lane.b32.xlu0 %v3422_v44, %s16911_s15 }
  0x9e   : > { %15676 = vmatprep.subr.msk.mxu1 %vm71_vm1, %v1041_v52  ;;  %v1367_v57 = vpop.permute.xlu1 %1366  ;;  %1196 = vmatprep.mubr.f32.mxu1 %v19849_v0  ;;  %v1036_v58 = vpop.permute.xlu0 %1035 }
  0x9f   : > { %15677 = vmatpush1.msk.msra.mxu1 %vm71_vm1, %v1040_v55  ;;  %1125 = vmatprep.mubr.f32.mxu0 %v19849_v0  ;;  %v1043_v59 = vsel %vm1037_vm5, %v1034_v49, %v1036_v58  ;;  %v4456_v49 = vld [vmem:[%s16970_s25 + $0x10] sm:$0x77]  ;;  %v4457_v55 = vld [vmem:[%s16970_s25 + $0x18] sm:$0x77] }
  0xa0   : > { %16485 = vmatprep.subr.mxu1 %v19849_v0  ;;  %15678 = vmatmul.mubr.msk.f32.vlgmr.msra.gmra.mxu1 %vm67_vm2, %v15672_v54  ;;  %v4464_v52 = vcombine.high %v4456_v49, %v4456_v49 }
  0xa1   : > { %3780 = vrot.lane.b32.xlu1 %v3765_v56, %s16912_s20  ;;  %3778 = vrot.lane.b32.xlu0 %v3772_v53, %s16912_s20 }
  0xa2   : > { %16486 = vmatpush3.msk.msra.mxu1 %vm71_vm1, %v1036_v58  ;;  %15679 = vmatprep.subr.msk.mxu0 %vm71_vm1, %v1043_v59  ;;  %v1365_v61 = vpop.permute.xlu1 %1364  ;;  %v1369_v62 = vpop.permute.xlu0 %1368  ;;  %v4465_v58 = vcombine.high %v4457_v55, %v4457_v55 }
  0xa3   : > { %15675 = vmatmul.mubr.msk.f32.vlgmr.msra.gmra.mxu0 %vm67_vm2, %v15672_v54  ;;  %v1380_v8 = vsel %vm1378_vm6, %v1367_v57, %v1369_v62  ;;  %16487 = vmatprep.mubr.msk.f32.mxu1 %vm16910_vm3, %v19849_v0  ;;  %v1379_v10 = vsel %vm1378_vm6, %v1365_v61, %v1367_v57  ;;  %v4799_v61 = vld [vmem:[%s16970_s25] sm:$0x77] }
  0xa4   : > { %15680 = vmatpush1.msk.msra.mxu0 %vm71_vm1, %v1042_v7  ;;  %1267 = vmatprep.mubr.f32.mxu0 %v19849_v0 }
  0xa5   : > { %3782 = vrot.lane.b32.xlu1 %v3773_v60, %s16912_s20  ;;  %3776 = vrot.lane.b32.xlu0 %v3764_v51, %s16912_s20  ;;  %v15708_v51 = vld [vmem:[%s19843_s1 + $0x30] sm:$0x3f] }
  0xa6   : > { %15685 = vmatprep.subr.msk.mxu0 %vm71_vm1, %v1380_v8  ;;  %v1373_v12 = vpop.permute.xlu1 %1372  ;;  %v1371_v13 = vpop.permute.xlu0 %1370  ;;  %16488 = vmatmul.mubr.msk.f32.vlgmr.msra.gmra.mxu1 %vm67_vm2, %v15672_v54  ;;  %v4807_v8 = vcombine.high %v4799_v61, %v4799_v61 }
  0xa7   : > { %15681 = vmatmul.mubr.msk.f32.vlgmr.msra.gmra.mxu0 %vm67_vm2, %v15672_v54  ;;  %v1381_v15 = vsel %vm1378_vm6, %v1369_v62, %v1371_v13  ;;  %v1382_v16 = vsel %vm1378_vm6, %v1371_v13, %v1373_v12  ;;  %1537 = vmatprep.mubr.f32.mxu1 %v19849_v0 }
  0xa8   : > { %15686 = vmatpush1.msk.msra.mxu0 %vm71_vm1, %v1379_v10  ;;  %15688 = vmatprep.subr.msk.mxu1 %vm71_vm1, %v1382_v16  ;;  %v4800_v10 = vld [vmem:[%s16970_s25 + $0x8] sm:$0x77] }
  0xa9   : > { %3786 = vrot.lane.b32.xlu1 %v3774_v11, %s16912_s20  ;;  %3784 = vrot.lane.b32.xlu0 %v3766_v63, %s16912_s20 }
  0xaa   : > { %15689 = vmatpush1.msk.msra.mxu1 %vm71_vm1, %v1381_v15  ;;  %v1377_v19 = vpop.permute.xlu1 %1376  ;;  %v1375_v20 = vpop.permute.xlu0 %1374  ;;  %1466 = vmatprep.mubr.f32.mxu0 %v19849_v0 }
  0xab   : > { %16490 = vmatprep.subr.mxu1 %v19849_v0  ;;  %15690 = vmatmul.mubr.msk.f32.vlgmr.msra.gmra.mxu1 %vm67_vm2, %v15684_v17  ;;  %v1384_v22 = vsel %vm1378_vm6, %v1375_v20, %v1377_v19  ;;  %v1383_v23 = vsel %vm1378_vm6, %v1373_v12, %v1375_v20 }
  0xac   : > { %16491 = vmatpush3.msk.msra.mxu1 %vm71_vm1, %v1377_v19  ;;  %15691 = vmatprep.subr.msk.mxu0 %vm71_vm1, %v1384_v22  ;;  %v15720_v19 = vld [vmem:[%s19843_s1 + $0x38] sm:$0x3f] }
  0xad   : > { %3790 = vrot.lane.b32.xlu1 %v3775_v18, %s16912_s20  ;;  %3788 = vrot.lane.b32.xlu0 %v3767_v14, %s16912_s20  ;;  %v4808_v14 = vcombine.high %v4800_v10, %v4800_v10 }
  0xae   : > { %15687 = vmatmul.mubr.msk.f32.vlgmr.msra.gmra.mxu0 %vm67_vm2, %v15684_v17  ;;  %v1711_v26 = vpop.permute.xlu1 %1710  ;;  %v1709_v27 = vpop.permute.xlu0 %1708  ;;  %16492 = vmatprep.mubr.msk.f32.mxu1 %vm16910_vm3, %v19849_v0 }
  0xaf   : > { %15692 = vmatpush1.msk.msra.mxu0 %vm71_vm1, %v1383_v23  ;;  %v1724_v28 = vsel %vm1722_vm7, %v1709_v27, %v1711_v26  ;;  %1608 = vmatprep.mubr.f32.mxu0 %v19849_v0  ;;  %v4802_v23 = vld [vmem:[%s16970_s25 + $0x18] sm:$0x77] }
  0xb0   : > { %15697 = vmatprep.subr.msk.mxu0 %vm71_vm1, %v1724_v28  ;;  %16493 = vmatmul.mubr.msk.f32.vlgmr.msra.gmra.mxu1 %vm67_vm2, %v15684_v17 }
  0xb1   : > { %4125 = vrot.lane.b32.xlu1 %v4110_v25, %s16913_s24  ;;  %4123 = vrot.lane.b32.xlu0 %v4117_v24, %s16913_s24 }
  0xb2   : > { %v1713_v30 = vpop.permute.xlu1 %1712  ;;  %v1707_v31 = vpop.permute.xlu0 %1706  ;;  %15693 = vmatmul.mubr.msk.f32.vlgmr.msra.gmra.mxu0 %vm67_vm2, %v15684_v17  ;;  %1882 = vmatprep.mubr.f32.mxu1 %v19849_v0  ;;  %v4801_v17 = vld [vmem:[%s16970_s25 + $0x10] sm:$0x77] }
  0xb3   : > { %v1723_v4 = vsel %vm1722_vm7, %v1707_v31, %v1709_v27  ;;  %1811 = vmatprep.mubr.f32.mxu0 %v19849_v0  ;;  %v1725_v6 = vsel %vm1722_vm7, %v1711_v26, %v1713_v30  ;;  %v4809_v20 = vcombine.high %v4801_v17, %v4801_v17  ;;  %v4810_v26 = vcombine.high %v4802_v23, %v4802_v23 }
  0xb4   : > { %15698 = vmatpush1.msk.msra.mxu0 %vm71_vm1, %v1723_v4 }
  0xb5   : > { %4127 = vrot.lane.b32.xlu1 %v4118_v29, %s16913_s24  ;;  %4121 = vrot.lane.b32.xlu0 %v4109_v21, %s16913_s24  ;;  %v5144_v29 = vld [vmem:[%s16970_s25] sm:$0x77] }
  0xb6   : > { %v1717_v3 = vpop.permute.xlu1 %1716  ;;  %v1715_v34 = vpop.permute.xlu0 %1714  ;;  %15699 = vmatmul.mubr.msk.f32.vlgmr.msra.gmra.mxu0 %vm67_vm2, %v15696_v2  ;;  %v5152_v4 = vcombine.high %v5144_v29, %v5144_v29 }
  0xb7   : > { %v1726_v35 = vsel %vm1722_vm7, %v1713_v30, %v1715_v34  ;;  %1953 = vmatprep.mubr.f32.mxu0 %v19849_v0  ;;  %v1727_v40 = vsel %vm1722_vm7, %v1715_v34, %v1717_v3 }
  0xb8   : > { %15700 = vmatprep.subr.msk.mxu1 %vm71_vm1, %v1726_v35 }
  0xb9   : > { %4131 = vrot.lane.b32.xlu1 %v4119_v33, %s16913_s24  ;;  %4129 = vrot.lane.b32.xlu0 %v4111_v32, %s16913_s24 }
  0xba   : > { %15701 = vmatpush1.msk.msra.mxu1 %vm71_vm1, %v1725_v6  ;;  %v1721_v36 = vpop.permute.xlu1 %1720  ;;  %v1719_v9 = vpop.permute.xlu0 %1718 }
  0xbb   : > { %v1729_v38 = vsel %vm1722_vm7, %v1719_v9, %v1721_v36  ;;  %16495 = vmatprep.subr.mxu1 %v19849_v0  ;;  %15702 = vmatmul.mubr.msk.f32.vlgmr.msra.gmra.mxu1 %vm67_vm2, %v15696_v2  ;;  %v1728_v39 = vsel %vm1722_vm7, %v1717_v3, %v1719_v9  ;;  %v15732_v9 = vld [vmem:[%s19843_s1 + $0x40] sm:$0x3f] }
  0xbc   : > { %15703 = vmatprep.subr.msk.mxu0 %vm71_vm1, %v1728_v39  ;;  %16496 = vmatpush3.msk.msra.mxu1 %vm71_vm1, %v1729_v38 }
  0xbd   : > { %4135 = vrot.lane.b32.xlu1 %v4120_v5, %s16913_s24  ;;  %4133 = vrot.lane.b32.xlu0 %v4112_v1, %s16913_s24  ;;  %v5146_v5 = vld [vmem:[%s16970_s25 + $0x10] sm:$0x77] }
  0xbe   : > { %15704 = vmatpush1.msk.msra.mxu0 %vm71_vm1, %v1727_v40  ;;  %v2056_v43 = vpop.permute.xlu1 %2055  ;;  %v2054_v44 = vpop.permute.xlu0 %2053  ;;  %16497 = vmatprep.mubr.msk.f32.mxu1 %vm16910_vm3, %v19849_v0  ;;  %v5147_v40 = vld [vmem:[%s16970_s25 + $0x18] sm:$0x77] }
  0xbf   : > { %v2069_v45 = vsel %vm2067_vm8, %v2054_v44, %v2056_v43  ;;  %15705 = vmatmul.mubr.msk.f32.vlgmr.msra.gmra.mxu0 %vm67_vm2, %v15696_v2  ;;  %16498 = vmatmul.mubr.msk.f32.vlgmr.msra.gmra.mxu1 %vm67_vm2, %v15696_v2  ;;  %v5145_v2 = vld [vmem:[%s16970_s25 + $0x8] sm:$0x77] }
  0xc0   : > { %15709 = vmatprep.subr.msk.mxu0 %vm71_vm1, %v2069_v45  ;;  %2227 = vmatprep.mubr.f32.mxu1 %v19849_v0  ;;  %v5153_v1 = vcombine.high %v5145_v2, %v5145_v2 }
  0xc1   : > { %4470 = vrot.lane.b32.xlu1 %v4455_v42, %s16914_s9  ;;  %4468 = vrot.lane.b32.xlu0 %v4462_v41, %s16914_s9 }
  0xc2   : > { %v2058_v47 = vpop.permute.xlu1 %2057  ;;  %v2052_v48 = vpop.permute.xlu0 %2051  ;;  %2156 = vmatprep.mubr.f32.mxu0 %v19849_v0 }
  0xc3   : > { %v2068_v50 = vsel %vm2067_vm8, %v2052_v48, %v2054_v44  ;;  %v2070_v57 = vsel %vm2067_vm8, %v2056_v43, %v2058_v47  ;;  %v5155_v43 = vcombine.high %v5147_v40, %v5147_v40 }
  0xc4   : > { %15710 = vmatpush1.msk.msra.mxu0 %vm71_vm1, %v2068_v50 }
  0xc5   : > { %4472 = vrot.lane.b32.xlu1 %v4463_v46, %s16914_s9  ;;  %4466 = vrot.lane.b32.xlu0 %v4454_v37, %s16914_s9  ;;  %v5154_v37 = vcombine.high %v5146_v5, %v5146_v5  ;;  %v5489_v46 = vld [vmem:[%s16970_s25] sm:$0x77] }
  0xc6   : > { %v2062_v53 = vpop.permute.xlu1 %2061  ;;  %v2060_v54 = vpop.permute.xlu0 %2059  ;;  %15711 = vmatmul.mubr.msk.f32.vlgmr.msra.gmra.mxu0 %vm67_vm2, %v15708_v51  ;;  %v5497_v50 = vcombine.high %v5489_v46, %v5489_v46 }
  0xc7   : > { %v2071_v56 = vsel %vm2067_vm8, %v2058_v47, %v2060_v54  ;;  %2298 = vmatprep.mubr.f32.mxu0 %v19849_v0  ;;  %v2072_v7 = vsel %vm2067_vm8, %v2060_v54, %v2062_v53 }
  0xc8   : > { %15712 = vmatprep.subr.msk.mxu1 %vm71_vm1, %v2071_v56 }
  0xc9   : > { %4476 = vrot.lane.b32.xlu1 %v4464_v52, %s16914_s9  ;;  %4474 = vrot.lane.b32.xlu0 %v4456_v49, %s16914_s9 }
  0xca   : > { %15713 = vmatpush1.msk.msra.mxu1 %vm71_vm1, %v2070_v57  ;;  %v2066_v59 = vpop.permute.xlu1 %2065  ;;  %v2064_v60 = vpop.permute.xlu0 %2063 }
  0xcb   : > { %v2074_v62 = vsel %vm2067_vm8, %v2064_v60, %v2066_v59  ;;  %16500 = vmatprep.subr.mxu1 %v19849_v0  ;;  %15714 = vmatmul.mubr.msk.f32.vlgmr.msra.gmra.mxu1 %vm67_vm2, %v15708_v51  ;;  %v2073_v63 = vsel %vm2067_vm8, %v2062_v53, %v2064_v60  ;;  %v15744_v60 = vld [vmem:[%s19843_s1 + $0x48] sm:$0x3f]  ;;  %vm4827_vm8 = vcmask 490496  }
  0xcc   : > { %15715 = vmatprep.subr.msk.mxu0 %vm71_vm1, %v2073_v63  ;;  %16501 = vmatpush3.msk.msra.mxu1 %vm71_vm1, %v2074_v62  ;;  %v5492_v63 = vld [vmem:[%s16970_s25 + $0x18] sm:$0x77] }
  0xcd   : > { %4480 = vrot.lane.b32.xlu1 %v4465_v58, %s16914_s9  ;;  %4478 = vrot.lane.b32.xlu0 %v4457_v55, %s16914_s9  ;;  %v5491_v58 = vld [vmem:[%s16970_s25 + $0x10] sm:$0x77]  ;;  %s16919_s9 = smov 29  }
  0xce   : > { %15716 = vmatpush1.msk.msra.mxu0 %vm71_vm1, %v2072_v7  ;;  %v2401_v11 = vpop.permute.xlu1 %2400  ;;  %v2399_v12 = vpop.permute.xlu0 %2398  ;;  %16502 = vmatprep.mubr.msk.f32.mxu1 %vm16910_vm3, %v19849_v0 }
  0xcf   : > { %v2414_v13 = vsel %vm2412_vm9, %v2399_v12, %v2401_v11  ;;  %15717 = vmatmul.mubr.msk.f32.vlgmr.msra.gmra.mxu0 %vm67_vm2, %v15708_v51  ;;  %16503 = vmatmul.mubr.msk.f32.vlgmr.msra.gmra.mxu1 %vm67_vm2, %v15708_v51  ;;  %v5490_v51 = vld [vmem:[%s16970_s25 + $0x8] sm:$0x77] }
  0xd0   : > { %15721 = vmatprep.subr.msk.mxu0 %vm71_vm1, %v2414_v13  ;;  %2572 = vmatprep.mubr.f32.mxu1 %v19849_v0  ;;  %v5498_v55 = vcombine.high %v5490_v51, %v5490_v51  ;;  %v5834_v13 = vld [vmem:[%s16970_s25] sm:$0x77] }
  0xd1   : > { %4815 = vrot.lane.b32.xlu1 %v4800_v10, %s16915_s12  ;;  %4813 = vrot.lane.b32.xlu0 %v4807_v8, %s16915_s12  ;;  %v5500_v10 = vcombine.high %v5492_v63, %v5492_v63 }
  0xd2   : > { %v2403_v15 = vpop.permute.xlu1 %2402  ;;  %v2397_v16 = vpop.permute.xlu0 %2396  ;;  %2501 = vmatprep.mubr.f32.mxu0 %v19849_v0 }
  0xd3   : > { %v2413_v18 = vsel %vm2412_vm9, %v2397_v16, %v2399_v12  ;;  %v2415_v25 = vsel %vm2412_vm9, %v2401_v11, %v2403_v15 }
  0xd4   : > { %15722 = vmatpush1.msk.msra.mxu0 %vm71_vm1, %v2413_v18 }
  0xd5   : > { %4817 = vrot.lane.b32.xlu1 %v4808_v14, %s16915_s12  ;;  %4811 = vrot.lane.b32.xlu0 %v4799_v61, %s16915_s12  ;;  %v5499_v61 = vcombine.high %v5491_v58, %v5491_v58 }
  0xd6   : > { %v2407_v21 = vpop.permute.xlu1 %2406  ;;  %v2405_v22 = vpop.permute.xlu0 %2404  ;;  %15723 = vmatmul.mubr.msk.f32.vlgmr.msra.gmra.mxu0 %vm67_vm2, %v15720_v19 }
  0xd7   : > { %v2416_v24 = vsel %vm2412_vm9, %v2403_v15, %v2405_v22  ;;  %2643 = vmatprep.mubr.f32.mxu0 %v19849_v0  ;;  %v2417_v32 = vsel %vm2412_vm9, %v2405_v22, %v2407_v21 }
  0xd8   : > { %15724 = vmatprep.subr.msk.mxu1 %vm71_vm1, %v2416_v24 }
  0xd9   : > { %4821 = vrot.lane.b32.xlu1 %v4809_v20, %s16915_s12  ;;  %4819 = vrot.lane.b32.xlu0 %v4801_v17, %s16915_s12  ;;  %v5842_v17 = vcombine.high %v5834_v13, %v5834_v13 }
  0xda   : > { %15725 = vmatpush1.msk.msra.mxu1 %vm71_vm1, %v2415_v25  ;;  %v2411_v27 = vpop.permute.xlu1 %2410  ;;  %v2409_v28 = vpop.permute.xlu0 %2408 }
  0xdb   : > { %v2419_v30 = vsel %vm2412_vm9, %v2409_v28, %v2411_v27  ;;  %16505 = vmatprep.subr.mxu1 %v19849_v0  ;;  %15726 = vmatmul.mubr.msk.f32.vlgmr.msra.gmra.mxu1 %vm67_vm2, %v15720_v19  ;;  %v2418_v31 = vsel %vm2412_vm9, %v2407_v21, %v2409_v28  ;;  %v5837_v28 = vld [vmem:[%s16970_s25 + $0x18] sm:$0x77]  ;;  %vm5172_vm9 = vcmask 261120  }
  0xdc   : > { %15727 = vmatprep.subr.msk.mxu0 %vm71_vm1, %v2418_v31  ;;  %16506 = vmatpush3.msk.msra.mxu1 %vm71_vm1, %v2419_v30  ;;  %v15756_v30 = vld [vmem:[%s19843_s1 + $0x50] sm:$0x3f]  ;;  %v5845_v31 = vcombine.high %v5837_v28, %v5837_v28 }
  0xdd   : > { %4825 = vrot.lane.b32.xlu1 %v4810_v26, %s16915_s12  ;;  %4823 = vrot.lane.b32.xlu0 %v4802_v23, %s16915_s12  ;;  %v5836_v23 = vld [vmem:[%s16970_s25 + $0x10] sm:$0x77] }
  0xde   : > { %15728 = vmatpush1.msk.msra.mxu0 %vm71_vm1, %v2417_v32  ;;  %v2746_v33 = vpop.permute.xlu1 %2745  ;;  %v2744_v3 = vpop.permute.xlu0 %2743  ;;  %16507 = vmatprep.mubr.msk.f32.mxu1 %vm16910_vm3, %v19849_v0  ;;  %v5844_v25 = vcombine.high %v5836_v23, %v5836_v23  ;;  %v6179_v32 = vld [vmem:[%s16970_s25] sm:$0x77] }
  0xdf   : > { %v2759_v34 = vsel %vm2757_vm10, %v2744_v3, %v2746_v33  ;;  %15729 = vmatmul.mubr.msk.f32.vlgmr.msra.gmra.mxu0 %vm67_vm2, %v15720_v19  ;;  %16508 = vmatmul.mubr.msk.f32.vlgmr.msra.gmra.mxu1 %vm67_vm2, %v15720_v19  ;;  %v5835_v19 = vld [vmem:[%s16970_s25 + $0x8] sm:$0x77] }
  0xe0   : > { %15733 = vmatprep.subr.msk.mxu0 %vm71_vm1, %v2759_v34  ;;  %2917 = vmatprep.mubr.f32.mxu1 %v19849_v0  ;;  %v5843_v20 = vcombine.high %v5835_v19, %v5835_v19 }
  0xe1   : > { %5160 = vrot.lane.b32.xlu1 %v5145_v2, %s16916_s16  ;;  %5158 = vrot.lane.b32.xlu0 %v5152_v4, %s16916_s16 }
  0xe2   : > { %v2748_v35 = vpop.permute.xlu1 %2747  ;;  %v2742_v6 = vpop.permute.xlu0 %2741  ;;  %2846 = vmatprep.mubr.f32.mxu0 %v19849_v0 }
  0xe3   : > { %v2758_v36 = vsel %vm2757_vm10, %v2742_v6, %v2744_v3  ;;  %v2760_v42 = vsel %vm2757_vm10, %v2746_v33, %v2748_v35  ;;  %v6187_v3 = vcombine.high %v6179_v32, %v6179_v32 }
  0xe4   : > { %15734 = vmatpush1.msk.msra.mxu0 %vm71_vm1, %v2758_v36 }
  0xe5   : > { %5162 = vrot.lane.b32.xlu1 %v5153_v1, %s16916_s16  ;;  %5156 = vrot.lane.b32.xlu0 %v5144_v29, %s16916_s16  ;;  %v6180_v1 = vld [vmem:[%s16970_s25 + $0x8] sm:$0x77] }
  0xe6   : > { %v2752_v38 = vpop.permute.xlu1 %2751  ;;  %v2750_v39 = vpop.permute.xlu0 %2749  ;;  %15735 = vmatmul.mubr.msk.f32.vlgmr.msra.gmra.mxu0 %vm67_vm2, %v15732_v9 }
  0xe7   : > { %v2761_v41 = vsel %vm2757_vm10, %v2748_v35, %v2750_v39  ;;  %2988 = vmatprep.mubr.f32.mxu0 %v19849_v0  ;;  %v2762_v49 = vsel %vm2757_vm10, %v2750_v39, %v2752_v38 }
  0xe8   : > { %15736 = vmatprep.subr.msk.mxu1 %vm71_vm1, %v2761_v41 }
  0xe9   : > { %5166 = vrot.lane.b32.xlu1 %v5154_v37, %s16916_s16  ;;  %5164 = vrot.lane.b32.xlu0 %v5146_v5, %s16916_s16 }
  0xea   : > { %15737 = vmatpush1.msk.msra.mxu1 %vm71_vm1, %v2760_v42  ;;  %v2756_v44 = vpop.permute.xlu1 %2755  ;;  %v2754_v45 = vpop.permute.xlu0 %2753 }
  0xeb   : > { %v2764_v47 = vsel %vm2757_vm10, %v2754_v45, %v2756_v44  ;;  %16510 = vmatprep.subr.mxu1 %v19849_v0  ;;  %15738 = vmatmul.mubr.msk.f32.vlgmr.msra.gmra.mxu1 %vm67_vm2, %v15732_v9  ;;  %v2763_v48 = vsel %vm2757_vm10, %v2752_v38, %v2754_v45  ;;  %v6181_v38 = vld [vmem:[%s16970_s25 + $0x10] sm:$0x77]  ;;  %vm5517_vm10 = vcmask 252928  }
  0xec   : > { %15739 = vmatprep.subr.msk.mxu0 %vm71_vm1, %v2763_v48  ;;  %16511 = vmatpush3.msk.msra.mxu1 %vm71_vm1, %v2764_v47  ;;  %v6189_v42 = vcombine.high %v6181_v38, %v6181_v38  ;;  %v15768_v47 = vld [vmem:[%s19843_s1 + $0x58] sm:$0x3f] }
  0xed   : > { %5170 = vrot.lane.b32.xlu1 %v5155_v43, %s16916_s16  ;;  %5168 = vrot.lane.b32.xlu0 %v5147_v40, %s16916_s16  ;;  %v6182_v43 = vld [vmem:[%s16970_s25 + $0x18] sm:$0x77] }
  0xee   : > { %15740 = vmatpush1.msk.msra.mxu0 %vm71_vm1, %v2762_v49  ;;  %v3091_v52 = vpop.permute.xlu1 %3090  ;;  %v3089_v53 = vpop.permute.xlu0 %3088  ;;  %16512 = vmatprep.mubr.msk.f32.mxu1 %vm16910_vm3, %v19849_v0  ;;  %v6190_v48 = vcombine.high %v6182_v43, %v6182_v43  ;;  %v6524_v49 = vld [vmem:[%s16970_s25] sm:$0x77] }
  0xef   : > { %v3104_v54 = vsel %vm3102_vm11, %v3089_v53, %v3091_v52  ;;  %15741 = vmatmul.mubr.msk.f32.vlgmr.msra.gmra.mxu0 %vm67_vm2, %v15732_v9  ;;  %16513 = vmatmul.mubr.msk.f32.vlgmr.msra.gmra.mxu1 %vm67_vm2, %v15732_v9  ;;  %v6188_v9 = vcombine.high %v6180_v1, %v6180_v1 }
  0xf0   : > { %15745 = vmatprep.subr.msk.mxu0 %vm71_vm1, %v3104_v54  ;;  %3262 = vmatprep.mubr.f32.mxu1 %v19849_v0 }
  0xf1   : > { %5505 = vrot.lane.b32.xlu1 %v5490_v51, %s16917_s19  ;;  %5503 = vrot.lane.b32.xlu0 %v5497_v50, %s16917_s19 }
  0xf2   : > { %v3093_v56 = vpop.permute.xlu1 %3092  ;;  %v3087_v57 = vpop.permute.xlu0 %3086  ;;  %3191 = vmatprep.mubr.f32.mxu0 %v19849_v0 }
  0xf3   : > { %v3103_v59 = vsel %vm3102_vm11, %v3087_v57, %v3089_v53  ;;  %v3105_v11 = vsel %vm3102_vm11, %v3091_v52, %v3093_v56  ;;  %v6532_v53 = vcombine.high %v6524_v49, %v6524_v49 }
  0xf4   : > { %15746 = vmatpush1.msk.msra.mxu0 %vm71_vm1, %v3103_v59 }
  0xf5   : > { %5507 = vrot.lane.b32.xlu1 %v5498_v55, %s16917_s19  ;;  %5501 = vrot.lane.b32.xlu0 %v5489_v46, %s16917_s19  ;;  %v6525_v55 = vld [vmem:[%s16970_s25 + $0x8] sm:$0x77] }
  0xf6   : > { %v3097_v62 = vpop.permute.xlu1 %3096  ;;  %15747 = vmatmul.mubr.msk.f32.vlgmr.msra.gmra.mxu0 %vm67_vm2, %v15744_v60 }
  0xf7   : > { %v3095_v7 = vpop.permute.xlu0 %3094  ;;  %3333 = vmatprep.mubr.f32.mxu0 %v19849_v0 }
  0xf8   : > { %v3106_v8 = vsel %vm3102_vm11, %v3093_v56, %v3095_v7  ;;  %v3107_v18 = vsel %vm3102_vm11, %v3095_v7, %v3097_v62 }
  0xf9   : > { %5511 = vrot.lane.b32.xlu1 %v5499_v61, %s16917_s19  ;;  %5509 = vrot.lane.b32.xlu0 %v5491_v58, %s16917_s19 }
  0xfa   : > { %15748 = vmatprep.subr.msk.mxu1 %vm71_vm1, %v3106_v8  ;;  %v3101_v12 = vpop.permute.xlu1 %3100 }
  0xfb   : > { %15749 = vmatpush1.msk.msra.mxu1 %vm71_vm1, %v3105_v11  ;;  %v3099_v14 = vpop.permute.xlu0 %3098  ;;  %v6527_v11 = vld [vmem:[%s16970_s25 + $0x18] sm:$0x77] }
  0xfc   : > { %v3109_v15 = vsel %vm3102_vm11, %v3099_v14, %v3101_v12  ;;  %16515 = vmatprep.subr.mxu1 %v19849_v0  ;;  %15750 = vmatmul.mubr.msk.f32.vlgmr.msra.gmra.mxu1 %vm67_vm2, %v15744_v60  ;;  %v3108_v16 = vsel %vm3102_vm11, %v3097_v62, %v3099_v14  ;;  %v6526_v62 = vld [vmem:[%s16970_s25 + $0x10] sm:$0x77]  ;;  %vm5862_vm11 = vcmask 244736  }
  0xfd   : > { %5515 = vrot.lane.b32.xlu1 %v5500_v10, %s16917_s19  ;;  %5513 = vrot.lane.b32.xlu0 %v5492_v63, %s16917_s19  ;;  %v6534_v10 = vcombine.high %v6526_v62, %v6526_v62  ;;  %s16262_s19 = sshll.u32 %s16898_s21, 4  ;;  %s28_s21 = sadd.s32 1, %s16898_s21  }
  0xfe   : > { %15751 = vmatprep.subr.msk.mxu0 %vm71_vm1, %v3108_v16  ;;  %16516 = vmatpush3.msk.msra.mxu1 %vm71_vm1, %v3109_v15  ;;  %v15780_v15 = vld [vmem:[%s19843_s1 + $0x60] sm:$0x3f]  ;;  %v6535_v16 = vcombine.high %v6527_v11, %v6527_v11  ;;  %p25_p0 = scmp.ge.s32.totalorder %s28_s21, 8  }
  0xff   : > { %15752 = vmatpush1.msk.msra.mxu0 %vm71_vm1, %v3107_v18  ;;  %16517 = vmatprep.mubr.msk.f32.mxu1 %vm16910_vm3, %v19849_v0 }
 0x100   : > { %15753 = vmatmul.mubr.msk.f32.vlgmr.msra.gmra.mxu0 %vm67_vm2, %v15744_v60  ;;  %16518 = vmatmul.mubr.msk.f32.vlgmr.msra.gmra.mxu1 %vm67_vm2, %v15744_v60  ;;  %v6533_v60 = vcombine.high %v6525_v55, %v6525_v55 }
 0x101   : > { %5850 = vrot.lane.b32.xlu1 %v5835_v19, %s16918_s23  ;;  %5848 = vrot.lane.b32.xlu0 %v5842_v17, %s16918_s23  ;;  %v3436_v21 = vpop.permute.xlu1 %3435  ;;  %v7189_v17 = vld [vmem:[%s16970_s25 + $0x4] sm:$0x77] }
 0x102   : > { %v3434_v22 = vpop.permute.xlu0 %3433  ;;  %3607 = vmatprep.mubr.f32.mxu1 %v19849_v0  ;;  %3536 = vmatprep.mubr.f32.mxu0 %v19849_v0 }
 0x103   : > { %v3449_v24 = vsel %vm3447_vm12, %v3434_v22, %v3436_v21 }
 0x104   : > { %15757 = vmatprep.subr.msk.mxu0 %vm71_vm1, %v3449_v24 }
 0x105   : > { %5852 = vrot.lane.b32.xlu1 %v5843_v20, %s16918_s23  ;;  %5846 = vrot.lane.b32.xlu0 %v5834_v13, %s16918_s23 }
 0x106   : > { %v3438_v26 = vpop.permute.xlu1 %3437  ;;  %v3432_v27 = vpop.permute.xlu0 %3431 }
 0x107   : > { %v3448_v29 = vsel %vm3447_vm12, %v3432_v27, %v3434_v22  ;;  %v3450_v34 = vsel %vm3447_vm12, %v3436_v21, %v3438_v26  ;;  %v7197_v21 = vcombine.high %v7189_v17, %v7189_v17 }
 0x108   : > { %15758 = vmatpush1.msk.msra.mxu0 %vm71_vm1, %v3448_v29 }
 0x109   : > { %5856 = vrot.lane.b32.xlu1 %v5844_v25, %s16918_s23  ;;  %5854 = vrot.lane.b32.xlu0 %v5836_v23, %s16918_s23  ;;  %v7190_v23 = vld [vmem:[%s16970_s25 + $0xc] sm:$0x77] }
 0x10a   : > { %15759 = vmatmul.mubr.msk.f32.vlgmr.msra.gmra.mxu0 %vm67_vm2, %v15756_v30 }
 0x10b   : > { %v3442_v4 = vpop.permute.xlu1 %3441  ;;  %v3440_v2 = vpop.permute.xlu0 %3439  ;;  %3678 = vmatprep.mubr.f32.mxu0 %v19849_v0 }
 0x10c   : > { %v3451_v33 = vsel %vm3447_vm12, %v3438_v26, %v3440_v2  ;;  %v3452_v37 = vsel %vm3447_vm12, %v3440_v2, %v3442_v4 }
 0x10d   : > { %5860 = vrot.lane.b32.xlu1 %v5845_v31, %s16918_s23  ;;  %5858 = vrot.lane.b32.xlu0 %v5837_v28, %s16918_s23  ;;  %v7198_v28 = vcombine.high %v7190_v23, %v7190_v23 }
 0x10e   : > { %15760 = vmatprep.subr.msk.mxu1 %vm71_vm1, %v3451_v33  ;;  %v7529_v33 = vld [vmem:[%s16970_s25 + $0x4] sm:$0x77] }
 0x10f   : > { %15761 = vmatpush1.msk.msra.mxu1 %vm71_vm1, %v3450_v34  ;;  %v3446_v35 = vpop.permute.xlu1 %3445  ;;  %v3444_v6 = vpop.permute.xlu0 %3443 }
 0x110   : > { %v3454_v5 = vsel %vm3447_vm12, %v3444_v6, %v3446_v35  ;;  %16520 = vmatprep.subr.mxu1 %v19849_v0  ;;  %15762 = vmatmul.mubr.msk.f32.vlgmr.msra.gmra.mxu1 %vm67_vm2, %v15756_v30  ;;  %v3453_v36 = vsel %vm3447_vm12, %v3442_v4, %v3444_v6  ;;  %v15792_v35 = vld [vmem:[%s19843_s1 + $0x68] sm:$0x3f]  ;;  %v7537_v6 = vcombine.high %v7529_v33, %v7529_v33 }
 0x111   : > { %6195 = vrot.lane.b32.xlu1 %v6180_v1, %s16919_s9  ;;  %6193 = vrot.lane.b32.xlu0 %v6187_v3, %s16919_s9 }
 0x112   : > { %15763 = vmatprep.subr.msk.mxu0 %vm71_vm1, %v3453_v36  ;;  %16521 = vmatpush3.msk.msra.mxu1 %vm71_vm1, %v3454_v5  ;;  %v7192_v5 = vld [vmem:[%s16970_s25 + $0x1c] sm:$0x7] }
 0x113   : > { %15764 = vmatpush1.msk.msra.mxu0 %vm71_vm1, %v3452_v37  ;;  %v3781_v39 = vpop.permute.xlu1 %3780  ;;  %v3779_v40 = vpop.permute.xlu0 %3778  ;;  %16522 = vmatprep.mubr.msk.f32.mxu1 %vm16910_vm3, %v19849_v0 }
 0x114   : > { %v3794_v41 = vsel %vm3792_vm13, %v3779_v40, %v3781_v39  ;;  %15765 = vmatmul.mubr.msk.f32.vlgmr.msra.gmra.mxu0 %vm67_vm2, %v15756_v30  ;;  %16523 = vmatmul.mubr.msk.f32.vlgmr.msra.gmra.mxu1 %vm67_vm2, %v15756_v30  ;;  %v7191_v30 = vld [vmem:[%s16970_s25 + $0x14] sm:$0x77] }
 0x115   : > { %6197 = vrot.lane.b32.xlu1 %v6188_v9, %s16919_s9  ;;  %6191 = vrot.lane.b32.xlu0 %v6179_v32, %s16919_s9  ;;  %v7199_v2 = vcombine.high %v7191_v30, %v7191_v30 }
 0x116   : > { %15769 = vmatprep.subr.msk.mxu0 %vm71_vm1, %v3794_v41  ;;  %3952 = vmatprep.mubr.f32.mxu1 %v19849_v0 }
 0x117   : > { %v3783_v44 = vpop.permute.xlu1 %3782  ;;  %v3777_v45 = vpop.permute.xlu0 %3776  ;;  %3881 = vmatprep.mubr.f32.mxu0 %v19849_v0 }
 0x118   : > { %v3793_v46 = vsel %vm3792_vm13, %v3777_v45, %v3779_v40  ;;  %v3795_v54 = vsel %vm3792_vm13, %v3781_v39, %v3783_v44  ;;  %v7530_v39 = vld [vmem:[%s16970_s25 + $0xc] sm:$0x77] }
 0x119   : > { %6201 = vrot.lane.b32.xlu1 %v6189_v42, %s16919_s9  ;;  %6199 = vrot.lane.b32.xlu0 %v6181_v38, %s16919_s9  ;;  %v7538_v45 = vcombine.high %v7530_v39, %v7530_v39 }
 0x11a   : > { %15770 = vmatpush1.msk.msra.mxu0 %vm71_vm1, %v3793_v46 }
 0x11b   : > { %v3787_v50 = vpop.permute.xlu1 %3786  ;;  %v3785_v51 = vpop.permute.xlu0 %3784  ;;  %15771 = vmatmul.mubr.msk.f32.vlgmr.msra.gmra.mxu0 %vm67_vm2, %v15768_v47 }
 0x11c   : > { %v3796_v52 = vsel %vm3792_vm13, %v3783_v44, %v3785_v51  ;;  %4023 = vmatprep.mubr.f32.mxu0 %v19849_v0  ;;  %v3797_v61 = vsel %vm3792_vm13, %v3785_v51, %v3787_v50 }
 0x11d   : > { %6205 = vrot.lane.b32.xlu1 %v6190_v48, %s16919_s9  ;;  %6203 = vrot.lane.b32.xlu0 %v6182_v43, %s16919_s9 }
 0x11e   : > { %15772 = vmatprep.subr.msk.mxu1 %vm71_vm1, %v3796_v52 }
 0x11f   : > { %15773 = vmatpush1.msk.msra.mxu1 %vm71_vm1, %v3795_v54  ;;  %v3791_v56 = vpop.permute.xlu1 %3790  ;;  %v3789_v57 = vpop.permute.xlu0 %3788  ;;  %v7532_v54 = vld [vmem:[%s16970_s25 + $0x1c] sm:$0x7] }
 0x120   : > { %v3799_v58 = vsel %vm3792_vm13, %v3789_v57, %v3791_v56  ;;  %16525 = vmatprep.subr.mxu1 %v19849_v0  ;;  %15774 = vmatmul.mubr.msk.f32.vlgmr.msra.gmra.mxu1 %vm67_vm2, %v15768_v47  ;;  %v3798_v59 = vsel %vm3792_vm13, %v3787_v50, %v3789_v57  ;;  %vm6207_vm13 = vcmask 236544  }
 0x121   : > { %6540 = vrot.lane.b32.xlu1 %v6525_v55, %s16920_s13  ;;  %6538 = vrot.lane.b32.xlu0 %v6532_v53, %s16920_s13  ;;  %v7869_v55 = vld [vmem:[%s16970_s25 + $0x4] sm:$0x77] }
 0x122   : > { %15775 = vmatprep.subr.msk.mxu0 %vm71_vm1, %v3798_v59  ;;  %16526 = vmatpush3.msk.msra.mxu1 %vm71_vm1, %v3799_v58 }
 0x123   : > { %15776 = vmatpush1.msk.msra.mxu0 %vm71_vm1, %v3797_v61  ;;  %v4126_v63 = vpop.permute.xlu1 %4125  ;;  %v4124_v7 = vpop.permute.xlu0 %4123  ;;  %16527 = vmatprep.mubr.msk.f32.mxu1 %vm16910_vm3, %v19849_v0 }
 0x124   : > { %v4139_v8 = vsel %vm4137_vm14, %v4124_v7, %v4126_v63  ;;  %15777 = vmatmul.mubr.msk.f32.vlgmr.msra.gmra.mxu0 %vm67_vm2, %v15768_v47  ;;  %16528 = vmatmul.mubr.msk.f32.vlgmr.msra.gmra.mxu1 %vm67_vm2, %v15768_v47  ;;  %v7531_v47 = vld [vmem:[%s16970_s25 + $0x14] sm:$0x77] }
 0x125   : > { %6542 = vrot.lane.b32.xlu1 %v6533_v60, %s16920_s13  ;;  %6536 = vrot.lane.b32.xlu0 %v6524_v49, %s16920_s13  ;;  %v7539_v53 = vcombine.high %v7531_v47, %v7531_v47  ;;  %v15804_v60 = vld [vmem:[%s19843_s1 + $0x70] sm:$0x3f] }
 0x126   : > { %15781 = vmatprep.subr.msk.mxu0 %vm71_vm1, %v4139_v8  ;;  %4226 = vmatprep.mubr.f32.mxu0 %v19849_v0 }
 0x127   : > { %v4128_v12 = vpop.permute.xlu1 %4127  ;;  %v4122_v13 = vpop.permute.xlu0 %4121  ;;  %4297 = vmatprep.mubr.f32.mxu1 %v19849_v0 }
 0x128   : > { %v4138_v14 = vsel %vm4137_vm14, %v4122_v13, %v4124_v7  ;;  %v4140_v22 = vsel %vm4137_vm14, %v4126_v63, %v4128_v12  ;;  %v7877_v63 = vcombine.high %v7869_v55, %v7869_v55  ;;  %v7870_v7 = vld [vmem:[%s16970_s25 + $0xc] sm:$0x77] }
 0x129   : > { %6546 = vrot.lane.b32.xlu1 %v6534_v10, %s16920_s13  ;;  %6544 = vrot.lane.b32.xlu0 %v6526_v62, %s16920_s13 }
 0x12a   : > { %15782 = vmatpush1.msk.msra.mxu0 %vm71_vm1, %v4138_v14 }
 0x12b   : > { %v4132_v18 = vpop.permute.xlu1 %4131  ;;  %v4130_v19 = vpop.permute.xlu0 %4129  ;;  %15783 = vmatmul.mubr.msk.f32.vlgmr.msra.gmra.mxu0 %vm67_vm2, %v15780_v15 }
 0x12c   : > { %v4141_v20 = vsel %vm4137_vm14, %v4128_v12, %v4130_v19  ;;  %4368 = vmatprep.mubr.f32.mxu0 %v19849_v0  ;;  %v4142_v29 = vsel %vm4137_vm14, %v4130_v19, %v4132_v18  ;;  %v7871_v19 = vld [vmem:[%s16970_s25 + $0x14] sm:$0x77] }
 0x12d   : > { %6550 = vrot.lane.b32.xlu1 %v6535_v16, %s16920_s13  ;;  %6548 = vrot.lane.b32.xlu0 %v6527_v11, %s16920_s13 }
 0x12e   : > { %15784 = vmatprep.subr.msk.mxu1 %vm71_vm1, %v4141_v20 }
 0x12f   : > { %15785 = vmatpush1.msk.msra.mxu1 %vm71_vm1, %v4140_v22  ;;  %v4136_v24 = vpop.permute.xlu1 %4135  ;;  %v4134_v25 = vpop.permute.xlu0 %4133 }
 0x130   : > { %15786 = vmatmul.mubr.msk.f32.vlgmr.msra.gmra.mxu1 %vm67_vm2, %v15780_v15  ;;  %v4144_v26 = vsel %vm4137_vm14, %v4134_v25, %v4136_v24  ;;  %16530 = vmatprep.subr.mxu1 %v19849_v0  ;;  %v4143_v27 = vsel %vm4137_vm14, %v4132_v18, %v4134_v25 }
 0x131   : > { %7204 = vrot.lane.b32.xlu1 %v7190_v23, %s16901_s26  ;;  %7202 = vrot.lane.b32.xlu0 %v7197_v21, %s16901_s26 }
 0x132   : > { %15787 = vmatprep.subr.msk.mxu0 %vm71_vm1, %v4143_v27  ;;  %16531 = vmatpush3.msk.msra.mxu1 %vm71_vm1, %v4144_v26  ;;  %v7879_v27 = vcombine.high %v7871_v19, %v7871_v19 }
 0x133   : > { %15788 = vmatpush1.msk.msra.mxu0 %vm71_vm1, %v4142_v29  ;;  %16532 = vmatprep.mubr.msk.f32.mxu1 %vm16910_vm3, %v19849_v0  ;;  %v4471_v31 = vpop.permute.xlu1 %4470  ;;  %v4469_v32 = vpop.permute.xlu0 %4468  ;;  %v8209_v29 = vld [vmem:[%s16970_s25 + $0x4] sm:$0x77] }
 0x134   : > { %15789 = vmatmul.mubr.msk.f32.vlgmr.msra.gmra.mxu0 %vm67_vm2, %v15780_v15  ;;  %16533 = vmatmul.mubr.msk.f32.vlgmr.msra.gmra.mxu1 %vm67_vm2, %v15780_v15  ;;  %v4484_v4 = vsel %vm4482_vm15, %v4469_v32, %v4471_v31  ;;  %v7878_v15 = vcombine.high %v7870_v7, %v7870_v7 }
 0x135   : > { %7206 = vrot.lane.b32.xlu1 %v7198_v28, %s16901_s26  ;;  %7200 = vrot.lane.b32.xlu0 %v7189_v17, %s16901_s26 }
 0x136   : > { %15793 = vmatprep.subr.msk.mxu0 %vm71_vm1, %v4484_v4  ;;  %4571 = vmatprep.mubr.f32.mxu0 %v19849_v0 }
 0x137   : > { %v4473_v3 = vpop.permute.xlu1 %4472  ;;  %v4467_v34 = vpop.permute.xlu0 %4466  ;;  %4642 = vmatprep.mubr.f32.mxu1 %v19849_v0 }
 0x138   : > { %v4483_v1 = vsel %vm4482_vm15, %v4467_v34, %v4469_v32  ;;  %v4485_v38 = vsel %vm4482_vm15, %v4471_v31, %v4473_v3 }
 0x139   : > { %7210 = vrot.lane.b32.xlu1 %v7199_v2, %s16901_s26  ;;  %7208 = vrot.lane.b32.xlu0 %v7191_v30, %s16901_s26 }
 0x13a   : > { %15794 = vmatpush1.msk.msra.mxu0 %vm71_vm1, %v4483_v1 }
 0x13b   : > { %15795 = vmatmul.mubr.msk.f32.vlgmr.msra.gmra.mxu0 %vm67_vm2, %v15792_v35  ;;  %v4477_v36 = vpop.permute.xlu1 %4476  ;;  %v4475_v9 = vpop.permute.xlu0 %4474 }
 0x13c   : > { %v4486_v37 = vsel %vm4482_vm15, %v4473_v3, %v4475_v9  ;;  %4713 = vmatprep.mubr.f32.mxu0 %v19849_v0  ;;  %v4487_v46 = vsel %vm4482_vm15, %v4475_v9, %v4477_v36 }
 0x13d   : > { %7542 = vrot.lane.b32.xlu1 %v7537_v6, %s16902_s27  ;;  %7212 = vrot.lane.b32.xlu0 %v7192_v5, %s16901_s26  ;;  %v7872_v6 = vld [vmem:[%s16970_s25 + $0x1c] sm:$0x7] }
 0x13e   : > { %15796 = vmatprep.subr.msk.mxu1 %vm71_vm1, %v4486_v37  ;;  %v15816_v37 = vld [vmem:[%s19843_s1 + $0x78] sm:$0x3f] }
 0x13f   : > { %15797 = vmatpush1.msk.msra.mxu1 %vm71_vm1, %v4485_v38  ;;  %v4481_v40 = vpop.permute.xlu1 %4480  ;;  %v4479_v41 = vpop.permute.xlu0 %4478 }
 0x140   : > { %15798 = vmatmul.mubr.msk.f32.vlgmr.msra.gmra.mxu1 %vm67_vm2, %v15792_v35  ;;  %v4489_v42 = vsel %vm4482_vm15, %v4479_v41, %v4481_v40  ;;  %16535 = vmatprep.subr.mxu1 %v19849_v0  ;;  %v4488_v43 = vsel %vm4482_vm15, %v4477_v36, %v4479_v41  ;;  %v152_v44 = vpop.f32.mrf.mxu0  ;;  %vm6552_vm15 = vcmask 228352  }
 0x141   : > { %7540 = vrot.lane.b32.xlu1 %v7529_v33, %s16902_s27  ;;  %7544 = vrot.lane.b32.xlu0 %v7530_v39, %s16902_s27 }
 0x142   : > { %15799 = vmatprep.subr.msk.mxu0 %vm71_vm1, %v4488_v43  ;;  %16536 = vmatpush3.msk.msra.mxu1 %vm71_vm1, %v4489_v42  ;;  %v17583_v51 = vpop.f32.mrf.mxu0  ;;  %v8210_v42 = vld [vmem:[%s16970_s25 + $0xc] sm:$0x77] }
 0x143   : > { %15800 = vmatpush1.msk.msra.mxu0 %vm71_vm1, %v4487_v46  ;;  %16537 = vmatprep.mubr.msk.f32.mxu1 %vm16910_vm3, %v19849_v0  ;;  %v4816_v48 = vpop.permute.xlu1 %4815  ;;  %v4814_v49 = vpop.permute.xlu0 %4813 }
 0x144   : > { %15801 = vmatmul.mubr.msk.f32.vlgmr.msra.gmra.mxu0 %vm67_vm2, %v15792_v35  ;;  %16538 = vmatmul.mubr.msk.f32.vlgmr.msra.gmra.mxu1 %vm67_vm2, %v15792_v35  ;;  %v4829_v50 = vsel %vm4827_vm8, %v4814_v49, %v4816_v48  ;;  %v223_v52 = vpop.f32.mrf.mxu1  ;;  %v8217_v35 = vcombine.high %v8209_v29, %v8209_v29 }
 0x145   : > { %7548 = vrot.lane.b32.xlu1 %v7531_v47, %s16902_s27  ;;  %7546 = vrot.lane.b32.xlu0 %v7538_v45, %s16902_s27 }
 0x146   : > { %15805 = vmatprep.subr.msk.mxu0 %vm71_vm1, %v4829_v50  ;;  %4916 = vmatprep.mubr.f32.mxu0 %v19849_v0  ;;  %v17591_v56 = vpop.f32.mrf.mxu1  ;;  %v8218_v50 = vcombine.high %v8210_v42, %v8210_v42 }
 0x147   : > { %v4818_v57 = vpop.permute.xlu1 %4817  ;;  %v4812_v58 = vpop.permute.xlu0 %4811  ;;  %4987 = vmatprep.mubr.f32.mxu1 %v19849_v0 }
 0x148   : > { %v4828_v59 = vsel %vm4827_vm8, %v4812_v58, %v4814_v49  ;;  %v294_v61 = vpop.f32.mrf.mxu0  ;;  %v365_v62 = vpop.f32.mrf.mxu1  ;;  %v4830_v18 = vsel %vm4827_vm8, %v4816_v48, %v4818_v57 }
 0x149   : > { %7552 = vrot.lane.b32.xlu1 %v7532_v54, %s16902_s27  ;;  %7550 = vrot.lane.b32.xlu0 %v7539_v53, %s16902_s27 }
 0x14a   : > { %15806 = vmatpush1.msk.msra.mxu0 %vm71_vm1, %v4828_v59  ;;  %v17602_v8 = vpop.f32.mrf.mxu0  ;;  %v16474_v10 = vpop.f32.mrf.mxu1 }
 0x14b   : > { %15807 = vmatmul.mubr.msk.f32.vlgmr.msra.gmra.mxu0 %vm67_vm2, %v15804_v60  ;;  %v4822_v11 = vpop.permute.xlu1 %4821  ;;  %v4820_v12 = vpop.permute.xlu0 %4819 }
 0x14c   : > { %v4831_v13 = vsel %vm4827_vm8, %v4818_v57, %v4820_v12  ;;  %5058 = vmatprep.mubr.f32.mxu0 %v19849_v0  ;;  %v452_v14 = vpop.f32.mrf.mxu0  ;;  %v4832_v28 = vsel %vm4827_vm8, %v4820_v12, %v4822_v11  ;;  %v8212_v12 = vld [vmem:[%s16970_s25 + $0x1c] sm:$0x7] }
 0x14d   : > { %7884 = vrot.lane.b32.xlu1 %v7870_v7, %s16903_s28  ;;  %7882 = vrot.lane.b32.xlu0 %v7877_v63, %s16903_s28  ;;  %v453_v16 = vadd.f32 %v452_v14, %v152_v44  ;;  %v523_v17 = vpop.f32.mrf.mxu1 }
 0x14e   : > { %15808 = vmatprep.subr.msk.mxu1 %vm71_vm1, %v4831_v13  ;;  %v17612_v20 = vpop.f32.mrf.mxu0  ;;  %v524_v21 = vadd.f32 %v523_v17, %v223_v52 }
 0x14f   : > { %15809 = vmatpush1.msk.msra.mxu1 %vm71_vm1, %v4830_v18  ;;  %v4826_v22 = vpop.permute.xlu1 %4825  ;;  %v4824_v23 = vpop.permute.xlu0 %4823 }
 0x150   : > { %15810 = vmatmul.mubr.msk.f32.vlgmr.msra.gmra.mxu1 %vm67_vm2, %v15804_v60  ;;  %v4834_v24 = vsel %vm4827_vm8, %v4824_v23, %v4826_v22  ;;  %16540 = vmatprep.subr.mxu1 %v19849_v0  ;;  %v4833_v25 = vsel %vm4827_vm8, %v4822_v11, %v4824_v23  ;;  %v17619_v26 = vpop.f32.mrf.mxu1 }
 0x151   : > { %7886 = vrot.lane.b32.xlu1 %v7878_v15, %s16903_s28  ;;  %7880 = vrot.lane.b32.xlu0 %v7869_v55, %s16903_s28  ;;  %v8211_v55 = vld [vmem:[%s16970_s25 + $0x14] sm:$0x77] }
 0x152   : > { %15811 = vmatprep.subr.msk.mxu0 %vm71_vm1, %v4833_v25  ;;  %16541 = vmatpush3.msk.msra.mxu1 %vm71_vm1, %v4834_v24  ;;  %v594_v30 = vpop.f32.mrf.mxu0  ;;  %v665_v31 = vpop.f32.mrf.mxu1  ;;  %v8219_v7 = vcombine.high %v8211_v55, %v8211_v55  ;;  %v15828_v24 = vld [vmem:[%s19843_s1 + $0x80] sm:$0x3f] }
 0x153   : > { %15812 = vmatpush1.msk.msra.mxu0 %vm71_vm1, %v4832_v28  ;;  %16542 = vmatprep.mubr.msk.f32.mxu1 %vm16910_vm3, %v19849_v0  ;;  %v5161_v32 = vpop.permute.xlu1 %5160  ;;  %v5159_v4 = vpop.permute.xlu0 %5158  ;;  %v595_v2 = vadd.f32 %v594_v30, %v294_v61  ;;  %v666_v33 = vadd.f32 %v665_v31, %v365_v62 }
 0x154   : > { %15813 = vmatmul.mubr.msk.f32.vlgmr.msra.gmra.mxu0 %vm67_vm2, %v15804_v60  ;;  %16543 = vmatmul.mubr.msk.f32.vlgmr.msra.gmra.mxu1 %vm67_vm2, %v15804_v60  ;;  %v5174_v3 = vsel %vm5172_vm9, %v5159_v4, %v5161_v32  ;;  %v17633_v34 = vpop.f32.mrf.mxu0  ;;  %v16479_v1 = vpop.f32.mrf.mxu1 }
 0x155   : > { %7890 = vrot.lane.b32.xlu1 %v7879_v27, %s16903_s28  ;;  %7888 = vrot.lane.b32.xlu0 %v7871_v19, %s16903_s28 }
 0x156   : > { %15817 = vmatprep.subr.msk.mxu0 %vm71_vm1, %v5174_v3  ;;  %5261 = vmatprep.mubr.f32.mxu0 %v19849_v0 }
 0x157   : > { %v5163_v5 = vpop.permute.xlu1 %5162  ;;  %v5157_v36 = vpop.permute.xlu0 %5156  ;;  %5332 = vmatprep.mubr.f32.mxu1 %v19849_v0 }
 0x158   : > { %v5173_v9 = vsel %vm5172_vm9, %v5157_v36, %v5159_v4  ;;  %v786_v38 = vpop.f32.mrf.mxu0  ;;  %v857_v39 = vpop.f32.mrf.mxu1  ;;  %v5175_v54 = vsel %vm5172_vm9, %v5161_v32, %v5163_v5 }
 0x159   : > { %8222 = vrot.lane.b32.xlu1 %v8217_v35, %s16904_s29  ;;  %7892 = vrot.lane.b32.xlu0 %v7872_v6, %s16903_s28  ;;  %v1003_v40 = vadd.f32 %v786_v38, %v453_v16  ;;  %v1005_v41 = vadd.f32 %v857_v39, %v524_v21 }
 0x15a   : > { %15818 = vmatpush1.msk.msra.mxu0 %vm71_vm1, %v5173_v9  ;;  %v17649_v43 = vpop.f32.mrf.mxu0  ;;  %v17651_v44 = vpop.f32.mrf.mxu1 }
 0x15b   : > { %15819 = vmatmul.mubr.msk.f32.vlgmr.msra.gmra.mxu0 %vm67_vm2, %v15816_v37  ;;  %v5167_v45 = vpop.permute.xlu1 %5166  ;;  %v5165_v46 = vpop.permute.xlu0 %5164 }
 0x15c   : > { %v5176_v47 = vsel %vm5172_vm9, %v5163_v5, %v5165_v46  ;;  %5403 = vmatprep.mubr.f32.mxu0 %v19849_v0  ;;  %v928_v48 = vpop.f32.mrf.mxu0  ;;  %v999_v49 = vpop.f32.mrf.mxu1  ;;  %v5177_v11 = vsel %vm5172_vm9, %v5165_v46, %v5167_v45 }
 0x15d   : > { %8220 = vrot.lane.b32.xlu1 %v8209_v29, %s16904_s29  ;;  %8224 = vrot.lane.b32.xlu0 %v8210_v42, %s16904_s29  ;;  %v1007_v52 = vadd.f32 %v928_v48, %v595_v2  ;;  %v1009_v53 = vadd.f32 %v999_v49, %v666_v33 }
 0x15e   : > { %15820 = vmatprep.subr.msk.mxu1 %vm71_vm1, %v5176_v47  ;;  %v16484_v57 = vpop.f32.mrf.mxu1  ;;  %v17666_v62 = vpop.f32.mrf.mxu0 }
 0x15f   : > { %15821 = vmatpush1.msk.msra.mxu1 %vm71_vm1, %v5175_v54  ;;  %v5171_v58 = vpop.permute.xlu1 %5170  ;;  %v5169_v59 = vpop.permute.xlu0 %5168  ;;  %v15840_v57 = vld [vmem:[%s19843_s1 + $0x88] sm:$0x3f] }
 0x160   : > { %15822 = vmatmul.mubr.msk.f32.vlgmr.msra.gmra.mxu1 %vm67_vm2, %v15816_v37  ;;  %v5179_v60 = vsel %vm5172_vm9, %v5169_v59, %v5171_v58  ;;  %16545 = vmatprep.subr.mxu1 %v19849_v0  ;;  %v5178_v61 = vsel %vm5172_vm9, %v5167_v45, %v5169_v59  ;;  %v1198_v63 = vpop.f32.mrf.mxu1 }
 0x161   : > { %8228 = vrot.lane.b32.xlu1 %v8211_v55, %s16904_s29  ;;  %8226 = vrot.lane.b32.xlu0 %v8218_v50, %s16904_s29  ;;  %v1346_v10 = vadd.f32 %v1198_v63, %v1005_v41 }
 0x162   : > { %15823 = vmatprep.subr.msk.mxu0 %vm71_vm1, %v5178_v61  ;;  %16546 = vmatpush3.msk.msra.mxu1 %vm71_vm1, %v5179_v60  ;;  %v17674_v13 = vpop.f32.mrf.mxu1 }
 0x163   : > { %15824 = vmatpush1.msk.msra.mxu0 %vm71_vm1, %v5177_v11  ;;  %16547 = vmatprep.mubr.msk.f32.mxu1 %vm16910_vm3, %v19849_v0  ;;  %v5506_v14 = vpop.permute.xlu1 %5505  ;;  %v5504_v15 = vpop.permute.xlu0 %5503 }
 0x164   : > { %15825 = vmatmul.mubr.msk.f32.vlgmr.msra.gmra.mxu0 %vm67_vm2, %v15816_v37  ;;  %16548 = vmatmul.mubr.msk.f32.vlgmr.msra.gmra.mxu1 %vm67_vm2, %v15816_v37  ;;  %v5519_v16 = vsel %vm5517_vm10, %v5504_v15, %v5506_v14  ;;  %v1127_v17 = vpop.f32.mrf.mxu0 }
 0x165   : > { %8232 = vrot.lane.b32.xlu1 %v8212_v12, %s16904_s29  ;;  %8230 = vrot.lane.b32.xlu0 %v8219_v7, %s16904_s29  ;;  %v1344_v18 = vadd.f32 %v1127_v17, %v1003_v40 }
 0x166   : > { %15829 = vmatprep.subr.msk.mxu0 %vm71_vm1, %v5519_v16  ;;  %5606 = vmatprep.mubr.f32.mxu0 %v19849_v0  ;;  %v17686_v19 = vpop.f32.mrf.mxu0  ;;  %v1340_v21 = vpop.f32.mrf.mxu1 }
 0x167   : > { %v5508_v22 = vpop.permute.xlu1 %5507  ;;  %v5502_v23 = vpop.permute.xlu0 %5501  ;;  %5677 = vmatprep.mubr.f32.mxu1 %v19849_v0  ;;  %v1350_v25 = vadd.f32 %v1340_v21, %v1009_v53 }
 0x168   : > { %v5518_v27 = vsel %vm5517_vm10, %v5502_v23, %v5504_v15  ;;  %v1269_v28 = vpop.f32.mrf.mxu0  ;;  %v16489_v29 = vpop.f32.mrf.mxu1  ;;  %v5520_v3 = vsel %vm5517_vm10, %v5506_v14, %v5508_v22 }
 0x169   : > { %15830 = vmatpush1.msk.msra.mxu0 %vm71_vm1, %v5518_v27  ;;  %v1348_v30 = vadd.f32 %v1269_v28, %v1007_v52 }
 0x16a   : > { %15831 = vmatmul.mubr.msk.f32.vlgmr.msra.gmra.mxu0 %vm67_vm2, %v15828_v24  ;;  %v17695_v31 = vpop.f32.mrf.mxu0 }
 0x16b   : > { %v5512_v32 = vpop.permute.xlu1 %5511  ;;  %v5510_v4 = vpop.permute.xlu0 %5509  ;;  %5748 = vmatprep.mubr.f32.mxu0 %v19849_v0 }
 0x16c   : > { %v5521_v2 = vsel %vm5517_vm10, %v5508_v22, %v5510_v4  ;;  %v1539_v33 = vpop.f32.mrf.mxu1  ;;  %v5522_v41 = vsel %vm5517_vm10, %v5510_v4, %v5512_v32 }
 0x16d   : > { %15832 = vmatprep.subr.msk.mxu1 %vm71_vm1, %v5521_v2  ;;  %v1687_v1 = vadd.f32 %v1539_v33, %v1346_v10 }
 0x16e   : > { %15833 = vmatpush1.msk.msra.mxu1 %vm71_vm1, %v5520_v3  ;;  %v1468_v35 = vpop.f32.mrf.mxu0  ;;  %v17702_v6 = vpop.f32.mrf.mxu1  ;;  %v15852_v3 = vld [vmem:[%s19843_s1 + $0x90] sm:$0x3f] }
 0x16f   : > { %v5516_v5 = vpop.permute.xlu1 %5515  ;;  %15834 = vmatmul.mubr.msk.f32.vlgmr.msra.gmra.mxu1 %vm67_vm2, %v15828_v24  ;;  %v5514_v36 = vpop.permute.xlu0 %5513  ;;  %16550 = vmatprep.subr.mxu1 %v19849_v0  ;;  %v1685_v9 = vadd.f32 %v1468_v35, %v1344_v18 }
 0x170   : > { %v5524_v37 = vsel %vm5517_vm10, %v5514_v36, %v5516_v5  ;;  %v5523_v38 = vsel %vm5517_vm10, %v5512_v32, %v5514_v36  ;;  %16552 = vmatprep.mubr.msk.f32.mxu1 %vm16910_vm3, %v19849_v0  ;;  %v17710_v39 = vpop.f32.mrf.mxu0  ;;  %v1681_v40 = vpop.f32.mrf.mxu1 }
 0x171   : > { %15835 = vmatprep.subr.msk.mxu0 %vm71_vm1, %v5523_v38  ;;  %16551 = vmatpush3.msk.msra.mxu1 %vm71_vm1, %v5524_v37  ;;  %v1691_v42 = vadd.f32 %v1681_v40, %v1350_v25 }
 0x172   : > { %15836 = vmatpush1.msk.msra.mxu0 %vm71_vm1, %v5522_v41  ;;  %v1610_v45 = vpop.f32.mrf.mxu0  ;;  %v16494_v46 = vpop.f32.mrf.mxu1 }
 0x173   : > { %v5851_v47 = vpop.permute.xlu1 %5850  ;;  %15837 = vmatmul.mubr.msk.f32.vlgmr.msra.gmra.mxu0 %vm67_vm2, %v15828_v24  ;;  %16553 = vmatmul.mubr.msk.f32.vlgmr.msra.gmra.mxu1 %vm67_vm2, %v15828_v24  ;;  %v5849_v48 = vpop.permute.xlu0 %5848  ;;  %v1689_v49 = vadd.f32 %v1610_v45, %v1348_v30 }
 0x174   : > { %v5864_v50 = vsel %vm5862_vm11, %v5849_v48, %v5851_v47  ;;  %5951 = vmatprep.mubr.f32.mxu0 %v19849_v0  ;;  %6022 = vmatprep.mubr.f32.mxu1 %v19849_v0  ;;  %v17721_v52 = vpop.f32.mrf.mxu0 }
 0x175   : > { %15841 = vmatprep.subr.msk.mxu0 %vm71_vm1, %v5864_v50 }
 0x176   : > { %v1813_v53 = vpop.f32.mrf.mxu0 }
 0x177   : > { %v5853_v54 = vpop.permute.xlu1 %5852  ;;  %v5847_v55 = vpop.permute.xlu0 %5846  ;;  %v2030_v58 = vadd.f32 %v1813_v53, %v1685_v9 }
 0x178   : > { %v5863_v59 = vsel %vm5862_vm11, %v5847_v55, %v5849_v48  ;;  %v17732_v7 = vpop.f32.mrf.mxu0  ;;  %v5865_v11 = vsel %vm5862_vm11, %v5851_v47, %v5853_v54 }
 0x179   : > { %15842 = vmatpush1.msk.msra.mxu0 %vm71_vm1, %v5863_v59 }
 0x17a   : > { %15843 = vmatmul.mubr.msk.f32.vlgmr.msra.gmra.mxu0 %vm67_vm2, %v15840_v57 }
 0x17b   : > { %v5857_v60 = vpop.permute.xlu1 %5856  ;;  %v5855_v61 = vpop.permute.xlu0 %5854  ;;  %6093 = vmatprep.mubr.f32.mxu0 %v19849_v0 }
 0x17c   : > { %v5866_v63 = vsel %vm5862_vm11, %v5853_v54, %v5855_v61  ;;  %v1884_v10 = vpop.f32.mrf.mxu1  ;;  %v5867_v23 = vsel %vm5862_vm11, %v5855_v61, %v5857_v60 }
 0x17d   : > { %15844 = vmatprep.subr.msk.mxu1 %vm71_vm1, %v5866_v63  ;;  %v2032_v12 = vadd.f32 %v1884_v10, %v1687_v1 }
 0x17e   : > { %15845 = vmatpush1.msk.msra.mxu1 %vm71_vm1, %v5865_v11  ;;  %v17737_v14 = vpop.f32.mrf.mxu1 }
 0x17f   : > { %v5861_v15 = vpop.permute.xlu1 %5860  ;;  %15846 = vmatmul.mubr.msk.f32.vlgmr.msra.gmra.mxu1 %vm67_vm2, %v15840_v57  ;;  %v5859_v16 = vpop.permute.xlu0 %5858  ;;  %16555 = vmatprep.subr.mxu1 %v19849_v0 }
 0x180   : > { %v5869_v17 = vsel %vm5862_vm11, %v5859_v16, %v5861_v15  ;;  %v5868_v18 = vsel %vm5862_vm11, %v5857_v60, %v5859_v16  ;;  %16557 = vmatprep.mubr.msk.f32.mxu1 %vm16910_vm3, %v19849_v0  ;;  %v1955_v21 = vpop.f32.mrf.mxu0  ;;  %v2026_v22 = vpop.f32.mrf.mxu1  ;;  %v8547_v16 = vld [vmem:[%s19844_s2] sm:$0x3f] }
 0x181   : > { %15847 = vmatprep.subr.msk.mxu0 %vm71_vm1, %v5868_v18  ;;  %16556 = vmatpush3.msk.msra.mxu1 %vm71_vm1, %v5869_v17  ;;  %v2034_v24 = vadd.f32 %v1955_v21, %v1689_v49  ;;  %v2036_v25 = vadd.f32 %v2026_v22, %v1691_v42  ;;  %v16921_v18 = vmov 0  }
 0x182   : > { %15848 = vmatpush1.msk.msra.mxu0 %vm71_vm1, %v5867_v23  ;;  %v17749_v27 = vpop.f32.mrf.mxu0  ;;  %v16499_v28 = vpop.f32.mrf.mxu1  ;;  %16763 = vset.pattern.permute.xlu0 %v16921_v18  ;;  %v6870_v23 = vld [vmem:[%s16970_s25 + $0xc] sm:$0x77] }
 0x183   : > { %v6196_v29 = vpop.permute.xlu1 %6195  ;;  %15849 = vmatmul.mubr.msk.f32.vlgmr.msra.gmra.mxu0 %vm67_vm2, %v15840_v57  ;;  %16558 = vmatmul.mubr.msk.f32.vlgmr.msra.gmra.mxu1 %vm67_vm2, %v15840_v57  ;;  %v6194_v30 = vpop.permute.xlu0 %6193 }
 0x184   : > { %v6209_v32 = vsel %vm6207_vm13, %v6194_v30, %v6196_v29  ;;  %6296 = vmatprep.mubr.f32.mxu0 %v19849_v0  ;;  %6367 = vmatprep.mubr.f32.mxu1 %v19849_v0 }
 0x185   : > { %15853 = vmatprep.subr.msk.mxu0 %vm71_vm1, %v6209_v32  ;;  %16764 = vset.pattern.permute.xlu1 %v16921_v18 }
 0x186   : > { %v2158_v4 = vpop.f32.mrf.mxu0  ;;  %8550 = vperm.xlu0 %16763, %v8547_v16  }
 0x187   : > { %v6198_v2 = vpop.permute.xlu1 %6197  ;;  %v6192_v33 = vpop.permute.xlu0 %6191  ;;  %v2375_v1 = vadd.f32 %v2158_v4, %v2030_v58  ;;  %v6878_v4 = vcombine.high %v6870_v23, %v6870_v23 }
 0x188   : > { %v6208_v35 = vsel %vm6207_vm13, %v6192_v33, %v6194_v30  ;;  %v17765_v37 = vpop.f32.mrf.mxu0  ;;  %v6210_v40 = vsel %vm6207_vm13, %v6196_v29, %v6198_v2  ;;  %v6869_v30 = vld [vmem:[%s16970_s25 + $0x4] sm:$0x77] }
 0x189   : > { %15854 = vmatpush1.msk.msra.mxu0 %vm71_vm1, %v6208_v35 }
 0x18a   : > { %15855 = vmatmul.mubr.msk.f32.vlgmr.msra.gmra.mxu0 %vm67_vm2, %v15852_v3 }
 0x18b   : > { %v6202_v5 = vpop.permute.xlu1 %6201  ;;  %v6200_v36 = vpop.permute.xlu0 %6199  ;;  %6438 = vmatprep.mubr.f32.mxu0 %v19849_v0 }
 0x18c   : > { %v6211_v9 = vsel %vm6207_vm13, %v6198_v2, %v6200_v36  ;;  %v2229_v38 = vpop.f32.mrf.mxu1  ;;  %v6212_v53 = vsel %vm6207_vm13, %v6200_v36, %v6202_v5  ;;  %v6877_v36 = vcombine.high %v6869_v30, %v6869_v30 }
 0x18d   : > { %15856 = vmatprep.subr.msk.mxu1 %vm71_vm1, %v6211_v9  ;;  %v2377_v41 = vadd.f32 %v2229_v38, %v2032_v12  ;;  %v15864_v12 = vld [vmem:[%s19843_s1 + $0x98] sm:$0x3f] }
 0x18e   : > { %15857 = vmatpush1.msk.msra.mxu1 %vm71_vm1, %v6210_v40  ;;  %v17770_v42 = vpop.f32.mrf.mxu1 }
 0x18f   : > { %v6206_v45 = vpop.permute.xlu1 %6205  ;;  %15858 = vmatmul.mubr.msk.f32.vlgmr.msra.gmra.mxu1 %vm67_vm2, %v15852_v3  ;;  %v6204_v46 = vpop.permute.xlu0 %6203  ;;  %16560 = vmatprep.subr.mxu1 %v19849_v0 }
 0x190   : > { %v6214_v47 = vsel %vm6207_vm13, %v6204_v46, %v6206_v45  ;;  %v6213_v48 = vsel %vm6207_vm13, %v6202_v5, %v6204_v46  ;;  %16562 = vmatprep.mubr.msk.f32.mxu1 %vm16910_vm3, %v19849_v0  ;;  %v2300_v49 = vpop.f32.mrf.mxu0  ;;  %v2371_v50 = vpop.f32.mrf.mxu1 }
 0x191   : > { %15859 = vmatprep.subr.msk.mxu0 %vm71_vm1, %v6213_v48  ;;  %16561 = vmatpush3.msk.msra.mxu1 %vm71_vm1, %v6214_v47  ;;  %v2379_v54 = vadd.f32 %v2300_v49, %v2034_v24  ;;  %v2381_v55 = vadd.f32 %v2371_v50, %v2036_v25 }
 0x192   : > { %15860 = vmatpush1.msk.msra.mxu0 %vm71_vm1, %v6212_v53  ;;  %v17782_v57 = vpop.f32.mrf.mxu0  ;;  %v16504_v58 = vpop.f32.mrf.mxu1  ;;  %v15876_v53 = vld [vmem:[%s19843_s1 + $0xa0] sm:$0x3f] }
 0x193   : > { %v6541_v59 = vpop.permute.xlu1 %6540  ;;  %15861 = vmatmul.mubr.msk.f32.vlgmr.msra.gmra.mxu0 %vm67_vm2, %v15852_v3  ;;  %16563 = vmatmul.mubr.msk.f32.vlgmr.msra.gmra.mxu1 %vm67_vm2, %v15852_v3  ;;  %v6539_v60 = vpop.permute.xlu0 %6538 }
 0x194   : > { %v6554_v61 = vsel %vm6552_vm15, %v6539_v60, %v6541_v59  ;;  %6641 = vmatprep.mubr.f32.mxu0 %v19849_v0  ;;  %6712 = vmatprep.mubr.f32.mxu1 %v19849_v0 }
 0x195   : > { %15865 = vmatprep.subr.msk.mxu0 %vm71_vm1, %v6554_v61 }
 0x196   : > { %v2503_v63 = vpop.f32.mrf.mxu0 }
 0x197   : > { %v6543_v10 = vpop.permute.xlu1 %6542  ;;  %v6537_v11 = vpop.permute.xlu0 %6536  ;;  %v2720_v15 = vadd.f32 %v2503_v63, %v2375_v1  ;;  %v6871_v1 = vld [vmem:[%s16970_s25 + $0x14] sm:$0x77] }
 0x198   : > { %v6553_v17 = vsel %vm6552_vm15, %v6537_v11, %v6539_v60  ;;  %v17802_v25 = vpop.f32.mrf.mxu0  ;;  %v6555_v29 = vsel %vm6552_vm15, %v6541_v59, %v6543_v10  ;;  %v6879_v46 = vcombine.high %v6871_v1, %v6871_v1  ;;  %v6872_v59 = vld [vmem:[%s16970_s25 + $0x1c] sm:$0x7] }
 0x199   : > { %15866 = vmatpush1.msk.msra.mxu0 %vm71_vm1, %v6553_v17 }
 0x19a   : > { %15867 = vmatmul.mubr.msk.f32.vlgmr.msra.gmra.mxu0 %vm67_vm2, %v15864_v12 }
 0x19b   : > { %v6547_v21 = vpop.permute.xlu1 %6546  ;;  %v6545_v22 = vpop.permute.xlu0 %6544  ;;  %6783 = vmatprep.mubr.f32.mxu0 %v19849_v0 }
 0x19c   : > { %v6556_v24 = vsel %vm6552_vm15, %v6543_v10, %v6545_v22  ;;  %v2574_v28 = vpop.f32.mrf.mxu1  ;;  %v6557_v40 = vsel %vm6552_vm15, %v6545_v22, %v6547_v21 }
 0x19d   : > { %15868 = vmatprep.subr.msk.mxu1 %vm71_vm1, %v6556_v24  ;;  %v17807_v32 = vadd.f32 %v2574_v28, %v2377_v41 }
 0x19e   : > { %15869 = vmatpush1.msk.msra.mxu1 %vm71_vm1, %v6555_v29  ;;  %v17810_v2 = vpop.f32.mrf.mxu1 }
 0x19f   : > { %v6551_v33 = vpop.permute.xlu1 %6550  ;;  %15870 = vmatmul.mubr.msk.f32.vlgmr.msra.gmra.mxu1 %vm67_vm2, %v15864_v12  ;;  %v6549_v3 = vpop.permute.xlu0 %6548  ;;  %16565 = vmatprep.subr.mxu1 %v19849_v0 }
 0x1a0   : > { %v6559_v35 = vsel %vm6552_vm15, %v6549_v3, %v6551_v33  ;;  %v6558_v5 = vsel %vm6552_vm15, %v6547_v21, %v6549_v3  ;;  %16567 = vmatprep.mubr.msk.f32.mxu1 %vm16910_vm3, %v19849_v0  ;;  %v2645_v9 = vpop.f32.mrf.mxu0  ;;  %v2716_v38 = vpop.f32.mrf.mxu1 }
 0x1a1   : > { %15871 = vmatprep.subr.msk.mxu0 %vm71_vm1, %v6558_v5  ;;  %16566 = vmatpush3.msk.msra.mxu1 %vm71_vm1, %v6559_v35  ;;  %v2724_v41 = vadd.f32 %v2645_v9, %v2379_v54  ;;  %v2726_v45 = vadd.f32 %v2716_v38, %v2381_v55  ;;  %v15900_v38 = vld [vmem:[%s19843_s1 + $0xb0] sm:$0x3f] }
 0x1a2   : > { %15872 = vmatpush1.msk.msra.mxu0 %vm71_vm1, %v6557_v40  ;;  %15880 = vmatprep.subr.msk.mxu1 %vm71_vm1, %v6878_v4  ;;  %v17824_v47 = vpop.f32.mrf.mxu0  ;;  %v16509_v48 = vpop.f32.mrf.mxu1 }
 0x1a3   : > { %v7205_v49 = vpop.permute.xlu1 %7204  ;;  %15873 = vmatmul.mubr.msk.f32.vlgmr.msra.gmra.mxu0 %vm67_vm2, %v15864_v12  ;;  %16568 = vmatmul.mubr.msk.f32.vlgmr.msra.gmra.mxu1 %vm67_vm2, %v15864_v12  ;;  %v7203_v50 = vpop.permute.xlu0 %7202 }
 0x1a4   : > { %15877 = vmatprep.subr.msk.mxu0 %vm71_vm1, %v6877_v36  ;;  %6961 = vmatprep.mubr.f32.mxu0 %v19849_v0  ;;  %v7215_v61 = vsel %vm60_vm0, %v7203_v50, %v7205_v49 }
 0x1a5   : > { %15878 = vmatpush1.msk.msra.mxu0 %vm71_vm1, %v6869_v30  ;;  %15881 = vmatpush1.msk.msra.mxu1 %vm71_vm1, %v6870_v23 }
 0x1a6   : > { %7032 = vmatprep.mubr.f32.mxu1 %v19849_v0  ;;  %15883 = vmatprep.subr.msk.mxu0 %vm71_vm1, %v6879_v46  ;;  %v2848_v54 = vpop.f32.mrf.mxu0 }
 0x1a7   : > { %v7207_v55 = vpop.permute.xlu1 %7206  ;;  %15879 = vmatmul.mubr.msk.f32.vlgmr.msra.gmra.mxu0 %vm67_vm2, %v15876_v53  ;;  %15882 = vmatmul.mubr.msk.f32.vlgmr.msra.gmra.mxu1 %vm67_vm2, %v15876_v53  ;;  %v7201_v58 = vpop.permute.xlu0 %7200  ;;  %v3065_v60 = vadd.f32 %v2848_v54, %v2720_v15  ;;  %v15888_v15 = vld [vmem:[%s19843_s1 + $0xa8] sm:$0x3f] }
 0x1a8   : > { %15884 = vmatpush1.msk.msra.mxu0 %vm71_vm1, %v6871_v1  ;;  %16570 = vmatprep.subr.mxu1 %v19849_v0  ;;  %v7214_v63 = vsel %vm60_vm0, %v7201_v58, %v7203_v50  ;;  %v17857_v16 = vpop.f32.mrf.mxu0  ;;  %v7216_v18 = vsel %vm60_vm0, %v7205_v49, %v7207_v55 }
 0x1a9   : > { %15889 = vmatprep.subr.msk.mxu0 %vm71_vm1, %v7215_v61  ;;  %7103 = vmatprep.mubr.f32.mxu0 %v19849_v0 }
 0x1aa   : > { %16571 = vmatpush3.msk.msra.mxu1 %vm71_vm1, %v6872_v59  ;;  %16572 = vmatprep.mubr.msk.f32.mxu1 %vm16910_vm3, %v19849_v0 }
 0x1ab   : > { %v7211_v10 = vpop.permute.xlu1 %7210  ;;  %15885 = vmatmul.mubr.msk.f32.vlgmr.msra.gmra.mxu0 %vm67_vm2, %v15876_v53  ;;  %16573 = vmatmul.mubr.msk.f32.vlgmr.msra.gmra.mxu1 %vm67_vm2, %v15876_v53  ;;  %v7209_v11 = vpop.permute.xlu0 %7208 }
 0x1ac   : > { %15890 = vmatpush1.msk.msra.mxu0 %vm71_vm1, %v7214_v63  ;;  %v7217_v12 = vsel %vm60_vm0, %v7207_v55, %v7209_v11  ;;  %7301 = vmatprep.mubr.f32.mxu0 %v19849_v0  ;;  %v2919_v17 = vpop.f32.mrf.mxu1 }
 0x1ad   : > { %15892 = vmatprep.subr.msk.mxu1 %vm71_vm1, %v7217_v12  ;;  %7372 = vmatprep.mubr.f32.mxu1 %v19849_v0  ;;  %v3067_v21 = vadd.f32 %v2919_v17, %v17807_v32  ;;  %v7218_v32 = vsel %vm60_vm0, %v7209_v11, %v7211_v10 }
 0x1ae   : > { %15893 = vmatpush1.msk.msra.mxu1 %vm71_vm1, %v7216_v18  ;;  %v17864_v22 = vpop.f32.mrf.mxu1 }
 0x1af   : > { %v7543_v23 = vpop.permute.xlu1 %7542  ;;  %15891 = vmatmul.mubr.msk.f32.vlgmr.msra.gmra.mxu0 %vm67_vm2, %v15888_v15  ;;  %15894 = vmatmul.mubr.msk.f32.vlgmr.msra.gmra.mxu1 %vm67_vm2, %v15888_v15  ;;  %v7213_v24 = vpop.permute.xlu0 %7212 }
 0x1b0   : > { %16575 = vmatprep.subr.mxu1 %v19849_v0  ;;  %v7219_v28 = vsel %vm60_vm0, %v7211_v10, %v7213_v24  ;;  %7443 = vmatprep.mubr.f32.mxu0 %v19849_v0  ;;  %v2990_v29 = vpop.f32.mrf.mxu0  ;;  %v3061_v30 = vpop.f32.mrf.mxu1 }
 0x1b1   : > { %16576 = vmatpush3.msk.msra.mxu1 %vm71_vm1, %v7213_v24  ;;  %15895 = vmatprep.subr.msk.mxu0 %vm71_vm1, %v7219_v28  ;;  %v3069_v4 = vadd.f32 %v2990_v29, %v2724_v41  ;;  %v3071_v33 = vadd.f32 %v3061_v30, %v2726_v45  ;;  %v15912_v28 = vld [vmem:[%s19843_s1 + $0xb8] sm:$0x3f] }
 0x1b2   : > { %15896 = vmatpush1.msk.msra.mxu0 %vm71_vm1, %v7218_v32  ;;  %16577 = vmatprep.mubr.msk.f32.mxu1 %vm16910_vm3, %v19849_v0  ;;  %v17877_v3 = vpop.f32.mrf.mxu0  ;;  %v16514_v1 = vpop.f32.mrf.mxu1 }
 0x1b3   : > { %v7541_v35 = vpop.permute.xlu1 %7540  ;;  %15897 = vmatmul.mubr.msk.f32.vlgmr.msra.gmra.mxu0 %vm67_vm2, %v15888_v15  ;;  %16578 = vmatmul.mubr.msk.f32.vlgmr.msra.gmra.mxu1 %vm67_vm2, %v15888_v15  ;;  %v7545_v5 = vpop.permute.xlu0 %7544 }
 0x1b4   : > { %v7554_v36 = vsel %vm696_vm4, %v7541_v35, %v7543_v23  ;;  %v7555_v9 = vsel %vm696_vm4, %v7543_v23, %v7545_v5  ;;  %7641 = vmatprep.mubr.f32.mxu0 %v19849_v0  ;;  %7712 = vmatprep.mubr.f32.mxu1 %v19849_v0 }
 0x1b5   : > { %15901 = vmatprep.subr.msk.mxu0 %vm71_vm1, %v7555_v9 }
 0x1b6   : > { %15902 = vmatpush1.msk.msra.mxu0 %vm71_vm1, %v7554_v36  ;;  %v3193_v40 = vpop.f32.mrf.mxu0 }
 0x1b7   : > { %v7549_v41 = vpop.permute.xlu1 %7548  ;;  %15903 = vmatmul.mubr.msk.f32.vlgmr.msra.gmra.mxu0 %vm67_vm2, %v15900_v38  ;;  %v7547_v45 = vpop.permute.xlu0 %7546  ;;  %v3410_v46 = vadd.f32 %v3193_v40, %v3065_v60 }
 0x1b8   : > { %v7556_v48 = vsel %vm696_vm4, %v7545_v5, %v7547_v45  ;;  %v7557_v49 = vsel %vm696_vm4, %v7547_v45, %v7549_v41  ;;  %7783 = vmatprep.mubr.f32.mxu0 %v19849_v0  ;;  %v17903_v58 = vpop.f32.mrf.mxu0 }
 0x1b9   : > { %15904 = vmatprep.subr.msk.mxu1 %vm71_vm1, %v7557_v49  ;;  %v15924_v49 = vld [vmem:[%s19843_s1 + $0xc0] sm:$0x3f] }
 0x1ba   : > { %15905 = vmatpush1.msk.msra.mxu1 %vm71_vm1, %v7556_v48 }
 0x1bb   : > { %v7553_v50 = vpop.permute.xlu1 %7552  ;;  %15906 = vmatmul.mubr.msk.f32.vlgmr.msra.gmra.mxu1 %vm67_vm2, %v15900_v38  ;;  %16580 = vmatprep.subr.mxu1 %v19849_v0  ;;  %v7551_v53 = vpop.permute.xlu0 %7550 }
 0x1bc   : > { %v7558_v54 = vsel %vm696_vm4, %v7549_v41, %v7551_v53  ;;  %16581 = vmatpush3.msk.msra.mxu1 %vm71_vm1, %v7553_v50  ;;  %v7559_v55 = vsel %vm696_vm4, %v7551_v53, %v7553_v50  ;;  %16582 = vmatprep.mubr.msk.f32.mxu1 %vm16910_vm3, %v19849_v0  ;;  %v3264_v59 = vpop.f32.mrf.mxu1 }
 0x1bd   : > { %15907 = vmatprep.subr.msk.mxu0 %vm71_vm1, %v7559_v55  ;;  %v3412_v60 = vadd.f32 %v3264_v59, %v3067_v21 }
 0x1be   : > { %15908 = vmatpush1.msk.msra.mxu0 %vm71_vm1, %v7558_v54  ;;  %v17907_v61 = vpop.f32.mrf.mxu1 }
 0x1bf   : > { %v7885_v63 = vpop.permute.xlu1 %7884  ;;  %15909 = vmatmul.mubr.msk.f32.vlgmr.msra.gmra.mxu0 %vm67_vm2, %v15900_v38  ;;  %16583 = vmatmul.mubr.msk.f32.vlgmr.msra.gmra.mxu1 %vm67_vm2, %v15900_v38  ;;  %v7883_v10 = vpop.permute.xlu0 %7882 }
 0x1c0   : > { %v7895_v11 = vsel %vm1037_vm5, %v7883_v10, %v7885_v63  ;;  %7981 = vmatprep.mubr.f32.mxu0 %v19849_v0  ;;  %8052 = vmatprep.mubr.f32.mxu1 %v19849_v0  ;;  %v3335_v12 = vpop.f32.mrf.mxu0  ;;  %v3406_v15 = vpop.f32.mrf.mxu1 }
 0x1c1   : > { %15913 = vmatprep.subr.msk.mxu0 %vm71_vm1, %v7895_v11  ;;  %v3414_v17 = vadd.f32 %v3335_v12, %v3069_v4  ;;  %v3416_v18 = vadd.f32 %v3406_v15, %v3071_v33 }
 0x1c2   : > { %v16519_v21 = vpop.f32.mrf.mxu1  ;;  %v17921_v30 = vpop.f32.mrf.mxu0 }
 0x1c3   : > { %v7887_v23 = vpop.permute.xlu1 %7886  ;;  %v7881_v24 = vpop.permute.xlu0 %7880 }
 0x1c4   : > { %v7894_v29 = vsel %vm1037_vm5, %v7881_v24, %v7883_v10  ;;  %v7896_v33 = vsel %vm1037_vm5, %v7885_v63, %v7887_v23 }
 0x1c5   : > { %15914 = vmatpush1.msk.msra.mxu0 %vm71_vm1, %v7894_v29 }
 0x1c6   : > { %15915 = vmatmul.mubr.msk.f32.vlgmr.msra.gmra.mxu0 %vm67_vm2, %v15912_v28 }
 0x1c7   : > { %v7891_v32 = vpop.permute.xlu1 %7890  ;;  %v7889_v1 = vpop.permute.xlu0 %7888  ;;  %8123 = vmatprep.mubr.f32.mxu0 %v19849_v0 }
 0x1c8   : > { %v7897_v4 = vsel %vm1037_vm5, %v7887_v23, %v7889_v1  ;;  %v7898_v40 = vsel %vm1037_vm5, %v7889_v1, %v7891_v32 }
 0x1c9   : > { %15916 = vmatprep.subr.msk.mxu1 %vm71_vm1, %v7897_v4 }
 0x1ca   : > { %15917 = vmatpush1.msk.msra.mxu1 %vm71_vm1, %v7896_v33  ;;  %v3538_v35 = vpop.f32.mrf.mxu0 }
 0x1cb   : > { %v8223_v5 = vpop.permute.xlu1 %8222  ;;  %15918 = vmatmul.mubr.msk.f32.vlgmr.msra.gmra.mxu1 %vm67_vm2, %v15912_v28  ;;  %16585 = vmatprep.subr.mxu1 %v19849_v0  ;;  %v7893_v36 = vpop.permute.xlu0 %7892  ;;  %v3755_v9 = vadd.f32 %v3538_v35, %v3410_v46 }
 0x1cc   : > { %16586 = vmatpush3.msk.msra.mxu1 %vm71_vm1, %v7893_v36  ;;  %v7899_v38 = vsel %vm1037_vm5, %v7891_v32, %v7893_v36  ;;  %16587 = vmatprep.mubr.msk.f32.mxu1 %vm16910_vm3, %v19849_v0  ;;  %v17946_v50 = vpop.f32.mrf.mxu0  ;;  %vm10824_vm5 = vcmask 474112  }
 0x1cd   : > { %15919 = vmatprep.subr.msk.mxu0 %vm71_vm1, %v7899_v38 }
 0x1ce   : > { %15920 = vmatpush1.msk.msra.mxu0 %vm71_vm1, %v7898_v40 }
 0x1cf   : > { %v8221_v41 = vpop.permute.xlu1 %8220  ;;  %15921 = vmatmul.mubr.msk.f32.vlgmr.msra.gmra.mxu0 %vm67_vm2, %v15912_v28  ;;  %16588 = vmatmul.mubr.msk.f32.vlgmr.msra.gmra.mxu1 %vm67_vm2, %v15912_v28  ;;  %v8225_v45 = vpop.permute.xlu0 %8224 }
 0x1d0   : > { %v8234_v46 = vsel %vm1378_vm6, %v8221_v41, %v8223_v5  ;;  %v8235_v48 = vsel %vm1378_vm6, %v8223_v5, %v8225_v45  ;;  %8321 = vmatprep.mubr.f32.mxu0 %v19849_v0  ;;  %8392 = vmatprep.mubr.f32.mxu1 %v19849_v0  ;;  %v3609_v53 = vpop.f32.mrf.mxu1 }
 0x1d1   : > { %15925 = vmatprep.subr.msk.mxu0 %vm71_vm1, %v8235_v48  ;;  %v3757_v54 = vadd.f32 %v3609_v53, %v3412_v60 }
 0x1d2   : > { %15926 = vmatpush1.msk.msra.mxu0 %vm71_vm1, %v8234_v46  ;;  %v17950_v55 = vpop.f32.mrf.mxu1 }
 0x1d3   : > { %v8229_v59 = vpop.permute.xlu1 %8228  ;;  %15927 = vmatmul.mubr.msk.f32.vlgmr.msra.gmra.mxu0 %vm67_vm2, %v15924_v49  ;;  %v8227_v63 = vpop.permute.xlu0 %8226 }
 0x1d4   : > { %v8236_v10 = vsel %vm1378_vm6, %v8225_v45, %v8227_v63  ;;  %v8237_v11 = vsel %vm1378_vm6, %v8227_v63, %v8229_v59  ;;  %8463 = vmatprep.mubr.f32.mxu0 %v19849_v0  ;;  %v3680_v12 = vpop.f32.mrf.mxu0  ;;  %v3751_v15 = vpop.f32.mrf.mxu1 }
 0x1d5   : > { %15928 = vmatprep.subr.msk.mxu1 %vm71_vm1, %v8237_v11  ;;  %v3759_v21 = vadd.f32 %v3680_v12, %v3414_v17  ;;  %v3761_v60 = vadd.f32 %v3751_v15, %v3416_v18 }
 0x1d6   : > { %15929 = vmatpush1.msk.msra.mxu1 %vm71_vm1, %v8236_v10  ;;  %v17958_v23 = vpop.f32.mrf.mxu0  ;;  %v16524_v24 = vpop.f32.mrf.mxu1 }
 0x1d7   : > { %v8233_v28 = vpop.permute.xlu1 %8232  ;;  %15930 = vmatmul.mubr.msk.f32.vlgmr.msra.gmra.mxu1 %vm67_vm2, %v15924_v49  ;;  %v8231_v29 = vpop.permute.xlu0 %8230  ;;  %16590 = vmatprep.subr.mxu1 %v19849_v0 }
 0x1d8   : > { %v8238_v32 = vsel %vm1378_vm6, %v8229_v59, %v8231_v29  ;;  %v8239_v1 = vsel %vm1378_vm6, %v8231_v29, %v8233_v28  ;;  %16591 = vmatpush3.msk.msra.mxu1 %vm71_vm1, %v8233_v28  ;;  %16592 = vmatprep.mubr.msk.f32.mxu1 %vm16910_vm3, %v19849_v0  ;;  %vm9723_vm3 = vcmask 982016  }
 0x1d9   : > { %15931 = vmatprep.subr.msk.mxu0 %vm71_vm1, %v8239_v1 }
 0x1da   : > { %15932 = vmatpush1.msk.msra.mxu0 %vm71_vm1, %v8238_v32  ;;  %vm8673_vm1 = vcmask 48128  }
 0x1db   : > { %15933 = vmatmul.mubr.msk.f32.vlgmr.msra.gmra.mxu0 %vm67_vm2, %v15924_v49  ;;  %16593 = vmatmul.mubr.msk.f32.vlgmr.msra.gmra.mxu1 %vm67_vm2, %v15924_v49  ;;  %v3883_v17 = vpop.f32.mrf.mxu0  ;;  %vm9450_vm2 = vcmask 998400  }
 0x1dc   : > { %v4100_v18 = vadd.f32 %v3883_v17, %v3755_v9  ;;  %8755 = vmatprep.mubr.f32.mxu0 %v19849_v0  ;;  %8832 = vmatprep.mubr.f32.mxu1 %v19849_v0 }
 0x1dd   : > { %v17973_v4 = vpop.f32.mrf.mxu0 }
 0x1e0   : > { %v3954_v33 = vpop.f32.mrf.mxu1 }
 0x1e1   : > { %v4102_v35 = vadd.f32 %v3954_v33, %v3757_v54 }
 0x1e2   : > { %v17975_v5 = vpop.f32.mrf.mxu1 }
 0x1e4   : > { %v4025_v36 = vpop.f32.mrf.mxu0  ;;  %v4096_v38 = vpop.f32.mrf.mxu1 }
 0x1e5   : > { %v4104_v40 = vadd.f32 %v4025_v36, %v3759_v21  ;;  %v4106_v41 = vadd.f32 %v4096_v38, %v3761_v60 }
 0x1e6   : > { %v16529_v45 = vpop.f32.mrf.mxu1  ;;  %v17977_v46 = vpop.f32.mrf.mxu0 }
 0x1eb   : > { %v4228_v48 = vpop.f32.mrf.mxu0 }
 0x1ec   : > { %v4445_v49 = vadd.f32 %v4228_v48, %v4100_v18 }
 0x1ed   : > { %v17979_v59 = vpop.f32.mrf.mxu0 }
 0x1f0   : > { %v4299_v9 = vpop.f32.mrf.mxu1 }
 0x1f1   : > { %v4447_v53 = vadd.f32 %v4299_v9, %v4102_v35 }
 0x1f2   : > { %v17981_v63 = vpop.f32.mrf.mxu1 }
 0x1f4   : > { %v4370_v10 = vpop.f32.mrf.mxu0  ;;  %v4441_v11 = vpop.f32.mrf.mxu1 }
 0x1f5   : > { %v4449_v54 = vadd.f32 %v4370_v10, %v4104_v40  ;;  %v4451_v12 = vadd.f32 %v4441_v11, %v4106_v41 }
 0x1f6   : > { %v16534_v15 = vpop.f32.mrf.mxu1  ;;  %v17983_v24 = vpop.f32.mrf.mxu0 }
 0x1fb   : > { %v4573_v21 = vpop.f32.mrf.mxu0 }
 0x1fc   : > { %v4790_v60 = vadd.f32 %v4573_v21, %v4445_v49 }
 0x1fd   : > { %v17985_v32 = vpop.f32.mrf.mxu0 }
 0x200   : > { %v4644_v28 = vpop.f32.mrf.mxu1 }
 0x201   : > { %v4792_v29 = vadd.f32 %v4644_v28, %v4447_v53 }
 0x202   : > { %v17987_v1 = vpop.f32.mrf.mxu1 }
 0x204   : > { %v4715_v17 = vpop.f32.mrf.mxu0  ;;  %v4786_v18 = vpop.f32.mrf.mxu1 }
 0x205   : > { %v17989_v33 = vadd.f32 %v4715_v17, %v4449_v54  ;;  %v4796_v35 = vadd.f32 %v4786_v18, %v4451_v12 }
 0x206   : > { %v16539_v36 = vpop.f32.mrf.mxu1  ;;  %v17991_v38 = vpop.f32.mrf.mxu0 }
 0x207   : > { %19856 = vst [vmem:[#allocation2_spill] sm:$0xff] %v17991_v38 }
 0x20b   : > { %v4918_v40 = vpop.f32.mrf.mxu0 }
 0x20c   : > { %v17993_v41 = vadd.f32 %v4918_v40, %v4790_v60 }
 0x20d   : > { %v17999_v28 = vpop.f32.mrf.mxu0 }
 0x210   : > { %v4989_v45 = vpop.f32.mrf.mxu1 }
 0x211   : > { %v5137_v48 = vadd.f32 %v4989_v45, %v4792_v29 }
 0x212   : > { %v17995_v49 = vpop.f32.mrf.mxu1 }
 0x214   : > { %v5131_v9 = vpop.f32.mrf.mxu1  ;;  %v18001_v18 = vpop.f32.mrf.mxu0 }
 0x215   : > { %v5141_v53 = vadd.f32 %v5131_v9, %v4796_v35 }
 0x216   : > { %v16544_v10 = vpop.f32.mrf.mxu1  ;;  %v18003_v60 = vpop.f32.mrf.mxu0 }
 0x217   : > { %19858 = vst [vmem:[#allocation4_spill] sm:$0xff] %v18003_v60 }
 0x21b   : > { %v18005_v36 = vpop.f32.mrf.mxu0 }
 0x21d   : > { %v18007_v45 = vpop.f32.mrf.mxu0 }
 0x220   : > { %v5334_v11 = vpop.f32.mrf.mxu1 }
 0x221   : > { %v5482_v15 = vadd.f32 %v5334_v11, %v5137_v48 }
 0x222   : > { %v17997_v21 = vpop.f32.mrf.mxu1 }
 0x223   : > { %19857 = vst [vmem:[#allocation3_spill] sm:$0xff] %v17997_v21 }
 0x224   : > { %v5476_v54 = vpop.f32.mrf.mxu1  ;;  %v18011_v48 = vpop.f32.mrf.mxu0 }
 0x225   : > { %v5486_v12 = vadd.f32 %v5476_v54, %v5141_v53  ;;  %19860 = vst [vmem:[#allocation6_spill] sm:$0xff] %v18011_v48 }
 0x226   : > { %v16549_v17 = vpop.f32.mrf.mxu1  ;;  %v18013_v0 = vpop.f32.mrf.mxu0 }
 0x227   : > { %19861 = vst [vmem:[#allocation7_spill] sm:$0xff] %v18013_v0 }
 0x22a   : > { %v18015_v53 = vpop.f32.mrf.mxu0 }
 0x22b   : > { %19862 = vst [vmem:[#allocation8_spill] sm:$0xff] %v18015_v53 }
 0x22c   : > { %v18017_v54 = vpop.f32.mrf.mxu0 }
 0x22f   : > { %v5679_v29 = vpop.f32.mrf.mxu1 }
 0x230   : > { %v5827_v40 = vadd.f32 %v5679_v29, %v5482_v15 }
 0x231   : > { %v18009_v35 = vpop.f32.mrf.mxu1 }
 0x232   : > { %19859 = vst [vmem:[#allocation5_spill] sm:$0xff] %v18009_v35 }
 0x233   : > { %v5821_v9 = vpop.f32.mrf.mxu1  ;;  %v18019_v17 = vpop.f32.mrf.mxu0 }
 0x234   : > { %v5831_v10 = vadd.f32 %v5821_v9, %v5486_v12  ;;  %19863 = vst [vmem:[#allocation9_spill] sm:$0xff] %v18019_v17 }
 0x235   : > { %v16554_v11 = vpop.f32.mrf.mxu1  ;;  %v18025_v29 = vpop.f32.mrf.mxu0 }
 0x236   : > { %19865 = vst [vmem:[#allocation11_spill] sm:$0xff] %v18025_v29  ;;  %v455_v29 = vadd.f32 %v17612_v20, %v17583_v51  ;;  %v597_v51 = vadd.f32 %v17633_v34, %v17602_v8 }
 0x23a   : > { %v18027_v21 = vpop.f32.mrf.mxu0 }
 0x23c   : > { %v18029_v9 = vpop.f32.mrf.mxu0 }
 0x23f   : > { %v6024_v60 = vpop.f32.mrf.mxu1 }
 0x240   : > { %v18021_v38 = vadd.f32 %v6024_v60, %v5827_v40 }
 0x241   : > { %v18023_v15 = vpop.f32.mrf.mxu1 }
 0x242   : > { %19864 = vst [vmem:[#allocation10_spill] sm:$0xff] %v18021_v38 }
 0x243   : > { %v6166_v35 = vpop.f32.mrf.mxu1  ;;  %v18031_v11 = vpop.f32.mrf.mxu0 }
 0x244   : > { %v6176_v48 = vadd.f32 %v6166_v35, %v5831_v10  ;;  %19866 = vst [vmem:[#allocation12_spill] sm:$0xff] %v18031_v11  ;;  %v1004_v11 = vadd.f32 %v17649_v43, %v455_v29 }
 0x245   : > { %v16559_v12 = vpop.f32.mrf.mxu1  ;;  %v18033_v0 = vpop.f32.mrf.mxu0 }
 0x246   : > { %19867 = vst [vmem:[#allocation13_spill] sm:$0xff] %v18033_v0  ;;  %v526_v0 = vadd.f32 %v17619_v26, %v17591_v56  ;;  %v1008_v56 = vadd.f32 %v17666_v62, %v597_v51 }
 0x24a   : > { %v18037_v17 = vpop.f32.mrf.mxu0 }
 0x24b   : > { %19869 = vst [vmem:[#allocation15_spill] sm:$0xff] %v18037_v17  ;;  %v1345_v17 = vadd.f32 %v17686_v19, %v1004_v11  ;;  %v1349_v19 = vadd.f32 %v17695_v31, %v1008_v56 }
 0x24c   : > { %v18045_v10 = vpop.f32.mrf.mxu0 }
 0x24f   : > { %v18035_v53 = vpop.f32.mrf.mxu1 }
 0x250   : > { %19868 = vst [vmem:[#allocation14_spill] sm:$0xff] %v18035_v53 }
 0x251   : > { %v18039_v60 = vpop.f32.mrf.mxu1 }
 0x252   : > { %19870 = vst [vmem:[#allocation16_spill] sm:$0xff] %v18039_v60  ;;  %v1006_v60 = vadd.f32 %v17651_v44, %v526_v0 }
 0x253   : > { %v6511_v40 = vpop.f32.mrf.mxu1  ;;  %v18047_v38 = vpop.f32.mrf.mxu0 }
 0x254   : > { %v18043_v35 = vadd.f32 %v6511_v40, %v6176_v48  ;;  %v1347_v40 = vadd.f32 %v17674_v13, %v1006_v60  ;;  %v1690_v60 = vadd.f32 %v17721_v52, %v1349_v19 }
 0x255   : > { %v16564_v12 = vpop.f32.mrf.mxu1  ;;  %v18052_v53 = vpop.f32.mrf.mxu0 }
 0x256   : > { %v1686_v12 = vadd.f32 %v17710_v39, %v1345_v17  ;;  %v1688_v8 = vadd.f32 %v17702_v6, %v1347_v40  ;;  %v2035_v56 = vadd.f32 %v17749_v27, %v1690_v60 }
 0x258   : > { %v2031_v34 = vadd.f32 %v17732_v7, %v1686_v12  ;;  %v2033_v17 = vadd.f32 %v17737_v14, %v1688_v8  ;;  %v2380_v19 = vadd.f32 %v17782_v57, %v2035_v56 }
 0x25a   : > { %v18058_v20 = vpop.f32.mrf.mxu0  ;;  %v2376_v11 = vadd.f32 %v17765_v37, %v2031_v34  ;;  %v2378_v40 = vadd.f32 %v17770_v42, %v2033_v17 }
 0x25c   : > { %v18065_v26 = vpop.f32.mrf.mxu0  ;;  %v2721_v12 = vadd.f32 %v17802_v25, %v2376_v11  ;;  %v2723_v8 = vadd.f32 %v17810_v2, %v2378_v40  ;;  %v2725_v11 = vadd.f32 %v17824_v47, %v2380_v19 }
 0x25e   : > { %v3066_v34 = vadd.f32 %v17857_v16, %v2721_v12  ;;  %v3068_v27 = vadd.f32 %v17864_v22, %v2723_v8  ;;  %v3070_v57 = vadd.f32 %v17877_v3, %v2725_v11 }
 0x25f   : > { %v18060_v48 = vpop.f32.mrf.mxu1 }
 0x260   : > { %v3411_v17 = vadd.f32 %v17903_v58, %v3066_v34  ;;  %v3413_v2 = vadd.f32 %v17907_v61, %v3068_v27  ;;  %v3415_v58 = vadd.f32 %v17921_v30, %v3070_v57  ;;  %v19873_v57 = vld [vmem:[#allocation2_spill] sm:$0xff] }
 0x261   : > { %v18067_v43 = vpop.f32.mrf.mxu1 }
 0x262   : > { %v3756_v16 = vadd.f32 %v17946_v50, %v3411_v17  ;;  %v3758_v56 = vadd.f32 %v17950_v55, %v3413_v2  ;;  %v3760_v50 = vadd.f32 %v17958_v23, %v3415_v58  ;;  %v5139_v2 = vadd.f32 %v18001_v18, %v17989_v33  ;;  %v19877_v18 = vld [vmem:[#allocation4_spill] sm:$0xff] }
 0x263   : > { %v18069_v0 = vpop.f32.mrf.mxu0  ;;  %v18071_v44 = vpop.f32.mrf.mxu1 }
 0x264   : > { %v4101_v22 = vadd.f32 %v17973_v4, %v3756_v16  ;;  %v4103_v61 = vadd.f32 %v17975_v5, %v3758_v56  ;;  %v19872_v16 = vld [vmem:[#allocation3_spill] sm:$0xff]  ;;  %v19874_v56 = vld [vmem:[#allocation6_spill] sm:$0xff] }
 0x265   : > { %v18076_v29 = vpop.f32.mrf.mxu0  ;;  %v16569_v13 = vpop.f32.mrf.mxu1 }
 0x266   : > { %v4446_v3 = vadd.f32 %v17979_v59, %v4101_v22  ;;  %v4448_v55 = vadd.f32 %v17981_v63, %v4103_v61 }
 0x267   : > { %v18078_v39 = vpop.f32.mrf.mxu0  ;;  %v18080_v62 = vpop.f32.mrf.mxu1 }
 0x268   : > { %v4791_v4 = vadd.f32 %v17985_v32, %v4446_v3  ;;  %v4793_v30 = vadd.f32 %v17987_v1, %v4448_v55  ;;  %v5480_v32 = vadd.f32 %v18005_v36, %v17993_v41 }
 0x269   : > { %v18085_v51 = vpop.f32.mrf.mxu0  ;;  %v18087_v6 = vpop.f32.mrf.mxu1 }
 0x26a   : > { %v5136_v11 = vadd.f32 %v17999_v28, %v4791_v4  ;;  %v5138_v5 = vadd.f32 %v17995_v49, %v4793_v30  ;;  %v5484_v49 = vadd.f32 %v19874_v56, %v5139_v2  ;;  %v19879_v4 = vld [vmem:[#allocation10_spill] sm:$0xff] }
 0x26b   : > { %v18089_v7 = vpop.f32.mrf.mxu0  ;;  %v18091_v31 = vpop.f32.mrf.mxu1  ;;  %v19880_v30 = vld [vmem:[#allocation14_spill] sm:$0xff] }
 0x26c   : > { %19871 = vst [vmem:[#allocation17_spill] sm:$0xff] %v18091_v31  ;;  %v5481_v59 = vadd.f32 %v18007_v45, %v5136_v11  ;;  %v5483_v1 = vadd.f32 %v19872_v16, %v5138_v5  ;;  %v19875_v45 = vld [vmem:[#allocation8_spill] sm:$0xff]  ;;  %v6517_v11 = vadd.f32 %v19880_v30, %v19879_v4 }
 0x26d   : > { %v18096_v13 = vpop.f32.mrf.mxu0  ;;  %v16574_v14 = vpop.f32.mrf.mxu1  ;;  %v5825_v58 = vadd.f32 %v19875_v45, %v5480_v32  ;;  %v19883_v32 = vld [vmem:[#allocation15_spill] sm:$0xff] }
 0x26e   : > { %v5826_v28 = vadd.f32 %v18017_v54, %v5481_v59  ;;  %v19882_v59 = vld [vmem:[#allocation12_spill] sm:$0xff] }
 0x26f   : > { %v18098_v37 = vpop.f32.mrf.mxu0  ;;  %v18100_v52 = vpop.f32.mrf.mxu1  ;;  %v6170_v36 = vadd.f32 %v18027_v21, %v5825_v58  ;;  %v6862_v21 = vadd.f32 %v18060_v48, %v6517_v11 }
 0x270   : > { %v6171_v33 = vadd.f32 %v18029_v9, %v5826_v28 }
 0x271   : > { %v18105_v31 = vpop.f32.mrf.mxu0  ;;  %v18107_v42 = vpop.f32.mrf.mxu1  ;;  %v6515_v16 = vadd.f32 %v19883_v32, %v6170_v36 }
 0x272   : > { %v6516_v55 = vadd.f32 %v18045_v10, %v6171_v33  ;;  %v19886_v33 = vld [vmem:[#allocation13_spill] sm:$0xff] }
 0x273   : > { %v18109_v25 = vpop.f32.mrf.mxu1  ;;  %v18114_v60 = vpop.f32.mrf.mxu0  ;;  %v6860_v45 = vadd.f32 %v18058_v20, %v6515_v16 }
 0x275   : > { %v16579_v14 = vpop.f32.mrf.mxu1  ;;  %v18119_v40 = vpop.f32.mrf.mxu0 }
 0x276   : > { %v4105_v14 = vadd.f32 %v17977_v46, %v3760_v50  ;;  %v19878_v50 = vld [vmem:[#allocation9_spill] sm:$0xff] }
 0x277   : > { %v18126_v47 = vpop.f32.mrf.mxu0 }
 0x278   : > { %v4450_v23 = vadd.f32 %v17983_v24, %v4105_v14  ;;  %v19876_v24 = vld [vmem:[#allocation5_spill] sm:$0xff]  ;;  %v19881_v14 = vld [vmem:[#allocation7_spill] sm:$0xff] }
 0x279   : > { %v7645_v19 = vpop.f32.mrf.mxu0  ;;  %v5828_v61 = vadd.f32 %v19876_v24, %v5483_v1  ;;  %v19884_v1 = vld [vmem:[#allocation16_spill] sm:$0xff]  ;;  %v7182_v24 = vadd.f32 %v18080_v62, %v6862_v21  ;;  %v6866_v62 = vadd.f32 %v18071_v44, %v18043_v35 }
 0x27a   : > { %v4795_v46 = vadd.f32 %v19873_v57, %v4450_v23  ;;  %v6861_v57 = vadd.f32 %v18065_v26, %v6516_v55 }
 0x27b   : > { %v18121_v12 = vpop.f32.mrf.mxu1  ;;  %v6173_v54 = vadd.f32 %v18023_v15, %v5828_v61  ;;  %v19885_v15 = vld [vmem:[#allocation11_spill] sm:$0xff] }
 0x27c   : > { %v5140_v3 = vadd.f32 %v19877_v18, %v4795_v46  ;;  %v7181_v61 = vadd.f32 %v18085_v51, %v6861_v57 }
 0x27d   : > { %v18128_v8 = vpop.f32.mrf.mxu1  ;;  %v6518_v28 = vadd.f32 %v19884_v1, %v6173_v54 }
 0x27e   : > { %v5485_v5 = vadd.f32 %v19881_v14, %v5140_v3  ;;  %v7521_v20 = vadd.f32 %v18105_v31, %v7181_v61 }
 0x27f   : > { %v18130_v34 = vpop.f32.mrf.mxu1  ;;  %v18137_v17 = vpop.f32.mrf.mxu0  ;;  %v6863_v58 = vadd.f32 %v18067_v43, %v6518_v28 }
 0x280   : > { %v5830_v46 = vadd.f32 %v19885_v15, %v5485_v5  ;;  %v7861_v55 = vadd.f32 %v7645_v19, %v7521_v20 }
 0x281   : > { %v16584_v27 = vpop.f32.mrf.mxu1  ;;  %v18147_v63 = vpop.f32.mrf.mxu0 }
 0x282   : > { %v5829_v27 = vadd.f32 %v19878_v50, %v5484_v49  ;;  %v6175_v18 = vadd.f32 %v19886_v33, %v5830_v46  ;;  %v7180_v50 = vadd.f32 %v18078_v39, %v6860_v45 }
 0x284   : > { %v6174_v23 = vadd.f32 %v19882_v59, %v5829_v27  ;;  %v7522_v27 = vadd.f32 %v18100_v52, %v7182_v24  ;;  %v6520_v43 = vadd.f32 %v18052_v53, %v6175_v18  ;;  %v19887_v52 = vld [vmem:[#allocation17_spill] sm:$0xff] }
 0x285   : > { %v7186_v4 = vadd.f32 %v19887_v52, %v6866_v62 }
 0x286   : > { %v7983_v22 = vpop.f32.mrf.mxu0  ;;  %v6519_v10 = vadd.f32 %v18047_v38, %v6174_v23  ;;  %v7183_v38 = vadd.f32 %v18087_v6, %v6863_v58  ;;  %v7862_v39 = vadd.f32 %v18121_v12, %v7522_v27  ;;  %v6865_v6 = vadd.f32 %v18076_v29, %v6520_v43 }
 0x288   : > { %v7985_v2 = vpop.f32.mrf.mxu0  ;;  %v6864_v26 = vadd.f32 %v18069_v0, %v6519_v10  ;;  %v7520_v0 = vadd.f32 %v18098_v37, %v7180_v50  ;;  %v7523_v54 = vadd.f32 %v18107_v42, %v7183_v38  ;;  %v7185_v37 = vadd.f32 %v18096_v13, %v6865_v6 }
 0x289   : > { %v8201_v44 = vadd.f32 %v7985_v2, %v7861_v55  ;;  %v7526_v42 = vadd.f32 %v18109_v25, %v7186_v4 }
 0x28a   : > { %v7184_v51 = vadd.f32 %v18089_v7, %v6864_v26  ;;  %v7860_v30 = vadd.f32 %v18126_v47, %v7520_v0  ;;  %v7863_v35 = vadd.f32 %v18128_v8, %v7523_v54  ;;  %v8551_v47 = vpop.permute.xlu0 %8550 }
 0x28b   : > { %v8054_v41 = vpop.f32.mrf.mxu1  ;;  %v7866_v59 = vadd.f32 %v18130_v34, %v7526_v42 }
 0x28c   : > { %v7524_v31 = vadd.f32 %v18114_v60, %v7184_v51  ;;  %v8202_v7 = vadd.f32 %v8054_v41, %v7862_v39  ;;  %v8200_v11 = vadd.f32 %v7983_v22, %v7860_v30  ;;  %v7525_v60 = vadd.f32 %v18119_v40, %v7185_v37 }
 0x28d   : > { %v8056_v9 = vpop.f32.mrf.mxu1 }
 0x28e   : > { %v7864_v19 = vadd.f32 %v18137_v17, %v7524_v31  ;;  %v8203_v29 = vadd.f32 %v8056_v9, %v7863_v35  ;;  %v7865_v13 = vadd.f32 %v18147_v63, %v7525_v60 }
 0x28f   : > { %v8125_v56 = vpop.f32.mrf.mxu0  ;;  %v8196_v49 = vpop.f32.mrf.mxu1 }
 0x290   : > { %v8204_v8 = vadd.f32 %v8125_v56, %v7864_v19  ;;  %v8206_v25 = vadd.f32 %v8196_v49, %v7866_v59 }
 0x291   : > { %v8127_v3 = vpop.f32.mrf.mxu0  ;;  %v16589_v48 = vpop.f32.mrf.mxu1 }
 0x292   : > { %v8205_v40 = vadd.f32 %v8127_v3, %v7865_v13  ;;  %v15936_v13 = vld [vmem:[%s19845_s3 + $0x10] sm:$0xff] }
 0x293   : > { %v8323_v36 = vpop.f32.mrf.mxu0 }
 0x294   : > { %v8540_v2 = vadd.f32 %v8323_v36, %v8200_v11 }
 0x295   : > { %v8325_v53 = vpop.f32.mrf.mxu0 }
 0x296   : > { %v8541_v14 = vadd.f32 %v8325_v53, %v8201_v44  ;;  %v8553_v46 = vadd.f32 %v8551_v47, %v8540_v2 }
 0x297   : > { %v8394_v12 = vpop.f32.mrf.mxu1 }
 0x298   : > { %v8542_v5 = vadd.f32 %v8394_v12, %v8202_v7  ;;  %v8554_v28 = vadd.f32 %v8551_v47, %v8541_v14  ;;  %v8560_v45 = vmax.f32 %v8553_v46, 0.0 }
 0x299   : > { %v8396_v23 = vpop.f32.mrf.mxu1 }
 0x29a   : > { %v8555_v41 = vadd.f32 %v8551_v47, %v8542_v5  ;;  %v8543_v32 = vadd.f32 %v8396_v23, %v8203_v29  ;;  %v8561_v63 = vmax.f32 %v8554_v28, 0.0 }
 0x29b   : > { %v8465_v16 = vpop.f32.mrf.mxu0  ;;  %v8536_v17 = vpop.f32.mrf.mxu1 }
 0x29c   : > { %v8562_v1 = vmax.f32 %v8555_v41, 0.0  ;;  %v8556_v22 = vadd.f32 %v8551_v47, %v8543_v32  ;;  %v8544_v9 = vadd.f32 %v8465_v16, %v8204_v8  ;;  %v8546_v34 = vadd.f32 %v8536_v17, %v8206_v25 }
 0x29d   : > { %v8467_v57 = vpop.f32.mrf.mxu0  ;;  %v16594_v21 = vpop.f32.mrf.mxu1 }
 0x29e   : > { %v8563_v15 = vmax.f32 %v8556_v22, 0.0  ;;  %8578 = vrot.lane.b32.xlu1 %v8562_v1, %s16901_s26  ;;  %v8557_v10 = vadd.f32 %v8551_v47, %v8544_v9  ;;  %v8545_v56 = vadd.f32 %v8467_v57, %v8205_v40  ;;  %v8559_v49 = vadd.f32 %v8551_v47, %v8546_v34  ;;  %v15937_v22 = vld [vmem:[%s19845_s3 + $0x18] sm:$0xff] }
 0x2a0   : > { %8580 = vrot.lane.b32.xlu0 %v8563_v15, %s16901_s26  ;;  %v8564_v58 = vmax.f32 %v8557_v10, 0.0  ;;  %v8558_v24 = vadd.f32 %v8551_v47, %v8545_v56  ;;  %v8566_v61 = vmax.f32 %v8559_v49, 0.0  ;;  %v8649_v56 = vld [vmem:[%s19845_s3] sm:$0xff] }
 0x2a2   : > { %8576 = vrot.lane.b32.xlu1 %v8561_v63, %s16901_s26  ;;  %v8565_v33 = vmax.f32 %v8558_v24, 0.0 }
 0x2a4   : > { %8574 = vrot.lane.b32.xlu0 %v8560_v45, %s16901_s26 }
 0x2a6   : > { %8582 = vrot.lane.b32.xlu1 %v8564_v58, %s16901_s26 }
 0x2a8   : > { %8586 = vrot.lane.b32.xlu0 %v8566_v61, %s16901_s26 }
 0x2aa   : > { %8584 = vrot.lane.b32.xlu1 %v8565_v33, %s16901_s26  ;;  %s16922_s26 = smov 122  }
 0x310   : > { %v8579_v18 = vpop.permute.xlu1 %8578 }
 0x312   : > { %v8581_v26 = vpop.permute.xlu0 %8580 }
 0x313   : > { %v8590_v3 = vsel %vm60_vm0, %v8579_v18, %v8581_v26 }
 0x314   : > { %v8603_v48 = vmax.f32 %v8562_v1, %v8590_v3  ;;  %v8577_v50 = vpop.permute.xlu1 %8576  ;;  %v19888_v1 = vmov 0.0  }
 0x315   : > { %v8589_v38 = vsel %vm60_vm0, %v8577_v50, %v8579_v18 }
 0x316   : > { %v8602_v27 = vmax.f32 %v8561_v63, %v8589_v38  ;;  %8619 = vrot.lane.b32.xlu0 %v8603_v48, %s16905_s30  ;;  %v8575_v20 = vpop.permute.xlu0 %8574 }
 0x317   : > { %v8588_v43 = vsel %vm60_vm0, %v8575_v20, %v8577_v50 }
 0x318   : > { %v8601_v62 = vmax.f32 %v8560_v45, %v8588_v43  ;;  %8617 = vrot.lane.b32.xlu1 %v8602_v27, %s16905_s30  ;;  %v8583_v51 = vpop.permute.xlu1 %8582 }
 0x319   : > { %v8591_v36 = vsel %vm60_vm0, %v8581_v26, %v8583_v51 }
 0x31a   : > { %v8604_v0 = vmax.f32 %v8563_v15, %v8591_v36  ;;  %8615 = vrot.lane.b32.xlu0 %v8601_v62, %s16905_s30  ;;  %v8587_v54 = vpop.permute.xlu0 %8586 }
 0x31b   : > { %v18239_v5 = vmax.f32 %v8566_v61, %v8587_v54 }
 0x31c   : > { %8621 = vrot.lane.b32.xlu1 %v8604_v0, %s16905_s30  ;;  %v8585_v55 = vpop.permute.xlu1 %8584 }
 0x31d   : > { %v8592_v39 = vsel %vm60_vm0, %v8583_v51, %v8585_v55  ;;  %v8593_v6 = vsel %vm60_vm0, %v8585_v55, %v8587_v54  ;;  %vm8680_vm0 = vcmask 1045504  }
 0x31e   : > { %v8605_v52 = vmax.f32 %v8564_v58, %v8592_v39  ;;  %v18218_v4 = vmax.f32 %v8565_v33, %v8593_v6  ;;  %v8650_v58 = vld [vmem:[%s19845_s3 + $0x8] sm:$0xff]  ;;  %v15960_v33 = vld [vmem:[%s19845_s3 + $0x20] sm:$0xff]  ;;  %v15973_v39 = vld [vmem:[%s19845_s3 + $0x30] sm:$0xff] }
 0x320   : > { %8623 = vrot.lane.b32.xlu1 %v8605_v52, %s16905_s30  ;;  %8625 = vrot.lane.b32.xlu0 %v18218_v4, %s16905_s30 }
 0x388   : > { %v8620_v31 = vpop.permute.xlu0 %8619 }
 0x38a   : > { %v8618_v53 = vpop.permute.xlu1 %8617 }
 0x38b   : > { %v8630_v30 = vsel %vm1722_vm7, %v8618_v53, %v8620_v31 }
 0x38c   : > { %v18224_v35 = vmax.f32 %v8602_v27, %v8630_v30  ;;  %v8616_v44 = vpop.permute.xlu0 %8615 }
 0x38d   : > { %v8629_v7 = vsel %vm1722_vm7, %v8616_v44, %v8618_v53  ;;  %v15986_v44 = vld [vmem:[%s19845_s3 + $0x40] sm:$0xff] }
 0x38e   : > { %v8622_v37 = vpop.permute.xlu1 %8621  ;;  %8661 = vrot.lane.b32.xlu1 %v18224_v35, %s16902_s27  ;;  %v18230_v19 = vmax.f32 %v8601_v62, %v8629_v7 }
 0x38f   : > { %v8631_v42 = vsel %vm1722_vm7, %v8620_v31, %v8622_v37  ;;  %v15974_v31 = vld [vmem:[%s19845_s3 + $0x38] sm:$0xff] }
 0x390   : > { %v18232_v12 = vmax.f32 %v8603_v48, %v8631_v42  ;;  %v15961_v48 = vld [vmem:[%s19845_s3 + $0x28] sm:$0xff] }
 0x392   : > { %v8624_v11 = vpop.permute.xlu1 %8623  ;;  %8663 = vrot.lane.b32.xlu0 %v18232_v12, %s16902_s27  ;;  %8659 = vrot.lane.b32.xlu1 %v18230_v19, %s16902_s27  ;;  %v8626_v29 = vpop.permute.xlu0 %8625 }
 0x393   : > { %v8632_v14 = vsel %vm1722_vm7, %v8622_v37, %v8624_v11  ;;  %v8633_v59 = vsel %vm1722_vm7, %v8624_v11, %v8626_v29  ;;  %v15987_v11 = vld [vmem:[%s19845_s3 + $0x48] sm:$0xff] }
 0x394   : > { %v18241_v60 = vmax.f32 %v8604_v0, %v8632_v14  ;;  %v18248_v47 = vmax.f32 %v8605_v52, %v8633_v59 }
 0x396   : > { %8627 = vrot.lane.b32.xlu0 %v18239_v5, %s16905_s30  ;;  %8665 = vrot.lane.b32.xlu1 %v18241_v60, %s16902_s27  ;;  %s16923_s30 = smov 120  }
 0x39a   : > { %9170 = vrot.lane.b32.xlu1 %v18224_v35, %s16904_s29  ;;  %8667 = vrot.lane.b32.xlu0 %v18248_v47, %s16902_s27 }
 0x39e   : > { %9168 = vrot.lane.b32.xlu1 %v18230_v19, %s16904_s29  ;;  %9172 = vrot.lane.b32.xlu0 %v18232_v12, %s16904_s29 }
 0x3a2   : > { %9442 = vrot.lane.b32.xlu1 %v18224_v35, %s16922_s26  ;;  %9444 = vrot.lane.b32.xlu0 %v18232_v12, %s16922_s26 }
 0x3a6   : > { %9715 = vrot.lane.b32.xlu1 %v18224_v35, %s16923_s30  ;;  %9440 = vrot.lane.b32.xlu0 %v18230_v19, %s16922_s26 }
 0x3aa   : > { %9176 = vrot.lane.b32.xlu1 %v18248_v47, %s16904_s29  ;;  %9174 = vrot.lane.b32.xlu0 %v18241_v60, %s16904_s29 }
 0x3ae   : > { %9448 = vrot.lane.b32.xlu1 %v18248_v47, %s16922_s26  ;;  %9446 = vrot.lane.b32.xlu0 %v18241_v60, %s16922_s26 }
 0x3b2   : > { %9713 = vrot.lane.b32.xlu1 %v18230_v19, %s16923_s30  ;;  %9717 = vrot.lane.b32.xlu0 %v18232_v12, %s16923_s30 }
 0x3b6   : > { %9989 = vrot.lane.b32.xlu1 %v18224_v35, %s16911_s15  ;;  %9991 = vrot.lane.b32.xlu0 %v18232_v12, %s16911_s15 }
 0x3ba   : > { %10264 = vrot.lane.b32.xlu1 %v18224_v35, %s16913_s24  ;;  %9987 = vrot.lane.b32.xlu0 %v18230_v19, %s16911_s15 }
 0x3be   : > { %9721 = vrot.lane.b32.xlu1 %v18248_v47, %s16923_s30  ;;  %9719 = vrot.lane.b32.xlu0 %v18241_v60, %s16923_s30 }
 0x3c2   : > { %9995 = vrot.lane.b32.xlu1 %v18248_v47, %s16911_s15  ;;  %9993 = vrot.lane.b32.xlu0 %v18241_v60, %s16911_s15 }
 0x3c6   : > { %10262 = vrot.lane.b32.xlu1 %v18230_v19, %s16913_s24  ;;  %10266 = vrot.lane.b32.xlu0 %v18232_v12, %s16913_s24 }
 0x3ca   : > { %10539 = vrot.lane.b32.xlu1 %v18224_v35, %s16915_s12  ;;  %10541 = vrot.lane.b32.xlu0 %v18232_v12, %s16915_s12 }
 0x3ce   : > { %10268 = vrot.lane.b32.xlu1 %v18241_v60, %s16913_s24 }
 0x400   : > { %v8662_v23 = vpop.permute.xlu1 %8661 }
 0x404   : > { %v8660_v8 = vpop.permute.xlu1 %8659  ;;  %v8664_v2 = vpop.permute.xlu0 %8663 }
 0x405   : > { %v8669_v41 = vsel %vm696_vm4, %v8660_v8, %v8662_v23  ;;  %v18306_v32 = vsel %vm696_vm4, %v8662_v23, %v8664_v2 }
 0x406   : > { %15938 = vmatprep.subr.msk.mxu0 %vm8680_vm0, %v18306_v32 }
 0x407   : > { %15939 = vmatpush1.msk.msra.mxu0 %vm8680_vm0, %v8669_v41 }
 0x408   : > { %v8666_v25 = vpop.permute.xlu1 %8665  ;;  %15940 = vmatmul.mubr.msk.f32.vlgmr.msra.gmra.mxu0 %vm8673_vm1, %v15936_v13  ;;  %v18315_v16 = vpop.permute.xlu0 %8627 }
 0x409   : > { %v8634_v17 = vsel %vm1722_vm7, %v8626_v29, %v18315_v16  ;;  %8761 = vmatprep.mubr.f32.mxu0 %v19888_v1  ;;  %v18340_v40 = vsel %vm696_vm4, %v8664_v2, %v8666_v25  ;;  %v18552_v23 = vmax.f32 %v18239_v5, %v18315_v16  ;;  %v16000_v16 = vld [vmem:[%s19845_s3 + $0x58] sm:$0xff]  ;;  %vm11100_vm7 = vcmask 457728  }
 0x40a   : > { %v18324_v9 = vmax.f32 %v18218_v4, %v8634_v17  ;;  %v16012_v17 = vld [vmem:[%s19845_s3 + $0x60] sm:$0xff] }
 0x40c   : > { %v9171_v28 = vpop.permute.xlu1 %9170  ;;  %15941 = vmatmul.mubr.msk.f32.gmra.mxu0 %vm8673_vm1, %v15937_v22  ;;  %10272 = vrot.lane.b32.xlu1 %v18324_v9, %s16913_s24  ;;  %v18329_v57 = vpop.permute.xlu0 %8667 }
 0x40d   : > { %9997 = vrot.lane.b32.xlu0 %v18324_v9, %s16911_s15  ;;  %16595 = vmatprep.subr.msk.mxu0 %vm8680_vm0, %v18329_v57  ;;  %v18337_v21 = vsel %vm696_vm4, %v8666_v25, %v18329_v57 }
 0x40e   : > { %15942 = vmatprep.subr.msk.mxu1 %vm8680_vm0, %v18337_v21  ;;  %16596 = vmatpush3.msk.msra.mxu0 %vm8680_vm0, %v18329_v57 }
 0x40f   : > { %15943 = vmatpush1.msk.msra.mxu1 %vm8680_vm0, %v18340_v40  ;;  %16597 = vmatprep.mubr.msk.f32.mxu0 %vm8673_vm1, %v15936_v13 }
 0x410   : > { %15953 = vmatprep.subr.msk.mxu0 %vm8680_vm0, %v18241_v60  ;;  %v9169_v15 = vpop.permute.xlu1 %9168  ;;  %10545 = vrot.lane.b32.xlu1 %v18248_v47, %s16915_s12  ;;  %v9173_v34 = vpop.permute.xlu0 %9172 }
 0x411   : > { %10270 = vrot.lane.b32.xlu0 %v18248_v47, %s16913_s24  ;;  %15944 = vmatmul.mubr.msk.f32.vlgmr.msra.gmra.mxu1 %vm8673_vm1, %v15936_v13  ;;  %v18357_v46 = vsel %vm1378_vm6, %v9171_v28, %v9173_v34  ;;  %v9178_v49 = vsel %vm1378_vm6, %v9169_v15, %v9171_v28  ;;  %v15999_v13 = vld [vmem:[%s19845_s3 + $0x50] sm:$0xff]  ;;  %v15168_v28 = vld [vmem:[%s19846_s4 + $0x8] sm:$0xff] }
 0x412   : > { %16598 = vmatmul.mubr.msk.f32.vlgmr.msra.gmra.mxu0 %vm8673_vm1, %v15937_v22  ;;  %15949 = vmatprep.subr.msk.mxu1 %vm8680_vm0, %v18224_v35 }
 0x413   : > { %15954 = vmatpush1.msk.msra.mxu0 %vm8680_vm0, %v18232_v12  ;;  %15950 = vmatpush1.msk.msra.mxu1 %vm8680_vm0, %v18230_v19 }
 0x414   : > { %16600 = vmatprep.subr.msk.mxu1 %vm8680_vm0, %v18248_v47  ;;  %15962 = vmatprep.subr.msk.mxu0 %vm8680_vm0, %v18357_v46  ;;  %v9443_v10 = vpop.permute.xlu1 %9442  ;;  %v9445_v63 = vpop.permute.xlu0 %9444 }
 0x415   : > { %8838 = vmatprep.mubr.f32.mxu1 %v19888_v1  ;;  %9077 = vmatprep.mubr.f32.mxu0 %v19888_v1  ;;  %v18442_v20 = vsel %vm9450_vm2, %v9443_v10, %v9445_v63 }
 0x416   : > { %10814 = vrot.lane.b32.xlu1 %v18224_v35, %s16924_s18  ;;  %10543 = vrot.lane.b32.xlu0 %v18241_v60, %s16915_s12 }
 0x417   : > { %15945 = vmatmul.mubr.msk.f32.gmra.mxu1 %vm8673_vm1, %v15937_v22  ;;  %15955 = vmatmul.mubr.msk.f32.vlgmr.msra.gmra.mxu0 %vm8673_vm1, %v8649_v56  ;;  %v16013_v22 = vld [vmem:[%s19845_s3 + $0x68] sm:$0xff] }
 0x418   : > { %15963 = vmatpush1.msk.msra.mxu0 %vm8680_vm0, %v9178_v49  ;;  %9000 = vmatprep.mubr.f32.mxu1 %v19888_v1  ;;  %v18384_v45 = vpop.permute.xlu1 %9715  ;;  %v9441_v24 = vpop.permute.xlu0 %9440 }
 0x419   : > { %9083 = vmatprep.mubr.f32.mxu0 %v19888_v1  ;;  %v9451_v51 = vsel %vm9450_vm2, %v9441_v24, %v9443_v10 }
 0x41a   : > { %10812 = vrot.lane.b32.xlu1 %v18230_v19, %s16924_s18  ;;  %10537 = vrot.lane.b32.xlu0 %v18230_v19, %s16915_s12 }
 0x41b   : > { %15951 = vmatmul.mubr.msk.f32.vlgmr.msra.gmra.mxu1 %vm8673_vm1, %v8649_v56  ;;  %15956 = vmatmul.mubr.msk.f32.gmra.mxu0 %vm8673_vm1, %v8650_v58 }
 0x41c   : > { %16601 = vmatpush3.msk.msra.mxu1 %vm8680_vm0, %v18248_v47  ;;  %9006 = vmatprep.mubr.f32.mxu1 %v19888_v1  ;;  %v18399_v61 = vpop.permute.xlu1 %9176  ;;  %v9175_v18 = vpop.permute.xlu0 %9174 }
 0x41d   : > { %9262 = vmatprep.mubr.f32.mxu0 %v19888_v1  ;;  %v18407_v26 = vsel %vm1378_vm6, %v9175_v18, %v18399_v61  ;;  %16605 = vmatprep.subr.msk.mxu0 %vm8680_vm0, %v18399_v61  ;;  %v18437_v27 = vsel %vm1378_vm6, %v9173_v34, %v9175_v18 }
 0x41e   : > { %10818 = vrot.lane.b32.xlu1 %v18241_v60, %s16924_s18  ;;  %10816 = vrot.lane.b32.xlu0 %v18232_v12, %s16924_s18 }
 0x41f   : > { %15952 = vmatmul.mubr.msk.f32.gmra.mxu1 %vm8673_vm1, %v8650_v58  ;;  %15964 = vmatmul.mubr.msk.f32.vlgmr.msra.gmra.mxu0 %vm8673_vm1, %v15960_v33 }
 0x420   : > { %15966 = vmatprep.subr.msk.mxu1 %vm8680_vm0, %v18407_v26  ;;  %16606 = vmatpush3.msk.msra.mxu0 %vm8680_vm0, %v18399_v61  ;;  %v18421_v3 = vpop.permute.xlu1 %9448  ;;  %v9447_v50 = vpop.permute.xlu0 %9446 }
 0x421   : > { %16602 = vmatprep.mubr.msk.f32.mxu1 %vm8673_vm1, %v8649_v56  ;;  %9268 = vmatprep.mubr.f32.mxu0 %v19888_v1  ;;  %v18430_v38 = vsel %vm9450_vm2, %v9447_v50, %v18421_v3  ;;  %v18463_v0 = vsel %vm9450_vm2, %v9445_v63, %v9447_v50 }
 0x422   : > { %10822 = vrot.lane.b32.xlu1 %v18324_v9, %s16924_s18  ;;  %10547 = vrot.lane.b32.xlu0 %v18324_v9, %s16915_s12 }
 0x423   : > { %16603 = vmatmul.mubr.msk.f32.vlgmr.msra.gmra.mxu1 %vm8673_vm1, %v8650_v58  ;;  %15965 = vmatmul.mubr.msk.f32.gmra.mxu0 %vm8673_vm1, %v15961_v48 }
 0x424   : > { %15967 = vmatpush1.msk.msra.mxu1 %vm8680_vm0, %v18437_v27  ;;  %15979 = vmatprep.subr.msk.mxu0 %vm8680_vm0, %v18430_v38  ;;  %v9714_v43 = vpop.permute.xlu1 %9713  ;;  %v9718_v62 = vpop.permute.xlu0 %9717 }
 0x425   : > { %15975 = vmatprep.subr.msk.mxu1 %vm8680_vm0, %v18442_v20  ;;  %9339 = vmatprep.mubr.f32.mxu1 %v19888_v1  ;;  %v18460_v36 = vsel %vm9723_vm3, %v18384_v45, %v9718_v62  ;;  %v9724_v4 = vsel %vm9723_vm3, %v9714_v43, %v18384_v45 }
 0x426   : > { %16607 = vmatprep.mubr.msk.f32.mxu0 %vm8673_vm1, %v15960_v33  ;;  %11096 = vrot.lane.b32.xlu1 %v18248_v47, %s16925_s7 }
 0x427   : > { %10820 = vrot.lane.b32.xlu0 %v18248_v47, %s16924_s18  ;;  %15968 = vmatmul.mubr.msk.f32.vlgmr.msra.gmra.mxu1 %vm8673_vm1, %v15960_v33 }
 0x428   : > { %16608 = vmatmul.mubr.msk.f32.vlgmr.msra.gmra.mxu0 %vm8673_vm1, %v15961_v48  ;;  %15976 = vmatpush1.msk.msra.mxu1 %vm8680_vm0, %v9451_v51  ;;  %v9990_v54 = vpop.permute.xlu1 %9989  ;;  %v9992_v55 = vpop.permute.xlu0 %9991 }
 0x429   : > { %15980 = vmatpush1.msk.msra.mxu0 %vm8680_vm0, %v18463_v0  ;;  %16610 = vmatprep.subr.msk.mxu1 %vm8680_vm0, %v18421_v3  ;;  %v18543_v14 = vsel %vm3447_vm12, %v9990_v54, %v9992_v55 }
 0x42a   : > { %15988 = vmatprep.subr.msk.mxu0 %vm8680_vm0, %v18460_v36  ;;  %9345 = vmatprep.mubr.f32.mxu1 %v19888_v1 }
 0x42b   : > { %9612 = vmatprep.mubr.f32.mxu0 %v19888_v1  ;;  %11090 = vrot.lane.b32.xlu1 %v18224_v35, %s16925_s7 }
 0x42c   : > { %11094 = vrot.lane.b32.xlu0 %v18241_v60, %s16925_s7  ;;  %15969 = vmatmul.mubr.msk.f32.gmra.mxu1 %vm8673_vm1, %v15961_v48  ;;  %v10265_v6 = vpop.permute.xlu1 %10264  ;;  %v9988_v52 = vpop.permute.xlu0 %9987 }
 0x42d   : > { %15981 = vmatmul.mubr.msk.f32.vlgmr.msra.gmra.mxu0 %vm8673_vm1, %v15973_v39  ;;  %9535 = vmatprep.mubr.f32.mxu1 %v19888_v1  ;;  %v9999_v8 = vsel %vm3447_vm12, %v9988_v52, %v9990_v54  ;;  %v16025_v54 = vld [vmem:[%s19845_s3 + $0x70] sm:$0xff]  ;;  %v16026_v52 = vld [vmem:[%s19845_s3 + $0x78] sm:$0xff] }
 0x42e   : > { %15989 = vmatpush1.msk.msra.mxu0 %vm8680_vm0, %v9724_v4  ;;  %9618 = vmatprep.mubr.f32.mxu0 %v19888_v1 }
 0x42f   : > { %11098 = vrot.lane.b32.xlu1 %v18324_v9, %s16925_s7 }
 0x430   : > { %11092 = vrot.lane.b32.xlu0 %v18232_v12, %s16925_s7  ;;  %15977 = vmatmul.mubr.msk.f32.vlgmr.msra.gmra.mxu1 %vm8673_vm1, %v15973_v39  ;;  %v18497_v53 = vpop.permute.xlu1 %9721  ;;  %v9720_v30 = vpop.permute.xlu0 %9719 }
 0x431   : > { %15982 = vmatmul.mubr.msk.f32.gmra.mxu0 %vm8673_vm1, %v15974_v31  ;;  %16611 = vmatpush3.msk.msra.mxu1 %vm8680_vm0, %v18421_v3  ;;  %v18509_v7 = vsel %vm9723_vm3, %v9720_v30, %v18497_v53  ;;  %v18537_v29 = vsel %vm9723_vm3, %v9718_v62, %v9720_v30 }
 0x432   : > { %9541 = vmatprep.mubr.f32.mxu1 %v19888_v1  ;;  %9808 = vmatprep.mubr.f32.mxu0 %v19888_v1  ;;  %19889 = vst [vmem:[#allocation3_spill] sm:$0xff] %v18509_v7  ;;  %19890 = vst [vmem:[#allocation2_spill] sm:$0xff] %v18537_v29 }
 0x433   : > { %11869 = vrot.lane.b32.xlu1 %v18324_v9, %s16904_s29  ;;  %16615 = vmatprep.subr.msk.mxu0 %vm8680_vm0, %v18497_v53 }
 0x434   : > { %11088 = vrot.lane.b32.xlu0 %v18230_v19, %s16925_s7  ;;  %15978 = vmatmul.mubr.msk.f32.gmra.mxu1 %vm8673_vm1, %v15974_v31  ;;  %v18518_v37 = vpop.permute.xlu1 %9995  ;;  %v9994_v42 = vpop.permute.xlu0 %9993 }
 0x435   : > { %15990 = vmatmul.mubr.msk.f32.vlgmr.msra.gmra.mxu0 %vm8673_vm1, %v15986_v44  ;;  %15992 = vmatprep.subr.msk.mxu1 %vm8680_vm0, %v18509_v7  ;;  %v18534_v19 = vsel %vm3447_vm12, %v9994_v42, %v18518_v37  ;;  %v18570_v2 = vsel %vm3447_vm12, %v9992_v55, %v9994_v42 }
 0x436   : > { %16616 = vmatpush3.msk.msra.mxu0 %vm8680_vm0, %v18497_v53  ;;  %16612 = vmatprep.mubr.msk.f32.mxu1 %vm8673_vm1, %v15973_v39 }
 0x437   : > { %9814 = vmatprep.mubr.f32.mxu0 %v19888_v1  ;;  %12379 = vrot.lane.b32.xlu1 %v18324_v9, %s16923_s30 }
 0x438   : > { %11614 = vrot.lane.b32.xlu0 %v18324_v9, %s16902_s27  ;;  %16613 = vmatmul.mubr.msk.f32.vlgmr.msra.gmra.mxu1 %vm8673_vm1, %v15974_v31  ;;  %v18548_v59 = vpop.permute.xlu0 %10266  ;;  %v10263_v41 = vpop.permute.xlu1 %10262 }
 0x439   : > { %15991 = vmatmul.mubr.msk.f32.gmra.mxu0 %vm8673_vm1, %v15987_v11  ;;  %15993 = vmatpush1.msk.msra.mxu1 %vm8680_vm0, %v18537_v29  ;;  %v18566_v5 = vsel %vm4137_vm14, %v10265_v6, %v18548_v59  ;;  %v10274_v25 = vsel %vm4137_vm14, %v10263_v41, %v10265_v6 }
 0x43a   : > { %16001 = vmatprep.subr.msk.mxu1 %vm8680_vm0, %v18543_v14  ;;  %16005 = vmatprep.subr.msk.mxu0 %vm8680_vm0, %v18534_v19 }
 0x43b   : > { %9885 = vmatprep.mubr.f32.mxu1 %v19888_v1  ;;  %16617 = vmatprep.mubr.msk.f32.mxu0 %vm8673_vm1, %v15986_v44 }
 0x43c   : > { %12888 = vrot.lane.b32.xlu1 %v18552_v23, %s16913_s24  ;;  %12124 = vrot.lane.b32.xlu0 %v18324_v9, %s16922_s26  ;;  %v10540_v15 = vpop.permute.xlu1 %10539  ;;  %v10542_v10 = vpop.permute.xlu0 %10541 }
 0x43d   : > { %15994 = vmatmul.mubr.msk.f32.vlgmr.msra.gmra.mxu1 %vm8673_vm1, %v15986_v44  ;;  %16618 = vmatmul.mubr.msk.f32.vlgmr.msra.gmra.mxu0 %vm8673_vm1, %v15987_v11  ;;  %v18663_v48 = vsel %vm4827_vm8, %v10540_v15, %v10542_v10  ;;  %v16038_v44 = vld [vmem:[%s19845_s3 + $0x80] sm:$0xff] }
 0x43e   : > { %16002 = vmatpush1.msk.msra.mxu1 %vm8680_vm0, %v9999_v8  ;;  %16006 = vmatpush1.msk.msra.mxu0 %vm8680_vm0, %v18570_v2  ;;  %v16039_v8 = vld [vmem:[%s19845_s3 + $0x88] sm:$0xff] }
 0x43f   : > { %16014 = vmatprep.subr.msk.mxu0 %vm8680_vm0, %v18566_v5  ;;  %10161 = vmatprep.mubr.f32.mxu0 %v19888_v1 }
 0x440   : > { %13394 = vrot.lane.b32.xlu1 %v18552_v23, %s16924_s18  ;;  %12635 = vrot.lane.b32.xlu0 %v18552_v23, %s16911_s15  ;;  %v10269_v34 = vpop.permute.xlu1 %10268  ;;  %s15619_s18 = scalar_lea.vmem %s19848_s6, %s16262_s19 }
 0x441   : > { %16007 = vmatmul.mubr.msk.f32.vlgmr.msra.gmra.mxu0 %vm8673_vm1, %v15999_v13  ;;  %9891 = vmatprep.mubr.f32.mxu1 %v19888_v1  ;;  %v18652_v18 = vsel %vm4137_vm14, %v18548_v59, %v10269_v34 }
 0x442   : > { %16015 = vmatpush1.msk.msra.mxu0 %vm8680_vm0, %v10274_v25  ;;  %15995 = vmatmul.mubr.msk.f32.gmra.mxu1 %vm8673_vm1, %v15987_v11 }
 0x443   : > { %10167 = vmatprep.mubr.f32.mxu0 %v19888_v1  ;;  %10084 = vmatprep.mubr.f32.mxu1 %v19888_v1 }
 0x444   : > { %14150 = vrot.lane.b32.xlu1 %v18552_v23, %s16902_s27  ;;  %13141 = vrot.lane.b32.xlu0 %v18552_v23, %s16915_s12 }
 0x445   : > { %16008 = vmatmul.mubr.msk.f32.gmra.mxu0 %vm8673_vm1, %v16000_v16 }
 0x446   : > { %16003 = vmatmul.mubr.msk.f32.vlgmr.msra.gmra.mxu1 %vm8673_vm1, %v15999_v13  ;;  %10359 = vmatprep.mubr.f32.mxu0 %v19888_v1 }
 0x447   : > { %10090 = vmatprep.mubr.f32.mxu1 %v19888_v1 }
 0x448   : > { %14660 = vrot.lane.b32.xlu1 %v18552_v23, %s16922_s26  ;;  %13647 = vrot.lane.b32.xlu0 %v18552_v23, %s16925_s7 }
 0x449   : > { %16016 = vmatmul.mubr.msk.f32.vlgmr.msra.gmra.mxu0 %vm8673_vm1, %v16012_v17 }
 0x44a   : > { %16004 = vmatmul.mubr.msk.f32.gmra.mxu1 %vm8673_vm1, %v16000_v16  ;;  %10365 = vmatprep.mubr.f32.mxu0 %v19888_v1 }
 0x44b   : > { %16622 = vmatprep.mubr.msk.f32.mxu1 %vm8673_vm1, %v15999_v13 }
 0x44c   : > { %14405 = vrot.lane.b32.xlu0 %v18552_v23, %s16904_s29 }
 0x44d   : > { %16017 = vmatmul.mubr.msk.f32.gmra.mxu0 %vm8673_vm1, %v16013_v22 }
 0x44e   : > { %16627 = vmatprep.mubr.msk.f32.mxu0 %vm8673_vm1, %v16012_v17 }
 0x450   : > { %14915 = vrot.lane.b32.xlu0 %v18552_v23, %s16923_s30 }
 0x454   : > { %15176 = vperm.xlu0 %16763, %v15168_v28  }
 0x47e   : > { %v18628_v56 = vpop.permute.xlu1 %10272 }
 0x47f   : > { %v18630_v63 = vpop.permute.xlu0 %9997 }
 0x480   : > { %v18635_v49 = vsel %vm3447_vm12, %v18518_v37, %v18630_v63 }
 0x481   : > { %16620 = vmatprep.subr.msk.mxu1 %vm8680_vm0, %v18635_v49 }
 0x482   : > { %16621 = vmatpush3.msk.msra.mxu1 %vm8680_vm0, %v18635_v49  ;;  %v10546_v45 = vpop.permute.xlu1 %10545 }
 0x483   : > { %16623 = vmatmul.mubr.msk.f32.vlgmr.msra.gmra.mxu1 %vm8673_vm1, %v16000_v16  ;;  %v10271_v58 = vpop.permute.xlu0 %10270 }
 0x484   : > { %v18643_v24 = vsel %vm4137_vm14, %v10269_v34, %v10271_v58  ;;  %v18647_v33 = vsel %vm4137_vm14, %v10271_v58, %v18628_v56  ;;  %10436 = vmatprep.mubr.f32.mxu1 %v19888_v1 }
 0x485   : > { %16018 = vmatprep.subr.msk.mxu1 %vm8680_vm0, %v18643_v24  ;;  %16625 = vmatprep.subr.msk.mxu0 %vm8680_vm0, %v18647_v33 }
 0x486   : > { %16019 = vmatpush1.msk.msra.mxu1 %vm8680_vm0, %v18652_v18  ;;  %16626 = vmatpush3.msk.msra.mxu0 %vm8680_vm0, %v18647_v33 }
 0x487   : > { %16020 = vmatmul.mubr.msk.f32.vlgmr.msra.gmra.mxu1 %vm8673_vm1, %v16012_v17  ;;  %16628 = vmatmul.mubr.msk.f32.vlgmr.msra.gmra.mxu0 %vm8673_vm1, %v16013_v22 }
 0x488   : > { %v10815_v50 = vpop.permute.xlu1 %10814  ;;  %16027 = vmatprep.subr.msk.mxu1 %vm8680_vm0, %v18663_v48  ;;  %v10544_v43 = vpop.permute.xlu0 %10543  ;;  %10442 = vmatprep.mubr.f32.mxu1 %v19888_v1 }
 0x489   : > { %v18671_v62 = vsel %vm4827_vm8, %v10542_v10, %v10544_v43  ;;  %v18674_v51 = vsel %vm4827_vm8, %v10544_v43, %v10546_v45  ;;  %10711 = vmatprep.mubr.f32.mxu0 %v19888_v1 }
 0x48a   : > { %16031 = vmatprep.subr.msk.mxu0 %vm8680_vm0, %v18674_v51 }
 0x48b   : > { %16032 = vmatpush1.msk.msra.mxu0 %vm8680_vm0, %v18671_v62  ;;  %16021 = vmatmul.mubr.msk.f32.gmra.mxu1 %vm8673_vm1, %v16013_v22 }
 0x48c   : > { %v10813_v55 = vpop.permute.xlu1 %10812  ;;  %16033 = vmatmul.mubr.msk.f32.vlgmr.msra.gmra.mxu0 %vm8673_vm1, %v16025_v54  ;;  %v10538_v39 = vpop.permute.xlu0 %10537  ;;  %10634 = vmatprep.mubr.f32.mxu1 %v19888_v1 }
 0x48d   : > { %v10549_v6 = vsel %vm4827_vm8, %v10538_v39, %v10540_v15  ;;  %10717 = vmatprep.mubr.f32.mxu0 %v19888_v1  ;;  %v10825_v37 = vsel %vm10824_vm5, %v10813_v55, %v10815_v50  ;;  %v16052_v55 = vld [vmem:[%s19845_s3 + $0x98] sm:$0xff] }
 0x48e   : > { %16028 = vmatpush1.msk.msra.mxu1 %vm8680_vm0, %v10549_v6 }
 0x48f   : > { %16029 = vmatmul.mubr.msk.f32.vlgmr.msra.gmra.mxu1 %vm8673_vm1, %v16025_v54 }
 0x490   : > { %v10819_v4 = vpop.permute.xlu1 %10818  ;;  %16034 = vmatmul.mubr.msk.f32.gmra.mxu0 %vm8673_vm1, %v16026_v52  ;;  %v10817_v31 = vpop.permute.xlu0 %10816  ;;  %10640 = vmatprep.mubr.f32.mxu1 %v19888_v1 }
 0x491   : > { %v18697_v30 = vsel %vm10824_vm5, %v10815_v50, %v10817_v31  ;;  %10910 = vmatprep.mubr.f32.mxu0 %v19888_v1  ;;  %v18738_v17 = vsel %vm10824_vm5, %v10817_v31, %v10819_v4 }
 0x492   : > { %16040 = vmatprep.subr.msk.mxu0 %vm8680_vm0, %v18697_v30 }
 0x493   : > { %16041 = vmatpush1.msk.msra.mxu0 %vm8680_vm0, %v10825_v37  ;;  %16030 = vmatmul.mubr.msk.f32.gmra.mxu1 %vm8673_vm1, %v16026_v52 }
 0x494   : > { %v18708_v42 = vpop.permute.xlu1 %10822  ;;  %16042 = vmatmul.mubr.msk.f32.vlgmr.msra.gmra.mxu0 %vm8673_vm1, %v16038_v44  ;;  %v18711_v11 = vpop.permute.xlu0 %10547  ;;  %16632 = vmatprep.mubr.msk.f32.mxu1 %vm8673_vm1, %v16025_v54 }
 0x495   : > { %v18716_v59 = vsel %vm4827_vm8, %v10546_v45, %v18711_v11  ;;  %10916 = vmatprep.mubr.f32.mxu0 %v19888_v1  ;;  %v16051_v45 = vld [vmem:[%s19845_s3 + $0x90] sm:$0xff] }
 0x496   : > { %16630 = vmatprep.subr.msk.mxu1 %vm8680_vm0, %v18716_v59 }
 0x497   : > { %16631 = vmatpush3.msk.msra.mxu1 %vm8680_vm0, %v18716_v59 }
 0x498   : > { %v11097_v41 = vpop.permute.xlu1 %11096  ;;  %16633 = vmatmul.mubr.msk.f32.vlgmr.msra.gmra.mxu1 %vm8673_vm1, %v16026_v52  ;;  %16043 = vmatmul.mubr.msk.f32.gmra.mxu0 %vm8673_vm1, %v16039_v8 }
 0x499   : > { %v10821_v13 = vpop.permute.xlu0 %10820  ;;  %10987 = vmatprep.mubr.f32.mxu1 %v19888_v1  ;;  %16637 = vmatprep.mubr.msk.f32.mxu0 %vm8673_vm1, %v16038_v44 }
 0x49a   : > { %v18731_v25 = vsel %vm10824_vm5, %v10819_v4, %v10821_v13  ;;  %v18735_v16 = vsel %vm10824_vm5, %v10821_v13, %v18708_v42  ;;  %v16064_v4 = vld [vmem:[%s19845_s3 + $0xa0] sm:$0xff] }
 0x49b   : > { %16044 = vmatprep.subr.msk.mxu1 %vm8680_vm0, %v18731_v25  ;;  %16635 = vmatprep.subr.msk.mxu0 %vm8680_vm0, %v18735_v16 }
 0x49c   : > { %16045 = vmatpush1.msk.msra.mxu1 %vm8680_vm0, %v18738_v17  ;;  %16636 = vmatpush3.msk.msra.mxu0 %vm8680_vm0, %v18735_v16 }
 0x49d   : > { %v11091_v22 = vpop.permute.xlu1 %11090  ;;  %16046 = vmatmul.mubr.msk.f32.vlgmr.msra.gmra.mxu1 %vm8673_vm1, %v16038_v44  ;;  %16638 = vmatmul.mubr.msk.f32.vlgmr.msra.gmra.mxu0 %vm8673_vm1, %v16039_v8 }
 0x49e   : > { %v11095_v28 = vpop.permute.xlu0 %11094  ;;  %10993 = vmatprep.mubr.f32.mxu1 %v19888_v1  ;;  %11263 = vmatprep.mubr.f32.mxu0 %v19888_v1 }
 0x49f   : > { %v18753_v15 = vsel %vm11100_vm7, %v11095_v28, %v11097_v41 }
 0x4a0   : > { %16057 = vmatprep.subr.msk.mxu0 %vm8680_vm0, %v18753_v15 }
 0x4a1   : > { %v18757_v34 = vpop.permute.xlu1 %11098  ;;  %16047 = vmatmul.mubr.msk.f32.gmra.mxu1 %vm8673_vm1, %v16039_v8  ;;  %v16065_v8 = vld [vmem:[%s19845_s3 + $0xa8] sm:$0xff] }
 0x4a2   : > { %v11093_v10 = vpop.permute.xlu0 %11092  ;;  %11186 = vmatprep.mubr.f32.mxu1 %v19888_v1  ;;  %v18791_v6 = vsel %vm11100_vm7, %v11097_v41, %v18757_v34 }
 0x4a3   : > { %v18765_v58 = vsel %vm11100_vm7, %v11091_v22, %v11093_v10  ;;  %v18768_v50 = vsel %vm11100_vm7, %v11093_v10, %v11095_v28  ;;  %v16078_v28 = vld [vmem:[%s19845_s3 + $0xb8] sm:$0xff] }
 0x4a4   : > { %16053 = vmatprep.subr.msk.mxu1 %vm8680_vm0, %v18765_v58  ;;  %16058 = vmatpush1.msk.msra.mxu0 %vm8680_vm0, %v18768_v50 }
 0x4a5   : > { %16059 = vmatmul.mubr.msk.f32.vlgmr.msra.gmra.mxu0 %vm8673_vm1, %v16051_v45  ;;  %16066 = vmatprep.subr.msk.mxu0 %vm8680_vm0, %v18232_v12  ;;  %v18777_v43 = vpop.permute.xlu1 %11869 }
 0x4a6   : > { %16067 = vmatpush1.msk.msra.mxu0 %vm8680_vm0, %v18224_v35  ;;  %v11089_v54 = vpop.permute.xlu0 %11088  ;;  %11269 = vmatprep.mubr.f32.mxu0 %v19888_v1 }
 0x4a7   : > { %v11101_v39 = vsel %vm11100_vm7, %v11089_v54, %v11091_v22  ;;  %16645 = vmatprep.subr.msk.mxu0 %vm8680_vm0, %v18324_v9  ;;  %v16103_v54 = vld [vmem:[%s19845_s3 + $0xd0] sm:$0xff] }
 0x4a8   : > { %16054 = vmatpush1.msk.msra.mxu1 %vm8680_vm0, %v11101_v39  ;;  %v16104_v39 = vld [vmem:[%s19845_s3 + $0xd8] sm:$0xff] }
 0x4a9   : > { %16055 = vmatmul.mubr.msk.f32.vlgmr.msra.gmra.mxu1 %vm8673_vm1, %v16051_v45  ;;  %16060 = vmatmul.mubr.msk.f32.gmra.mxu0 %vm8673_vm1, %v16052_v55  ;;  %v18795_v35 = vpop.permute.xlu1 %12379 }
 0x4aa   : > { %19891 = vst [vmem:[#allocation6_spill] sm:$0xff] %v18795_v35  ;;  %16640 = vmatprep.subr.msk.mxu1 %vm8680_vm0, %v18791_v6  ;;  %v18799_v52 = vpop.permute.xlu0 %11614  ;;  %11192 = vmatprep.mubr.f32.mxu1 %v19888_v1 }
 0x4ab   : > { %16641 = vmatpush3.msk.msra.mxu1 %vm8680_vm0, %v18791_v6  ;;  %11436 = vmatprep.mubr.f32.mxu0 %v19888_v1  ;;  %v18819_v44 = vsel %vm696_vm4, %v18329_v57, %v18799_v52 }
 0x4ac   : > { %16070 = vmatprep.subr.msk.mxu1 %vm8680_vm0, %v18248_v47 }
 0x4ad   : > { %16056 = vmatmul.mubr.msk.f32.gmra.mxu1 %vm8673_vm1, %v16052_v55  ;;  %16068 = vmatmul.mubr.msk.f32.vlgmr.msra.gmra.mxu0 %vm8673_vm1, %v16064_v4 }
 0x4ae   : > { %16646 = vmatpush3.msk.msra.mxu0 %vm8680_vm0, %v18324_v9  ;;  %v18814_v31 = vpop.permute.xlu1 %12888  ;;  %v18821_v37 = vpop.permute.xlu0 %12124  ;;  %16642 = vmatprep.mubr.msk.f32.mxu1 %vm8673_vm1, %v16051_v45  ;;  %v16091_v45 = vld [vmem:[%s19845_s3 + $0xc8] sm:$0xff] }
 0x4af   : > { %16083 = vmatprep.subr.msk.mxu0 %vm8680_vm0, %v18819_v44  ;;  %11442 = vmatprep.mubr.f32.mxu0 %v19888_v1 }
 0x4b1   : > { %16643 = vmatmul.mubr.msk.f32.vlgmr.msra.gmra.mxu1 %vm8673_vm1, %v16052_v55  ;;  %16069 = vmatmul.mubr.msk.f32.gmra.mxu0 %vm8673_vm1, %v16065_v8 }
 0x4b2   : > { %16071 = vmatpush1.msk.msra.mxu1 %vm8680_vm0, %v18241_v60  ;;  %v13395_v57 = vpop.permute.xlu1 %13394  ;;  %v18834_v41 = vpop.permute.xlu0 %12635  ;;  %11513 = vmatprep.mubr.f32.mxu1 %v19888_v1 }
 0x4b3   : > { %v18839_v13 = vsel %vm10824_vm5, %v18708_v42, %v13395_v57  ;;  %16079 = vmatprep.subr.msk.mxu1 %vm8680_vm0, %v18340_v40  ;;  %16647 = vmatprep.mubr.msk.f32.mxu0 %vm8673_vm1, %v16064_v4  ;;  %v16077_v42 = vld [vmem:[%s19845_s3 + $0xb0] sm:$0xff]  ;;  %v16116_v57 = vld [vmem:[%s19845_s3 + $0xe0] sm:$0xff] }
 0x4b5   : > { %16072 = vmatmul.mubr.msk.f32.vlgmr.msra.gmra.mxu1 %vm8673_vm1, %v16064_v4  ;;  %16648 = vmatmul.mubr.msk.f32.vlgmr.msra.gmra.mxu0 %vm8673_vm1, %v16065_v8 }
 0x4b6   : > { %16080 = vmatpush1.msk.msra.mxu1 %vm8680_vm0, %v18306_v32  ;;  %16084 = vmatpush1.msk.msra.mxu0 %vm8680_vm0, %v18337_v21  ;;  %v18850_v22 = vpop.permute.xlu0 %13141 }
 0x4b7   : > { %16650 = vmatprep.subr.msk.mxu1 %vm8680_vm0, %v18799_v52  ;;  %16092 = vmatprep.subr.msk.mxu0 %vm8680_vm0, %v18437_v27 }
 0x4b8   : > { %11519 = vmatprep.mubr.f32.mxu1 %v19888_v1  ;;  %11768 = vmatprep.mubr.f32.mxu0 %v19888_v1 }
 0x4b9   : > { %16073 = vmatmul.mubr.msk.f32.gmra.mxu1 %vm8673_vm1, %v16065_v8  ;;  %16085 = vmatmul.mubr.msk.f32.vlgmr.msra.gmra.mxu0 %vm8673_vm1, %v16077_v42 }
 0x4ba   : > { %16093 = vmatpush1.msk.msra.mxu0 %vm8680_vm0, %v18357_v46  ;;  %v13648_v32 = vpop.permute.xlu0 %13647  ;;  %11691 = vmatprep.mubr.f32.mxu1 %v19888_v1  ;;  %v18883_v46 = vsel %vm1378_vm6, %v18399_v61, %v18777_v43  ;;  %v18899_v61 = vsel %vm9450_vm2, %v18421_v3, %v18821_v37 }
 0x4bb   : > { %16655 = vmatprep.subr.msk.mxu0 %vm8680_vm0, %v18777_v43  ;;  %v18873_v10 = vsel %vm11100_vm7, %v18757_v34, %v13648_v32  ;;  %11774 = vmatprep.mubr.f32.mxu0 %v19888_v1  ;;  %v16090_v34 = vld [vmem:[%s19845_s3 + $0xc0] sm:$0xff]  ;;  %19892 = vst [vmem:[#allocation8_spill] sm:$0xff] %v18899_v61 }
 0x4bd   : > { %16081 = vmatmul.mubr.msk.f32.vlgmr.msra.gmra.mxu1 %vm8673_vm1, %v16077_v42  ;;  %16086 = vmatmul.mubr.msk.f32.gmra.mxu0 %vm8673_vm1, %v16078_v28 }
 0x4be   : > { %16651 = vmatpush3.msk.msra.mxu1 %vm8680_vm0, %v18799_v52  ;;  %11697 = vmatprep.mubr.f32.mxu1 %v19888_v1 }
 0x4bf   : > { %16096 = vmatprep.subr.msk.mxu1 %vm8680_vm0, %v18883_v46  ;;  %11946 = vmatprep.mubr.f32.mxu0 %v19888_v1 }
 0x4c1   : > { %16082 = vmatmul.mubr.msk.f32.gmra.mxu1 %vm8673_vm1, %v16078_v28  ;;  %16094 = vmatmul.mubr.msk.f32.vlgmr.msra.gmra.mxu0 %vm8673_vm1, %v16090_v34 }
 0x4c2   : > { %16656 = vmatpush3.msk.msra.mxu0 %vm8680_vm0, %v18777_v43  ;;  %16652 = vmatprep.mubr.msk.f32.mxu1 %vm8673_vm1, %v16077_v42 }
 0x4c3   : > { %16109 = vmatprep.subr.msk.mxu0 %vm8680_vm0, %v18899_v61  ;;  %11952 = vmatprep.mubr.f32.mxu0 %v19888_v1 }
 0x4c5   : > { %16653 = vmatmul.mubr.msk.f32.vlgmr.msra.gmra.mxu1 %vm8673_vm1, %v16078_v28  ;;  %16095 = vmatmul.mubr.msk.f32.gmra.mxu0 %vm8673_vm1, %v16091_v45 }
 0x4c6   : > { %16097 = vmatpush1.msk.msra.mxu1 %vm8680_vm0, %v18407_v26  ;;  %12023 = vmatprep.mubr.f32.mxu1 %v19888_v1 }
 0x4c7   : > { %16105 = vmatprep.subr.msk.mxu1 %vm8680_vm0, %v18463_v0  ;;  %16657 = vmatprep.mubr.msk.f32.mxu0 %vm8673_vm1, %v16090_v34 }
 0x4c8   : > { %v8757_v3 = vpop.f32.mrf.mxu0 }
 0x4c9   : > { %16098 = vmatmul.mubr.msk.f32.vlgmr.msra.gmra.mxu1 %vm8673_vm1, %v16090_v34  ;;  %16658 = vmatmul.mubr.msk.f32.vlgmr.msra.gmra.mxu0 %vm8673_vm1, %v16091_v45 }
 0x4ca   : > { %16106 = vmatpush1.msk.msra.mxu1 %vm8680_vm0, %v18442_v20  ;;  %16110 = vmatpush1.msk.msra.mxu0 %vm8680_vm0, %v18430_v38  ;;  %v18925_v55 = vpop.f32.mrf.mxu0 }
 0x4cb   : > { %16660 = vmatprep.subr.msk.mxu1 %vm8680_vm0, %v18821_v37  ;;  %16118 = vmatprep.subr.msk.mxu0 %vm8680_vm0, %v18537_v29 }
 0x4cc   : > { %12029 = vmatprep.mubr.f32.mxu1 %v19888_v1  ;;  %12278 = vmatprep.mubr.f32.mxu0 %v19888_v1  ;;  %v8763_v20 = vpop.f32.mrf.mxu0 }
 0x4cd   : > { %16099 = vmatmul.mubr.msk.f32.gmra.mxu1 %vm8673_vm1, %v16091_v45  ;;  %16111 = vmatmul.mubr.msk.f32.vlgmr.msra.gmra.mxu0 %vm8673_vm1, %v16103_v54 }
 0x4ce   : > { %16119 = vmatpush1.msk.msra.mxu0 %vm8680_vm0, %v18460_v36  ;;  %12201 = vmatprep.mubr.f32.mxu1 %v19888_v1  ;;  %v18941_v4 = vpop.f32.mrf.mxu0  ;;  %v18953_v36 = vsel %vm9723_vm3, %v18497_v53, %v18795_v35  ;;  %v16117_v53 = vld [vmem:[%s19845_s3 + $0xe8] sm:$0xff] }
 0x4cf   : > { %16665 = vmatprep.subr.msk.mxu0 %vm8680_vm0, %v18795_v35  ;;  %12284 = vmatprep.mubr.f32.mxu0 %v19888_v1  ;;  %19893 = vst [vmem:[#allocation5_spill] sm:$0xff] %v18953_v36 }
 0x4d1   : > { %16107 = vmatmul.mubr.msk.f32.vlgmr.msra.gmra.mxu1 %vm8673_vm1, %v16103_v54  ;;  %16112 = vmatmul.mubr.msk.f32.gmra.mxu0 %vm8673_vm1, %v16104_v39  ;;  %v8834_v8 = vpop.f32.mrf.mxu1 }
 0x4d2   : > { %16661 = vmatpush3.msk.msra.mxu1 %vm8680_vm0, %v18821_v37  ;;  %12207 = vmatprep.mubr.f32.mxu1 %v19888_v1  ;;  %v16599_v42 = vpop.f32.mrf.mxu0 }
 0x4d3   : > { %16122 = vmatprep.subr.msk.mxu1 %vm8680_vm0, %v18953_v36  ;;  %12456 = vmatprep.mubr.f32.mxu0 %v19888_v1  ;;  %v18962_v32 = vpop.f32.mrf.mxu1 }
 0x4d4   : > { %v18964_v28 = vpop.f32.mrf.mxu0 }
 0x4d5   : > { %16108 = vmatmul.mubr.msk.f32.gmra.mxu1 %vm8673_vm1, %v16104_v39  ;;  %16120 = vmatmul.mubr.msk.f32.vlgmr.msra.gmra.mxu0 %vm8673_vm1, %v16116_v57 }
 0x4d6   : > { %16666 = vmatpush3.msk.msra.mxu0 %vm8680_vm0, %v18795_v35  ;;  %16662 = vmatprep.mubr.msk.f32.mxu1 %vm8673_vm1, %v16103_v54 }
 0x4d7   : > { %16135 = vmatprep.subr.msk.mxu0 %vm8680_vm0, %v18635_v49  ;;  %12462 = vmatprep.mubr.f32.mxu0 %v19888_v1  ;;  %v9079_v34 = vpop.f32.mrf.mxu0  ;;  %v8840_v45 = vpop.f32.mrf.mxu1 }
 0x4d8   : > { %v9080_v36 = vadd.f32 %v9079_v34, %v8834_v8 }
 0x4d9   : > { %16663 = vmatmul.mubr.msk.f32.vlgmr.msra.gmra.mxu1 %vm8673_vm1, %v16104_v39  ;;  %16121 = vmatmul.mubr.msk.f32.gmra.mxu0 %vm8673_vm1, %v16117_v53  ;;  %v18979_v29 = vpop.f32.mrf.mxu0  ;;  %v18981_v35 = vpop.f32.mrf.mxu1 }
 0x4da   : > { %16123 = vmatpush1.msk.msra.mxu1 %vm8680_vm0, %v18509_v7  ;;  %12533 = vmatprep.mubr.f32.mxu1 %v19888_v1  ;;  %v12637_v7 = vsel %vm3447_vm12, %v18630_v63, %v18834_v41 }
 0x4db   : > { %16131 = vmatprep.subr.msk.mxu1 %vm8680_vm0, %v18570_v2  ;;  %16667 = vmatprep.mubr.msk.f32.mxu0 %vm8673_vm1, %v16116_v57  ;;  %v9085_v49 = vpop.f32.mrf.mxu0  ;;  %v9002_v54 = vpop.f32.mrf.mxu1  ;;  %v16129_v2 = vld [vmem:[%s19845_s3 + $0xf0] sm:$0xff] }
 0x4dc   : > { %v9086_v8 = vadd.f32 %v9085_v49, %v8840_v45  ;;  %v9003_v39 = vadd.f32 %v9002_v54, %v8757_v3 }
 0x4dd   : > { %16124 = vmatmul.mubr.msk.f32.vlgmr.msra.gmra.mxu1 %vm8673_vm1, %v16116_v57  ;;  %16668 = vmatmul.mubr.msk.f32.vlgmr.msra.gmra.mxu0 %vm8673_vm1, %v16117_v53  ;;  %v18991_v34 = vpop.f32.mrf.mxu0  ;;  %v18993_v61 = vpop.f32.mrf.mxu1 }
 0x4de   : > { %16132 = vmatpush1.msk.msra.mxu1 %vm8680_vm0, %v18543_v14  ;;  %16136 = vmatpush1.msk.msra.mxu0 %vm8680_vm0, %v18534_v19 }
 0x4df   : > { %16670 = vmatprep.subr.msk.mxu1 %vm8680_vm0, %v12637_v7  ;;  %16144 = vmatprep.subr.msk.mxu0 %vm8680_vm0, %v18652_v18  ;;  %v9264_v3 = vpop.f32.mrf.mxu0  ;;  %v9008_v57 = vpop.f32.mrf.mxu1  ;;  %v12890_v18 = vsel %vm4137_vm14, %v18628_v56, %v18814_v31  ;;  %v16142_v31 = vld [vmem:[%s19845_s3 + $0x100] sm:$0xff] }
 0x4e0   : > { %12539 = vmatprep.mubr.f32.mxu1 %v19888_v1  ;;  %12787 = vmatprep.mubr.f32.mxu0 %v19888_v1  ;;  %v9427_v63 = vadd.f32 %v9264_v3, %v9003_v39  ;;  %v9009_v14 = vadd.f32 %v9008_v57, %v8763_v20  ;;  %v16130_v20 = vld [vmem:[%s19845_s3 + $0xf8] sm:$0xff] }
 0x4e1   : > { %16125 = vmatmul.mubr.msk.f32.gmra.mxu1 %vm8673_vm1, %v16117_v53  ;;  %16137 = vmatmul.mubr.msk.f32.vlgmr.msra.gmra.mxu0 %vm8673_vm1, %v16129_v2  ;;  %v19012_v19 = vpop.f32.mrf.mxu0  ;;  %v19014_v41 = vpop.f32.mrf.mxu1 }
 0x4e2   : > { %16145 = vmatpush1.msk.msra.mxu0 %vm8680_vm0, %v18566_v5  ;;  %12710 = vmatprep.mubr.f32.mxu1 %v19888_v1 }
 0x4e3   : > { %16675 = vmatprep.subr.msk.mxu0 %vm8680_vm0, %v12890_v18  ;;  %12793 = vmatprep.mubr.f32.mxu0 %v19888_v1  ;;  %v9270_v53 = vpop.f32.mrf.mxu0  ;;  %v16604_v45 = vpop.f32.mrf.mxu1 }
 0x4e4   : > { %v9432_v49 = vadd.f32 %v9270_v53, %v9009_v14  ;;  %v9162_v54 = vadd.f32 %v16604_v45, %v16599_v42  ;;  %v16143_v14 = vld [vmem:[%s19845_s3 + $0x108] sm:$0xff] }
 0x4e5   : > { %16133 = vmatmul.mubr.msk.f32.vlgmr.msra.gmra.mxu1 %vm8673_vm1, %v16129_v2  ;;  %16138 = vmatmul.mubr.msk.f32.gmra.mxu0 %vm8673_vm1, %v16130_v20  ;;  %v19029_v56 = vpop.f32.mrf.mxu0  ;;  %v9156_v5 = vpop.f32.mrf.mxu1 }
 0x4e6   : > { %16671 = vmatpush3.msk.msra.mxu1 %vm8680_vm0, %v12637_v7  ;;  %12716 = vmatprep.mubr.f32.mxu1 %v19888_v1 }
 0x4e7   : > { %16148 = vmatprep.subr.msk.mxu1 %vm8680_vm0, %v18647_v33  ;;  %12963 = vmatprep.mubr.f32.mxu0 %v19888_v1  ;;  %v9341_v42 = vpop.f32.mrf.mxu1 }
 0x4e8   : > { %v16609_v39 = vpop.f32.mrf.mxu0  ;;  %v9429_v3 = vadd.f32 %v9341_v42, %v9080_v36 }
 0x4e9   : > { %16134 = vmatmul.mubr.msk.f32.gmra.mxu1 %vm8673_vm1, %v16130_v20  ;;  %16146 = vmatmul.mubr.msk.f32.vlgmr.msra.gmra.mxu0 %vm8673_vm1, %v16142_v31  ;;  %v9436_v57 = vadd.f32 %v16609_v39, %v9162_v54  ;;  %v9343_v7 = vpop.f32.mrf.mxu1 }
 0x4ea   : > { %16676 = vmatpush3.msk.msra.mxu0 %vm8680_vm0, %v12890_v18  ;;  %16672 = vmatprep.mubr.msk.f32.mxu1 %vm8673_vm1, %v16129_v2  ;;  %v9418_v33 = vpop.f32.mrf.mxu0 }
 0x4eb   : > { %16161 = vmatprep.subr.msk.mxu0 %vm8680_vm0, %v18716_v59  ;;  %12969 = vmatprep.mubr.f32.mxu0 %v19888_v1 }
 0x4ec   : > { %v9347_v36 = vpop.f32.mrf.mxu1 }
 0x4ed   : > { %16673 = vmatmul.mubr.msk.f32.vlgmr.msra.gmra.mxu1 %vm8673_vm1, %v16130_v20  ;;  %16147 = vmatmul.mubr.msk.f32.gmra.mxu0 %vm8673_vm1, %v16143_v14  ;;  %v9614_v53 = vpop.f32.mrf.mxu0  ;;  %v9434_v45 = vadd.f32 %v9347_v36, %v9086_v8 }
 0x4ee   : > { %16149 = vmatpush1.msk.msra.mxu1 %vm8680_vm0, %v18643_v24  ;;  %13040 = vmatprep.mubr.f32.mxu1 %v19888_v1  ;;  %v19054_v2 = vadd.f32 %v9614_v53, %v9429_v3  ;;  %v9349_v18 = vpop.f32.mrf.mxu1  ;;  %v13143_v24 = vsel %vm4827_vm8, %v18711_v11, %v18850_v22  ;;  %v9082_v11 = vadd.f32 %v18979_v29, %v18962_v32  ;;  %v16156_v29 = vld [vmem:[%s19845_s3 + $0x118] sm:$0xff] }
 0x4ef   : > { %16157 = vmatprep.subr.msk.mxu1 %vm8680_vm0, %v18671_v62  ;;  %16677 = vmatprep.mubr.msk.f32.mxu0 %vm8673_vm1, %v16142_v31  ;;  %v9616_v59 = vpop.f32.mrf.mxu0  ;;  %v16155_v62 = vld [vmem:[%s19845_s3 + $0x110] sm:$0xff] }
 0x4f0   : > { %v9537_v54 = vpop.f32.mrf.mxu1 }
 0x4f1   : > { %16150 = vmatmul.mubr.msk.f32.vlgmr.msra.gmra.mxu1 %vm8673_vm1, %v16142_v31  ;;  %16678 = vmatmul.mubr.msk.f32.vlgmr.msra.gmra.mxu0 %vm8673_vm1, %v16143_v14  ;;  %v9620_v8 = vpop.f32.mrf.mxu0  ;;  %v9700_v20 = vadd.f32 %v9537_v54, %v9427_v63 }
 0x4f2   : > { %16158 = vmatpush1.msk.msra.mxu1 %vm8680_vm0, %v18663_v48  ;;  %16162 = vmatpush1.msk.msra.mxu0 %vm8680_vm0, %v18674_v51  ;;  %v19071_v42 = vadd.f32 %v9620_v8, %v9434_v45  ;;  %v9539_v31 = vpop.f32.mrf.mxu1  ;;  %v9157_v48 = vadd.f32 %v9156_v5, %v18964_v28  ;;  %v9011_v45 = vadd.f32 %v19014_v41, %v18941_v4 }
 0x4f3   : > { %16680 = vmatprep.subr.msk.mxu1 %vm8680_vm0, %v13143_v24  ;;  %16170 = vmatprep.subr.msk.mxu0 %vm8680_vm0, %v18738_v17  ;;  %v9622_v63 = vpop.f32.mrf.mxu0 }
 0x4f4   : > { %13046 = vmatprep.mubr.f32.mxu1 %v19888_v1  ;;  %13293 = vmatprep.mubr.f32.mxu0 %v19888_v1  ;;  %v9543_v51 = vpop.f32.mrf.mxu1  ;;  %v9431_v5 = vadd.f32 %v9418_v33, %v9157_v48 }
 0x4f5   : > { %16151 = vmatmul.mubr.msk.f32.gmra.mxu1 %vm8673_vm1, %v16143_v14  ;;  %16163 = vmatmul.mubr.msk.f32.vlgmr.msra.gmra.mxu0 %vm8673_vm1, %v16155_v62  ;;  %v9810_v22 = vpop.f32.mrf.mxu0  ;;  %v9705_v39 = vadd.f32 %v9543_v51, %v9432_v49  ;;  %v9430_v49 = vadd.f32 %v9343_v7, %v9082_v11  ;;  %v9005_v14 = vadd.f32 %v18993_v61, %v18925_v55  ;;  %v16168_v7 = vld [vmem:[%s19845_s3 + $0x120] sm:$0xff] }
 0x4f6   : > { %16171 = vmatpush1.msk.msra.mxu0 %vm8680_vm0, %v18697_v30  ;;  %13216 = vmatprep.mubr.f32.mxu1 %v19888_v1  ;;  %v19089_v17 = vadd.f32 %v9810_v22, %v9700_v20  ;;  %v9545_v32 = vpop.f32.mrf.mxu1  ;;  %v9088_v30 = vadd.f32 %v18991_v34, %v18981_v35 }
 0x4f7   : > { %16685 = vmatprep.subr.msk.mxu0 %vm8680_vm0, %v18839_v13  ;;  %13299 = vmatprep.mubr.f32.mxu0 %v19888_v1  ;;  %v9812_v28 = vpop.f32.mrf.mxu0  ;;  %v9703_v55 = vadd.f32 %v9616_v59, %v9430_v49 }
 0x4f8   : > { %v16614_v3 = vpop.f32.mrf.mxu1  ;;  %v9435_v54 = vadd.f32 %v9349_v18, %v9088_v30 }
 0x4f9   : > { %16159 = vmatmul.mubr.msk.f32.vlgmr.msra.gmra.mxu1 %vm8673_vm1, %v16155_v62  ;;  %16164 = vmatmul.mubr.msk.f32.gmra.mxu0 %vm8673_vm1, %v16156_v29  ;;  %v9816_v36 = vpop.f32.mrf.mxu0  ;;  %v9709_v53 = vadd.f32 %v16614_v3, %v9436_v57  ;;  %v9428_v57 = vadd.f32 %v19012_v19, %v9005_v14 }
 0x4fa   : > { %16681 = vmatpush3.msk.msra.mxu1 %vm8680_vm0, %v13143_v24  ;;  %13222 = vmatprep.mubr.f32.mxu1 %v19888_v1  ;;  %v19105_v33 = vadd.f32 %v9816_v36, %v9705_v39  ;;  %v9691_v35 = vpop.f32.mrf.mxu1  ;;  %v9433_v24 = vadd.f32 %v19029_v56, %v9011_v45 }
 0x4fb   : > { %16174 = vmatprep.subr.msk.mxu1 %vm8680_vm0, %v18735_v16  ;;  %13469 = vmatprep.mubr.f32.mxu0 %v19888_v1  ;;  %v9818_v61 = vpop.f32.mrf.mxu0  ;;  %v9704_v34 = vadd.f32 %v9691_v35, %v9431_v5  ;;  %v16169_v16 = vld [vmem:[%s19845_s3 + $0x128] sm:$0xff]  ;;  %v9701_v11 = vadd.f32 %v9539_v31, %v9428_v57  ;;  %v14151_v57 = vpop.permute.xlu1 %14150 }
 0x4fc   : > { %v9706_v39 = vadd.f32 %v9545_v32, %v9433_v24 }
 0x4fd   : > { %16160 = vmatmul.mubr.msk.f32.gmra.mxu1 %vm8673_vm1, %v16156_v29  ;;  %16172 = vmatmul.mubr.msk.f32.vlgmr.msra.gmra.mxu0 %vm8673_vm1, %v16168_v7  ;;  %v16619_v8 = vpop.f32.mrf.mxu0  ;;  %v9887_v20 = vpop.f32.mrf.mxu1 }
 0x4fe   : > { %16686 = vmatpush3.msk.msra.mxu0 %vm8680_vm0, %v18839_v13  ;;  %16682 = vmatprep.mubr.msk.f32.mxu1 %vm8673_vm1, %v16155_v62  ;;  %v19121_v19 = vadd.f32 %v16619_v8, %v9709_v53  ;;  %v9975_v4 = vadd.f32 %v9887_v20, %v19054_v2  ;;  %v9708_v62 = vadd.f32 %v9622_v63, %v9435_v54  ;;  %v16234_v8 = vld [vmem:[%s19845_s3 + $0x178] sm:$0xff]  ;;  %v19897_v20 = vld [vmem:[#allocation6_spill] sm:$0xff] }
 0x4ff   : > { %16187 = vmatprep.subr.msk.mxu0 %vm8680_vm0, %v18791_v6  ;;  %13475 = vmatprep.mubr.f32.mxu0 %v19888_v1  ;;  %v9964_v41 = vpop.f32.mrf.mxu0  ;;  %v9889_v18 = vpop.f32.mrf.mxu1  ;;  %v15167_v6 = vld [vmem:[%s19846_s4] sm:$0xff]  ;;  %v9979_v3 = vadd.f32 %v9818_v61, %v9706_v39 }
 0x500   : > { %v19127_v59 = vadd.f32 %v9964_v41, %v9704_v34  ;;  %v9976_v13 = vadd.f32 %v9889_v18, %v9703_v55  ;;  %15171 = vperm.xlu1 %16764, %v15167_v6   ;;  %v16194_v34 = vld [vmem:[%s19845_s3 + $0x140] sm:$0xff]  ;;  %v16247_v41 = vld [vmem:[%s19845_s3 + $0x188] sm:$0xff]  ;;  %v19898_v18 = vld [vmem:[#allocation5_spill] sm:$0xff] }
 0x501   : > { %16683 = vmatmul.mubr.msk.f32.vlgmr.msra.gmra.mxu1 %vm8673_vm1, %v16156_v29  ;;  %16173 = vmatmul.mubr.msk.f32.gmra.mxu0 %vm8673_vm1, %v16169_v16  ;;  %v10163_v48 = vpop.f32.mrf.mxu0 }
 0x502   : > { %16175 = vmatpush1.msk.msra.mxu1 %vm8680_vm0, %v18731_v25  ;;  %13546 = vmatprep.mubr.f32.mxu1 %v19888_v1  ;;  %v19138_v2 = vadd.f32 %v10163_v48, %v9975_v4  ;;  %v9893_v51 = vpop.f32.mrf.mxu1  ;;  %v9974_v25 = vadd.f32 %v9812_v28, %v9701_v11  ;;  %v16246_v4 = vld [vmem:[%s19845_s3 + $0x180] sm:$0xff] }
 0x503   : > { %16183 = vmatprep.subr.msk.mxu1 %vm8680_vm0, %v18768_v50  ;;  %16687 = vmatprep.mubr.msk.f32.mxu0 %vm8673_vm1, %v16168_v7  ;;  %v9980_v56 = vadd.f32 %v9893_v51, %v19071_v42  ;;  %v10165_v31 = vpop.f32.mrf.mxu0  ;;  %v16181_v50 = vld [vmem:[%s19845_s3 + $0x130] sm:$0xff] }
 0x504   : > { %v19144_v63 = vadd.f32 %v10165_v31, %v9976_v13  ;;  %v9895_v22 = vpop.f32.mrf.mxu1 }
 0x505   : > { %16176 = vmatmul.mubr.msk.f32.vlgmr.msra.gmra.mxu1 %vm8673_vm1, %v16168_v7  ;;  %16688 = vmatmul.mubr.msk.f32.vlgmr.msra.gmra.mxu0 %vm8673_vm1, %v16169_v16  ;;  %v9981_v29 = vadd.f32 %v9895_v22, %v9708_v62  ;;  %v10169_v5 = vpop.f32.mrf.mxu0 }
 0x506   : > { %16184 = vmatpush1.msk.msra.mxu1 %vm8680_vm0, %v18765_v58  ;;  %16188 = vmatpush1.msk.msra.mxu0 %vm8680_vm0, %v18753_v15  ;;  %v19155_v42 = vadd.f32 %v10169_v5, %v9980_v56  ;;  %v10086_v49 = vpop.f32.mrf.mxu1 }
 0x507   : > { %16690 = vmatprep.subr.msk.mxu1 %vm8680_vm0, %v18873_v10  ;;  %16196 = vmatprep.subr.msk.mxu0 %vm8680_vm0, %v18241_v60  ;;  %v10249_v32 = vadd.f32 %v10086_v49, %v19089_v17  ;;  %v10171_v28 = vpop.f32.mrf.mxu0  ;;  %v16182_v60 = vld [vmem:[%s19845_s3 + $0x138] sm:$0xff] }
 0x508   : > { %13552 = vmatprep.mubr.f32.mxu1 %v19888_v1  ;;  %13799 = vmatprep.mubr.f32.mxu0 %v19888_v1  ;;  %v19164_v15 = vadd.f32 %v10171_v28, %v9981_v29  ;;  %v10088_v58 = vpop.f32.mrf.mxu1 }
 0x509   : > { %16177 = vmatmul.mubr.msk.f32.gmra.mxu1 %vm8673_vm1, %v16169_v16  ;;  %16189 = vmatmul.mubr.msk.f32.vlgmr.msra.gmra.mxu0 %vm8673_vm1, %v16181_v50  ;;  %v10250_v30 = vadd.f32 %v10088_v58, %v9974_v25  ;;  %v10361_v14 = vpop.f32.mrf.mxu0 }
 0x50a   : > { %16197 = vmatpush1.msk.msra.mxu0 %vm8680_vm0, %v18232_v12  ;;  %13722 = vmatprep.mubr.f32.mxu1 %v19888_v1  ;;  %v19174_v17 = vadd.f32 %v10361_v14, %v10249_v32  ;;  %v10092_v36 = vpop.f32.mrf.mxu1 }
 0x50b   : > { %16695 = vmatprep.subr.msk.mxu0 %vm8680_vm0, %v18552_v23  ;;  %13805 = vmatprep.mubr.f32.mxu0 %v19888_v1  ;;  %v10254_v53 = vadd.f32 %v10092_v36, %v19105_v33  ;;  %v10363_v7 = vpop.f32.mrf.mxu0 }
 0x50c   : > { %v19180_v35 = vadd.f32 %v10363_v7, %v10250_v30  ;;  %v10094_v12 = vpop.f32.mrf.mxu1 }
 0x50d   : > { %16185 = vmatmul.mubr.msk.f32.vlgmr.msra.gmra.mxu1 %vm8673_vm1, %v16181_v50  ;;  %16190 = vmatmul.mubr.msk.f32.gmra.mxu0 %vm8673_vm1, %v16182_v60  ;;  %v10255_v61 = vadd.f32 %v10094_v12, %v9979_v3  ;;  %v10367_v55 = vpop.f32.mrf.mxu0 }
 0x50e   : > { %16691 = vmatpush3.msk.msra.mxu1 %vm8680_vm0, %v18873_v10  ;;  %13728 = vmatprep.mubr.f32.mxu1 %v19888_v1  ;;  %v19190_v33 = vadd.f32 %v10367_v55, %v10254_v53  ;;  %v14152_v10 = vsel %vm696_vm4, %v18799_v52, %v14151_v57  ;;  %v16221_v52 = vld [vmem:[%s19845_s3 + $0x168] sm:$0xff] }
 0x50f   : > { %16200 = vmatprep.subr.msk.mxu1 %vm8680_vm0, %v18324_v9  ;;  %13972 = vmatprep.mubr.f32.mxu0 %v19888_v1  ;;  %v10369_v45 = vpop.f32.mrf.mxu0  ;;  %v16195_v9 = vld [vmem:[%s19845_s3 + $0x148] sm:$0xff] }
 0x510   : > { %v19195_v54 = vadd.f32 %v10369_v45, %v10255_v61 }
 0x511   : > { %16186 = vmatmul.mubr.msk.f32.gmra.mxu1 %vm8673_vm1, %v16182_v60  ;;  %16198 = vmatmul.mubr.msk.f32.vlgmr.msra.gmra.mxu0 %vm8673_vm1, %v16194_v34 }
 0x512   : > { %16696 = vmatpush3.msk.msra.mxu0 %vm8680_vm0, %v18552_v23  ;;  %16692 = vmatprep.mubr.msk.f32.mxu1 %vm8673_vm1, %v16181_v50  ;;  %v14661_v23 = vpop.permute.xlu1 %14660 }
 0x513   : > { %16213 = vmatprep.subr.msk.mxu0 %vm8680_vm0, %v14152_v10  ;;  %13978 = vmatprep.mubr.f32.mxu0 %v19888_v1 }
 0x515   : > { %16693 = vmatmul.mubr.msk.f32.vlgmr.msra.gmra.mxu1 %vm8673_vm1, %v16182_v60  ;;  %16199 = vmatmul.mubr.msk.f32.gmra.mxu0 %vm8673_vm1, %v16195_v9 }
 0x516   : > { %16201 = vmatpush1.msk.msra.mxu1 %vm8680_vm0, %v18248_v47  ;;  %14049 = vmatprep.mubr.f32.mxu1 %v19888_v1  ;;  %v16207_v47 = vld [vmem:[%s19845_s3 + $0x150] sm:$0xff] }
 0x517   : > { %16209 = vmatprep.subr.msk.mxu1 %vm8680_vm0, %v18337_v21  ;;  %16697 = vmatprep.mubr.msk.f32.mxu0 %vm8673_vm1, %v16194_v34  ;;  %v14406_v21 = vpop.permute.xlu0 %14405 }
 0x519   : > { %16202 = vmatmul.mubr.msk.f32.vlgmr.msra.gmra.mxu1 %vm8673_vm1, %v16194_v34  ;;  %16698 = vmatmul.mubr.msk.f32.vlgmr.msra.gmra.mxu0 %vm8673_vm1, %v16195_v9 }
 0x51a   : > { %16210 = vmatpush1.msk.msra.mxu1 %vm8680_vm0, %v18340_v40  ;;  %16214 = vmatpush1.msk.msra.mxu0 %vm8680_vm0, %v18819_v44  ;;  %v16208_v40 = vld [vmem:[%s19845_s3 + $0x158] sm:$0xff]  ;;  %v19894_v44 = vld [vmem:[#allocation8_spill] sm:$0xff] }
 0x51b   : > { %16700 = vmatprep.subr.msk.mxu1 %vm8680_vm0, %v14151_v57  ;;  %16222 = vmatprep.subr.msk.mxu0 %vm8680_vm0, %v18407_v26  ;;  %v14407_v26 = vsel %vm1378_vm6, %v18777_v43, %v14406_v21  ;;  %v14662_v43 = vsel %vm9450_vm2, %v18821_v37, %v14661_v23  ;;  %v16233_v37 = vld [vmem:[%s19845_s3 + $0x170] sm:$0xff]  ;;  %vm15382_vm6 = vcmask 138240  }
 0x51c   : > { %14055 = vmatprep.mubr.f32.mxu1 %v19888_v1  ;;  %14304 = vmatprep.mubr.f32.mxu0 %v19888_v1 }
 0x51d   : > { %16203 = vmatmul.mubr.msk.f32.gmra.mxu1 %vm8673_vm1, %v16195_v9  ;;  %16215 = vmatmul.mubr.msk.f32.vlgmr.msra.gmra.mxu0 %vm8673_vm1, %v16207_v47 }
 0x51e   : > { %16223 = vmatpush1.msk.msra.mxu0 %vm8680_vm0, %v18437_v27  ;;  %14227 = vmatprep.mubr.f32.mxu1 %v19888_v1  ;;  %v16220_v27 = vld [vmem:[%s19845_s3 + $0x160] sm:$0xff] }
 0x51f   : > { %16705 = vmatprep.subr.msk.mxu0 %vm8680_vm0, %v14406_v21  ;;  %14310 = vmatprep.mubr.f32.mxu0 %v19888_v1 }
 0x521   : > { %16211 = vmatmul.mubr.msk.f32.vlgmr.msra.gmra.mxu1 %vm8673_vm1, %v16207_v47  ;;  %16216 = vmatmul.mubr.msk.f32.gmra.mxu0 %vm8673_vm1, %v16208_v40 }
 0x522   : > { %16701 = vmatpush3.msk.msra.mxu1 %vm8680_vm0, %v14151_v57  ;;  %14233 = vmatprep.mubr.f32.mxu1 %v19888_v1 }
 0x523   : > { %16226 = vmatprep.subr.msk.mxu1 %vm8680_vm0, %v14407_v26  ;;  %14482 = vmatprep.mubr.f32.mxu0 %v19888_v1 }
 0x525   : > { %16212 = vmatmul.mubr.msk.f32.gmra.mxu1 %vm8673_vm1, %v16208_v40  ;;  %16224 = vmatmul.mubr.msk.f32.vlgmr.msra.gmra.mxu0 %vm8673_vm1, %v16220_v27 }
 0x526   : > { %16706 = vmatpush3.msk.msra.mxu0 %vm8680_vm0, %v14406_v21  ;;  %16702 = vmatprep.mubr.msk.f32.mxu1 %vm8673_vm1, %v16207_v47 }
 0x527   : > { %16239 = vmatprep.subr.msk.mxu0 %vm8680_vm0, %v14662_v43  ;;  %14488 = vmatprep.mubr.f32.mxu0 %v19888_v1 }
 0x529   : > { %16703 = vmatmul.mubr.msk.f32.vlgmr.msra.gmra.mxu1 %vm8673_vm1, %v16208_v40  ;;  %16225 = vmatmul.mubr.msk.f32.gmra.mxu0 %vm8673_vm1, %v16221_v52 }
 0x52a   : > { %16227 = vmatpush1.msk.msra.mxu1 %vm8680_vm0, %v18883_v46  ;;  %14559 = vmatprep.mubr.f32.mxu1 %v19888_v1  ;;  %v19895_v46 = vld [vmem:[#allocation3_spill] sm:$0xff] }
 0x52b   : > { %16235 = vmatprep.subr.msk.mxu1 %vm8680_vm0, %v18430_v38  ;;  %16707 = vmatprep.mubr.msk.f32.mxu0 %vm8673_vm1, %v16220_v27  ;;  %v14916_v38 = vpop.permute.xlu0 %14915 }
 0x52c   : > { %v14917_v16 = vsel %vm9723_vm3, %v19897_v20, %v14916_v38 }
 0x52d   : > { %16228 = vmatmul.mubr.msk.f32.vlgmr.msra.gmra.mxu1 %vm8673_vm1, %v16220_v27  ;;  %16708 = vmatmul.mubr.msk.f32.vlgmr.msra.gmra.mxu0 %vm8673_vm1, %v16221_v52 }
 0x52e   : > { %16236 = vmatpush1.msk.msra.mxu1 %vm8680_vm0, %v18463_v0  ;;  %16240 = vmatpush1.msk.msra.mxu0 %vm8680_vm0, %v19894_v44  ;;  %v19896_v0 = vld [vmem:[#allocation2_spill] sm:$0xff] }
 0x52f   : > { %16710 = vmatprep.subr.msk.mxu1 %vm8680_vm0, %v14661_v23  ;;  %16248 = vmatprep.subr.msk.mxu0 %vm8680_vm0, %v19895_v46 }
 0x530   : > { %14565 = vmatprep.mubr.f32.mxu1 %v19888_v1  ;;  %14814 = vmatprep.mubr.f32.mxu0 %v19888_v1 }
 0x531   : > { %16229 = vmatmul.mubr.msk.f32.gmra.mxu1 %vm8673_vm1, %v16221_v52  ;;  %16241 = vmatmul.mubr.msk.f32.vlgmr.msra.gmra.mxu0 %vm8673_vm1, %v16233_v37 }
 0x532   : > { %16249 = vmatpush1.msk.msra.mxu0 %vm8680_vm0, %v19896_v0  ;;  %14737 = vmatprep.mubr.f32.mxu1 %v19888_v1 }
 0x533   : > { %16715 = vmatprep.subr.msk.mxu0 %vm8680_vm0, %v14916_v38  ;;  %14820 = vmatprep.mubr.f32.mxu0 %v19888_v1 }
 0x535   : > { %16237 = vmatmul.mubr.msk.f32.vlgmr.msra.gmra.mxu1 %vm8673_vm1, %v16233_v37  ;;  %16242 = vmatmul.mubr.msk.f32.gmra.mxu0 %vm8673_vm1, %v16234_v8 }
 0x536   : > { %16711 = vmatpush3.msk.msra.mxu1 %vm8680_vm0, %v14661_v23  ;;  %14743 = vmatprep.mubr.f32.mxu1 %v19888_v1 }
 0x537   : > { %16252 = vmatprep.subr.msk.mxu1 %vm8680_vm0, %v14917_v16  ;;  %14992 = vmatprep.mubr.f32.mxu0 %v19888_v1 }
 0x539   : > { %16238 = vmatmul.mubr.msk.f32.gmra.mxu1 %vm8673_vm1, %v16234_v8  ;;  %16250 = vmatmul.mubr.msk.f32.vlgmr.msra.gmra.mxu0 %vm8673_vm1, %v16246_v4 }
 0x53a   : > { %16716 = vmatpush3.msk.msra.mxu0 %vm8680_vm0, %v14916_v38  ;;  %16712 = vmatprep.mubr.msk.f32.mxu1 %vm8673_vm1, %v16233_v37 }
 0x53b   : > { %14998 = vmatprep.mubr.f32.mxu0 %v19888_v1 }
 0x53d   : > { %16713 = vmatmul.mubr.msk.f32.vlgmr.msra.gmra.mxu1 %vm8673_vm1, %v16234_v8  ;;  %16251 = vmatmul.mubr.msk.f32.gmra.mxu0 %vm8673_vm1, %v16247_v41 }
 0x53e   : > { %16253 = vmatpush1.msk.msra.mxu1 %vm8680_vm0, %v19898_v18  ;;  %15069 = vmatprep.mubr.f32.mxu1 %v19888_v1 }
 0x53f   : > { %16717 = vmatprep.mubr.msk.f32.mxu0 %vm8673_vm1, %v16246_v4 }
 0x541   : > { %16254 = vmatmul.mubr.msk.f32.vlgmr.msra.gmra.mxu1 %vm8673_vm1, %v16246_v4  ;;  %16718 = vmatmul.mubr.msk.f32.vlgmr.msra.gmra.mxu0 %vm8673_vm1, %v16247_v41 }
 0x542   : > { %15075 = vmatprep.mubr.f32.mxu1 %v19888_v1 }
 0x543   : > { %v16624_v13 = vpop.f32.mrf.mxu1 }
 0x544   : > { %v10258_v24 = vadd.f32 %v16624_v13, %v19121_v19 }
 0x545   : > { %16255 = vmatmul.mubr.msk.f32.gmra.mxu1 %vm8673_vm1, %v16247_v41  ;;  %v10240_v62 = vpop.f32.mrf.mxu1 }
 0x546   : > { %v10253_v11 = vadd.f32 %v10240_v62, %v19127_v59 }
 0x547   : > { %v10438_v48 = vpop.f32.mrf.mxu1  ;;  %v16629_v6 = vpop.f32.mrf.mxu0 }
 0x548   : > { %v10526_v51 = vadd.f32 %v10438_v48, %v19138_v2  ;;  %v10533_v56 = vadd.f32 %v16629_v6, %v10258_v24 }
 0x549   : > { %v10440_v31 = vpop.f32.mrf.mxu1  ;;  %v10515_v22 = vpop.f32.mrf.mxu0 }
 0x54a   : > { %v10527_v25 = vadd.f32 %v10440_v31, %v19144_v63  ;;  %v10528_v39 = vadd.f32 %v10515_v22, %v10253_v11 }
 0x54b   : > { %v10444_v29 = vpop.f32.mrf.mxu1 }
 0x54c   : > { %v10531_v1 = vadd.f32 %v10444_v29, %v19155_v42  ;;  %v10713_v5 = vpop.f32.mrf.mxu0 }
 0x54d   : > { %v10801_v19 = vadd.f32 %v10713_v5, %v10526_v51  ;;  %v10446_v50 = vpop.f32.mrf.mxu1 }
 0x54e   : > { %v10532_v49 = vadd.f32 %v10446_v50, %v19164_v15  ;;  %v10715_v32 = vpop.f32.mrf.mxu0 }
 0x54f   : > { %v10802_v59 = vadd.f32 %v10715_v32, %v10527_v25  ;;  %v10636_v28 = vpop.f32.mrf.mxu1 }
 0x550   : > { %v10799_v58 = vadd.f32 %v10636_v28, %v19174_v17  ;;  %v10719_v2 = vpop.f32.mrf.mxu0 }
 0x551   : > { %v10806_v3 = vadd.f32 %v10719_v2, %v10531_v1  ;;  %v10638_v30 = vpop.f32.mrf.mxu1 }
 0x552   : > { %v10800_v14 = vadd.f32 %v10638_v30, %v19180_v35  ;;  %v10721_v63 = vpop.f32.mrf.mxu0 }
 0x553   : > { %v10807_v60 = vadd.f32 %v10721_v63, %v10532_v49  ;;  %v10642_v36 = vpop.f32.mrf.mxu1 }
 0x554   : > { %v10804_v42 = vadd.f32 %v10642_v36, %v19190_v33  ;;  %v10912_v53 = vpop.f32.mrf.mxu0 }
 0x555   : > { %v11075_v7 = vadd.f32 %v10912_v53, %v10799_v58  ;;  %v10644_v12 = vpop.f32.mrf.mxu1 }
 0x556   : > { %v10805_v15 = vadd.f32 %v10644_v12, %v19195_v54  ;;  %v10914_v61 = vpop.f32.mrf.mxu0 }
 0x557   : > { %v11076_v55 = vadd.f32 %v10914_v61, %v10800_v14 }
 0x558   : > { %v16634_v34 = vpop.f32.mrf.mxu1  ;;  %v10918_v57 = vpop.f32.mrf.mxu0 }
 0x559   : > { %v10808_v17 = vadd.f32 %v16634_v34, %v10533_v56  ;;  %v11080_v45 = vadd.f32 %v10918_v57, %v10804_v42 }
 0x55a   : > { %v10790_v10 = vpop.f32.mrf.mxu1  ;;  %v10920_v9 = vpop.f32.mrf.mxu0 }
 0x55b   : > { %v10803_v47 = vadd.f32 %v10790_v10, %v10528_v39  ;;  %v11081_v35 = vadd.f32 %v10920_v9, %v10805_v15 }
 0x55d   : > { %v10989_v21 = vpop.f32.mrf.mxu1  ;;  %v16639_v40 = vpop.f32.mrf.mxu0 }
 0x55e   : > { %v11077_v26 = vadd.f32 %v10989_v21, %v10801_v19  ;;  %v11084_v27 = vadd.f32 %v16639_v40, %v10808_v17 }
 0x55f   : > { %v10991_v33 = vpop.f32.mrf.mxu1  ;;  %v11066_v23 = vpop.f32.mrf.mxu0 }
 0x560   : > { %v11078_v43 = vadd.f32 %v10991_v33, %v10802_v59  ;;  %v11079_v52 = vadd.f32 %v11066_v23, %v10803_v47 }
 0x561   : > { %v10995_v44 = vpop.f32.mrf.mxu1 }
 0x562   : > { %v11082_v54 = vadd.f32 %v10995_v44, %v10806_v3 }
 0x563   : > { %v10997_v37 = vpop.f32.mrf.mxu1 }
 0x564   : > { %v11083_v46 = vadd.f32 %v10997_v37, %v10807_v60 }
 0x565   : > { %v11265_v38 = vpop.f32.mrf.mxu0 }
 0x566   : > { %v11353_v0 = vadd.f32 %v11265_v38, %v11077_v26 }
 0x567   : > { %v11267_v8 = vpop.f32.mrf.mxu0 }
 0x568   : > { %v11354_v20 = vadd.f32 %v11267_v8, %v11078_v43 }
 0x569   : > { %v11188_v16 = vpop.f32.mrf.mxu1  ;;  %v11271_v4 = vpop.f32.mrf.mxu0 }
 0x56a   : > { %v11351_v41 = vadd.f32 %v11188_v16, %v11075_v7  ;;  %v11358_v18 = vadd.f32 %v11271_v4, %v11082_v54 }
 0x56b   : > { %v11190_v13 = vpop.f32.mrf.mxu1  ;;  %v11273_v24 = vpop.f32.mrf.mxu0 }
 0x56c   : > { %v11352_v62 = vadd.f32 %v11190_v13, %v11076_v55  ;;  %v11359_v11 = vadd.f32 %v11273_v24, %v11083_v46 }
 0x56d   : > { %v11194_v48 = vpop.f32.mrf.mxu1  ;;  %v11438_v6 = vpop.f32.mrf.mxu0 }
 0x56e   : > { %v11356_v51 = vadd.f32 %v11194_v48, %v11080_v45  ;;  %v11601_v56 = vadd.f32 %v11438_v6, %v11351_v41 }
 0x56f   : > { %v11196_v31 = vpop.f32.mrf.mxu1  ;;  %v11440_v22 = vpop.f32.mrf.mxu0 }
 0x570   : > { %v11357_v25 = vadd.f32 %v11196_v31, %v11081_v35  ;;  %v11602_v39 = vadd.f32 %v11440_v22, %v11352_v62 }
 0x571   : > { %v16644_v29 = vpop.f32.mrf.mxu1  ;;  %v11444_v1 = vpop.f32.mrf.mxu0 }
 0x572   : > { %v11360_v5 = vadd.f32 %v16644_v29, %v11084_v27  ;;  %v11606_v19 = vadd.f32 %v11444_v1, %v11356_v51 }
 0x573   : > { %v11342_v50 = vpop.f32.mrf.mxu1  ;;  %v11446_v49 = vpop.f32.mrf.mxu0 }
 0x574   : > { %v11355_v32 = vadd.f32 %v11342_v50, %v11079_v52  ;;  %v11607_v59 = vadd.f32 %v11446_v49, %v11357_v25 }
 0x575   : > { %v11515_v28 = vpop.f32.mrf.mxu1  ;;  %v16649_v58 = vpop.f32.mrf.mxu0 }
 0x576   : > { %v11603_v2 = vadd.f32 %v11515_v28, %v11353_v0  ;;  %v11610_v3 = vadd.f32 %v16649_v58, %v11360_v5 }
 0x577   : > { %v11517_v30 = vpop.f32.mrf.mxu1  ;;  %v11592_v14 = vpop.f32.mrf.mxu0 }
 0x578   : > { %v11604_v63 = vadd.f32 %v11517_v30, %v11354_v20  ;;  %v11605_v60 = vadd.f32 %v11592_v14, %v11355_v32 }
 0x579   : > { %v11521_v36 = vpop.f32.mrf.mxu1  ;;  %v11770_v42 = vpop.f32.mrf.mxu0 }
 0x57a   : > { %v11608_v53 = vadd.f32 %v11521_v36, %v11358_v18  ;;  %v11858_v7 = vadd.f32 %v11770_v42, %v11603_v2 }
 0x57b   : > { %v11523_v12 = vpop.f32.mrf.mxu1  ;;  %v11772_v15 = vpop.f32.mrf.mxu0 }
 0x57c   : > { %v11609_v61 = vadd.f32 %v11523_v12, %v11359_v11  ;;  %v11859_v55 = vadd.f32 %v11772_v15, %v11604_v63 }
 0x57d   : > { %v11693_v34 = vpop.f32.mrf.mxu1  ;;  %v11776_v57 = vpop.f32.mrf.mxu0 }
 0x57e   : > { %v11856_v17 = vadd.f32 %v11693_v34, %v11601_v56  ;;  %v11863_v45 = vadd.f32 %v11776_v57, %v11608_v53 }
 0x57f   : > { %v11695_v10 = vpop.f32.mrf.mxu1  ;;  %v11778_v9 = vpop.f32.mrf.mxu0 }
 0x580   : > { %v11857_v47 = vadd.f32 %v11695_v10, %v11602_v39  ;;  %v11864_v35 = vadd.f32 %v11778_v9, %v11609_v61 }
 0x581   : > { %v11699_v21 = vpop.f32.mrf.mxu1  ;;  %v11948_v40 = vpop.f32.mrf.mxu0 }
 0x582   : > { %v11861_v26 = vadd.f32 %v11699_v21, %v11606_v19  ;;  %v12111_v27 = vadd.f32 %v11948_v40, %v11856_v17 }
 0x583   : > { %v11701_v33 = vpop.f32.mrf.mxu1  ;;  %v11950_v23 = vpop.f32.mrf.mxu0 }
 0x584   : > { %v11862_v43 = vadd.f32 %v11701_v33, %v11607_v59  ;;  %v12112_v52 = vadd.f32 %v11950_v23, %v11857_v47 }
 0x585   : > { %v16654_v44 = vpop.f32.mrf.mxu1  ;;  %v11954_v54 = vpop.f32.mrf.mxu0 }
 0x586   : > { %v11865_v37 = vadd.f32 %v16654_v44, %v11610_v3  ;;  %v12116_v46 = vadd.f32 %v11954_v54, %v11861_v26 }
 0x587   : > { %v11847_v38 = vpop.f32.mrf.mxu1  ;;  %v11956_v0 = vpop.f32.mrf.mxu0 }
 0x588   : > { %v11860_v8 = vadd.f32 %v11847_v38, %v11605_v60  ;;  %v12117_v20 = vadd.f32 %v11956_v0, %v11862_v43 }
 0x589   : > { %v12025_v16 = vpop.f32.mrf.mxu1  ;;  %v16659_v4 = vpop.f32.mrf.mxu0 }
 0x58a   : > { %v12113_v41 = vadd.f32 %v12025_v16, %v11858_v7  ;;  %v12120_v18 = vadd.f32 %v16659_v4, %v11865_v37 }
 0x58b   : > { %v12027_v13 = vpop.f32.mrf.mxu1  ;;  %v12102_v24 = vpop.f32.mrf.mxu0 }
 0x58c   : > { %v12114_v62 = vadd.f32 %v12027_v13, %v11859_v55  ;;  %v12115_v11 = vadd.f32 %v12102_v24, %v11860_v8 }
 0x58d   : > { %v12031_v48 = vpop.f32.mrf.mxu1  ;;  %v12280_v6 = vpop.f32.mrf.mxu0 }
 0x58e   : > { %v12118_v51 = vadd.f32 %v12031_v48, %v11863_v45  ;;  %v12368_v56 = vadd.f32 %v12280_v6, %v12113_v41 }
 0x58f   : > { %v12033_v31 = vpop.f32.mrf.mxu1  ;;  %v12282_v22 = vpop.f32.mrf.mxu0 }
 0x590   : > { %v12119_v25 = vadd.f32 %v12033_v31, %v11864_v35  ;;  %v12369_v39 = vadd.f32 %v12282_v22, %v12114_v62 }
 0x591   : > { %v12203_v29 = vpop.f32.mrf.mxu1  ;;  %v12286_v1 = vpop.f32.mrf.mxu0 }
 0x592   : > { %v12366_v5 = vadd.f32 %v12203_v29, %v12111_v27  ;;  %v12373_v19 = vadd.f32 %v12286_v1, %v12118_v51 }
 0x593   : > { %v12205_v50 = vpop.f32.mrf.mxu1  ;;  %v12288_v49 = vpop.f32.mrf.mxu0 }
 0x594   : > { %v12367_v32 = vadd.f32 %v12205_v50, %v12112_v52  ;;  %v12374_v59 = vadd.f32 %v12288_v49, %v12119_v25 }
 0x595   : > { %v12209_v28 = vpop.f32.mrf.mxu1  ;;  %v12458_v58 = vpop.f32.mrf.mxu0 }
 0x596   : > { %v12371_v2 = vadd.f32 %v12209_v28, %v12116_v46  ;;  %v12621_v3 = vadd.f32 %v12458_v58, %v12366_v5 }
 0x597   : > { %v12211_v30 = vpop.f32.mrf.mxu1  ;;  %v12460_v14 = vpop.f32.mrf.mxu0 }
 0x598   : > { %v12372_v63 = vadd.f32 %v12211_v30, %v12117_v20  ;;  %v12622_v60 = vadd.f32 %v12460_v14, %v12367_v32 }
 0x599   : > { %v16664_v36 = vpop.f32.mrf.mxu1  ;;  %v12464_v42 = vpop.f32.mrf.mxu0 }
 0x59a   : > { %v12375_v53 = vadd.f32 %v16664_v36, %v12120_v18  ;;  %v12626_v7 = vadd.f32 %v12464_v42, %v12371_v2 }
 0x59b   : > { %v12357_v12 = vpop.f32.mrf.mxu1  ;;  %v12466_v15 = vpop.f32.mrf.mxu0 }
 0x59c   : > { %v12370_v61 = vadd.f32 %v12357_v12, %v12115_v11  ;;  %v12627_v55 = vadd.f32 %v12466_v15, %v12372_v63 }
 0x59d   : > { %v12535_v34 = vpop.f32.mrf.mxu1  ;;  %v16669_v57 = vpop.f32.mrf.mxu0 }
 0x59e   : > { %v12623_v17 = vadd.f32 %v12535_v34, %v12368_v56  ;;  %v12630_v45 = vadd.f32 %v16669_v57, %v12375_v53 }
 0x59f   : > { %v12537_v10 = vpop.f32.mrf.mxu1  ;;  %v12612_v9 = vpop.f32.mrf.mxu0 }
 0x5a0   : > { %v12624_v47 = vadd.f32 %v12537_v10, %v12369_v39  ;;  %v12625_v35 = vadd.f32 %v12612_v9, %v12370_v61 }
 0x5a1   : > { %v12541_v21 = vpop.f32.mrf.mxu1  ;;  %v12789_v40 = vpop.f32.mrf.mxu0 }
 0x5a2   : > { %v12628_v26 = vadd.f32 %v12541_v21, %v12373_v19  ;;  %v12877_v27 = vadd.f32 %v12789_v40, %v12623_v17 }
 0x5a3   : > { %v12543_v33 = vpop.f32.mrf.mxu1  ;;  %v12791_v23 = vpop.f32.mrf.mxu0 }
 0x5a4   : > { %v12629_v43 = vadd.f32 %v12543_v33, %v12374_v59  ;;  %v12878_v52 = vadd.f32 %v12791_v23, %v12624_v47 }
 0x5a5   : > { %v12712_v44 = vpop.f32.mrf.mxu1  ;;  %v12795_v54 = vpop.f32.mrf.mxu0 }
 0x5a6   : > { %v12875_v37 = vadd.f32 %v12712_v44, %v12621_v3  ;;  %v12882_v46 = vadd.f32 %v12795_v54, %v12628_v26 }
 0x5a7   : > { %v12714_v38 = vpop.f32.mrf.mxu1  ;;  %v12797_v0 = vpop.f32.mrf.mxu0 }
 0x5a8   : > { %v12876_v8 = vadd.f32 %v12714_v38, %v12622_v60  ;;  %v12883_v20 = vadd.f32 %v12797_v0, %v12629_v43 }
 0x5a9   : > { %v12718_v16 = vpop.f32.mrf.mxu1  ;;  %v12965_v4 = vpop.f32.mrf.mxu0 }
 0x5aa   : > { %v12880_v41 = vadd.f32 %v12718_v16, %v12626_v7  ;;  %v19334_v18 = vadd.f32 %v12965_v4, %v12875_v37 }
 0x5ab   : > { %v12720_v13 = vpop.f32.mrf.mxu1  ;;  %v12967_v24 = vpop.f32.mrf.mxu0 }
 0x5ac   : > { %v12881_v62 = vadd.f32 %v12720_v13, %v12627_v55  ;;  %v19336_v11 = vadd.f32 %v12967_v24, %v12876_v8 }
 0x5ad   : > { %v16674_v48 = vpop.f32.mrf.mxu1  ;;  %v12971_v6 = vpop.f32.mrf.mxu0 }
 0x5ae   : > { %v12884_v51 = vadd.f32 %v16674_v48, %v12630_v45  ;;  %v19338_v56 = vadd.f32 %v12971_v6, %v12880_v41 }
 0x5af   : > { %v12866_v31 = vpop.f32.mrf.mxu1  ;;  %v12973_v22 = vpop.f32.mrf.mxu0 }
 0x5b0   : > { %v12879_v25 = vadd.f32 %v12866_v31, %v12625_v35  ;;  %v19340_v39 = vadd.f32 %v12973_v22, %v12881_v62 }
 0x5b1   : > { %v13042_v29 = vpop.f32.mrf.mxu1  ;;  %v16679_v1 = vpop.f32.mrf.mxu0 }
 0x5b2   : > { %v19342_v5 = vadd.f32 %v13042_v29, %v12877_v27  ;;  %v19344_v19 = vadd.f32 %v16679_v1, %v12884_v51 }
 0x5b3   : > { %v13044_v50 = vpop.f32.mrf.mxu1  ;;  %v13119_v49 = vpop.f32.mrf.mxu0 }
 0x5b4   : > { %v19346_v32 = vadd.f32 %v13044_v50, %v12878_v52  ;;  %v19348_v59 = vadd.f32 %v13119_v49, %v12879_v25 }
 0x5b5   : > { %v13048_v28 = vpop.f32.mrf.mxu1  ;;  %v19350_v58 = vpop.f32.mrf.mxu0 }
 0x5b6   : > { %v19352_v2 = vadd.f32 %v13048_v28, %v12882_v46 }
 0x5b7   : > { %v13050_v3 = vpop.f32.mrf.mxu1  ;;  %v19354_v30 = vpop.f32.mrf.mxu0 }
 0x5b8   : > { %v19356_v14 = vadd.f32 %v13050_v3, %v12883_v20 }
 0x5b9   : > { %v13218_v63 = vpop.f32.mrf.mxu1  ;;  %v13301_v60 = vpop.f32.mrf.mxu0 }
 0x5bb   : > { %v13220_v36 = vpop.f32.mrf.mxu1  ;;  %v19358_v42 = vpop.f32.mrf.mxu0 }
 0x5bd   : > { %v13224_v53 = vpop.f32.mrf.mxu1  ;;  %v13471_v7 = vpop.f32.mrf.mxu0 }
 0x5bf   : > { %v19360_v12 = vpop.f32.mrf.mxu1  ;;  %v13473_v15 = vpop.f32.mrf.mxu0 }
 0x5c1   : > { %v16684_v61 = vpop.f32.mrf.mxu1  ;;  %v19362_v55 = vpop.f32.mrf.mxu0 }
 0x5c3   : > { %v19364_v34 = vpop.f32.mrf.mxu1  ;;  %v19366_v57 = vpop.f32.mrf.mxu0 }
 0x5c5   : > { %v13548_v17 = vpop.f32.mrf.mxu1  ;;  %v19368_v45 = vpop.f32.mrf.mxu0 }
 0x5c7   : > { %v19370_v10 = vpop.f32.mrf.mxu1  ;;  %v19372_v9 = vpop.f32.mrf.mxu0 }
 0x5c9   : > { %v19374_v47 = vpop.f32.mrf.mxu1  ;;  %v19376_v35 = vpop.f32.mrf.mxu0 }
 0x5cb   : > { %v19378_v21 = vpop.f32.mrf.mxu1  ;;  %v19380_v40 = vpop.f32.mrf.mxu0 }
 0x5cd   : > { %v13724_v26 = vpop.f32.mrf.mxu1  ;;  %v19382_v27 = vpop.f32.mrf.mxu0 }
 0x5cf   : > { %v13726_v33 = vpop.f32.mrf.mxu1  ;;  %v19384_v23 = vpop.f32.mrf.mxu0 }
 0x5d1   : > { %v19386_v43 = vpop.f32.mrf.mxu1  ;;  %v13974_v52 = vpop.f32.mrf.mxu0 }
 0x5d3   : > { %v19388_v44 = vpop.f32.mrf.mxu1  ;;  %v13976_v54 = vpop.f32.mrf.mxu0 }
 0x5d5   : > { %v19390_v37 = vpop.f32.mrf.mxu1  ;;  %v19392_v46 = vpop.f32.mrf.mxu0 }
 0x5d7   : > { %v19394_v38 = vpop.f32.mrf.mxu1  ;;  %v19396_v0 = vpop.f32.mrf.mxu0 }
 0x5d9   : > { %v19398_v8 = vpop.f32.mrf.mxu1  ;;  %v19400_v20 = vpop.f32.mrf.mxu0 }
 0x5db   : > { %v19402_v16 = vpop.f32.mrf.mxu1  ;;  %v19404_v4 = vpop.f32.mrf.mxu0 }
 0x5dc   : > { %19899 = vst [vmem:[#allocation4_spill] sm:$0xff] %v19404_v4 }
 0x5dd   : > { %v19406_v41 = vpop.f32.mrf.mxu1  ;;  %v19408_v13 = vpop.f32.mrf.mxu0 }
 0x5df   : > { %v19410_v24 = vpop.f32.mrf.mxu1  ;;  %v19412_v62 = vpop.f32.mrf.mxu0 }
 0x5e0   : > { %19900 = vst [vmem:[#allocation9_spill] sm:$0xff] %v19410_v24  ;;  %19901 = vst [vmem:[#allocation10_spill] sm:$0xff] %v19412_v62 }
 0x5e1   : > { %v14229_v48 = vpop.f32.mrf.mxu1  ;;  %v19414_v6 = vpop.f32.mrf.mxu0 }
 0x5e2   : > { %19902 = vst [vmem:[#allocation14_spill] sm:$0xff] %v19414_v6 }
 0x5e3   : > { %v14231_v51 = vpop.f32.mrf.mxu1  ;;  %v19416_v31 = vpop.f32.mrf.mxu0 }
 0x5e4   : > { %19903 = vst [vmem:[#allocation7_spill] sm:$0xff] %v19416_v31 }
 0x5e5   : > { %v19418_v22 = vpop.f32.mrf.mxu1  ;;  %v14484_v25 = vpop.f32.mrf.mxu0 }
 0x5e6   : > { %19904 = vst [vmem:[#allocation12_spill] sm:$0xff] %v19418_v22  ;;  %v13382_v22 = vadd.f32 %v13220_v36, %v19336_v11 }
 0x5e7   : > { %v19420_v29 = vpop.f32.mrf.mxu1  ;;  %v14486_v1 = vpop.f32.mrf.mxu0 }
 0x5e8   : > { %19905 = vst [vmem:[#allocation15_spill] sm:$0xff] %v19420_v29  ;;  %v13381_v29 = vadd.f32 %v13218_v63, %v19334_v18  ;;  %v13389_v18 = vadd.f32 %v19358_v42, %v19356_v14  ;;  %v13387_v63 = vadd.f32 %v19360_v12, %v19340_v39 }
 0x5e9   : > { %v19422_v50 = vpop.f32.mrf.mxu1  ;;  %v19424_v49 = vpop.f32.mrf.mxu0 }
 0x5ea   : > { %19906 = vst [vmem:[#allocation16_spill] sm:$0xff] %v19422_v50  ;;  %19907 = vst [vmem:[#allocation11_spill] sm:$0xff] %v19424_v49  ;;  %v13383_v49 = vadd.f32 %v19350_v58, %v19342_v5  ;;  %v13390_v5 = vadd.f32 %v16684_v61, %v19344_v19 }
 0x5eb   : > { %v19426_v28 = vpop.f32.mrf.mxu1  ;;  %v19428_v3 = vpop.f32.mrf.mxu0 }
 0x5ec   : > { %19908 = vst [vmem:[#allocation13_spill] sm:$0xff] %v19426_v28  ;;  %19909 = vst [vmem:[#allocation17_spill] sm:$0xff] %v19428_v3  ;;  %v13635_v3 = vadd.f32 %v13473_v15, %v13382_v22  ;;  %v13384_v28 = vadd.f32 %v19354_v30, %v19346_v32  ;;  %v13643_v14 = vadd.f32 %v19368_v45, %v13390_v5 }
 0x5ed   : > { %v19430_v62 = vpop.f32.mrf.mxu1  ;;  %v19432_v6 = vpop.f32.mrf.mxu0 }
 0x5ee   : > { %19910 = vst [vmem:[#allocation8_spill] sm:$0xff] %v19430_v62  ;;  %19911 = vst [vmem:[#allocation3_spill] sm:$0xff] %v19432_v6  ;;  %v13388_v6 = vadd.f32 %v13301_v60, %v19352_v2  ;;  %v13888_v58 = vadd.f32 %v13726_v33, %v13635_v3  ;;  %v13385_v2 = vadd.f32 %v19364_v34, %v19348_v59 }
 0x5ef   : > { %v19434_v24 = vpop.f32.mrf.mxu1  ;;  %v19436_v31 = vpop.f32.mrf.mxu0  ;;  %v13637_v42 = vadd.f32 %v19370_v10, %v13384_v28  ;;  %v19918_v28 = vld [vmem:[#allocation14_spill] sm:$0xff] }
 0x5f0   : > { %19912 = vst [vmem:[#allocation2_spill] sm:$0xff] %v19434_v24  ;;  %19913 = vst [vmem:[#allocation6_spill] sm:$0xff] %v19436_v31  ;;  %v13386_v24 = vadd.f32 %v13224_v53, %v19338_v56  ;;  %v13634_v31 = vadd.f32 %v13471_v7, %v13381_v29  ;;  %v13636_v56 = vadd.f32 %v13548_v17, %v13383_v49  ;;  %v19916_v29 = vld [vmem:[#allocation15_spill] sm:$0xff] }
 0x5f1   : > { %v19440_v4 = vpop.f32.mrf.mxu1  ;;  %v19442_v50 = vpop.f32.mrf.mxu0  ;;  %v13640_v53 = vadd.f32 %v19366_v57, %v13387_v63  ;;  %v14138_v39 = vadd.f32 %v13976_v54, %v13888_v58  ;;  %v13638_v19 = vadd.f32 %v19372_v9, %v13385_v2  ;;  %v13641_v7 = vadd.f32 %v19374_v47, %v13388_v6 }
 0x5f2   : > { %v13639_v32 = vadd.f32 %v19362_v55, %v13386_v24  ;;  %v13887_v30 = vadd.f32 %v13724_v26, %v13634_v31  ;;  %v13889_v12 = vadd.f32 %v19376_v35, %v13636_v56  ;;  %v13642_v55 = vadd.f32 %v19378_v21, %v13389_v18 }
 0x5f3   : > { %v19450_v62 = vpop.f32.mrf.mxu1  ;;  %v19452_v11 = vpop.f32.mrf.mxu0  ;;  %v13890_v34 = vadd.f32 %v19380_v40, %v13637_v42  ;;  %v14393_v17 = vadd.f32 %v14231_v51, %v14138_v39  ;;  %v13894_v45 = vadd.f32 %v19382_v27, %v13641_v7  ;;  %v13893_v10 = vadd.f32 %v19388_v44, %v13640_v53  ;;  %v19924_v42 = vld [vmem:[#allocation16_spill] sm:$0xff] }
 0x5f4   : > { %v14137_v15 = vadd.f32 %v13974_v52, %v13887_v30  ;;  %v13892_v57 = vadd.f32 %v19386_v43, %v13639_v32  ;;  %v13896_v9 = vadd.f32 %v19390_v37, %v13643_v14  ;;  %v13895_v33 = vadd.f32 %v19384_v23, %v13642_v55  ;;  %v19922_v32 = vld [vmem:[#allocation17_spill] sm:$0xff]  ;;  %v19923_v14 = vld [vmem:[#allocation7_spill] sm:$0xff] }
 0x5f5   : > { %v14739_v60 = vpop.f32.mrf.mxu1  ;;  %v19462_v36 = vpop.f32.mrf.mxu0  ;;  %v14139_v21 = vadd.f32 %v19398_v8, %v13889_v12  ;;  %v14648_v54 = vadd.f32 %v14486_v1, %v14393_v17  ;;  %v13891_v40 = vadd.f32 %v19394_v38, %v13638_v19  ;;  %v14143_v43 = vadd.f32 %v19396_v0, %v13893_v10  ;;  %v19915_v8 = vld [vmem:[#allocation9_spill] sm:$0xff]  ;;  %v19919_v18 = vld [vmem:[#allocation8_spill] sm:$0xff] }
 0x5f6   : > { %v14392_v47 = vadd.f32 %v14229_v48, %v14137_v15  ;;  %v14142_v52 = vadd.f32 %v19392_v46, %v13892_v57  ;;  %v14146_v27 = vadd.f32 %v19400_v20, %v13896_v9  ;;  %v14140_v37 = vadd.f32 %v19402_v16, %v13890_v34  ;;  %v19914_v46 = vld [vmem:[#allocation4_spill] sm:$0xff]  ;;  %v19917_v20 = vld [vmem:[#allocation10_spill] sm:$0xff]  ;;  %v15172_v15 = vpop.permute.xlu1 %15171 }
 0x5f7   : > { %v14741_v59 = vpop.f32.mrf.mxu1  ;;  %v19470_v61 = vpop.f32.mrf.mxu0  ;;  %v14144_v48 = vadd.f32 %v19406_v41, %v13894_v45  ;;  %v14394_v23 = vadd.f32 %v19408_v13, %v14139_v21  ;;  %v14141_v31 = vadd.f32 %v19914_v46, %v13891_v40  ;;  %v14145_v22 = vadd.f32 %v19915_v8, %v13895_v33  ;;  %v19920_v41 = vld [vmem:[#allocation12_spill] sm:$0xff]  ;;  %v19921_v13 = vld [vmem:[#allocation13_spill] sm:$0xff]  ;;  %v19925_v19 = vld [vmem:[#allocation2_spill] sm:$0xff] }
 0x5f8   : > { %v14647_v24 = vadd.f32 %v14484_v25, %v14392_v47  ;;  %v14903_v51 = vadd.f32 %v14741_v59, %v14648_v54  ;;  %v14398_v38 = vadd.f32 %v19916_v29, %v14143_v43  ;;  %v14395_v25 = vadd.f32 %v19917_v20, %v14140_v37  ;;  %v19926_v59 = vld [vmem:[#allocation11_spill] sm:$0xff]  ;;  %v19927_v34 = vld [vmem:[#allocation6_spill] sm:$0xff] }
 0x5f9   : > { %v14745_v26 = vpop.f32.mrf.mxu1  ;;  %v14994_v35 = vpop.f32.mrf.mxu0  ;;  %v14399_v3 = vadd.f32 %v19918_v28, %v14144_v48  ;;  %v14649_v16 = vadd.f32 %v19919_v18, %v14394_v23  ;;  %v14397_v5 = vadd.f32 %v19920_v41, %v14142_v52  ;;  %v14396_v58 = vadd.f32 %v19921_v13, %v14141_v31 }
 0x5fa   : > { %v14902_v1 = vadd.f32 %v14739_v60, %v14647_v24  ;;  %v14653_v2 = vadd.f32 %v19922_v32, %v14398_v38  ;;  %v14400_v60 = vadd.f32 %v19923_v14, %v14145_v22  ;;  %v14401_v39 = vadd.f32 %v19924_v42, %v14146_v27  ;;  %v15378_v14 = vld [vmem:[%s19847_s5 + $0x1f8] sm:$0xff] }
 0x5fb   : > { %v14747_v44 = vpop.f32.mrf.mxu1  ;;  %v14996_v6 = vpop.f32.mrf.mxu0  ;;  %v14650_v7 = vadd.f32 %v19925_v19, %v14395_v25  ;;  %v14904_v12 = vadd.f32 %v19442_v50, %v14649_v16  ;;  %v14652_v55 = vadd.f32 %v19926_v59, %v14397_v5  ;;  %v14651_v57 = vadd.f32 %v19927_v34, %v14396_v58  ;;  %16427 = vmatprep.subr.mxu0 %v15378_v14  ;;  %v15362_v42 = vld [vmem:[%s19847_s5 + $0x178] sm:$0xff]  ;;  %v15377_v19 = vld [vmem:[%s19847_s5 + $0x1f0] sm:$0xff]  ;;  %v15376_v59 = vld [vmem:[%s19847_s5 + $0x1e8] sm:$0xff] }
 0x5fc   : > { %v15158_v63 = vadd.f32 %v14996_v6, %v14903_v51  ;;  %v15157_v56 = vadd.f32 %v14994_v35, %v14902_v1  ;;  %v14654_v17 = vadd.f32 %v19440_v4, %v14399_v3  ;;  %v14908_v45 = vadd.f32 %v14747_v44, %v14653_v2  ;;  %v19928_v6 = vld [vmem:[#allocation3_spill] sm:$0xff]  ;;  %v15177_v51 = vpop.permute.xlu0 %15176  ;;  %16428 = vmatpush3.msra.mxu0 %v15362_v42  ;;  %v15335_v14 = vld [vmem:[%s19847_s5 + $0xa0] sm:$0xff] }
 0x5fd   : > { %v16714_v0 = vpop.f32.mrf.mxu1  ;;  %v15000_v49 = vpop.f32.mrf.mxu0  ;;  %v14655_v47 = vadd.f32 %v19450_v62, %v14400_v60  ;;  %v14905_v35 = vadd.f32 %v19452_v11, %v14650_v7  ;;  %v14907_v21 = vadd.f32 %v14745_v26, %v14652_v55  ;;  %v14656_v37 = vadd.f32 %v19928_v6, %v14401_v39  ;;  %v15345_v60 = vld [vmem:[%s19847_s5 + $0xf0] sm:$0xff]  ;;  %v15344_v7 = vld [vmem:[%s19847_s5 + $0xe8] sm:$0xff]  ;;  %16429 = vmatprep.subr.mxu0 %v15377_v19  ;;  %v15343_v55 = vld [vmem:[%s19847_s5 + $0xe0] sm:$0xff] }
 0x5fe   : > { %v19505_v33 = vadd.f32 %v15172_v15, %v15158_v63  ;;  %v19507_v43 = vadd.f32 %v15172_v15, %v15157_v56  ;;  %v14909_v24 = vadd.f32 %v19462_v36, %v14654_v17  ;;  %v15329_v39 = vld [vmem:[%s19847_s5 + $0x70] sm:$0xff]  ;;  %v15360_v34 = vld [vmem:[%s19847_s5 + $0x168] sm:$0xff]  ;;  %v15327_v17 = vld [vmem:[%s19847_s5 + $0x60] sm:$0xff] }
 0x5ff   : > { %v14893_v30 = vpop.f32.mrf.mxu1  ;;  %v15002_v53 = vpop.f32.mrf.mxu0  ;;  %v14910_v62 = vadd.f32 %v19470_v61, %v14655_v47  ;;  %v15162_v11 = vadd.f32 %v15000_v49, %v14907_v21  ;;  %v14911_v22 = vadd.f32 %v16714_v0, %v14656_v37  ;;  %v15326_v47 = vld [vmem:[%s19847_s5 + $0x58] sm:$0xff]  ;;  %v15373_v21 = vld [vmem:[%s19847_s5 + $0x1d0] sm:$0xff]  ;;  %v15339_v6 = vld [vmem:[%s19847_s5 + $0xc0] sm:$0xff] }
 0x600   : > { %v14906_v54 = vadd.f32 %v14893_v30, %v14651_v57  ;;  %v15163_v50 = vadd.f32 %v15002_v53, %v14908_v45  ;;  %v15190_v26 = vmax.f32 %v19505_v33, 0.0  ;;  %v15189_v29 = vmax.f32 %v19507_v43, 0.0  ;;  %v15346_v30 = vld [vmem:[%s19847_s5 + $0xf8] sm:$0xff]  ;;  %v15375_v57 = vld [vmem:[%s19847_s5 + $0x1e0] sm:$0xff]  ;;  %v15352_v42 = vld [vmem:[%s19847_s5 + $0x128] sm:$0xff] }
 0x601   : > { %v15071_v10 = vpop.f32.mrf.mxu1  ;;  %v16719_v9 = vpop.f32.mrf.mxu0  ;;  %v19530_v28 = vadd.f32 %v15177_v51, %v15162_v11  ;;  %v15330_v53 = vld [vmem:[%s19847_s5 + $0x78] sm:$0xff]  ;;  %16389 = vmatprep.subr.mxu1 %v15346_v30  ;;  %v15359_v45 = vld [vmem:[%s19847_s5 + $0x160] sm:$0xff]  ;;  %v15320_v30 = vld [vmem:[%s19847_s5 + $0x28] sm:$0xff] }
 0x602   : > { %v15159_v52 = vadd.f32 %v15071_v10, %v14904_v12  ;;  %v19518_v36 = vadd.f32 %v15177_v51, %v15163_v50  ;;  %v15166_v0 = vadd.f32 %v16719_v9, %v14911_v22  ;;  %16390 = vmatpush3.msra.mxu1 %v15330_v53  ;;  %v15361_v12 = vld [vmem:[%s19847_s5 + $0x170] sm:$0xff]  ;;  %v15342_v10 = vld [vmem:[%s19847_s5 + $0xd8] sm:$0xff]  ;;  %v15371_v37 = vld [vmem:[%s19847_s5 + $0x1c0] sm:$0xff] }
 0x603   : > { %v15073_v40 = vpop.f32.mrf.mxu1  ;;  %v15148_v27 = vpop.f32.mrf.mxu0  ;;  %v15194_v13 = vmax.f32 %v19530_v28, 0.0  ;;  %16391 = vmatprep.subr.mxu1 %v15345_v60  ;;  %16430 = vmatpush3.msra.mxu0 %v15361_v12  ;;  %v15374_v9 = vld [vmem:[%s19847_s5 + $0x1d8] sm:$0xff]  ;;  %v15357_v50 = vld [vmem:[%s19847_s5 + $0x150] sm:$0xff]  ;;  %v15355_v11 = vld [vmem:[%s19847_s5 + $0x140] sm:$0xff] }
 0x604   : > { %v19510_v4 = vadd.f32 %v15172_v15, %v15159_v52  ;;  %v15160_v44 = vadd.f32 %v15073_v40, %v14905_v35  ;;  %v15161_v48 = vadd.f32 %v15148_v27, %v14906_v54  ;;  %v15195_v63 = vmax.f32 %v19518_v36, 0.0  ;;  %16392 = vmatpush3.msra.mxu1 %v15329_v39  ;;  %16431 = vmatprep.subr.mxu0 %v15376_v59  ;;  %v15358_v35 = vld [vmem:[%s19847_s5 + $0x158] sm:$0xff]  ;;  %v15341_v52 = vld [vmem:[%s19847_s5 + $0xd0] sm:$0xff]  ;;  %v15340_v40 = vld [vmem:[%s19847_s5 + $0xc8] sm:$0xff] }
 0x605   : > { %v15077_v23 = vpop.f32.mrf.mxu1  ;;  %v19545_v58 = vadd.f32 %v15177_v51, %v15166_v0  ;;  %16393 = vmatprep.subr.mxu1 %v15344_v7  ;;  %16432 = vmatpush3.msra.mxu0 %v15360_v34  ;;  %v15325_v54 = vld [vmem:[%s19847_s5 + $0x50] sm:$0xff]  ;;  %v15372_v27 = vld [vmem:[%s19847_s5 + $0x1c8] sm:$0xff]  ;;  %v15354_v22 = vld [vmem:[%s19847_s5 + $0x138] sm:$0xff] }
 0x606   : > { %v15191_v46 = vmax.f32 %v19510_v4, 0.0  ;;  %v19516_v31 = vadd.f32 %v15172_v15, %v15160_v44  ;;  %v15164_v8 = vadd.f32 %v15077_v23, %v14909_v24  ;;  %v19521_v38 = vadd.f32 %v15172_v15, %v15161_v48  ;;  %v15328_v15 = vld [vmem:[%s19847_s5 + $0x68] sm:$0xff]  ;;  %16433 = vmatprep.subr.mxu0 %v15375_v57  ;;  %v15338_v48 = vld [vmem:[%s19847_s5 + $0xb8] sm:$0xff]  ;;  %v15353_v0 = vld [vmem:[%s19847_s5 + $0x130] sm:$0xff] }
 0x607   : > { %v15079_v1 = vpop.f32.mrf.mxu1  ;;  %v15198_v56 = vmax.f32 %v19545_v58, 0.0  ;;  %16394 = vmatpush3.msra.mxu1 %v15328_v15  ;;  %16434 = vmatpush3.msra.mxu0 %v15359_v45  ;;  %v15324_v24 = vld [vmem:[%s19847_s5 + $0x48] sm:$0xff]  ;;  %v15322_v23 = vld [vmem:[%s19847_s5 + $0x38] sm:$0xff]  ;;  %v15319_v7 = vld [vmem:[%s19847_s5 + $0x20] sm:$0xff] }
 0x608   : > { %v16765_v61 = vpack.i.bf16 %v15191_v46, %v15190_v26  ;;  %v15192_v49 = vmax.f32 %v19516_v31, 0.0  ;;  %v19528_v20 = vadd.f32 %v15177_v51, %v15164_v8  ;;  %v15165_v25 = vadd.f32 %v15079_v1, %v14910_v62  ;;  %16395 = vmatprep.subr.mxu1 %v15343_v55  ;;  %16435 = vmatprep.subr.mxu0 %v15374_v9  ;;  %v15356_v44 = vld [vmem:[%s19847_s5 + $0x148] sm:$0xff]  ;;  %v15323_v62 = vld [vmem:[%s19847_s5 + $0x40] sm:$0xff]  ;;  %v15337_v8 = vld [vmem:[%s19847_s5 + $0xb0] sm:$0xff] }
 0x609   : > { %v15193_v41 = vmax.f32 %v19521_v38, 0.0  ;;  %16396 = vmatpush3.msra.mxu1 %v15327_v17  ;;  %16436 = vmatpush3.msra.mxu0 %v15358_v35  ;;  %v15321_v1 = vld [vmem:[%s19847_s5 + $0x30] sm:$0xff]  ;;  %v15368_v53 = vld [vmem:[%s19847_s5 + $0x1a8] sm:$0xff]  ;;  %v15367_v12 = vld [vmem:[%s19847_s5 + $0x1a0] sm:$0xff] }
 0x60a   : > { %v16770_v3 = vpack.i.bf16 %v15189_v29, %v15192_v49  ;;  %v15196_v18 = vmax.f32 %v19528_v20, 0.0  ;;  %v19537_v16 = vadd.f32 %v15177_v51, %v15165_v25  ;;  %16766 = vrot.lane.b32.xlu1 %v16765_v61, %s16902_s27  ;;  %16397 = vmatprep.subr.mxu1 %v15342_v10  ;;  %v15370_v51 = vld [vmem:[%s19847_s5 + $0x1b8] sm:$0xff]  ;;  %v15369_v61 = vld [vmem:[%s19847_s5 + $0x1b0] sm:$0xff]  ;;  %v15336_v25 = vld [vmem:[%s19847_s5 + $0xa8] sm:$0xff] }
 0x60b   : > { %16398 = vmatpush3.msra.mxu1 %v15326_v47  ;;  %16437 = vmatprep.subr.mxu0 %v15373_v21  ;;  %v15334_v15 = vld [vmem:[%s19847_s5 + $0x98] sm:$0xff]  ;;  %v15351_v55 = vld [vmem:[%s19847_s5 + $0x120] sm:$0xff]  ;;  %v15333_v33 = vld [vmem:[%s19847_s5 + $0x90] sm:$0xff] }
 0x60c   : > { %v15197_v5 = vmax.f32 %v19537_v16, 0.0  ;;  %16771 = vrot.lane.b32.xlu0 %v16770_v3, %s16902_s27  ;;  %v16775_v32 = vpack.i.bf16 %v15196_v18, %v15195_v63  ;;  %16399 = vmatprep.subr.mxu1 %v15341_v52  ;;  %v15318_v9 = vld [vmem:[%s19847_s5 + $0x18] sm:$0xff]  ;;  %v15317_v21 = vld [vmem:[%s19847_s5 + $0x10] sm:$0xff]  ;;  %v15347_v20 = vld [vmem:[%s19847_s5 + $0x100] sm:$0xff] }
 0x60d   : > { %16400 = vmatpush3.msra.mxu1 %v15325_v54  ;;  %16438 = vmatpush3.msra.mxu0 %v15357_v50  ;;  %v15366_v47 = vld [vmem:[%s19847_s5 + $0x198] sm:$0xff]  ;;  %v15365_v54 = vld [vmem:[%s19847_s5 + $0x190] sm:$0xff] }
 0x60e   : > { %15217 = vrot.lane.b32.xlu1 %v15193_v41, %s16902_s27  ;;  %v16780_v2 = vpack.i.bf16 %v15194_v13, %v15197_v5  ;;  %16401 = vmatprep.subr.mxu1 %v15340_v40  ;;  %v15350_v4 = vld [vmem:[%s19847_s5 + $0x118] sm:$0xff] }
 0x60f   : > { %16439 = vmatprep.subr.mxu0 %v15372_v27  ;;  %16402 = vmatpush3.msra.mxu1 %v15324_v24  ;;  %v15332_v24 = vld [vmem:[%s19847_s5 + $0x88] sm:$0xff] }
 0x610   : > { %16776 = vrot.lane.b32.xlu0 %v16775_v32, %s16902_s27  ;;  %16440 = vmatpush3.msra.mxu0 %v15356_v44  ;;  %v15349_v44 = vld [vmem:[%s19847_s5 + $0x110] sm:$0xff] }
 0x611   : > { %16403 = vmatprep.subr.mxu1 %v15339_v6  ;;  %16441 = vmatprep.subr.mxu0 %v15371_v37 }
 0x612   : > { %16781 = vrot.lane.b32.xlu1 %v16780_v2, %s16902_s27  ;;  %16404 = vmatpush3.msra.mxu1 %v15323_v62 }
 0x613   : > { %16442 = vmatpush3.msra.mxu0 %v15355_v11  ;;  %16405 = vmatprep.subr.mxu1 %v15338_v48  ;;  %v15316_v48 = vld [vmem:[%s19847_s5 + $0x8] sm:$0xff] }
 0x614   : > { %15227 = vrot.lane.b32.xlu0 %v15198_v56, %s16902_s27  ;;  %16406 = vmatpush3.msra.mxu1 %v15322_v23  ;;  %v15364_v23 = vld [vmem:[%s19847_s5 + $0x188] sm:$0xff] }
 0x615   : > { %16443 = vmatprep.subr.mxu0 %v15370_v51  ;;  %16407 = vmatprep.subr.mxu1 %v15337_v8  ;;  %v15331_v51 = vld [vmem:[%s19847_s5 + $0x80] sm:$0xff] }
 0x616   : > { %16444 = vmatpush3.msra.mxu0 %v15354_v22  ;;  %16408 = vmatpush3.msra.mxu1 %v15321_v1  ;;  %v15348_v1 = vld [vmem:[%s19847_s5 + $0x108] sm:$0xff] }
 0x617   : > { %16445 = vmatprep.subr.mxu0 %v15369_v61  ;;  %16409 = vmatprep.subr.mxu1 %v15336_v25  ;;  %v15315_v25 = vld [vmem:[%s19847_s5] sm:$0xff] }
 0x618   : > { %16446 = vmatpush3.msra.mxu0 %v15353_v0  ;;  %16410 = vmatpush3.msra.mxu1 %v15320_v30  ;;  %v15363_v0 = vld [vmem:[%s19847_s5 + $0x180] sm:$0xff] }
 0x619   : > { %16447 = vmatprep.subr.mxu0 %v15368_v53  ;;  %16411 = vmatprep.subr.mxu1 %v15335_v14 }
 0x61a   : > { %16448 = vmatpush3.msra.mxu0 %v15352_v42  ;;  %16412 = vmatpush3.msra.mxu1 %v15319_v7 }
 0x61b   : > { %16449 = vmatprep.subr.mxu0 %v15367_v12  ;;  %16413 = vmatprep.subr.mxu1 %v15334_v15 }
 0x61c   : > { %16450 = vmatpush3.msra.mxu0 %v15351_v55  ;;  %16414 = vmatpush3.msra.mxu1 %v15318_v9 }
 0x61d   : > { %16451 = vmatprep.subr.mxu0 %v15366_v47  ;;  %16415 = vmatprep.subr.mxu1 %v15333_v33 }
 0x61e   : > { %16452 = vmatpush3.msra.mxu0 %v15350_v4  ;;  %16416 = vmatpush3.msra.mxu1 %v15317_v21  ;;  %v15380_v4 = vld [vmem:[%s19847_s5 + $0x208] sm:$0xff] }
 0x61f   : > { %16453 = vmatprep.subr.mxu0 %v15365_v54  ;;  %16417 = vmatprep.subr.mxu1 %v15332_v24 }
 0x620   : > { %16454 = vmatpush3.msra.mxu0 %v15349_v44  ;;  %16418 = vmatpush3.msra.mxu1 %v15316_v48 }
 0x621   : > { %16455 = vmatprep.subr.mxu0 %v15364_v23  ;;  %16419 = vmatprep.subr.mxu1 %v15331_v51 }
 0x622   : > { %16456 = vmatpush3.msra.mxu0 %v15348_v1  ;;  %16420 = vmatpush3.msra.mxu1 %v15315_v25 }
 0x623   : > { %16457 = vmatprep.subr.mxu0 %v15363_v0 }
 0x624   : > { %16458 = vmatpush3.msra.mxu0 %v15347_v20 }
 0x67c   : > { %v16767_v3 = vpop.permute.xlu1 %16766 }
 0x67d   : > { %v16769_v32 = vunpack.i.h.bf16 %v16767_v3  ;;  %v16768_v2 = vunpack.i.l.bf16 %v16767_v3 }
 0x67e   : > { %v16772_v60 = vpop.permute.xlu0 %16771 }
 0x67f   : > { %v15230_v39 = vsel %vm696_vm4, %v16768_v2, %v16769_v32  ;;  %v16773_v19 = vunpack.i.l.bf16 %v16772_v60  ;;  %v16774_v17 = vunpack.i.h.bf16 %v16772_v60 }
 0x680   : > { %v15218_v59 = vpop.permute.xlu1 %15217  ;;  %v19715_v57 = vmax.f32 %v15190_v26, %v15230_v39 }
 0x681   : > { %v15231_v34 = vsel %vm696_vm4, %v16769_v32, %v16773_v19  ;;  %v15229_v6 = vsel %vm696_vm4, %v16774_v17, %v16768_v2  ;;  %v15232_v37 = vsel %vm696_vm4, %v16773_v19, %v15218_v59  ;;  %v19752_v62 = vmax.f32 %v15193_v41, %v15218_v59 }
 0x682   : > { %v19719_v45 = vmax.f32 %v15191_v46, %v15231_v34  ;;  %v16777_v10 = vpop.permute.xlu0 %16776  ;;  %v15247_v28 = vmax.f32 %v15189_v29, %v15229_v6 }
 0x683   : > { %v16779_v35 = vunpack.i.h.bf16 %v16777_v10  ;;  %v16778_v52 = vunpack.i.l.bf16 %v16777_v10 }
 0x684   : > { %v16782_v26 = vpop.permute.xlu1 %16781  ;;  %v16785_v46 = vpack.i.bf16 %v19719_v45, %v19715_v57 }
 0x685   : > { %v15234_v50 = vsel %vm696_vm4, %v16778_v52, %v16779_v35  ;;  %v16784_v40 = vunpack.i.h.bf16 %v16782_v26  ;;  %v16783_v27 = vunpack.i.l.bf16 %v16782_v26 }
 0x686   : > { %v15228_v11 = vpop.permute.xlu0 %15227  ;;  %16786 = vrot.lane.b32.xlu1 %v16785_v46, %s16911_s15  ;;  %v19766_v38 = vmax.f32 %v15195_v63, %v15234_v50  ;;  %v15379_v46 = vld [vmem:[%s19847_s5 + $0x200] sm:$0xff] }
 0x687   : > { %v15233_v41 = vsel %vm696_vm4, %v16784_v40, %v16778_v52  ;;  %v15235_v8 = vsel %vm696_vm4, %v16779_v35, %v16783_v27  ;;  %v15236_v22 = vsel %vm696_vm4, %v16783_v27, %v15228_v11  ;;  %vm15389_vm4 = vcmask 1040384  }
 0x688   : > { %v19776_v61 = vmax.f32 %v15196_v18, %v15235_v8  ;;  %v19780_v36 = vmax.f32 %v15194_v13, %v15233_v41  ;;  %v15255_v63 = vmax.f32 %v15197_v5, %v15236_v22  ;;  %v15250_v18 = vmax.f32 %v15192_v49, %v15232_v37  ;;  %v15381_v5 = vld [vmem:[%s19847_s5 + $0x210] sm:$0x1] }
 0x689   : > { %16720 = vmatprep.subr.msk.mxu1 %vm15389_vm4, %v15381_v5  ;;  %v15256_v29 = vmax.f32 %v15198_v56, %v15228_v11 }
 0x68a   : > { %15275 = vrot.lane.b32.xlu1 %v19752_v62, %s16911_s15  ;;  %v16790_v16 = vpack.i.bf16 %v19776_v61, %v19766_v38  ;;  %v16800_v43 = vpack.i.bf16 %v19780_v36, %v15255_v63  ;;  %v16795_v31 = vpack.i.bf16 %v15247_v28, %v15250_v18 }
 0x68c   : > { %16791 = vrot.lane.b32.xlu0 %v16790_v16, %s16911_s15 }
 0x68e   : > { %16801 = vrot.lane.b32.xlu1 %v16800_v43, %s16911_s15 }
 0x690   : > { %16796 = vrot.lane.b32.xlu0 %v16795_v31, %s16911_s15 }
 0x694   : > { %15285 = vrot.lane.b32.xlu0 %v15256_v29, %s16911_s15 }
 0x6f8   : > { %v16787_v49 = vpop.permute.xlu1 %16786 }
 0x6f9   : > { %v16789_v13 = vunpack.i.h.bf16 %v16787_v49  ;;  %v16788_v3 = vunpack.i.l.bf16 %v16787_v49 }
 0x6fb   : > { %v15288_v32 = vsel %vm3447_vm12, %v16788_v3, %v16789_v13 }
 0x6fc   : > { %v15276_v2 = vpop.permute.xlu1 %15275  ;;  %v15306_v30 = vmax.f32 %v19715_v57, %v15288_v32 }
 0x6fd   : > { %v15309_v21 = vmax.f32 %v19752_v62, %v15276_v2 }
 0x6fe   : > { %v16792_v53 = vpop.permute.xlu0 %16791  ;;  %15457 = vmatprep.mubr.f32.mxu1 %v15306_v30 }
 0x6ff   : > { %v16794_v14 = vunpack.i.h.bf16 %v16792_v53  ;;  %v16793_v60 = vunpack.i.l.bf16 %v16792_v53 }
 0x700   : > { %v16802_v42 = vpop.permute.xlu1 %16801 }
 0x701   : > { %v16804_v19 = vunpack.i.h.bf16 %v16802_v42  ;;  %v16803_v56 = vunpack.i.l.bf16 %v16802_v42  ;;  %v15292_v12 = vsel %vm3447_vm12, %v16793_v60, %v16794_v14 }
 0x702   : > { %v16797_v39 = vpop.permute.xlu0 %16796  ;;  %v15311_v35 = vmax.f32 %v19766_v38, %v15292_v12 }
 0x703   : > { %v16799_v7 = vunpack.i.h.bf16 %v16797_v39  ;;  %v16798_v58 = vunpack.i.l.bf16 %v16797_v39  ;;  %v15291_v9 = vsel %vm3447_vm12, %v16804_v19, %v16793_v60  ;;  %v15293_v52 = vsel %vm3447_vm12, %v16794_v14, %v16803_v56 }
 0x704   : > { %v15312_v26 = vmax.f32 %v19776_v61, %v15293_v52 }
 0x705   : > { %v15287_v15 = vsel %vm3447_vm12, %v16799_v7, %v16788_v3  ;;  %v15289_v59 = vsel %vm3447_vm12, %v16789_v13, %v16798_v58  ;;  %v15290_v55 = vsel %vm3447_vm12, %v16798_v58, %v15276_v2 }
 0x706   : > { %v15305_v34 = vmax.f32 %v15247_v28, %v15287_v15  ;;  %v15307_v57 = vmax.f32 %v19719_v45, %v15289_v59  ;;  %v15286_v17 = vpop.permute.xlu0 %15285  ;;  %v15308_v10 = vmax.f32 %v15250_v18, %v15290_v55  ;;  %v15310_v45 = vmax.f32 %v19780_v36, %v15291_v9 }
 0x707   : > { %v15294_v47 = vsel %vm3447_vm12, %v16803_v56, %v15286_v17  ;;  %v15314_v54 = vmax.f32 %v15256_v29, %v15286_v17 }
 0x708   : > { %v15313_v33 = vmax.f32 %v15255_v63, %v15294_v47  ;;  %15458 = vmatmul.mubr.f32.vlgmr.msra.gmra.mxu1 %v15305_v34  ;;  %15532 = vmatprep.mubr.f32.mxu0 %v15308_v10 }
 0x709   : > { %15462 = vmatprep.mubr.f32.mxu1 %v15311_v35  ;;  %15533 = vmatmul.mubr.f32.vlgmr.msra.gmra.mxu0 %v15307_v57 }
 0x70a   : > { %15537 = vmatprep.mubr.f32.mxu0 %v15313_v33  ;;  %16721 = vmatpush3.msk.msra.mxu1 %vm15389_vm4, %v15381_v5 }
 0x70b   : > { %16722 = vmatprep.subr.mxu1 %v15380_v4 }
 0x70c   : > { %15463 = vmatmul.mubr.f32.gmra.mxu1 %v15310_v45 }
 0x70d   : > { %15538 = vmatmul.mubr.f32.gmra.mxu0 %v15312_v26  ;;  %16723 = vmatpush3.msra.mxu1 %v15380_v4 }
 0x70e   : > { %16726 = vmatprep.mubr.msk.f32.mxu1 %vm15382_vm6, %v15309_v21  ;;  %16724 = vmatprep.subr.mxu1 %v15379_v46 }
 0x70f   : > { %16725 = vmatpush3.msra.mxu1 %v15379_v46 }
 0x710   : > { %16727 = vmatmul.mubr.msk.f32.vlgmr.msra.gmra.mxu1 %vm15382_vm6, %v15314_v54 }
 0x7c8   : > { %v16421_v50 = vpop.f32.mrf.mxu1 }
 0x7c9   : > { %v16459_v40 = vpop.f32.mrf.mxu0 }
 0x7ca   : > { %v16422_v27 = vpop.f32.mrf.mxu1 }
 0x7cb   : > { %v16460_v24 = vpop.f32.mrf.mxu0  ;;  %v16423_v6 = vadd.f32 %v16422_v27, %v16421_v50 }
 0x7cc   : > { %v16424_v44 = vpop.f32.mrf.mxu1  ;;  %v16461_v37 = vadd.f32 %v16460_v24, %v16459_v40 }
 0x7cd   : > { %v16462_v11 = vpop.f32.mrf.mxu0 }
 0x7ce   : > { %v16425_v48 = vpop.f32.mrf.mxu1  ;;  %v15535_v41 = vadd.f32 %v16461_v37, %v16423_v6 }
 0x7cf   : > { %v16426_v23 = vadd.f32 %v16425_v48, %v16424_v44  ;;  %v16463_v62 = vpop.f32.mrf.mxu0 }
 0x7d0   : > { %v16464_v51 = vadd.f32 %v16463_v62, %v16462_v11  ;;  %v16728_v38 = vpop.f32.mrf.mxu1 }
 0x7d2   : > { %v15540_v8 = vadd.f32 %v16464_v51, %v16426_v23  ;;  %v15609_v22 = vpop.f32.mrf.mxu1  ;;  %27 = sbr.rel (!%p25_p0) target bundleno = 1 (0x1), region = 101 }
 0x7d3   : > { %v15610_v1 = vadd.f32 %v15609_v22, %v15535_v41 }
 0x7d4   : > { %v15615_v61 = vadd.f32 %v16728_v38, %v15540_v8 }
 0x7d5   : > { %15620 = vst.msk [vmem:[%s15619_s18] sm:$0xff] %vm5172_vm9, %v15610_v1 }
 0x7d6   : > { %15621 = vst.msk [vmem:[%s15619_s18 + $0x8] sm:$0xff] %vm5172_vm9, %v15615_v61 }

</bundles_post_ra>
